<compile_context>
chip_gen: v7x
topology: tpu7x:2x2x1
jax: 0.10.0
libtpu: 0.0.40
codegen_flags: <defaults>
</compile_context>

<pallas_src>
import functools

import jax
import jax.numpy as jnp
from jax.experimental import pallas as pl
from jax.experimental.pallas import tpu as pltpu


def _round_up(x, m):
    return (x + m - 1) // m * m


# ----------------------------------------------------------------------------
# Pallas kernels:  C = act(A @ B + bias)
# ----------------------------------------------------------------------------
def _matmul_bias_single_kernel(a_ref, b_ref, bias_ref, o_ref, *, apply_relu):
    # Single K step: no accumulator scratch needed.
    out = jnp.dot(a_ref[...], b_ref[...], preferred_element_type=jnp.float32)
    out = out + bias_ref[...]                      # bias broadcasts (1, tn)
    if apply_relu:
        out = jnp.maximum(out, 0.0)
    o_ref[...] = out.astype(o_ref.dtype)


def _matmul_bias_acc_kernel(a_ref, b_ref, bias_ref, o_ref, acc_ref, *, apply_relu):
    k = pl.program_id(2)

    @pl.when(k == 0)
    def _():
        acc_ref[...] = jnp.zeros_like(acc_ref)

    acc_ref[...] += jnp.dot(
        a_ref[...], b_ref[...], preferred_element_type=jnp.float32
    )

    @pl.when(k == pl.num_programs(2) - 1)
    def _():
        out = acc_ref[...] + bias_ref[...]
        if apply_relu:
            out = jnp.maximum(out, 0.0)
        o_ref[...] = out.astype(o_ref.dtype)


def pallas_linear(a, b_p, bias_p, *, relu, tn, tk, n_out, out_dtype=None,
                  vmem_limit_bytes=None):
    """Computes act(a @ b_p + bias_p)[:, :n_out] with a tiled Pallas kernel.

    a      : (M, K)  activations (cast to bf16 for the MXU).
    b_p    : (K, Np) weights, already transposed / padded / bf16 at init.
    bias_p : (1, Np) f32 bias, already padded at init.
    """
    M, K = a.shape
    Kp, Np = b_p.shape
    assert K == Kp, (K, Kp)
    assert Np % tn == 0 and Kp % tk == 0, (Np, tn, Kp, tk)

    if out_dtype is None:
        # ReLU layers feed the next bf16 matmul; write bf16 to halve writeback.
        out_dtype = jnp.bfloat16 if relu else jnp.float32

    # Single M tile (batch is tiny); pad rows to a bf16-friendly multiple of 16.
    Mp = _round_up(M, 16)
    tm = Mp
    a_p = a.astype(jnp.bfloat16)
    if Mp != M:
        a_p = jnp.pad(a_p, ((0, Mp - M), (0, 0)))

    nk = Kp // tk

    cost = pl.CostEstimate(
        flops=2 * Mp * Kp * Np,
        transcendentals=0,
        bytes_accessed=(
            Mp * Kp * a_p.dtype.itemsize
            + Kp * Np * b_p.dtype.itemsize
            + Np * 4
            + Mp * Np * jnp.dtype(out_dtype).itemsize
        ),
    )

    if nk == 1:
        kernel = functools.partial(_matmul_bias_single_kernel, apply_relu=relu)
        scratch = []
    else:
        kernel = functools.partial(_matmul_bias_acc_kernel, apply_relu=relu)
        scratch = [pltpu.VMEM((tm, tn), jnp.float32)]

    out = pl.pallas_call(
        kernel,
        out_shape=jax.ShapeDtypeStruct((Mp, Np), out_dtype),
        grid_spec=pltpu.PrefetchScalarGridSpec(
            num_scalar_prefetch=0,
            grid=(Mp // tm, Np // tn, nk),
            in_specs=[
                pl.BlockSpec((tm, tk), lambda i, j, k: (i, k)),
                pl.BlockSpec((tk, tn), lambda i, j, k: (k, j)),
                pl.BlockSpec((1, tn), lambda i, j, k: (0, j)),
            ],
            out_specs=pl.BlockSpec((tm, tn), lambda i, j, k: (i, j)),
            scratch_shapes=scratch,
        ),
        compiler_params=pltpu.CompilerParams(
            dimension_semantics=("parallel", "parallel", "arbitrary"),
            vmem_limit_bytes=vmem_limit_bytes,
        ),
        cost_estimate=cost,
    )(a_p, b_p, bias_p)
    return out[:M, :n_out]


# ----------------------------------------------------------------------------
# fc1 tiling choice (trace-time, per TPU generation)
# ----------------------------------------------------------------------------
def _fc1_tiles():
    kind = ""
    try:
        kind = jax.devices()[0].device_kind.lower()
    except Exception:
        pass
    if "v7" in kind:
        # 2 TensorCores: split N so both cores stream half of wf1; 4 K steps.
        return 256, 4864
    # Single TensorCore (v5e/v6e/unknown): full-N tile, grid (1, 1, 4).
    return 512, 4864


# ----------------------------------------------------------------------------
# im2col glue (plain JAX, fused under jit): NHWC -> (B*Ho*Wo, C*kh*kw) with
# (C, kh, kw) ordering to match torch Conv2d weight layout (out_c, in_c, kh, kw).
# ----------------------------------------------------------------------------
def im2col(x_nhwc, kh, kw, stride, padding):
    N, H, W, C = x_nhwc.shape
    if padding:
        x_nhwc = jnp.pad(
            x_nhwc, ((0, 0), (padding, padding), (padding, padding), (0, 0))
        )
    Hp, Wp = H + 2 * padding, W + 2 * padding
    Ho = (Hp - kh) // stride + 1
    Wo = (Wp - kw) // stride + 1

    rows = []
    for i in range(kh):
        cols = []
        for j in range(kw):
            patch = x_nhwc[
                :,
                i : i + (Ho - 1) * stride + 1 : stride,
                j : j + (Wo - 1) * stride + 1 : stride,
                :,
            ]  # (N, Ho, Wo, C)
            cols.append(patch)
        rows.append(jnp.stack(cols, axis=3))        # (N, Ho, Wo, kw, C)
    patches = jnp.stack(rows, axis=3)               # (N, Ho, Wo, kh, kw, C)
    patches = jnp.transpose(patches, (0, 1, 2, 5, 3, 4))  # (N,Ho,Wo,C,kh,kw)
    return patches.reshape(N * Ho * Wo, C * kh * kw), Ho, Wo


def conv2d_relu(x_nhwc, w_mat, bias_row, *, kh, kw, stride, padding, out_c, tn, tk):
    """Conv2d + ReLU via im2col + Pallas matmul (weights pre-laid-out (K, Np))."""
    patches, Ho, Wo = im2col(x_nhwc, kh, kw, stride, padding)     # (M, C*kh*kw)
    y = pallas_linear(patches, w_mat, bias_row, relu=True, tn=tn, tk=tk,
                      n_out=out_c)                                # (M, out_c) bf16
    N = x_nhwc.shape[0]
    return y.reshape(N, Ho, Wo, out_c)                            # NHWC


# ----------------------------------------------------------------------------
# Parameters (deterministic, torch-default-style uniform(-1/sqrt(fan_in), ...))
# ----------------------------------------------------------------------------
def init_params(key):
    def u(key, shape, fan_in):
        bound = 1.0 / jnp.sqrt(fan_in)
        return jax.random.uniform(key, shape, jnp.float32, -bound, bound)

    keys = jax.random.split(key, 10)
    params = {}
    params["w1"] = u(keys[0], (32, 1, 8, 8), 1 * 8 * 8)           # conv1
    params["b1"] = u(keys[1], (32,), 1 * 8 * 8)
    params["w2"] = u(keys[2], (64, 32, 4, 4), 32 * 4 * 4)         # conv2
    params["b2"] = u(keys[3], (64,), 32 * 4 * 4)
    params["w3"] = u(keys[4], (128, 64, 3, 3), 64 * 3 * 3)        # conv3
    params["b3"] = u(keys[5], (128,), 64 * 3 * 3)
    params["wf1"] = u(keys[6], (512, 128 * 19 * 8), 128 * 19 * 8) # fc1
    params["bf1"] = u(keys[7], (512,), 128 * 19 * 8)
    params["wf2"] = u(keys[8], (6, 512), 512)                     # fc2
    params["bf2"] = u(keys[9], (6,), 512)
    return params


def prepare_params(raw):
    """One-time conversion of torch-layout params into the padded, transposed,
    bf16 (K, Np) layouts the kernels consume (done once, not per forward).
    Output/bias N is padded to a lane-dense 128 multiple; padded columns are
    sliced off after each kernel.  Biases stay f32 (f32 accumulate/bias/ReLU)."""

    def conv_w(w, n_pad=None):  # (out_c, in_c, kh, kw) -> (in_c*kh*kw, Np) bf16
        out_c = w.shape[0]
        m = w.reshape(out_c, -1).T
        if n_pad is not None and n_pad > m.shape[1]:
            m = jnp.pad(m, ((0, 0), (0, n_pad - m.shape[1])))
        return m.astype(jnp.bfloat16)

    def fc_w(w, n_pad=None):  # (out_f, in_f) -> (in_f, out_f[padded]) bf16
        m = w.T
        if n_pad is not None and n_pad > m.shape[1]:
            m = jnp.pad(m, ((0, 0), (0, n_pad - m.shape[1])))
        return m.astype(jnp.bfloat16)

    def bias_row(b, n_pad=None):  # (n,) -> (1, n[padded]) f32
        b = b.reshape(1, -1).astype(jnp.float32)
        if n_pad is not None and n_pad > b.shape[1]:
            b = jnp.pad(b, ((0, 0), (0, n_pad - b.shape[1])))
        return b

    return {
        "w1": conv_w(raw["w1"], n_pad=128), "b1": bias_row(raw["b1"], n_pad=128),
        "w2": conv_w(raw["w2"], n_pad=128), "b2": bias_row(raw["b2"], n_pad=128),
        "w3": conv_w(raw["w3"]),            "b3": bias_row(raw["b3"]),
        "wf1": fc_w(raw["wf1"]),            "bf1": bias_row(raw["bf1"]),
        "wf2": fc_w(raw["wf2"], n_pad=128), "bf2": bias_row(raw["bf2"], n_pad=128),
    }


# ----------------------------------------------------------------------------
# Forward pass (matches DeepQNetwork.forward)
# ----------------------------------------------------------------------------
def deep_q_network_forward(params, observation):
    # observation.view(-1, 1, 185, 95)
    x = observation.reshape(-1, 1, 185, 95).astype(jnp.float32)   # NCHW
    x = jnp.transpose(x, (0, 2, 3, 1))                            # NHWC

    # conv1: K = 1*8*8 = 64, N padded 32 -> 128 (lane-dense) -> grid (1,1,1)
    x = conv2d_relu(x, params["w1"], params["b1"], kh=8, kw=8, stride=4,
                    padding=1, out_c=32, tn=128, tk=64)           # (B, 45, 23, 32)
    # conv2: K = 512, N padded 64 -> 128 -> grid (1,1,1)
    x = conv2d_relu(x, params["w2"], params["b2"], kh=4, kw=4, stride=2,
                    padding=0, out_c=64, tn=128, tk=512)          # (B, 21, 10, 64)
    # conv3: K = 576, N = 128 -> grid (1,1,1)
    x = conv2d_relu(x, params["w3"], params["b3"], kh=3, kw=3, stride=1,
                    padding=0, out_c=128, tn=128, tk=576)         # (B, 19, 8, 128)

    # torch flattens NCHW -> (B, 128*19*8); restore that ordering.
    x = jnp.transpose(x, (0, 3, 1, 2)).reshape(-1, 128 * 19 * 8)

    # fc1: K = 19456 streamed in 4 chunks of 4864; full-N (512) tile on
    # single-TC chips, 2x256 N split on v7x.  bf16 weight stream, f32
    # accumulate, fused bias + ReLU, bf16 output.
    tn_fc1, tk_fc1 = _fc1_tiles()
    x = pallas_linear(x, params["wf1"], params["bf1"], relu=True,
                      tn=tn_fc1, tk=tk_fc1, n_out=512,
                      vmem_limit_bytes=32 * 1024 * 1024)          # (B, 512) bf16
    # fc2: K = 512, N padded 6 -> 128, single grid step, no ReLU, f32 output.
    actions = pallas_linear(x, params["wf2"], params["bf2"], relu=False,
                            tn=128, tk=512, n_out=6)              # (B, 6)
    return actions


if __name__ == "__main__":
    key = jax.random.PRNGKey(0)
    pkey, xkey = jax.random.split(key)
    params = prepare_params(init_params(pkey))

    # Spatial shape is fixed by the module's view(-1, 1, 185, 95); batch=2.
    observation = jax.random.normal(xkey, (2, 1, 185, 95), jnp.float32)

    fwd = jax.jit(deep_q_network_forward)
    actions = fwd(params, observation)
    actions = jax.block_until_ready(actions)
    assert actions.shape == (2, 6), actions.shape
    print("KERNEL_OK")
</pallas_src>

<mosaic_0001>
module attributes {stable_mosaic.version = 11 : i64} {
  func.func @_matmul_bias_single_kernel(%arg0: i32, %arg1: i32, %arg2: i32, %arg3: memref<2080x64xbf16, #tpu.memory_space<vmem>>, %arg4: memref<64x128xbf16, #tpu.memory_space<vmem>>, %arg5: memref<1x128xf32, #tpu.memory_space<vmem>>, %arg6: memref<2080x128xbf16, #tpu.memory_space<vmem>>) attributes {dimension_semantics = [#tpu.dimension_semantics<parallel>, #tpu.dimension_semantics<parallel>, #tpu.dimension_semantics<arbitrary>], iteration_bounds = array<i64: 1, 1, 1>, scalar_prefetch = 0 : i64, scratch_operands = 0 : i64, tpu.core_type = #tpu.core_type<tc>, window_params = [{transform_indices = @transform_0, window_bounds = array<i64: 2080, 64>}, {transform_indices = @transform_1, window_bounds = array<i64: 64, 128>}, {transform_indices = @transform_2, window_bounds = array<i64: 1, 128>}, {transform_indices = @transform_3, window_bounds = array<i64: 2080, 128>}]} {
    %c0 = arith.constant 0 : index
    %c0_0 = arith.constant 0 : index
    %0 = vector.load %arg3[%c0, %c0_0] : memref<2080x64xbf16, #tpu.memory_space<vmem>>, vector<2080x64xbf16>
    %c0_1 = arith.constant 0 : index
    %c0_2 = arith.constant 0 : index
    %1 = vector.load %arg4[%c0_1, %c0_2] : memref<64x128xbf16, #tpu.memory_space<vmem>>, vector<64x128xbf16>
    %cst = arith.constant dense<0.000000e+00> : vector<2080x128xf32>
    %2 = tpu.matmul %0, %1, %cst {dimension_numbers = #tpu.dot_dimension_numbers<[1], [0], [0], [1], [0, 0, 1, 1], [], []>} : vector<2080x64xbf16>, vector<64x128xbf16>, vector<2080x128xf32> -> vector<2080x128xf32>
    %c0_3 = arith.constant 0 : index
    %c0_4 = arith.constant 0 : index
    %3 = vector.load %arg5[%c0_3, %c0_4] : memref<1x128xf32, #tpu.memory_space<vmem>>, vector<1x128xf32>
    %4 = vector.broadcast %3 : vector<1x128xf32> to vector<2080x128xf32>
    %5 = arith.addf %2, %4 : vector<2080x128xf32>
    %cst_5 = arith.constant 0.000000e+00 : f32
    %6 = vector.broadcast %cst_5 : f32 to vector<2080x128xf32>
    %7 = arith.maximumf %5, %6 : vector<2080x128xf32>
    %8 = arith.truncf %7 : vector<2080x128xf32> to vector<2080x128xbf16>
    %c0_6 = arith.constant 0 : index
    %c0_7 = arith.constant 0 : index
    %9 = vector.load %arg6[%c0_6, %c0_7] : memref<2080x128xbf16, #tpu.memory_space<vmem>>, vector<2080x128xbf16>
    tpu.vector_store %arg6[%c0_6, %c0_7], %8 {strides = array<i32>} : memref<2080x128xbf16, #tpu.memory_space<vmem>>, vector<2080x128xbf16>,
    return
  }
  func.func @transform_0(%arg0: i32, %arg1: i32, %arg2: i32) -> (i32, i32) {
    %c0_i32 = arith.constant 0 : i32
    return %arg0, %arg2 : i32, i32
  }
  func.func @transform_1(%arg0: i32, %arg1: i32, %arg2: i32) -> (i32, i32) {
    %c0_i32 = arith.constant 0 : i32
    return %arg2, %arg1 : i32, i32
  }
  func.func @transform_2(%arg0: i32, %arg1: i32, %arg2: i32) -> (i32, i32) {
    %c0_i32 = arith.constant 0 : i32
    %c0_i32_0 = arith.constant 0 : i32
    return %c0_i32, %arg1 : i32, i32
  }
  func.func @transform_3(%arg0: i32, %arg1: i32, %arg2: i32) -> (i32, i32) {
    %c0_i32 = arith.constant 0 : i32
    return %arg0, %arg1 : i32, i32
  }
}

module attributes {stable_mosaic.version = 11 : i64} {
  func.func @_matmul_bias_single_kernel(%arg0: i32, %arg1: i32, %arg2: i32, %arg3: memref<432x512xbf16, #tpu.memory_space<vmem>>, %arg4: memref<512x128xbf16, #tpu.memory_space<vmem>>, %arg5: memref<1x128xf32, #tpu.memory_space<vmem>>, %arg6: memref<432x128xbf16, #tpu.memory_space<vmem>>) attributes {dimension_semantics = [#tpu.dimension_semantics<parallel>, #tpu.dimension_semantics<parallel>, #tpu.dimension_semantics<arbitrary>], iteration_bounds = array<i64: 1, 1, 1>, scalar_prefetch = 0 : i64, scratch_operands = 0 : i64, tpu.core_type = #tpu.core_type<tc>, window_params = [{transform_indices = @transform_0, window_bounds = array<i64: 432, 512>}, {transform_indices = @transform_1, window_bounds = array<i64: 512, 128>}, {transform_indices = @transform_2, window_bounds = array<i64: 1, 128>}, {transform_indices = @transform_3, window_bounds = array<i64: 432, 128>}]} {
    %c0 = arith.constant 0 : index
    %c0_0 = arith.constant 0 : index
    %0 = vector.load %arg3[%c0, %c0_0] : memref<432x512xbf16, #tpu.memory_space<vmem>>, vector<432x512xbf16>
    %c0_1 = arith.constant 0 : index
    %c0_2 = arith.constant 0 : index
    %1 = vector.load %arg4[%c0_1, %c0_2] : memref<512x128xbf16, #tpu.memory_space<vmem>>, vector<512x128xbf16>
    %cst = arith.constant dense<0.000000e+00> : vector<432x128xf32>
    %2 = tpu.matmul %0, %1, %cst {dimension_numbers = #tpu.dot_dimension_numbers<[1], [0], [0], [1], [0, 0, 1, 1], [], []>} : vector<432x512xbf16>, vector<512x128xbf16>, vector<432x128xf32> -> vector<432x128xf32>
    %c0_3 = arith.constant 0 : index
    %c0_4 = arith.constant 0 : index
    %3 = vector.load %arg5[%c0_3, %c0_4] : memref<1x128xf32, #tpu.memory_space<vmem>>, vector<1x128xf32>
    %4 = vector.broadcast %3 : vector<1x128xf32> to vector<432x128xf32>
    %5 = arith.addf %2, %4 : vector<432x128xf32>
    %cst_5 = arith.constant 0.000000e+00 : f32
    %6 = vector.broadcast %cst_5 : f32 to vector<432x128xf32>
    %7 = arith.maximumf %5, %6 : vector<432x128xf32>
    %8 = arith.truncf %7 : vector<432x128xf32> to vector<432x128xbf16>
    %c0_6 = arith.constant 0 : index
    %c0_7 = arith.constant 0 : index
    %9 = vector.load %arg6[%c0_6, %c0_7] : memref<432x128xbf16, #tpu.memory_space<vmem>>, vector<432x128xbf16>
    tpu.vector_store %arg6[%c0_6, %c0_7], %8 {strides = array<i32>} : memref<432x128xbf16, #tpu.memory_space<vmem>>, vector<432x128xbf16>,
    return
  }
  func.func @transform_0(%arg0: i32, %arg1: i32, %arg2: i32) -> (i32, i32) {
    %c0_i32 = arith.constant 0 : i32
    return %arg0, %arg2 : i32, i32
  }
  func.func @transform_1(%arg0: i32, %arg1: i32, %arg2: i32) -> (i32, i32) {
    %c0_i32 = arith.constant 0 : i32
    return %arg2, %arg1 : i32, i32
  }
  func.func @transform_2(%arg0: i32, %arg1: i32, %arg2: i32) -> (i32, i32) {
    %c0_i32 = arith.constant 0 : i32
    %c0_i32_0 = arith.constant 0 : i32
    return %c0_i32, %arg1 : i32, i32
  }
  func.func @transform_3(%arg0: i32, %arg1: i32, %arg2: i32) -> (i32, i32) {
    %c0_i32 = arith.constant 0 : i32
    return %arg0, %arg1 : i32, i32
  }
}

module attributes {stable_mosaic.version = 11 : i64} {
  func.func @_matmul_bias_single_kernel(%arg0: i32, %arg1: i32, %arg2: i32, %arg3: memref<304x576xbf16, #tpu.memory_space<vmem>>, %arg4: memref<576x128xbf16, #tpu.memory_space<vmem>>, %arg5: memref<1x128xf32, #tpu.memory_space<vmem>>, %arg6: memref<304x128xbf16, #tpu.memory_space<vmem>>) attributes {dimension_semantics = [#tpu.dimension_semantics<parallel>, #tpu.dimension_semantics<parallel>, #tpu.dimension_semantics<arbitrary>], iteration_bounds = array<i64: 1, 1, 1>, scalar_prefetch = 0 : i64, scratch_operands = 0 : i64, tpu.core_type = #tpu.core_type<tc>, window_params = [{transform_indices = @transform_0, window_bounds = array<i64: 304, 576>}, {transform_indices = @transform_1, window_bounds = array<i64: 576, 128>}, {transform_indices = @transform_2, window_bounds = array<i64: 1, 128>}, {transform_indices = @transform_3, window_bounds = array<i64: 304, 128>}]} {
    %c0 = arith.constant 0 : index
    %c0_0 = arith.constant 0 : index
    %0 = vector.load %arg3[%c0, %c0_0] : memref<304x576xbf16, #tpu.memory_space<vmem>>, vector<304x576xbf16>
    %c0_1 = arith.constant 0 : index
    %c0_2 = arith.constant 0 : index
    %1 = vector.load %arg4[%c0_1, %c0_2] : memref<576x128xbf16, #tpu.memory_space<vmem>>, vector<576x128xbf16>
    %cst = arith.constant dense<0.000000e+00> : vector<304x128xf32>
    %2 = tpu.matmul %0, %1, %cst {dimension_numbers = #tpu.dot_dimension_numbers<[1], [0], [0], [1], [0, 0, 1, 1], [], []>} : vector<304x576xbf16>, vector<576x128xbf16>, vector<304x128xf32> -> vector<304x128xf32>
    %c0_3 = arith.constant 0 : index
    %c0_4 = arith.constant 0 : index
    %3 = vector.load %arg5[%c0_3, %c0_4] : memref<1x128xf32, #tpu.memory_space<vmem>>, vector<1x128xf32>
    %4 = vector.broadcast %3 : vector<1x128xf32> to vector<304x128xf32>
    %5 = arith.addf %2, %4 : vector<304x128xf32>
    %cst_5 = arith.constant 0.000000e+00 : f32
    %6 = vector.broadcast %cst_5 : f32 to vector<304x128xf32>
    %7 = arith.maximumf %5, %6 : vector<304x128xf32>
    %8 = arith.truncf %7 : vector<304x128xf32> to vector<304x128xbf16>
    %c0_6 = arith.constant 0 : index
    %c0_7 = arith.constant 0 : index
    %9 = vector.load %arg6[%c0_6, %c0_7] : memref<304x128xbf16, #tpu.memory_space<vmem>>, vector<304x128xbf16>
    tpu.vector_store %arg6[%c0_6, %c0_7], %8 {strides = array<i32>} : memref<304x128xbf16, #tpu.memory_space<vmem>>, vector<304x128xbf16>,
    return
  }
  func.func @transform_0(%arg0: i32, %arg1: i32, %arg2: i32) -> (i32, i32) {
    %c0_i32 = arith.constant 0 : i32
    return %arg0, %arg2 : i32, i32
  }
  func.func @transform_1(%arg0: i32, %arg1: i32, %arg2: i32) -> (i32, i32) {
    %c0_i32 = arith.constant 0 : i32
    return %arg2, %arg1 : i32, i32
  }
  func.func @transform_2(%arg0: i32, %arg1: i32, %arg2: i32) -> (i32, i32) {
    %c0_i32 = arith.constant 0 : i32
    %c0_i32_0 = arith.constant 0 : i32
    return %c0_i32, %arg1 : i32, i32
  }
  func.func @transform_3(%arg0: i32, %arg1: i32, %arg2: i32) -> (i32, i32) {
    %c0_i32 = arith.constant 0 : i32
    return %arg0, %arg1 : i32, i32
  }
}

module attributes {stable_mosaic.version = 11 : i64} {
  func.func @_matmul_bias_acc_kernel(%arg0: i32, %arg1: i32, %arg2: i32, %arg3: memref<16x4864xbf16, #tpu.memory_space<vmem>>, %arg4: memref<4864x512xbf16, #tpu.memory_space<vmem>>, %arg5: memref<1x512xf32, #tpu.memory_space<vmem>>, %arg6: memref<16x512xbf16, #tpu.memory_space<vmem>>, %arg7: memref<16x512xf32, #tpu.memory_space<vmem>>) attributes {dimension_semantics = [#tpu.dimension_semantics<parallel>, #tpu.dimension_semantics<parallel>, #tpu.dimension_semantics<arbitrary>], iteration_bounds = array<i64: 1, 1, 4>, scalar_prefetch = 0 : i64, scratch_operands = 1 : i64, tpu.core_type = #tpu.core_type<tc>, window_params = [{transform_indices = @transform_0, window_bounds = array<i64: 16, 4864>}, {transform_indices = @transform_1, window_bounds = array<i64: 4864, 512>}, {transform_indices = @transform_2, window_bounds = array<i64: 1, 512>}, {transform_indices = @transform_3, window_bounds = array<i64: 16, 512>}]} {
    %c0_i32 = arith.constant 0 : i32
    %0 = arith.cmpi eq, %arg2, %c0_i32 : i32
    %1 = arith.extui %0 : i1 to i32
    %c0_i32_0 = arith.constant 0 : i32
    %2 = arith.cmpi ne, %1, %c0_i32_0 : i32
    scf.if %2 {
      %cst_9 = arith.constant 0.000000e+00 : f32
      %12 = vector.broadcast %cst_9 : f32 to vector<16x512xf32>
      %c0_10 = arith.constant 0 : index
      %c0_11 = arith.constant 0 : index
      %13 = vector.load %arg7[%c0_10, %c0_11] : memref<16x512xf32, #tpu.memory_space<vmem>>, vector<16x512xf32>
      tpu.vector_store %arg7[%c0_10, %c0_11], %12 {strides = array<i32>} : memref<16x512xf32, #tpu.memory_space<vmem>>, vector<16x512xf32>,
    } else {
    }
    %c0 = arith.constant 0 : index
    %c0_1 = arith.constant 0 : index
    %3 = vector.load %arg7[%c0, %c0_1] : memref<16x512xf32, #tpu.memory_space<vmem>>, vector<16x512xf32>
    %c0_2 = arith.constant 0 : index
    %c0_3 = arith.constant 0 : index
    %4 = vector.load %arg3[%c0_2, %c0_3] : memref<16x4864xbf16, #tpu.memory_space<vmem>>, vector<16x4864xbf16>
    %c0_4 = arith.constant 0 : index
    %c0_5 = arith.constant 0 : index
    %5 = vector.load %arg4[%c0_4, %c0_5] : memref<4864x512xbf16, #tpu.memory_space<vmem>>, vector<4864x512xbf16>
    %cst = arith.constant dense<0.000000e+00> : vector<16x512xf32>
    %6 = tpu.matmul %4, %5, %cst {dimension_numbers = #tpu.dot_dimension_numbers<[1], [0], [0], [1], [0, 0, 1, 1], [], []>} : vector<16x4864xbf16>, vector<4864x512xbf16>, vector<16x512xf32> -> vector<16x512xf32>
    %7 = arith.addf %3, %6 : vector<16x512xf32>
    %c0_6 = arith.constant 0 : index
    %c0_7 = arith.constant 0 : index
    %8 = vector.load %arg7[%c0_6, %c0_7] : memref<16x512xf32, #tpu.memory_space<vmem>>, vector<16x512xf32>
    tpu.vector_store %arg7[%c0_6, %c0_7], %7 {strides = array<i32>} : memref<16x512xf32, #tpu.memory_space<vmem>>, vector<16x512xf32>,
    %c3_i32 = arith.constant 3 : i32
    %9 = arith.cmpi eq, %arg2, %c3_i32 : i32
    %10 = arith.extui %9 : i1 to i32
    %c0_i32_8 = arith.constant 0 : i32
    %11 = arith.cmpi ne, %10, %c0_i32_8 : i32
    scf.if %11 {
      %c0_9 = arith.constant 0 : index
      %c0_10 = arith.constant 0 : index
      %12 = vector.load %arg7[%c0_9, %c0_10] : memref<16x512xf32, #tpu.memory_space<vmem>>, vector<16x512xf32>
      %c0_11 = arith.constant 0 : index
      %c0_12 = arith.constant 0 : index
      %13 = vector.load %arg5[%c0_11, %c0_12] : memref<1x512xf32, #tpu.memory_space<vmem>>, vector<1x512xf32>
      %14 = vector.broadcast %13 : vector<1x512xf32> to vector<16x512xf32>
      %15 = arith.addf %12, %14 : vector<16x512xf32>
      %cst_13 = arith.constant 0.000000e+00 : f32
      %16 = vector.broadcast %cst_13 : f32 to vector<16x512xf32>
      %17 = arith.maximumf %15, %16 : vector<16x512xf32>
      %18 = arith.truncf %17 : vector<16x512xf32> to vector<16x512xbf16>
      %c0_14 = arith.constant 0 : index
      %c0_15 = arith.constant 0 : index
      %19 = vector.load %arg6[%c0_14, %c0_15] : memref<16x512xbf16, #tpu.memory_space<vmem>>, vector<16x512xbf16>
      tpu.vector_store %arg6[%c0_14, %c0_15], %18 {strides = array<i32>} : memref<16x512xbf16, #tpu.memory_space<vmem>>, vector<16x512xbf16>,
    } else {
    }
    return
  }
  func.func @transform_0(%arg0: i32, %arg1: i32, %arg2: i32) -> (i32, i32) {
    %c0_i32 = arith.constant 0 : i32
    return %arg0, %arg2 : i32, i32
  }
  func.func @transform_1(%arg0: i32, %arg1: i32, %arg2: i32) -> (i32, i32) {
    %c0_i32 = arith.constant 0 : i32
    return %arg2, %arg1 : i32, i32
  }
  func.func @transform_2(%arg0: i32, %arg1: i32, %arg2: i32) -> (i32, i32) {
    %c0_i32 = arith.constant 0 : i32
    %c0_i32_0 = arith.constant 0 : i32
    return %c0_i32, %arg1 : i32, i32
  }
  func.func @transform_3(%arg0: i32, %arg1: i32, %arg2: i32) -> (i32, i32) {
    %c0_i32 = arith.constant 0 : i32
    return %arg0, %arg1 : i32, i32
  }
}

module attributes {stable_mosaic.version = 11 : i64} {
  func.func @_matmul_bias_single_kernel(%arg0: i32, %arg1: i32, %arg2: i32, %arg3: memref<16x512xbf16, #tpu.memory_space<vmem>>, %arg4: memref<512x128xbf16, #tpu.memory_space<vmem>>, %arg5: memref<1x128xf32, #tpu.memory_space<vmem>>, %arg6: memref<16x128xf32, #tpu.memory_space<vmem>>) attributes {dimension_semantics = [#tpu.dimension_semantics<parallel>, #tpu.dimension_semantics<parallel>, #tpu.dimension_semantics<arbitrary>], iteration_bounds = array<i64: 1, 1, 1>, scalar_prefetch = 0 : i64, scratch_operands = 0 : i64, tpu.core_type = #tpu.core_type<tc>, window_params = [{transform_indices = @transform_0, window_bounds = array<i64: 16, 512>}, {transform_indices = @transform_1, window_bounds = array<i64: 512, 128>}, {transform_indices = @transform_2, window_bounds = array<i64: 1, 128>}, {transform_indices = @transform_3, window_bounds = array<i64: 16, 128>}]} {
    %c0 = arith.constant 0 : index
    %c0_0 = arith.constant 0 : index
    %0 = vector.load %arg3[%c0, %c0_0] : memref<16x512xbf16, #tpu.memory_space<vmem>>, vector<16x512xbf16>
    %c0_1 = arith.constant 0 : index
    %c0_2 = arith.constant 0 : index
    %1 = vector.load %arg4[%c0_1, %c0_2] : memref<512x128xbf16, #tpu.memory_space<vmem>>, vector<512x128xbf16>
    %cst = arith.constant dense<0.000000e+00> : vector<16x128xf32>
    %2 = tpu.matmul %0, %1, %cst {dimension_numbers = #tpu.dot_dimension_numbers<[1], [0], [0], [1], [0, 0, 1, 1], [], []>} : vector<16x512xbf16>, vector<512x128xbf16>, vector<16x128xf32> -> vector<16x128xf32>
    %c0_3 = arith.constant 0 : index
    %c0_4 = arith.constant 0 : index
    %3 = vector.load %arg5[%c0_3, %c0_4] : memref<1x128xf32, #tpu.memory_space<vmem>>, vector<1x128xf32>
    %4 = vector.broadcast %3 : vector<1x128xf32> to vector<16x128xf32>
    %5 = arith.addf %2, %4 : vector<16x128xf32>
    %c0_5 = arith.constant 0 : index
    %c0_6 = arith.constant 0 : index
    %6 = vector.load %arg6[%c0_5, %c0_6] : memref<16x128xf32, #tpu.memory_space<vmem>>, vector<16x128xf32>
    tpu.vector_store %arg6[%c0_5, %c0_6], %5 {strides = array<i32>} : memref<16x128xf32, #tpu.memory_space<vmem>>, vector<16x128xf32>,
    return
  }
  func.func @transform_0(%arg0: i32, %arg1: i32, %arg2: i32) -> (i32, i32) {
    %c0_i32 = arith.constant 0 : i32
    return %arg0, %arg2 : i32, i32
  }
  func.func @transform_1(%arg0: i32, %arg1: i32, %arg2: i32) -> (i32, i32) {
    %c0_i32 = arith.constant 0 : i32
    return %arg2, %arg1 : i32, i32
  }
  func.func @transform_2(%arg0: i32, %arg1: i32, %arg2: i32) -> (i32, i32) {
    %c0_i32 = arith.constant 0 : i32
    %c0_i32_0 = arith.constant 0 : i32
    return %c0_i32, %arg1 : i32, i32
  }
  func.func @transform_3(%arg0: i32, %arg1: i32, %arg2: i32) -> (i32, i32) {
    %c0_i32 = arith.constant 0 : i32
    return %arg0, %arg1 : i32, i32
  }
}

</mosaic_0001>

<bundles_post_ra>
// kernel: deep_q_network_forward.5
= control target key start
LH: loop header
LB: loop body
LE: loop exit
PB: predicated region body
PF: predicated region fallthrough
CT: control target
= control target key end

     0   :  { %vm964_vm0 = vcmask 523264   ;;  %s7305_s1 = inlined_call_operand.vmem [shape: bf16[64,128], index: 1, kind: input, shape index: {}]   ;;  %s7306_s0 = inlined_call_operand.vmem [shape: bf16[2080,64], index: 0, kind: input, shape index: {}]   ;;  %s7307_s2 = inlined_call_operand.vmem [shape: f32[1,128], index: 2, kind: input, shape index: {}]   ;;  %s7308_s3 = inlined_call_operand.vmem [shape: bf16[2080,128], index: 3, kind: output, shape index: {}]  }
   0x1   :  { %v5966_v0 = vld [vmem:[%s7305_s1] sm:$0xff]   ;;  %v5967_v1 = vld [vmem:[%s7305_s1 + $0x8] sm:$0xff]   ;;  %v5968_v2 = vld [vmem:[%s7305_s1 + $0x10] sm:$0xff]  }
   0x2   :  { %5690 = vmatprep.subr.bf16.mxu0 %v5966_v0  ;;  %5958 = vmatprep.subr.bf16.mxu1 %v5966_v0  ;;  %v5970_v3 = vld [vmem:[%s7306_s0] sm:$0xff]   ;;  %v5972_v4 = vld [vmem:[%s7306_s0 + $0x210] sm:$0xff]   ;;  %v5969_v5 = vld [vmem:[%s7305_s1 + $0x18] sm:$0xff]  }
   0x3   :  { %5691 = vmatpush3.bf16.msra.mxu0 %v5966_v0  ;;  %5962 = vmatpush3.bf16.msra.mxu1 %v5966_v0  ;;  %v5971_v6 = vld [vmem:[%s7306_s0 + $0x8] sm:$0xff]   ;;  %v5973_v7 = vld [vmem:[%s7306_s0 + $0x218] sm:$0xff]   ;;  %v5974_v8 = vld [vmem:[%s7306_s0 + $0x10] sm:$0xff]  }
   0x4   :  { %5692 = vmatprep.subr.bf16.mxu0 %v5967_v1  ;;  %5959 = vmatprep.subr.bf16.mxu1 %v5967_v1  ;;  %v5976_v9 = vld [vmem:[%s7306_s0 + $0x220] sm:$0xff]   ;;  %v5975_v10 = vld [vmem:[%s7306_s0 + $0x18] sm:$0xff]   ;;  %v5977_v11 = vld [vmem:[%s7306_s0 + $0x228] sm:$0xff]  }
   0x5   :  { %5698 = vmatprep.mubr.msk.bf16.mxu0 %vm964_vm0, %v5970_v3  ;;  %5830 = vmatprep.mubr.msk.bf16.mxu1 %vm964_vm0, %v5972_v4  ;;  %v5978_v12 = vld [vmem:[%s7306_s0 + $0x20] sm:$0xff]   ;;  %v5980_v13 = vld [vmem:[%s7306_s0 + $0x230] sm:$0xff]   ;;  %v5979_v14 = vld [vmem:[%s7306_s0 + $0x28] sm:$0xff]  }
   0x6   :  { %v5981_v15 = vld [vmem:[%s7306_s0 + $0x238] sm:$0xff]   ;;  %v5982_v16 = vld [vmem:[%s7306_s0 + $0x30] sm:$0xff]   ;;  %v5984_v17 = vld [vmem:[%s7306_s0 + $0x240] sm:$0xff]  }
   0x7   :  { %5693 = vmatpush3.bf16.msra.mxu0 %v5967_v1  ;;  %5963 = vmatpush3.bf16.msra.mxu1 %v5967_v1  ;;  %v5983_v18 = vld [vmem:[%s7306_s0 + $0x38] sm:$0xff]   ;;  %v5985_v19 = vld [vmem:[%s7306_s0 + $0x248] sm:$0xff]   ;;  %v5986_v20 = vld [vmem:[%s7306_s0 + $0x40] sm:$0xff]  }
   0x8   :  { %5694 = vmatprep.subr.bf16.mxu0 %v5968_v2  ;;  %5960 = vmatprep.subr.bf16.mxu1 %v5968_v2  ;;  %v5988_v21 = vld [vmem:[%s7306_s0 + $0x250] sm:$0xff]   ;;  %v5987_v22 = vld [vmem:[%s7306_s0 + $0x48] sm:$0xff]   ;;  %v5989_v23 = vld [vmem:[%s7306_s0 + $0x258] sm:$0xff]  }
   0x9   :  { %v5990_v24 = vld [vmem:[%s7306_s0 + $0x50] sm:$0xff]   ;;  %v5992_v25 = vld [vmem:[%s7306_s0 + $0x260] sm:$0xff]   ;;  %v5991_v26 = vld [vmem:[%s7306_s0 + $0x58] sm:$0xff]  }
   0xa   :  { %v5993_v27 = vld [vmem:[%s7306_s0 + $0x268] sm:$0xff]   ;;  %v5994_v28 = vld [vmem:[%s7306_s0 + $0x60] sm:$0xff]   ;;  %v5996_v29 = vld [vmem:[%s7306_s0 + $0x270] sm:$0xff]  }
   0xb   :  { %5695 = vmatpush3.bf16.msra.mxu0 %v5968_v2  ;;  %5964 = vmatpush3.bf16.msra.mxu1 %v5968_v2  ;;  %v5995_v30 = vld [vmem:[%s7306_s0 + $0x68] sm:$0xff]   ;;  %v5997_v31 = vld [vmem:[%s7306_s0 + $0x278] sm:$0xff]   ;;  %v5998_v32 = vld [vmem:[%s7306_s0 + $0x70] sm:$0xff]  }
   0xc   :  { %5696 = vmatprep.subr.bf16.mxu0 %v5969_v5  ;;  %5961 = vmatprep.subr.bf16.mxu1 %v5969_v5  ;;  %v6000_v33 = vld [vmem:[%s7306_s0 + $0x280] sm:$0xff]   ;;  %v5999_v34 = vld [vmem:[%s7306_s0 + $0x78] sm:$0xff]   ;;  %v6001_v35 = vld [vmem:[%s7306_s0 + $0x288] sm:$0xff]  }
   0xd   :  { %v6002_v36 = vld [vmem:[%s7306_s0 + $0x80] sm:$0xff]   ;;  %v6004_v37 = vld [vmem:[%s7306_s0 + $0x290] sm:$0xff]   ;;  %v6003_v38 = vld [vmem:[%s7306_s0 + $0x88] sm:$0xff]  }
   0xe   :  { %v6005_v39 = vld [vmem:[%s7306_s0 + $0x298] sm:$0xff]   ;;  %v6006_v40 = vld [vmem:[%s7306_s0 + $0x90] sm:$0xff]   ;;  %v6008_v41 = vld [vmem:[%s7306_s0 + $0x2a0] sm:$0xff]  }
   0xf   :  { %5697 = vmatpush3.bf16.msra.mxu0 %v5969_v5  ;;  %5965 = vmatpush3.bf16.msra.mxu1 %v5969_v5  ;;  %v6007_v42 = vld [vmem:[%s7306_s0 + $0x98] sm:$0xff]   ;;  %v6009_v43 = vld [vmem:[%s7306_s0 + $0x2a8] sm:$0xff]   ;;  %v6010_v44 = vld [vmem:[%s7306_s0 + $0xa0] sm:$0xff]  }
  0x10   :  { %v6012_v45 = vld [vmem:[%s7306_s0 + $0x2b0] sm:$0xff]   ;;  %v6011_v46 = vld [vmem:[%s7306_s0 + $0xa8] sm:$0xff]   ;;  %v6013_v47 = vld [vmem:[%s7306_s0 + $0x2b8] sm:$0xff]  }
  0x11   :  { %v6014_v48 = vld [vmem:[%s7306_s0 + $0xb0] sm:$0xff]   ;;  %v6016_v49 = vld [vmem:[%s7306_s0 + $0x2c0] sm:$0xff]   ;;  %v6015_v50 = vld [vmem:[%s7306_s0 + $0xb8] sm:$0xff]  }
  0x12   :  { %5699 = vmatmul.mubr.msk.bf16.vlgmr.msra.gmra.mrb[0].mxu0 %vm964_vm0, %v5971_v6  ;;  %5831 = vmatmul.mubr.msk.bf16.vlgmr.msra.gmra.mrb[0].mxu1 %vm964_vm0, %v5973_v7  ;;  %v6017_v51 = vld [vmem:[%s7306_s0 + $0x2c8] sm:$0xff]   ;;  %v6018_v52 = vld [vmem:[%s7306_s0 + $0xc0] sm:$0xff]   ;;  %v6020_v53 = vld [vmem:[%s7306_s0 + $0x2d0] sm:$0xff]  }
  0x13   :  { %5702 = vmatprep.mubr.msk.bf16.mxu0 %vm964_vm0, %v5974_v8  ;;  %5834 = vmatprep.mubr.msk.bf16.mxu1 %vm964_vm0, %v5976_v9  ;;  %v6019_v54 = vld [vmem:[%s7306_s0 + $0xc8] sm:$0xff]   ;;  %v6021_v55 = vld [vmem:[%s7306_s0 + $0x2d8] sm:$0xff]   ;;  %v6022_v56 = vld [vmem:[%s7306_s0 + $0xd0] sm:$0xff]  }
  0x14   :  { %v6024_v57 = vld [vmem:[%s7306_s0 + $0x2e0] sm:$0xff]   ;;  %v6023_v58 = vld [vmem:[%s7306_s0 + $0xd8] sm:$0xff]   ;;  %v6025_v59 = vld [vmem:[%s7306_s0 + $0x2e8] sm:$0xff]  }
  0x15   :  { %v6026_v60 = vld [vmem:[%s7306_s0 + $0xe0] sm:$0xff]   ;;  %v6028_v61 = vld [vmem:[%s7306_s0 + $0x2f0] sm:$0xff]   ;;  %v6027_v62 = vld [vmem:[%s7306_s0 + $0xe8] sm:$0xff]  }
  0x16   :  { %v6029_v63 = vld [vmem:[%s7306_s0 + $0x2f8] sm:$0xff]   ;;  %v6030_v0 = vld [vmem:[%s7306_s0 + $0xf0] sm:$0xff]   ;;  %v6032_v1 = vld [vmem:[%s7306_s0 + $0x300] sm:$0xff]  }
  0x17   :  { %v6031_v2 = vld [vmem:[%s7306_s0 + $0xf8] sm:$0xff]   ;;  %v6033_v3 = vld [vmem:[%s7306_s0 + $0x308] sm:$0xff]   ;;  %v6034_v4 = vld [vmem:[%s7306_s0 + $0x100] sm:$0xff]  }
  0x18   :  { %v6036_v5 = vld [vmem:[%s7306_s0 + $0x310] sm:$0xff]   ;;  %v6035_v6 = vld [vmem:[%s7306_s0 + $0x108] sm:$0xff]   ;;  %v6037_v7 = vld [vmem:[%s7306_s0 + $0x318] sm:$0xff]  }
  0x19   :  { %v6038_v8 = vld [vmem:[%s7306_s0 + $0x110] sm:$0xff]   ;;  %v6040_v9 = vld [vmem:[%s7306_s0 + $0x320] sm:$0xff]  }
  0x1a   :  { %5703 = vmatmul.mubr.msk.bf16.gmra.mrb[4].mxu0 %vm964_vm0, %v5975_v10  ;;  %5835 = vmatmul.mubr.msk.bf16.gmra.mrb[4].mxu1 %vm964_vm0, %v5977_v11  ;;  %v6039_v10 = vld [vmem:[%s7306_s0 + $0x118] sm:$0xff]   ;;  %v6041_v11 = vld [vmem:[%s7306_s0 + $0x328] sm:$0xff]  }
  0x1b   :  { %5706 = vmatprep.mubr.msk.bf16.mxu0 %vm964_vm0, %v5978_v12  ;;  %5838 = vmatprep.mubr.msk.bf16.mxu1 %vm964_vm0, %v5980_v13  ;;  %v6042_v12 = vld [vmem:[%s7306_s0 + $0x120] sm:$0xff]   ;;  %v6044_v13 = vld [vmem:[%s7306_s0 + $0x330] sm:$0xff]  }
  0x22   :  { %5707 = vmatmul.mubr.msk.bf16.gmra.mrb[8].mxu0 %vm964_vm0, %v5979_v14  ;;  %5839 = vmatmul.mubr.msk.bf16.gmra.mrb[8].mxu1 %vm964_vm0, %v5981_v15  ;;  %v6043_v14 = vld [vmem:[%s7306_s0 + $0x128] sm:$0xff]   ;;  %v6045_v15 = vld [vmem:[%s7306_s0 + $0x338] sm:$0xff]  }
  0x23   :  { %5710 = vmatprep.mubr.msk.bf16.mxu0 %vm964_vm0, %v5982_v16  ;;  %5842 = vmatprep.mubr.msk.bf16.mxu1 %vm964_vm0, %v5984_v17  ;;  %v6046_v16 = vld [vmem:[%s7306_s0 + $0x130] sm:$0xff]   ;;  %v6048_v17 = vld [vmem:[%s7306_s0 + $0x340] sm:$0xff]  }
  0x2a   :  { %5711 = vmatmul.mubr.msk.bf16.gmra.mrb[12].mxu0 %vm964_vm0, %v5983_v18  ;;  %5843 = vmatmul.mubr.msk.bf16.gmra.mrb[12].mxu1 %vm964_vm0, %v5985_v19  ;;  %v6047_v18 = vld [vmem:[%s7306_s0 + $0x138] sm:$0xff]   ;;  %v6049_v19 = vld [vmem:[%s7306_s0 + $0x348] sm:$0xff]  }
  0x2b   :  { %5714 = vmatprep.mubr.msk.bf16.mxu0 %vm964_vm0, %v5986_v20  ;;  %5846 = vmatprep.mubr.msk.bf16.mxu1 %vm964_vm0, %v5988_v21  ;;  %v6050_v20 = vld [vmem:[%s7306_s0 + $0x140] sm:$0xff]   ;;  %v6052_v21 = vld [vmem:[%s7306_s0 + $0x350] sm:$0xff]  }
  0x32   :  { %5715 = vmatmul.mubr.msk.bf16.gmra.mrb[16].mxu0 %vm964_vm0, %v5987_v22  ;;  %5847 = vmatmul.mubr.msk.bf16.gmra.mrb[16].mxu1 %vm964_vm0, %v5989_v23  ;;  %v6051_v22 = vld [vmem:[%s7306_s0 + $0x148] sm:$0xff]   ;;  %v6053_v23 = vld [vmem:[%s7306_s0 + $0x358] sm:$0xff]  }
  0x33   :  { %5718 = vmatprep.mubr.msk.bf16.mxu0 %vm964_vm0, %v5990_v24  ;;  %5850 = vmatprep.mubr.msk.bf16.mxu1 %vm964_vm0, %v5992_v25  ;;  %v6054_v24 = vld [vmem:[%s7306_s0 + $0x150] sm:$0xff]   ;;  %v6056_v25 = vld [vmem:[%s7306_s0 + $0x360] sm:$0xff]  }
  0x3a   :  { %5719 = vmatmul.mubr.msk.bf16.gmra.mrb[20].mxu0 %vm964_vm0, %v5991_v26  ;;  %5851 = vmatmul.mubr.msk.bf16.gmra.mrb[20].mxu1 %vm964_vm0, %v5993_v27  ;;  %v6055_v26 = vld [vmem:[%s7306_s0 + $0x158] sm:$0xff]   ;;  %v6057_v27 = vld [vmem:[%s7306_s0 + $0x368] sm:$0xff]  }
  0x3b   :  { %5722 = vmatprep.mubr.msk.bf16.mxu0 %vm964_vm0, %v5994_v28  ;;  %5854 = vmatprep.mubr.msk.bf16.mxu1 %vm964_vm0, %v5996_v29  ;;  %v6058_v28 = vld [vmem:[%s7306_s0 + $0x160] sm:$0xff]   ;;  %v6060_v29 = vld [vmem:[%s7306_s0 + $0x370] sm:$0xff]  }
  0x42   :  { %5723 = vmatmul.mubr.msk.bf16.gmra.mrb[24].mxu0 %vm964_vm0, %v5995_v30  ;;  %5855 = vmatmul.mubr.msk.bf16.gmra.mrb[24].mxu1 %vm964_vm0, %v5997_v31  ;;  %v6059_v30 = vld [vmem:[%s7306_s0 + $0x168] sm:$0xff]   ;;  %v6061_v31 = vld [vmem:[%s7306_s0 + $0x378] sm:$0xff]  }
  0x43   :  { %5726 = vmatprep.mubr.msk.bf16.mxu0 %vm964_vm0, %v5998_v32  ;;  %5858 = vmatprep.mubr.msk.bf16.mxu1 %vm964_vm0, %v6000_v33  ;;  %v6062_v32 = vld [vmem:[%s7306_s0 + $0x170] sm:$0xff]   ;;  %v6064_v33 = vld [vmem:[%s7306_s0 + $0x380] sm:$0xff]  }
  0x4a   :  { %5727 = vmatmul.mubr.msk.bf16.gmra.mrb[28].mxu0 %vm964_vm0, %v5999_v34  ;;  %5859 = vmatmul.mubr.msk.bf16.gmra.mrb[28].mxu1 %vm964_vm0, %v6001_v35  ;;  %v6063_v34 = vld [vmem:[%s7306_s0 + $0x178] sm:$0xff]   ;;  %v6065_v35 = vld [vmem:[%s7306_s0 + $0x388] sm:$0xff]  }
  0x4b   :  { %5730 = vmatprep.mubr.msk.bf16.mxu0 %vm964_vm0, %v6002_v36  ;;  %5862 = vmatprep.mubr.msk.bf16.mxu1 %vm964_vm0, %v6004_v37  ;;  %v6066_v36 = vld [vmem:[%s7306_s0 + $0x180] sm:$0xff]   ;;  %v6068_v37 = vld [vmem:[%s7306_s0 + $0x390] sm:$0xff]  }
  0x52   :  { %5731 = vmatmul.mubr.msk.bf16.gmra.mrb[32].mxu0 %vm964_vm0, %v6003_v38  ;;  %5863 = vmatmul.mubr.msk.bf16.gmra.mrb[32].mxu1 %vm964_vm0, %v6005_v39  ;;  %v6067_v38 = vld [vmem:[%s7306_s0 + $0x188] sm:$0xff]   ;;  %v6069_v39 = vld [vmem:[%s7306_s0 + $0x398] sm:$0xff]  }
  0x53   :  { %5734 = vmatprep.mubr.msk.bf16.mxu0 %vm964_vm0, %v6006_v40  ;;  %5866 = vmatprep.mubr.msk.bf16.mxu1 %vm964_vm0, %v6008_v41  ;;  %v6070_v40 = vld [vmem:[%s7306_s0 + $0x190] sm:$0xff]   ;;  %v6072_v41 = vld [vmem:[%s7306_s0 + $0x3a0] sm:$0xff]  }
  0x5a   :  { %5735 = vmatmul.mubr.msk.bf16.gmra.mrb[36].mxu0 %vm964_vm0, %v6007_v42  ;;  %5867 = vmatmul.mubr.msk.bf16.gmra.mrb[36].mxu1 %vm964_vm0, %v6009_v43  ;;  %v6071_v42 = vld [vmem:[%s7306_s0 + $0x198] sm:$0xff]   ;;  %v6073_v43 = vld [vmem:[%s7306_s0 + $0x3a8] sm:$0xff]  }
  0x5b   :  { %5738 = vmatprep.mubr.msk.bf16.mxu0 %vm964_vm0, %v6010_v44  ;;  %5870 = vmatprep.mubr.msk.bf16.mxu1 %vm964_vm0, %v6012_v45  ;;  %v6074_v44 = vld [vmem:[%s7306_s0 + $0x1a0] sm:$0xff]   ;;  %v6076_v45 = vld [vmem:[%s7306_s0 + $0x3b0] sm:$0xff]  }
  0x62   :  { %5739 = vmatmul.mubr.msk.bf16.gmra.mrb[40].mxu0 %vm964_vm0, %v6011_v46  ;;  %5871 = vmatmul.mubr.msk.bf16.gmra.mrb[40].mxu1 %vm964_vm0, %v6013_v47  ;;  %v6075_v46 = vld [vmem:[%s7306_s0 + $0x1a8] sm:$0xff]   ;;  %v6077_v47 = vld [vmem:[%s7306_s0 + $0x3b8] sm:$0xff]  }
  0x63   :  { %5742 = vmatprep.mubr.msk.bf16.mxu0 %vm964_vm0, %v6014_v48  ;;  %5874 = vmatprep.mubr.msk.bf16.mxu1 %vm964_vm0, %v6016_v49  ;;  %v6078_v48 = vld [vmem:[%s7306_s0 + $0x1b0] sm:$0xff]   ;;  %v6080_v49 = vld [vmem:[%s7306_s0 + $0x3c0] sm:$0xff]  }
  0x6a   :  { %5743 = vmatmul.mubr.msk.bf16.gmra.mrb[44].mxu0 %vm964_vm0, %v6015_v50  ;;  %5875 = vmatmul.mubr.msk.bf16.gmra.mrb[44].mxu1 %vm964_vm0, %v6017_v51  ;;  %v6575_v50 = vld [vmem:[%s7307_s2] ss:$0 sm:$0xff] }
  0x6b   :  { %5746 = vmatprep.mubr.msk.bf16.mxu0 %vm964_vm0, %v6018_v52  ;;  %5878 = vmatprep.mubr.msk.bf16.mxu1 %vm964_vm0, %v6020_v53 }
  0x72   :  { %5747 = vmatmul.mubr.msk.bf16.gmra.mrb[48].mxu0 %vm964_vm0, %v6019_v54  ;;  %5879 = vmatmul.mubr.msk.bf16.gmra.mrb[48].mxu1 %vm964_vm0, %v6021_v55  ;;  %v6079_v55 = vld [vmem:[%s7306_s0 + $0x1b8] sm:$0xff]  }
  0x73   :  { %5750 = vmatprep.mubr.msk.bf16.mxu0 %vm964_vm0, %v6022_v56  ;;  %5882 = vmatprep.mubr.msk.bf16.mxu1 %vm964_vm0, %v6024_v57 }
  0x7a   :  { %5751 = vmatmul.mubr.msk.bf16.gmra.mrb[52].mxu0 %vm964_vm0, %v6023_v58  ;;  %5883 = vmatmul.mubr.msk.bf16.gmra.mrb[52].mxu1 %vm964_vm0, %v6025_v59  ;;  %v6081_v58 = vld [vmem:[%s7306_s0 + $0x3c8] sm:$0xff]  }
  0x7b   :  { %5754 = vmatprep.mubr.msk.bf16.mxu0 %vm964_vm0, %v6026_v60  ;;  %5886 = vmatprep.mubr.msk.bf16.mxu1 %vm964_vm0, %v6028_v61 }
  0x82   :  { %5755 = vmatmul.mubr.msk.bf16.gmra.mrb[56].mxu0 %vm964_vm0, %v6027_v62  ;;  %5887 = vmatmul.mubr.msk.bf16.gmra.mrb[56].mxu1 %vm964_vm0, %v6029_v63  ;;  %v6082_v63 = vld [vmem:[%s7306_s0 + $0x1c0] sm:$0xff]  }
  0x83   :  { %5758 = vmatprep.mubr.msk.bf16.mxu0 %vm964_vm0, %v6030_v0  ;;  %5890 = vmatprep.mubr.msk.bf16.mxu1 %vm964_vm0, %v6032_v1  ;;  %v6084_v0 = vld [vmem:[%s7306_s0 + $0x3d0] sm:$0xff]  }
  0x8a   :  { %5759 = vmatmul.mubr.msk.bf16.gmra.mrb[60].mxu0 %vm964_vm0, %v6031_v2  ;;  %5891 = vmatmul.mubr.msk.bf16.gmra.mrb[60].mxu1 %vm964_vm0, %v6033_v3 }
  0x8b   :  { %5762 = vmatprep.mubr.msk.bf16.mxu0 %vm964_vm0, %v6034_v4  ;;  %5894 = vmatprep.mubr.msk.bf16.mxu1 %vm964_vm0, %v6036_v5 }
  0x92   :  { %5763 = vmatmul.mubr.msk.bf16.gmra.mrb[64].mxu0 %vm964_vm0, %v6035_v6  ;;  %5895 = vmatmul.mubr.msk.bf16.gmra.mrb[64].mxu1 %vm964_vm0, %v6037_v7 }
  0x93   :  { %5766 = vmatprep.mubr.msk.bf16.mxu0 %vm964_vm0, %v6038_v8  ;;  %5898 = vmatprep.mubr.msk.bf16.mxu1 %vm964_vm0, %v6040_v9 }
  0x9a   :  { %5767 = vmatmul.mubr.msk.bf16.gmra.mrb[68].mxu0 %vm964_vm0, %v6039_v10  ;;  %5899 = vmatmul.mubr.msk.bf16.gmra.mrb[68].mxu1 %vm964_vm0, %v6041_v11 }
  0x9b   :  { %5770 = vmatprep.mubr.msk.bf16.mxu0 %vm964_vm0, %v6042_v12  ;;  %5902 = vmatprep.mubr.msk.bf16.mxu1 %vm964_vm0, %v6044_v13 }
  0xa2   :  { %5771 = vmatmul.mubr.msk.bf16.gmra.mrb[72].mxu0 %vm964_vm0, %v6043_v14  ;;  %5903 = vmatmul.mubr.msk.bf16.gmra.mrb[72].mxu1 %vm964_vm0, %v6045_v15 }
  0xa3   :  { %5774 = vmatprep.mubr.msk.bf16.mxu0 %vm964_vm0, %v6046_v16  ;;  %5906 = vmatprep.mubr.msk.bf16.mxu1 %vm964_vm0, %v6048_v17 }
  0xaa   :  { %5775 = vmatmul.mubr.msk.bf16.gmra.mrb[76].mxu0 %vm964_vm0, %v6047_v18  ;;  %5907 = vmatmul.mubr.msk.bf16.gmra.mrb[76].mxu1 %vm964_vm0, %v6049_v19 }
  0xab   :  { %5778 = vmatprep.mubr.msk.bf16.mxu0 %vm964_vm0, %v6050_v20  ;;  %5910 = vmatprep.mubr.msk.bf16.mxu1 %vm964_vm0, %v6052_v21 }
  0xb2   :  { %5779 = vmatmul.mubr.msk.bf16.gmra.mrb[80].mxu0 %vm964_vm0, %v6051_v22  ;;  %5911 = vmatmul.mubr.msk.bf16.gmra.mrb[80].mxu1 %vm964_vm0, %v6053_v23  ;;  %v6083_v23 = vld [vmem:[%s7306_s0 + $0x1c8] sm:$0xff]  }
  0xb3   :  { %5782 = vmatprep.mubr.msk.bf16.mxu0 %vm964_vm0, %v6054_v24  ;;  %5914 = vmatprep.mubr.msk.bf16.mxu1 %vm964_vm0, %v6056_v25 }
  0xba   :  { %5783 = vmatmul.mubr.msk.bf16.gmra.mrb[84].mxu0 %vm964_vm0, %v6055_v26  ;;  %5915 = vmatmul.mubr.msk.bf16.gmra.mrb[84].mxu1 %vm964_vm0, %v6057_v27  ;;  %v6085_v26 = vld [vmem:[%s7306_s0 + $0x3d8] sm:$0xff]  }
  0xbb   :  { %5786 = vmatprep.mubr.msk.bf16.mxu0 %vm964_vm0, %v6058_v28  ;;  %5918 = vmatprep.mubr.msk.bf16.mxu1 %vm964_vm0, %v6060_v29 }
  0xc2   :  { %5787 = vmatmul.mubr.msk.bf16.gmra.mrb[88].mxu0 %vm964_vm0, %v6059_v30  ;;  %5919 = vmatmul.mubr.msk.bf16.gmra.mrb[88].mxu1 %vm964_vm0, %v6061_v31  ;;  %v6086_v31 = vld [vmem:[%s7306_s0 + $0x1d0] sm:$0xff]  }
  0xc3   :  { %5790 = vmatprep.mubr.msk.bf16.mxu0 %vm964_vm0, %v6062_v32  ;;  %5922 = vmatprep.mubr.msk.bf16.mxu1 %vm964_vm0, %v6064_v33  ;;  %v6088_v32 = vld [vmem:[%s7306_s0 + $0x3e0] sm:$0xff]  }
  0xca   :  { %5791 = vmatmul.mubr.msk.bf16.gmra.mrb[92].mxu0 %vm964_vm0, %v6063_v34  ;;  %5923 = vmatmul.mubr.msk.bf16.gmra.mrb[92].mxu1 %vm964_vm0, %v6065_v35 }
  0xcb   :  { %5794 = vmatprep.mubr.msk.bf16.mxu0 %vm964_vm0, %v6066_v36  ;;  %5926 = vmatprep.mubr.msk.bf16.mxu1 %vm964_vm0, %v6068_v37 }
  0xd2   :  { %5795 = vmatmul.mubr.msk.bf16.gmra.mrb[96].mxu0 %vm964_vm0, %v6067_v38  ;;  %5927 = vmatmul.mubr.msk.bf16.gmra.mrb[96].mxu1 %vm964_vm0, %v6069_v39 }
  0xd3   :  { %5798 = vmatprep.mubr.msk.bf16.mxu0 %vm964_vm0, %v6070_v40  ;;  %5930 = vmatprep.mubr.msk.bf16.mxu1 %vm964_vm0, %v6072_v41 }
  0xda   :  { %5799 = vmatmul.mubr.msk.bf16.gmra.mrb[100].mxu0 %vm964_vm0, %v6071_v42  ;;  %5931 = vmatmul.mubr.msk.bf16.gmra.mrb[100].mxu1 %vm964_vm0, %v6073_v43 }
  0xdb   :  { %5802 = vmatprep.mubr.msk.bf16.mxu0 %vm964_vm0, %v6074_v44  ;;  %5934 = vmatprep.mubr.msk.bf16.mxu1 %vm964_vm0, %v6076_v45 }
  0xe2   :  { %5803 = vmatmul.mubr.msk.bf16.gmra.mrb[104].mxu0 %vm964_vm0, %v6075_v46  ;;  %5935 = vmatmul.mubr.msk.bf16.gmra.mrb[104].mxu1 %vm964_vm0, %v6077_v47 }
  0xe3   :  { %5806 = vmatprep.mubr.msk.bf16.mxu0 %vm964_vm0, %v6078_v48  ;;  %5938 = vmatprep.mubr.msk.bf16.mxu1 %vm964_vm0, %v6080_v49 }
  0xe5   :  { %v5700_v51 = vpop.f32.mrb[0].mxu0  ;;  %v5832_v52 = vpop.f32.mrb[0].mxu1 }
  0xe6   :  { %v1398_v53 = vadd.f32 %v5700_v51, %v6575_v50  ;;  %v1389_v54 = vpop.f32.mrb[1].mxu0  ;;  %v1926_v56 = vadd.f32 %v5832_v52, %v6575_v50  ;;  %v1917_v57 = vpop.f32.mrb[1].mxu1 }
  0xe7   :  { %v1390_v59 = vadd.f32 %v6575_v50, %v1389_v54  ;;  %v5701_v60 = vpop.f32.mrb[2].mxu0  ;;  %v1918_v61 = vadd.f32 %v6575_v50, %v1917_v57  ;;  %v5833_v62 = vpop.f32.mrb[2].mxu1 }
  0xe8   :  { %v1401_v1 = vadd.f32 %v5701_v60, %v6575_v50  ;;  %v1392_v2 = vpop.f32.mrb[3].mxu0  ;;  %v2562_v3 = vmax.f32 %v1926_v56, 0.0  ;;  %v1929_v4 = vadd.f32 %v5833_v62, %v6575_v50  ;;  %v1920_v5 = vpop.f32.mrb[3].mxu1  ;;  %v2430_v9 = vmax.f32 %v1398_v53, 0.0  ;;  %v6087_v56 = vld [vmem:[%s7306_s0 + $0x1d8] sm:$0xff]  }
  0xe9   :  { %v1393_v6 = vadd.f32 %v6575_v50, %v1392_v2  ;;  %v2560_v7 = vmax.f32 %v1918_v61, 0.0  ;;  %v1921_v8 = vadd.f32 %v6575_v50, %v1920_v5  ;;  %v2428_v12 = vmax.f32 %v1390_v59, 0.0  ;;  %v6089_v59 = vld [vmem:[%s7306_s0 + $0x3e8] sm:$0xff]  }
  0xea   :  { %v2431_v10 = vmax.f32 %v1401_v1, 0.0  ;;  %5807 = vmatmul.mubr.msk.bf16.gmra.mrb[108].mxu0 %vm964_vm0, %v6079_v55  ;;  %v2563_v11 = vmax.f32 %v1929_v4, 0.0  ;;  %5939 = vmatmul.mubr.msk.bf16.gmra.mrb[108].mxu1 %vm964_vm0, %v6081_v58  ;;  %v6092_v1 = vld [vmem:[%s7306_s0 + $0x3f0] sm:$0xff]  }
  0xeb   :  { %v2429_v13 = vmax.f32 %v1393_v6, 0.0  ;;  %v2561_v14 = vmax.f32 %v1921_v8, 0.0  ;;  %5810 = vmatprep.mubr.msk.bf16.mxu0 %vm964_vm0, %v6082_v63  ;;  %5942 = vmatprep.mubr.msk.bf16.mxu1 %vm964_vm0, %v6084_v0  ;;  %v6090_v0 = vld [vmem:[%s7306_s0 + $0x1e0] sm:$0xff]  }
  0xec   :  { %v4785_v15 = vpack.c.bf16 %v2431_v10, %v2430_v9  ;;  %v5115_v16 = vpack.c.bf16 %v2563_v11, %v2562_v3 }
  0xed   :  { %v4780_v17 = vpack.c.bf16 %v2429_v13, %v2428_v12  ;;  %v5704_v18 = vpop.f32.mrb[4].mxu0  ;;  %v5110_v19 = vpack.c.bf16 %v2561_v14, %v2560_v7  ;;  %v5836_v20 = vpop.f32.mrb[4].mxu1 }
  0xee   :  { %5427 = vst [vmem:[%s7308_s3 + $0x8] sm:$0xff] %v4785_v15   ;;  %5493 = vst [vmem:[%s7308_s3 + $0x218] sm:$0xff] %v5115_v16   ;;  %v1414_v21 = vadd.f32 %v5704_v18, %v6575_v50  ;;  %v1405_v22 = vpop.f32.mrb[5].mxu0  ;;  %v1942_v24 = vadd.f32 %v5836_v20, %v6575_v50  ;;  %v1933_v25 = vpop.f32.mrb[5].mxu1 }
  0xef   :  { %4781 = vst [vmem:[%s7308_s3] sm:$0xff] %v4780_v17   ;;  %5492 = vst [vmem:[%s7308_s3 + $0x210] sm:$0xff] %v5110_v19   ;;  %v1406_v27 = vadd.f32 %v6575_v50, %v1405_v22  ;;  %v5705_v28 = vpop.f32.mrb[6].mxu0  ;;  %v1934_v29 = vadd.f32 %v6575_v50, %v1933_v25  ;;  %v5837_v30 = vpop.f32.mrb[6].mxu1 }
  0xf0   :  { %v1417_v33 = vadd.f32 %v5705_v28, %v6575_v50  ;;  %v1408_v34 = vpop.f32.mrb[7].mxu0  ;;  %v2566_v35 = vmax.f32 %v1942_v24, 0.0  ;;  %v1945_v36 = vadd.f32 %v5837_v30, %v6575_v50  ;;  %v1936_v37 = vpop.f32.mrb[7].mxu1  ;;  %v2434_v41 = vmax.f32 %v1414_v21, 0.0  ;;  %v6091_v24 = vld [vmem:[%s7306_s0 + $0x1e8] sm:$0xff]  }
  0xf1   :  { %v1409_v38 = vadd.f32 %v6575_v50, %v1408_v34  ;;  %v2564_v39 = vmax.f32 %v1934_v29, 0.0  ;;  %v1937_v40 = vadd.f32 %v6575_v50, %v1936_v37  ;;  %v2432_v44 = vmax.f32 %v1406_v27, 0.0  ;;  %v6093_v27 = vld [vmem:[%s7306_s0 + $0x3f8] sm:$0xff]  }
  0xf2   :  { %v2435_v42 = vmax.f32 %v1417_v33, 0.0  ;;  %5811 = vmatmul.mubr.msk.bf16.gmra.mrb[112].mxu0 %vm964_vm0, %v6083_v23  ;;  %v2567_v43 = vmax.f32 %v1945_v36, 0.0  ;;  %5943 = vmatmul.mubr.msk.bf16.gmra.mrb[112].mxu1 %vm964_vm0, %v6085_v26  ;;  %v6096_v33 = vld [vmem:[%s7306_s0 + $0x400] sm:$0xff]  }
  0xf3   :  { %v2433_v45 = vmax.f32 %v1409_v38, 0.0  ;;  %v2565_v46 = vmax.f32 %v1937_v40, 0.0  ;;  %5814 = vmatprep.mubr.msk.bf16.mxu0 %vm964_vm0, %v6086_v31  ;;  %5946 = vmatprep.mubr.msk.bf16.mxu1 %vm964_vm0, %v6088_v32  ;;  %v6094_v32 = vld [vmem:[%s7306_s0 + $0x1f0] sm:$0xff]  }
  0xf4   :  { %v4795_v47 = vpack.c.bf16 %v2435_v42, %v2434_v41  ;;  %v5125_v48 = vpack.c.bf16 %v2567_v43, %v2566_v35 }
  0xf5   :  { %v4790_v49 = vpack.c.bf16 %v2433_v45, %v2432_v44  ;;  %v5708_v51 = vpop.f32.mrb[8].mxu0  ;;  %v5120_v52 = vpack.c.bf16 %v2565_v46, %v2564_v39  ;;  %v5840_v53 = vpop.f32.mrb[8].mxu1 }
  0xf6   :  { %5429 = vst [vmem:[%s7308_s3 + $0x18] sm:$0xff] %v4795_v47   ;;  %5495 = vst [vmem:[%s7308_s3 + $0x228] sm:$0xff] %v5125_v48   ;;  %v1430_v54 = vadd.f32 %v5708_v51, %v6575_v50  ;;  %v1421_v55 = vpop.f32.mrb[9].mxu0  ;;  %v1958_v57 = vadd.f32 %v5840_v53, %v6575_v50  ;;  %v1949_v58 = vpop.f32.mrb[9].mxu1 }
  0xf7   :  { %5428 = vst [vmem:[%s7308_s3 + $0x10] sm:$0xff] %v4790_v49   ;;  %5494 = vst [vmem:[%s7308_s3 + $0x220] sm:$0xff] %v5120_v52   ;;  %v1422_v60 = vadd.f32 %v6575_v50, %v1421_v55  ;;  %v5709_v61 = vpop.f32.mrb[10].mxu0  ;;  %v1950_v62 = vadd.f32 %v6575_v50, %v1949_v58  ;;  %v5841_v63 = vpop.f32.mrb[10].mxu1 }
  0xf8   :  { %v1433_v2 = vadd.f32 %v5709_v61, %v6575_v50  ;;  %v1424_v3 = vpop.f32.mrb[11].mxu0  ;;  %v2570_v4 = vmax.f32 %v1958_v57, 0.0  ;;  %v1961_v5 = vadd.f32 %v5841_v63, %v6575_v50  ;;  %v1952_v6 = vpop.f32.mrb[11].mxu1  ;;  %v2438_v10 = vmax.f32 %v1430_v54, 0.0  ;;  %v6095_v57 = vld [vmem:[%s7306_s0 + $0x1f8] sm:$0xff]  }
  0xf9   :  { %v1425_v7 = vadd.f32 %v6575_v50, %v1424_v3  ;;  %v2568_v8 = vmax.f32 %v1950_v62, 0.0  ;;  %v1953_v9 = vadd.f32 %v6575_v50, %v1952_v6  ;;  %v2436_v13 = vmax.f32 %v1422_v60, 0.0  ;;  %v6097_v60 = vld [vmem:[%s7306_s0 + $0x408] sm:$0xff]  }
  0xfa   :  { %v2439_v11 = vmax.f32 %v1433_v2, 0.0  ;;  %5815 = vmatmul.mubr.msk.bf16.gmra.mrb[116].mxu0 %vm964_vm0, %v6087_v56  ;;  %v2571_v12 = vmax.f32 %v1961_v5, 0.0  ;;  %5947 = vmatmul.mubr.msk.bf16.gmra.mrb[116].mxu1 %vm964_vm0, %v6089_v59 }
  0xfb   :  { %v2437_v14 = vmax.f32 %v1425_v7, 0.0  ;;  %v2569_v15 = vmax.f32 %v1953_v9, 0.0  ;;  %5818 = vmatprep.mubr.msk.bf16.mxu0 %vm964_vm0, %v6090_v0  ;;  %5950 = vmatprep.mubr.msk.bf16.mxu1 %vm964_vm0, %v6092_v1  ;;  %v6098_v1 = vld [vmem:[%s7306_s0 + $0x200] sm:$0xff]  }
  0xfc   :  { %v4805_v16 = vpack.c.bf16 %v2439_v11, %v2438_v10  ;;  %v5135_v17 = vpack.c.bf16 %v2571_v12, %v2570_v4 }
  0xfd   :  { %v4800_v18 = vpack.c.bf16 %v2437_v14, %v2436_v13  ;;  %v5712_v19 = vpop.f32.mrb[12].mxu0  ;;  %v5130_v20 = vpack.c.bf16 %v2569_v15, %v2568_v8  ;;  %v5844_v21 = vpop.f32.mrb[12].mxu1 }
  0xfe   :  { %5431 = vst [vmem:[%s7308_s3 + $0x28] sm:$0xff] %v4805_v16   ;;  %5497 = vst [vmem:[%s7308_s3 + $0x238] sm:$0xff] %v5135_v17   ;;  %v1446_v22 = vadd.f32 %v5712_v19, %v6575_v50  ;;  %v1437_v23 = vpop.f32.mrb[13].mxu0  ;;  %v1974_v25 = vadd.f32 %v5844_v21, %v6575_v50  ;;  %v1965_v26 = vpop.f32.mrb[13].mxu1 }
  0xff   :  { %5430 = vst [vmem:[%s7308_s3 + $0x20] sm:$0xff] %v4800_v18   ;;  %5496 = vst [vmem:[%s7308_s3 + $0x230] sm:$0xff] %v5130_v20   ;;  %v1438_v28 = vadd.f32 %v6575_v50, %v1437_v23  ;;  %v5713_v29 = vpop.f32.mrb[14].mxu0  ;;  %v1966_v30 = vadd.f32 %v6575_v50, %v1965_v26  ;;  %v5845_v31 = vpop.f32.mrb[14].mxu1 }
 0x100   :  { %v1449_v34 = vadd.f32 %v5713_v29, %v6575_v50  ;;  %v1440_v35 = vpop.f32.mrb[15].mxu0  ;;  %v2574_v36 = vmax.f32 %v1974_v25, 0.0  ;;  %v1977_v37 = vadd.f32 %v5845_v31, %v6575_v50  ;;  %v1968_v38 = vpop.f32.mrb[15].mxu1  ;;  %v2442_v42 = vmax.f32 %v1446_v22, 0.0 }
 0x101   :  { %v1441_v39 = vadd.f32 %v6575_v50, %v1440_v35  ;;  %v2572_v40 = vmax.f32 %v1966_v30, 0.0  ;;  %v1969_v41 = vadd.f32 %v6575_v50, %v1968_v38  ;;  %v2440_v45 = vmax.f32 %v1438_v28, 0.0 }
 0x102   :  { %v2443_v43 = vmax.f32 %v1449_v34, 0.0  ;;  %5819 = vmatmul.mubr.msk.bf16.gmra.mrb[120].mxu0 %vm964_vm0, %v6091_v24  ;;  %v2575_v44 = vmax.f32 %v1977_v37, 0.0  ;;  %5951 = vmatmul.mubr.msk.bf16.gmra.mrb[120].mxu1 %vm964_vm0, %v6093_v27  ;;  %v6099_v24 = vld [vmem:[%s7306_s0 + $0x208] sm:$0xff]  }
 0x103   :  { %v2441_v46 = vmax.f32 %v1441_v39, 0.0  ;;  %v2573_v47 = vmax.f32 %v1969_v41, 0.0  ;;  %5822 = vmatprep.mubr.msk.bf16.mxu0 %vm964_vm0, %v6094_v32  ;;  %5954 = vmatprep.mubr.msk.bf16.mxu1 %vm964_vm0, %v6096_v33 }
 0x104   :  { %v4815_v48 = vpack.c.bf16 %v2443_v43, %v2442_v42  ;;  %v5145_v49 = vpack.c.bf16 %v2575_v44, %v2574_v36 }
 0x105   :  { %v4810_v51 = vpack.c.bf16 %v2441_v46, %v2440_v45  ;;  %v5716_v52 = vpop.f32.mrb[16].mxu0  ;;  %v5140_v53 = vpack.c.bf16 %v2573_v47, %v2572_v40  ;;  %v5848_v54 = vpop.f32.mrb[16].mxu1 }
 0x106   :  { %5433 = vst [vmem:[%s7308_s3 + $0x38] sm:$0xff] %v4815_v48   ;;  %5499 = vst [vmem:[%s7308_s3 + $0x248] sm:$0xff] %v5145_v49   ;;  %v1462_v55 = vadd.f32 %v5716_v52, %v6575_v50  ;;  %v1453_v56 = vpop.f32.mrb[17].mxu0  ;;  %v1990_v58 = vadd.f32 %v5848_v54, %v6575_v50  ;;  %v1981_v59 = vpop.f32.mrb[17].mxu1 }
 0x107   :  { %5432 = vst [vmem:[%s7308_s3 + $0x30] sm:$0xff] %v4810_v51   ;;  %5498 = vst [vmem:[%s7308_s3 + $0x240] sm:$0xff] %v5140_v53   ;;  %v1454_v61 = vadd.f32 %v6575_v50, %v1453_v56  ;;  %v5717_v62 = vpop.f32.mrb[18].mxu0  ;;  %v1982_v63 = vadd.f32 %v6575_v50, %v1981_v59  ;;  %v5849_v0 = vpop.f32.mrb[18].mxu1 }
 0x108   :  { %v1465_v2 = vadd.f32 %v5717_v62, %v6575_v50  ;;  %v1456_v3 = vpop.f32.mrb[19].mxu0  ;;  %v2578_v4 = vmax.f32 %v1990_v58, 0.0  ;;  %v1993_v5 = vadd.f32 %v5849_v0, %v6575_v50  ;;  %v1984_v6 = vpop.f32.mrb[19].mxu1  ;;  %v2446_v10 = vmax.f32 %v1462_v55, 0.0 }
 0x109   :  { %v1457_v7 = vadd.f32 %v6575_v50, %v1456_v3  ;;  %v2576_v8 = vmax.f32 %v1982_v63, 0.0  ;;  %v1985_v9 = vadd.f32 %v6575_v50, %v1984_v6  ;;  %v2444_v13 = vmax.f32 %v1454_v61, 0.0 }
 0x10a   :  { %v2447_v11 = vmax.f32 %v1465_v2, 0.0  ;;  %5823 = vmatmul.mubr.msk.bf16.gmra.mrb[124].mxu0 %vm964_vm0, %v6095_v57  ;;  %v2579_v12 = vmax.f32 %v1993_v5, 0.0  ;;  %5955 = vmatmul.mubr.msk.bf16.gmra.mrb[124].mxu1 %vm964_vm0, %v6097_v60 }
 0x10b   :  { %v2445_v14 = vmax.f32 %v1457_v7, 0.0  ;;  %v2577_v15 = vmax.f32 %v1985_v9, 0.0  ;;  %5826 = vmatprep.mubr.msk.bf16.mxu0 %vm964_vm0, %v6098_v1 }
 0x10c   :  { %v4825_v16 = vpack.c.bf16 %v2447_v11, %v2446_v10  ;;  %v5155_v17 = vpack.c.bf16 %v2579_v12, %v2578_v4 }
 0x10d   :  { %v4820_v18 = vpack.c.bf16 %v2445_v14, %v2444_v13  ;;  %v5720_v19 = vpop.f32.mrb[20].mxu0  ;;  %v5150_v20 = vpack.c.bf16 %v2577_v15, %v2576_v8  ;;  %v5852_v21 = vpop.f32.mrb[20].mxu1 }
 0x10e   :  { %5435 = vst [vmem:[%s7308_s3 + $0x48] sm:$0xff] %v4825_v16   ;;  %5501 = vst [vmem:[%s7308_s3 + $0x258] sm:$0xff] %v5155_v17   ;;  %v1478_v22 = vadd.f32 %v5720_v19, %v6575_v50  ;;  %v1469_v23 = vpop.f32.mrb[21].mxu0  ;;  %v2006_v25 = vadd.f32 %v5852_v21, %v6575_v50  ;;  %v1997_v26 = vpop.f32.mrb[21].mxu1 }
 0x10f   :  { %5434 = vst [vmem:[%s7308_s3 + $0x40] sm:$0xff] %v4820_v18   ;;  %5500 = vst [vmem:[%s7308_s3 + $0x250] sm:$0xff] %v5150_v20   ;;  %v1470_v27 = vadd.f32 %v6575_v50, %v1469_v23  ;;  %v5721_v28 = vpop.f32.mrb[22].mxu0  ;;  %v1998_v29 = vadd.f32 %v6575_v50, %v1997_v26  ;;  %v5853_v30 = vpop.f32.mrb[22].mxu1 }
 0x110   :  { %v1481_v31 = vadd.f32 %v5721_v28, %v6575_v50  ;;  %v1472_v32 = vpop.f32.mrb[23].mxu0  ;;  %v2582_v33 = vmax.f32 %v2006_v25, 0.0  ;;  %v2009_v34 = vadd.f32 %v5853_v30, %v6575_v50  ;;  %v2000_v35 = vpop.f32.mrb[23].mxu1  ;;  %v2450_v39 = vmax.f32 %v1478_v22, 0.0 }
 0x111   :  { %v1473_v36 = vadd.f32 %v6575_v50, %v1472_v32  ;;  %v2580_v37 = vmax.f32 %v1998_v29, 0.0  ;;  %v2001_v38 = vadd.f32 %v6575_v50, %v2000_v35  ;;  %v2448_v42 = vmax.f32 %v1470_v27, 0.0 }
 0x112   :  { %v2451_v40 = vmax.f32 %v1481_v31, 0.0  ;;  %5827 = vmatmul.mubr.msk.bf16.gmra.mrb[128].mxu0 %vm964_vm0, %v6099_v24  ;;  %v2583_v41 = vmax.f32 %v2009_v34, 0.0 }
 0x113   :  { %v2449_v43 = vmax.f32 %v1473_v36, 0.0  ;;  %v2581_v44 = vmax.f32 %v2001_v38, 0.0 }
 0x114   :  { %v4835_v45 = vpack.c.bf16 %v2451_v40, %v2450_v39  ;;  %v5165_v46 = vpack.c.bf16 %v2583_v41, %v2582_v33 }
 0x115   :  { %v4830_v47 = vpack.c.bf16 %v2449_v43, %v2448_v42  ;;  %v5724_v48 = vpop.f32.mrb[24].mxu0  ;;  %v5160_v49 = vpack.c.bf16 %v2581_v44, %v2580_v37  ;;  %v5856_v51 = vpop.f32.mrb[24].mxu1 }
 0x116   :  { %5437 = vst [vmem:[%s7308_s3 + $0x58] sm:$0xff] %v4835_v45   ;;  %5503 = vst [vmem:[%s7308_s3 + $0x268] sm:$0xff] %v5165_v46   ;;  %v1494_v52 = vadd.f32 %v5724_v48, %v6575_v50  ;;  %v1485_v53 = vpop.f32.mrb[25].mxu0  ;;  %v2022_v54 = vadd.f32 %v5856_v51, %v6575_v50  ;;  %v2013_v55 = vpop.f32.mrb[25].mxu1 }
 0x117   :  { %5436 = vst [vmem:[%s7308_s3 + $0x50] sm:$0xff] %v4830_v47   ;;  %5502 = vst [vmem:[%s7308_s3 + $0x260] sm:$0xff] %v5160_v49   ;;  %v1486_v56 = vadd.f32 %v6575_v50, %v1485_v53  ;;  %v5725_v57 = vpop.f32.mrb[26].mxu0  ;;  %v2014_v58 = vadd.f32 %v6575_v50, %v2013_v55  ;;  %v5857_v59 = vpop.f32.mrb[26].mxu1 }
 0x118   :  { %v1497_v60 = vadd.f32 %v5725_v57, %v6575_v50  ;;  %v1488_v61 = vpop.f32.mrb[27].mxu0  ;;  %v2586_v62 = vmax.f32 %v2022_v54, 0.0  ;;  %v2025_v63 = vadd.f32 %v5857_v59, %v6575_v50  ;;  %v2016_v0 = vpop.f32.mrb[27].mxu1  ;;  %v2454_v4 = vmax.f32 %v1494_v52, 0.0 }
 0x119   :  { %v1489_v1 = vadd.f32 %v6575_v50, %v1488_v61  ;;  %v2584_v2 = vmax.f32 %v2014_v58, 0.0  ;;  %v2017_v3 = vadd.f32 %v6575_v50, %v2016_v0  ;;  %v2452_v7 = vmax.f32 %v1486_v56, 0.0 }
 0x11a   :  { %v2455_v5 = vmax.f32 %v1497_v60, 0.0  ;;  %v2587_v6 = vmax.f32 %v2025_v63, 0.0 }
 0x11b   :  { %v2453_v8 = vmax.f32 %v1489_v1, 0.0  ;;  %v2585_v9 = vmax.f32 %v2017_v3, 0.0 }
 0x11c   :  { %v4845_v10 = vpack.c.bf16 %v2455_v5, %v2454_v4  ;;  %v5175_v11 = vpack.c.bf16 %v2587_v6, %v2586_v62 }
 0x11d   :  { %v4840_v12 = vpack.c.bf16 %v2453_v8, %v2452_v7  ;;  %v5728_v13 = vpop.f32.mrb[28].mxu0  ;;  %v5170_v14 = vpack.c.bf16 %v2585_v9, %v2584_v2  ;;  %v5860_v15 = vpop.f32.mrb[28].mxu1 }
 0x11e   :  { %5439 = vst [vmem:[%s7308_s3 + $0x68] sm:$0xff] %v4845_v10   ;;  %5505 = vst [vmem:[%s7308_s3 + $0x278] sm:$0xff] %v5175_v11   ;;  %v1510_v16 = vadd.f32 %v5728_v13, %v6575_v50  ;;  %v1501_v17 = vpop.f32.mrb[29].mxu0  ;;  %v2038_v18 = vadd.f32 %v5860_v15, %v6575_v50  ;;  %v2029_v19 = vpop.f32.mrb[29].mxu1 }
 0x11f   :  { %5438 = vst [vmem:[%s7308_s3 + $0x60] sm:$0xff] %v4840_v12   ;;  %5504 = vst [vmem:[%s7308_s3 + $0x270] sm:$0xff] %v5170_v14   ;;  %v1502_v20 = vadd.f32 %v6575_v50, %v1501_v17  ;;  %v5729_v21 = vpop.f32.mrb[30].mxu0  ;;  %v2030_v22 = vadd.f32 %v6575_v50, %v2029_v19  ;;  %v5861_v23 = vpop.f32.mrb[30].mxu1 }
 0x120   :  { %v1513_v24 = vadd.f32 %v5729_v21, %v6575_v50  ;;  %v1504_v25 = vpop.f32.mrb[31].mxu0  ;;  %v2590_v26 = vmax.f32 %v2038_v18, 0.0  ;;  %v2041_v27 = vadd.f32 %v5861_v23, %v6575_v50  ;;  %v2032_v28 = vpop.f32.mrb[31].mxu1  ;;  %v2458_v32 = vmax.f32 %v1510_v16, 0.0 }
 0x121   :  { %v1505_v29 = vadd.f32 %v6575_v50, %v1504_v25  ;;  %v2588_v30 = vmax.f32 %v2030_v22, 0.0  ;;  %v2033_v31 = vadd.f32 %v6575_v50, %v2032_v28  ;;  %v2456_v35 = vmax.f32 %v1502_v20, 0.0 }
 0x122   :  { %v2459_v33 = vmax.f32 %v1513_v24, 0.0  ;;  %v2591_v34 = vmax.f32 %v2041_v27, 0.0 }
 0x123   :  { %v2457_v36 = vmax.f32 %v1505_v29, 0.0  ;;  %v2589_v37 = vmax.f32 %v2033_v31, 0.0 }
 0x124   :  { %v4855_v38 = vpack.c.bf16 %v2459_v33, %v2458_v32  ;;  %v5185_v39 = vpack.c.bf16 %v2591_v34, %v2590_v26 }
 0x125   :  { %v4850_v40 = vpack.c.bf16 %v2457_v36, %v2456_v35  ;;  %v5732_v41 = vpop.f32.mrb[32].mxu0  ;;  %v5180_v42 = vpack.c.bf16 %v2589_v37, %v2588_v30  ;;  %v5864_v43 = vpop.f32.mrb[32].mxu1 }
 0x126   :  { %5441 = vst [vmem:[%s7308_s3 + $0x78] sm:$0xff] %v4855_v38   ;;  %5507 = vst [vmem:[%s7308_s3 + $0x288] sm:$0xff] %v5185_v39   ;;  %v1526_v44 = vadd.f32 %v5732_v41, %v6575_v50  ;;  %v1517_v45 = vpop.f32.mrb[33].mxu0  ;;  %v2054_v46 = vadd.f32 %v5864_v43, %v6575_v50  ;;  %v2045_v47 = vpop.f32.mrb[33].mxu1 }
 0x127   :  { %5440 = vst [vmem:[%s7308_s3 + $0x70] sm:$0xff] %v4850_v40   ;;  %5506 = vst [vmem:[%s7308_s3 + $0x280] sm:$0xff] %v5180_v42   ;;  %v1518_v48 = vadd.f32 %v6575_v50, %v1517_v45  ;;  %v5733_v49 = vpop.f32.mrb[34].mxu0  ;;  %v2046_v51 = vadd.f32 %v6575_v50, %v2045_v47  ;;  %v5865_v52 = vpop.f32.mrb[34].mxu1 }
 0x128   :  { %v1529_v53 = vadd.f32 %v5733_v49, %v6575_v50  ;;  %v1520_v54 = vpop.f32.mrb[35].mxu0  ;;  %v2594_v55 = vmax.f32 %v2054_v46, 0.0  ;;  %v2057_v56 = vadd.f32 %v5865_v52, %v6575_v50  ;;  %v2048_v57 = vpop.f32.mrb[35].mxu1  ;;  %v2462_v61 = vmax.f32 %v1526_v44, 0.0 }
 0x129   :  { %v1521_v58 = vadd.f32 %v6575_v50, %v1520_v54  ;;  %v2592_v59 = vmax.f32 %v2046_v51, 0.0  ;;  %v2049_v60 = vadd.f32 %v6575_v50, %v2048_v57  ;;  %v2460_v0 = vmax.f32 %v1518_v48, 0.0 }
 0x12a   :  { %v2463_v62 = vmax.f32 %v1529_v53, 0.0  ;;  %v2595_v63 = vmax.f32 %v2057_v56, 0.0 }
 0x12b   :  { %v2461_v1 = vmax.f32 %v1521_v58, 0.0  ;;  %v2593_v2 = vmax.f32 %v2049_v60, 0.0 }
 0x12c   :  { %v4865_v3 = vpack.c.bf16 %v2463_v62, %v2462_v61  ;;  %v5195_v4 = vpack.c.bf16 %v2595_v63, %v2594_v55 }
 0x12d   :  { %v4860_v5 = vpack.c.bf16 %v2461_v1, %v2460_v0  ;;  %v5736_v6 = vpop.f32.mrb[36].mxu0  ;;  %v5190_v7 = vpack.c.bf16 %v2593_v2, %v2592_v59  ;;  %v5868_v8 = vpop.f32.mrb[36].mxu1 }
 0x12e   :  { %5443 = vst [vmem:[%s7308_s3 + $0x88] sm:$0xff] %v4865_v3   ;;  %5509 = vst [vmem:[%s7308_s3 + $0x298] sm:$0xff] %v5195_v4   ;;  %v1542_v9 = vadd.f32 %v5736_v6, %v6575_v50  ;;  %v1533_v10 = vpop.f32.mrb[37].mxu0  ;;  %v2070_v11 = vadd.f32 %v5868_v8, %v6575_v50  ;;  %v2061_v12 = vpop.f32.mrb[37].mxu1 }
 0x12f   :  { %5442 = vst [vmem:[%s7308_s3 + $0x80] sm:$0xff] %v4860_v5   ;;  %5508 = vst [vmem:[%s7308_s3 + $0x290] sm:$0xff] %v5190_v7   ;;  %v1534_v13 = vadd.f32 %v6575_v50, %v1533_v10  ;;  %v5737_v14 = vpop.f32.mrb[38].mxu0  ;;  %v2062_v15 = vadd.f32 %v6575_v50, %v2061_v12  ;;  %v5869_v16 = vpop.f32.mrb[38].mxu1 }
 0x130   :  { %v1545_v17 = vadd.f32 %v5737_v14, %v6575_v50  ;;  %v1536_v18 = vpop.f32.mrb[39].mxu0  ;;  %v2598_v19 = vmax.f32 %v2070_v11, 0.0  ;;  %v2073_v20 = vadd.f32 %v5869_v16, %v6575_v50  ;;  %v2064_v21 = vpop.f32.mrb[39].mxu1  ;;  %v2466_v25 = vmax.f32 %v1542_v9, 0.0 }
 0x131   :  { %v1537_v22 = vadd.f32 %v6575_v50, %v1536_v18  ;;  %v2596_v23 = vmax.f32 %v2062_v15, 0.0  ;;  %v2065_v24 = vadd.f32 %v6575_v50, %v2064_v21  ;;  %v2464_v28 = vmax.f32 %v1534_v13, 0.0 }
 0x132   :  { %v2467_v26 = vmax.f32 %v1545_v17, 0.0  ;;  %v2599_v27 = vmax.f32 %v2073_v20, 0.0 }
 0x133   :  { %v2465_v29 = vmax.f32 %v1537_v22, 0.0  ;;  %v2597_v30 = vmax.f32 %v2065_v24, 0.0 }
 0x134   :  { %v4875_v31 = vpack.c.bf16 %v2467_v26, %v2466_v25  ;;  %v5205_v32 = vpack.c.bf16 %v2599_v27, %v2598_v19 }
 0x135   :  { %v4870_v33 = vpack.c.bf16 %v2465_v29, %v2464_v28  ;;  %v5740_v34 = vpop.f32.mrb[40].mxu0  ;;  %v5200_v35 = vpack.c.bf16 %v2597_v30, %v2596_v23  ;;  %v5872_v36 = vpop.f32.mrb[40].mxu1 }
 0x136   :  { %5445 = vst [vmem:[%s7308_s3 + $0x98] sm:$0xff] %v4875_v31   ;;  %5511 = vst [vmem:[%s7308_s3 + $0x2a8] sm:$0xff] %v5205_v32   ;;  %v1558_v37 = vadd.f32 %v5740_v34, %v6575_v50  ;;  %v1549_v38 = vpop.f32.mrb[41].mxu0  ;;  %v2086_v39 = vadd.f32 %v5872_v36, %v6575_v50  ;;  %v2077_v40 = vpop.f32.mrb[41].mxu1 }
 0x137   :  { %5444 = vst [vmem:[%s7308_s3 + $0x90] sm:$0xff] %v4870_v33   ;;  %5510 = vst [vmem:[%s7308_s3 + $0x2a0] sm:$0xff] %v5200_v35   ;;  %v1550_v41 = vadd.f32 %v6575_v50, %v1549_v38  ;;  %v5741_v42 = vpop.f32.mrb[42].mxu0  ;;  %v2078_v43 = vadd.f32 %v6575_v50, %v2077_v40  ;;  %v5873_v44 = vpop.f32.mrb[42].mxu1 }
 0x138   :  { %v1561_v45 = vadd.f32 %v5741_v42, %v6575_v50  ;;  %v1552_v46 = vpop.f32.mrb[43].mxu0  ;;  %v2602_v47 = vmax.f32 %v2086_v39, 0.0  ;;  %v2089_v48 = vadd.f32 %v5873_v44, %v6575_v50  ;;  %v2080_v49 = vpop.f32.mrb[43].mxu1  ;;  %v2470_v54 = vmax.f32 %v1558_v37, 0.0 }
 0x139   :  { %v1553_v51 = vadd.f32 %v6575_v50, %v1552_v46  ;;  %v2600_v52 = vmax.f32 %v2078_v43, 0.0  ;;  %v2081_v53 = vadd.f32 %v6575_v50, %v2080_v49  ;;  %v2468_v57 = vmax.f32 %v1550_v41, 0.0 }
 0x13a   :  { %v2471_v55 = vmax.f32 %v1561_v45, 0.0  ;;  %v2603_v56 = vmax.f32 %v2089_v48, 0.0 }
 0x13b   :  { %v2469_v58 = vmax.f32 %v1553_v51, 0.0  ;;  %v2601_v59 = vmax.f32 %v2081_v53, 0.0 }
 0x13c   :  { %v4885_v60 = vpack.c.bf16 %v2471_v55, %v2470_v54  ;;  %v5215_v61 = vpack.c.bf16 %v2603_v56, %v2602_v47 }
 0x13d   :  { %v4880_v62 = vpack.c.bf16 %v2469_v58, %v2468_v57  ;;  %v5744_v63 = vpop.f32.mrb[44].mxu0  ;;  %v5210_v0 = vpack.c.bf16 %v2601_v59, %v2600_v52  ;;  %v5876_v1 = vpop.f32.mrb[44].mxu1 }
 0x13e   :  { %5447 = vst [vmem:[%s7308_s3 + $0xa8] sm:$0xff] %v4885_v60   ;;  %5513 = vst [vmem:[%s7308_s3 + $0x2b8] sm:$0xff] %v5215_v61   ;;  %v1574_v2 = vadd.f32 %v5744_v63, %v6575_v50  ;;  %v1565_v3 = vpop.f32.mrb[45].mxu0  ;;  %v2102_v4 = vadd.f32 %v5876_v1, %v6575_v50  ;;  %v2093_v5 = vpop.f32.mrb[45].mxu1 }
 0x13f   :  { %5446 = vst [vmem:[%s7308_s3 + $0xa0] sm:$0xff] %v4880_v62   ;;  %5512 = vst [vmem:[%s7308_s3 + $0x2b0] sm:$0xff] %v5210_v0   ;;  %v1566_v6 = vadd.f32 %v6575_v50, %v1565_v3  ;;  %v5745_v7 = vpop.f32.mrb[46].mxu0  ;;  %v2094_v8 = vadd.f32 %v6575_v50, %v2093_v5  ;;  %v5877_v9 = vpop.f32.mrb[46].mxu1 }
 0x140   :  { %v1577_v10 = vadd.f32 %v5745_v7, %v6575_v50  ;;  %v1568_v11 = vpop.f32.mrb[47].mxu0  ;;  %v2606_v12 = vmax.f32 %v2102_v4, 0.0  ;;  %v2105_v13 = vadd.f32 %v5877_v9, %v6575_v50  ;;  %v2096_v14 = vpop.f32.mrb[47].mxu1  ;;  %v2474_v18 = vmax.f32 %v1574_v2, 0.0 }
 0x141   :  { %v1569_v15 = vadd.f32 %v6575_v50, %v1568_v11  ;;  %v2604_v16 = vmax.f32 %v2094_v8, 0.0  ;;  %v2097_v17 = vadd.f32 %v6575_v50, %v2096_v14  ;;  %v2472_v21 = vmax.f32 %v1566_v6, 0.0 }
 0x142   :  { %v2475_v19 = vmax.f32 %v1577_v10, 0.0  ;;  %v2607_v20 = vmax.f32 %v2105_v13, 0.0 }
 0x143   :  { %v2473_v22 = vmax.f32 %v1569_v15, 0.0  ;;  %v2605_v23 = vmax.f32 %v2097_v17, 0.0 }
 0x144   :  { %v4895_v24 = vpack.c.bf16 %v2475_v19, %v2474_v18  ;;  %v5225_v25 = vpack.c.bf16 %v2607_v20, %v2606_v12 }
 0x145   :  { %v4890_v26 = vpack.c.bf16 %v2473_v22, %v2472_v21  ;;  %v5748_v27 = vpop.f32.mrb[48].mxu0  ;;  %v5220_v28 = vpack.c.bf16 %v2605_v23, %v2604_v16  ;;  %v5880_v29 = vpop.f32.mrb[48].mxu1 }
 0x146   :  { %5449 = vst [vmem:[%s7308_s3 + $0xb8] sm:$0xff] %v4895_v24   ;;  %5515 = vst [vmem:[%s7308_s3 + $0x2c8] sm:$0xff] %v5225_v25   ;;  %v1590_v30 = vadd.f32 %v5748_v27, %v6575_v50  ;;  %v1581_v31 = vpop.f32.mrb[49].mxu0  ;;  %v2118_v32 = vadd.f32 %v5880_v29, %v6575_v50  ;;  %v2109_v33 = vpop.f32.mrb[49].mxu1 }
 0x147   :  { %5448 = vst [vmem:[%s7308_s3 + $0xb0] sm:$0xff] %v4890_v26   ;;  %5514 = vst [vmem:[%s7308_s3 + $0x2c0] sm:$0xff] %v5220_v28   ;;  %v1582_v34 = vadd.f32 %v6575_v50, %v1581_v31  ;;  %v5749_v35 = vpop.f32.mrb[50].mxu0  ;;  %v2110_v36 = vadd.f32 %v6575_v50, %v2109_v33  ;;  %v5881_v37 = vpop.f32.mrb[50].mxu1 }
 0x148   :  { %v1593_v38 = vadd.f32 %v5749_v35, %v6575_v50  ;;  %v1584_v39 = vpop.f32.mrb[51].mxu0  ;;  %v2610_v40 = vmax.f32 %v2118_v32, 0.0  ;;  %v2121_v41 = vadd.f32 %v5881_v37, %v6575_v50  ;;  %v2112_v42 = vpop.f32.mrb[51].mxu1  ;;  %v2478_v46 = vmax.f32 %v1590_v30, 0.0 }
 0x149   :  { %v1585_v43 = vadd.f32 %v6575_v50, %v1584_v39  ;;  %v2608_v44 = vmax.f32 %v2110_v36, 0.0  ;;  %v2113_v45 = vadd.f32 %v6575_v50, %v2112_v42  ;;  %v2476_v49 = vmax.f32 %v1582_v34, 0.0 }
 0x14a   :  { %v2479_v47 = vmax.f32 %v1593_v38, 0.0  ;;  %v2611_v48 = vmax.f32 %v2121_v41, 0.0 }
 0x14b   :  { %v2477_v51 = vmax.f32 %v1585_v43, 0.0  ;;  %v2609_v52 = vmax.f32 %v2113_v45, 0.0 }
 0x14c   :  { %v4905_v53 = vpack.c.bf16 %v2479_v47, %v2478_v46  ;;  %v5235_v54 = vpack.c.bf16 %v2611_v48, %v2610_v40 }
 0x14d   :  { %v4900_v55 = vpack.c.bf16 %v2477_v51, %v2476_v49  ;;  %v5752_v56 = vpop.f32.mrb[52].mxu0  ;;  %v5230_v57 = vpack.c.bf16 %v2609_v52, %v2608_v44  ;;  %v5884_v58 = vpop.f32.mrb[52].mxu1 }
 0x14e   :  { %5451 = vst [vmem:[%s7308_s3 + $0xc8] sm:$0xff] %v4905_v53   ;;  %5517 = vst [vmem:[%s7308_s3 + $0x2d8] sm:$0xff] %v5235_v54   ;;  %v1606_v59 = vadd.f32 %v5752_v56, %v6575_v50  ;;  %v1597_v60 = vpop.f32.mrb[53].mxu0  ;;  %v2134_v61 = vadd.f32 %v5884_v58, %v6575_v50  ;;  %v2125_v62 = vpop.f32.mrb[53].mxu1 }
 0x14f   :  { %5450 = vst [vmem:[%s7308_s3 + $0xc0] sm:$0xff] %v4900_v55   ;;  %5516 = vst [vmem:[%s7308_s3 + $0x2d0] sm:$0xff] %v5230_v57   ;;  %v1598_v63 = vadd.f32 %v6575_v50, %v1597_v60  ;;  %v5753_v0 = vpop.f32.mrb[54].mxu0  ;;  %v2126_v1 = vadd.f32 %v6575_v50, %v2125_v62  ;;  %v5885_v2 = vpop.f32.mrb[54].mxu1 }
 0x150   :  { %v1609_v3 = vadd.f32 %v5753_v0, %v6575_v50  ;;  %v1600_v4 = vpop.f32.mrb[55].mxu0  ;;  %v2614_v5 = vmax.f32 %v2134_v61, 0.0  ;;  %v2137_v6 = vadd.f32 %v5885_v2, %v6575_v50  ;;  %v2128_v7 = vpop.f32.mrb[55].mxu1  ;;  %v2482_v11 = vmax.f32 %v1606_v59, 0.0 }
 0x151   :  { %v1601_v8 = vadd.f32 %v6575_v50, %v1600_v4  ;;  %v2612_v9 = vmax.f32 %v2126_v1, 0.0  ;;  %v2129_v10 = vadd.f32 %v6575_v50, %v2128_v7  ;;  %v2480_v14 = vmax.f32 %v1598_v63, 0.0 }
 0x152   :  { %v2483_v12 = vmax.f32 %v1609_v3, 0.0  ;;  %v2615_v13 = vmax.f32 %v2137_v6, 0.0 }
 0x153   :  { %v2481_v15 = vmax.f32 %v1601_v8, 0.0  ;;  %v2613_v16 = vmax.f32 %v2129_v10, 0.0 }
 0x154   :  { %v4915_v17 = vpack.c.bf16 %v2483_v12, %v2482_v11  ;;  %v5245_v18 = vpack.c.bf16 %v2615_v13, %v2614_v5 }
 0x155   :  { %v4910_v19 = vpack.c.bf16 %v2481_v15, %v2480_v14  ;;  %v5756_v20 = vpop.f32.mrb[56].mxu0  ;;  %v5240_v21 = vpack.c.bf16 %v2613_v16, %v2612_v9  ;;  %v5888_v22 = vpop.f32.mrb[56].mxu1 }
 0x156   :  { %5453 = vst [vmem:[%s7308_s3 + $0xd8] sm:$0xff] %v4915_v17   ;;  %5519 = vst [vmem:[%s7308_s3 + $0x2e8] sm:$0xff] %v5245_v18   ;;  %v1622_v23 = vadd.f32 %v5756_v20, %v6575_v50  ;;  %v1613_v24 = vpop.f32.mrb[57].mxu0  ;;  %v2150_v25 = vadd.f32 %v5888_v22, %v6575_v50  ;;  %v2141_v26 = vpop.f32.mrb[57].mxu1 }
 0x157   :  { %5452 = vst [vmem:[%s7308_s3 + $0xd0] sm:$0xff] %v4910_v19   ;;  %5518 = vst [vmem:[%s7308_s3 + $0x2e0] sm:$0xff] %v5240_v21   ;;  %v1614_v27 = vadd.f32 %v6575_v50, %v1613_v24  ;;  %v5757_v28 = vpop.f32.mrb[58].mxu0  ;;  %v2142_v29 = vadd.f32 %v6575_v50, %v2141_v26  ;;  %v5889_v30 = vpop.f32.mrb[58].mxu1 }
 0x158   :  { %v1625_v31 = vadd.f32 %v5757_v28, %v6575_v50  ;;  %v1616_v32 = vpop.f32.mrb[59].mxu0  ;;  %v2618_v33 = vmax.f32 %v2150_v25, 0.0  ;;  %v2153_v34 = vadd.f32 %v5889_v30, %v6575_v50  ;;  %v2144_v35 = vpop.f32.mrb[59].mxu1  ;;  %v2486_v39 = vmax.f32 %v1622_v23, 0.0 }
 0x159   :  { %v1617_v36 = vadd.f32 %v6575_v50, %v1616_v32  ;;  %v2616_v37 = vmax.f32 %v2142_v29, 0.0  ;;  %v2145_v38 = vadd.f32 %v6575_v50, %v2144_v35  ;;  %v2484_v42 = vmax.f32 %v1614_v27, 0.0  ;;  %v6956_v50 = vld [vmem:[%s7307_s2] ss:$0 sm:$0xff] }
 0x15a   :  { %v2487_v40 = vmax.f32 %v1625_v31, 0.0  ;;  %v2619_v41 = vmax.f32 %v2153_v34, 0.0 }
 0x15b   :  { %v2485_v43 = vmax.f32 %v1617_v36, 0.0  ;;  %v2617_v44 = vmax.f32 %v2145_v38, 0.0 }
 0x15c   :  { %v4925_v45 = vpack.c.bf16 %v2487_v40, %v2486_v39  ;;  %v5255_v46 = vpack.c.bf16 %v2619_v41, %v2618_v33 }
 0x15d   :  { %v4920_v47 = vpack.c.bf16 %v2485_v43, %v2484_v42  ;;  %v5760_v48 = vpop.f32.mrb[60].mxu0  ;;  %v5250_v49 = vpack.c.bf16 %v2617_v44, %v2616_v37  ;;  %v5892_v51 = vpop.f32.mrb[60].mxu1 }
 0x15e   :  { %5455 = vst [vmem:[%s7308_s3 + $0xe8] sm:$0xff] %v4925_v45   ;;  %5521 = vst [vmem:[%s7308_s3 + $0x2f8] sm:$0xff] %v5255_v46   ;;  %v1638_v52 = vadd.f32 %v6956_v50, %v5760_v48  ;;  %v1629_v53 = vpop.f32.mrb[61].mxu0  ;;  %v2166_v54 = vadd.f32 %v6956_v50, %v5892_v51  ;;  %v2157_v55 = vpop.f32.mrb[61].mxu1 }
 0x15f   :  { %5454 = vst [vmem:[%s7308_s3 + $0xe0] sm:$0xff] %v4920_v47   ;;  %5520 = vst [vmem:[%s7308_s3 + $0x2f0] sm:$0xff] %v5250_v49   ;;  %v1630_v56 = vadd.f32 %v6956_v50, %v1629_v53  ;;  %v5761_v57 = vpop.f32.mrb[62].mxu0  ;;  %v2158_v58 = vadd.f32 %v6956_v50, %v2157_v55  ;;  %v5893_v59 = vpop.f32.mrb[62].mxu1 }
 0x160   :  { %v1641_v60 = vadd.f32 %v6956_v50, %v5761_v57  ;;  %v1632_v61 = vpop.f32.mrb[63].mxu0  ;;  %v2622_v62 = vmax.f32 %v2166_v54, 0.0  ;;  %v2169_v63 = vadd.f32 %v6956_v50, %v5893_v59  ;;  %v2160_v0 = vpop.f32.mrb[63].mxu1  ;;  %v2490_v4 = vmax.f32 %v1638_v52, 0.0 }
 0x161   :  { %v1633_v1 = vadd.f32 %v6956_v50, %v1632_v61  ;;  %v2620_v2 = vmax.f32 %v2158_v58, 0.0  ;;  %v2161_v3 = vadd.f32 %v6956_v50, %v2160_v0  ;;  %v2488_v7 = vmax.f32 %v1630_v56, 0.0 }
 0x162   :  { %v2491_v5 = vmax.f32 %v1641_v60, 0.0  ;;  %v2623_v6 = vmax.f32 %v2169_v63, 0.0 }
 0x163   :  { %v2489_v8 = vmax.f32 %v1633_v1, 0.0  ;;  %v2621_v9 = vmax.f32 %v2161_v3, 0.0 }
 0x164   :  { %v4935_v10 = vpack.c.bf16 %v2491_v5, %v2490_v4  ;;  %v5265_v11 = vpack.c.bf16 %v2623_v6, %v2622_v62 }
 0x165   :  { %v4930_v12 = vpack.c.bf16 %v2489_v8, %v2488_v7  ;;  %v5764_v13 = vpop.f32.mrb[64].mxu0  ;;  %v5260_v14 = vpack.c.bf16 %v2621_v9, %v2620_v2  ;;  %v5896_v15 = vpop.f32.mrb[64].mxu1 }
 0x166   :  { %5457 = vst [vmem:[%s7308_s3 + $0xf8] sm:$0xff] %v4935_v10   ;;  %5523 = vst [vmem:[%s7308_s3 + $0x308] sm:$0xff] %v5265_v11   ;;  %v1654_v16 = vadd.f32 %v6956_v50, %v5764_v13  ;;  %v1645_v17 = vpop.f32.mrb[65].mxu0  ;;  %v2182_v18 = vadd.f32 %v6956_v50, %v5896_v15  ;;  %v2173_v19 = vpop.f32.mrb[65].mxu1 }
 0x167   :  { %5456 = vst [vmem:[%s7308_s3 + $0xf0] sm:$0xff] %v4930_v12   ;;  %5522 = vst [vmem:[%s7308_s3 + $0x300] sm:$0xff] %v5260_v14   ;;  %v1646_v20 = vadd.f32 %v6956_v50, %v1645_v17  ;;  %v5765_v21 = vpop.f32.mrb[66].mxu0  ;;  %v2174_v22 = vadd.f32 %v6956_v50, %v2173_v19  ;;  %v5897_v23 = vpop.f32.mrb[66].mxu1 }
 0x168   :  { %v1657_v24 = vadd.f32 %v6956_v50, %v5765_v21  ;;  %v1648_v25 = vpop.f32.mrb[67].mxu0  ;;  %v2626_v26 = vmax.f32 %v2182_v18, 0.0  ;;  %v2185_v27 = vadd.f32 %v6956_v50, %v5897_v23  ;;  %v2176_v28 = vpop.f32.mrb[67].mxu1  ;;  %v2494_v32 = vmax.f32 %v1654_v16, 0.0 }
 0x169   :  { %v1649_v29 = vadd.f32 %v6956_v50, %v1648_v25  ;;  %v2624_v30 = vmax.f32 %v2174_v22, 0.0  ;;  %v2177_v31 = vadd.f32 %v6956_v50, %v2176_v28  ;;  %v2492_v35 = vmax.f32 %v1646_v20, 0.0 }
 0x16a   :  { %v2495_v33 = vmax.f32 %v1657_v24, 0.0  ;;  %v2627_v34 = vmax.f32 %v2185_v27, 0.0 }
 0x16b   :  { %v2493_v36 = vmax.f32 %v1649_v29, 0.0  ;;  %v2625_v37 = vmax.f32 %v2177_v31, 0.0 }
 0x16c   :  { %v4945_v38 = vpack.c.bf16 %v2495_v33, %v2494_v32  ;;  %v5275_v39 = vpack.c.bf16 %v2627_v34, %v2626_v26 }
 0x16d   :  { %v4940_v40 = vpack.c.bf16 %v2493_v36, %v2492_v35  ;;  %v5768_v41 = vpop.f32.mrb[68].mxu0  ;;  %v5270_v42 = vpack.c.bf16 %v2625_v37, %v2624_v30  ;;  %v5900_v43 = vpop.f32.mrb[68].mxu1 }
 0x16e   :  { %5459 = vst [vmem:[%s7308_s3 + $0x108] sm:$0xff] %v4945_v38   ;;  %5525 = vst [vmem:[%s7308_s3 + $0x318] sm:$0xff] %v5275_v39   ;;  %v1670_v44 = vadd.f32 %v6956_v50, %v5768_v41  ;;  %v1661_v45 = vpop.f32.mrb[69].mxu0  ;;  %v2198_v46 = vadd.f32 %v6956_v50, %v5900_v43  ;;  %v2189_v47 = vpop.f32.mrb[69].mxu1 }
 0x16f   :  { %5458 = vst [vmem:[%s7308_s3 + $0x100] sm:$0xff] %v4940_v40   ;;  %5524 = vst [vmem:[%s7308_s3 + $0x310] sm:$0xff] %v5270_v42   ;;  %v1662_v48 = vadd.f32 %v6956_v50, %v1661_v45  ;;  %v5769_v49 = vpop.f32.mrb[70].mxu0  ;;  %v2190_v51 = vadd.f32 %v6956_v50, %v2189_v47  ;;  %v5901_v52 = vpop.f32.mrb[70].mxu1 }
 0x170   :  { %v1673_v53 = vadd.f32 %v6956_v50, %v5769_v49  ;;  %v1664_v54 = vpop.f32.mrb[71].mxu0  ;;  %v2630_v55 = vmax.f32 %v2198_v46, 0.0  ;;  %v2201_v56 = vadd.f32 %v6956_v50, %v5901_v52  ;;  %v2192_v57 = vpop.f32.mrb[71].mxu1  ;;  %v2498_v61 = vmax.f32 %v1670_v44, 0.0 }
 0x171   :  { %v1665_v58 = vadd.f32 %v6956_v50, %v1664_v54  ;;  %v2628_v59 = vmax.f32 %v2190_v51, 0.0  ;;  %v2193_v60 = vadd.f32 %v6956_v50, %v2192_v57  ;;  %v2496_v0 = vmax.f32 %v1662_v48, 0.0 }
 0x172   :  { %v2499_v62 = vmax.f32 %v1673_v53, 0.0  ;;  %v2631_v63 = vmax.f32 %v2201_v56, 0.0 }
 0x173   :  { %v2497_v1 = vmax.f32 %v1665_v58, 0.0  ;;  %v2629_v2 = vmax.f32 %v2193_v60, 0.0 }
 0x174   :  { %v4955_v3 = vpack.c.bf16 %v2499_v62, %v2498_v61  ;;  %v5285_v4 = vpack.c.bf16 %v2631_v63, %v2630_v55 }
 0x175   :  { %v4950_v5 = vpack.c.bf16 %v2497_v1, %v2496_v0  ;;  %v5772_v6 = vpop.f32.mrb[72].mxu0  ;;  %v5280_v7 = vpack.c.bf16 %v2629_v2, %v2628_v59  ;;  %v5904_v8 = vpop.f32.mrb[72].mxu1 }
 0x176   :  { %5461 = vst [vmem:[%s7308_s3 + $0x118] sm:$0xff] %v4955_v3   ;;  %5527 = vst [vmem:[%s7308_s3 + $0x328] sm:$0xff] %v5285_v4   ;;  %v1686_v9 = vadd.f32 %v6956_v50, %v5772_v6  ;;  %v1677_v10 = vpop.f32.mrb[73].mxu0  ;;  %v2214_v11 = vadd.f32 %v6956_v50, %v5904_v8  ;;  %v2205_v12 = vpop.f32.mrb[73].mxu1 }
 0x177   :  { %5460 = vst [vmem:[%s7308_s3 + $0x110] sm:$0xff] %v4950_v5   ;;  %5526 = vst [vmem:[%s7308_s3 + $0x320] sm:$0xff] %v5280_v7   ;;  %v1678_v13 = vadd.f32 %v6956_v50, %v1677_v10  ;;  %v5773_v14 = vpop.f32.mrb[74].mxu0  ;;  %v2206_v15 = vadd.f32 %v6956_v50, %v2205_v12  ;;  %v5905_v16 = vpop.f32.mrb[74].mxu1 }
 0x178   :  { %v1689_v17 = vadd.f32 %v6956_v50, %v5773_v14  ;;  %v1680_v18 = vpop.f32.mrb[75].mxu0  ;;  %v2634_v19 = vmax.f32 %v2214_v11, 0.0  ;;  %v2217_v20 = vadd.f32 %v6956_v50, %v5905_v16  ;;  %v2208_v21 = vpop.f32.mrb[75].mxu1  ;;  %v2502_v25 = vmax.f32 %v1686_v9, 0.0 }
 0x179   :  { %v1681_v22 = vadd.f32 %v6956_v50, %v1680_v18  ;;  %v2632_v23 = vmax.f32 %v2206_v15, 0.0  ;;  %v2209_v24 = vadd.f32 %v6956_v50, %v2208_v21  ;;  %v2500_v28 = vmax.f32 %v1678_v13, 0.0 }
 0x17a   :  { %v2503_v26 = vmax.f32 %v1689_v17, 0.0  ;;  %v2635_v27 = vmax.f32 %v2217_v20, 0.0 }
 0x17b   :  { %v2501_v29 = vmax.f32 %v1681_v22, 0.0  ;;  %v2633_v30 = vmax.f32 %v2209_v24, 0.0 }
 0x17c   :  { %v4965_v31 = vpack.c.bf16 %v2503_v26, %v2502_v25  ;;  %v5295_v32 = vpack.c.bf16 %v2635_v27, %v2634_v19 }
 0x17d   :  { %v4960_v33 = vpack.c.bf16 %v2501_v29, %v2500_v28  ;;  %v5776_v34 = vpop.f32.mrb[76].mxu0  ;;  %v5290_v35 = vpack.c.bf16 %v2633_v30, %v2632_v23  ;;  %v5908_v36 = vpop.f32.mrb[76].mxu1 }
 0x17e   :  { %5463 = vst [vmem:[%s7308_s3 + $0x128] sm:$0xff] %v4965_v31   ;;  %5529 = vst [vmem:[%s7308_s3 + $0x338] sm:$0xff] %v5295_v32   ;;  %v1702_v37 = vadd.f32 %v6956_v50, %v5776_v34  ;;  %v1693_v38 = vpop.f32.mrb[77].mxu0  ;;  %v2230_v39 = vadd.f32 %v6956_v50, %v5908_v36  ;;  %v2221_v40 = vpop.f32.mrb[77].mxu1 }
 0x17f   :  { %5462 = vst [vmem:[%s7308_s3 + $0x120] sm:$0xff] %v4960_v33   ;;  %5528 = vst [vmem:[%s7308_s3 + $0x330] sm:$0xff] %v5290_v35   ;;  %v1694_v41 = vadd.f32 %v6956_v50, %v1693_v38  ;;  %v5777_v42 = vpop.f32.mrb[78].mxu0  ;;  %v2222_v43 = vadd.f32 %v6956_v50, %v2221_v40  ;;  %v5909_v44 = vpop.f32.mrb[78].mxu1 }
 0x180   :  { %v1705_v45 = vadd.f32 %v6956_v50, %v5777_v42  ;;  %v1696_v46 = vpop.f32.mrb[79].mxu0  ;;  %v2638_v47 = vmax.f32 %v2230_v39, 0.0  ;;  %v2233_v48 = vadd.f32 %v6956_v50, %v5909_v44  ;;  %v2224_v49 = vpop.f32.mrb[79].mxu1  ;;  %v2506_v54 = vmax.f32 %v1702_v37, 0.0 }
 0x181   :  { %v1697_v51 = vadd.f32 %v6956_v50, %v1696_v46  ;;  %v2636_v52 = vmax.f32 %v2222_v43, 0.0  ;;  %v2225_v53 = vadd.f32 %v6956_v50, %v2224_v49  ;;  %v2504_v57 = vmax.f32 %v1694_v41, 0.0 }
 0x182   :  { %v2507_v55 = vmax.f32 %v1705_v45, 0.0  ;;  %v2639_v56 = vmax.f32 %v2233_v48, 0.0 }
 0x183   :  { %v2505_v58 = vmax.f32 %v1697_v51, 0.0  ;;  %v2637_v59 = vmax.f32 %v2225_v53, 0.0 }
 0x184   :  { %v4975_v60 = vpack.c.bf16 %v2507_v55, %v2506_v54  ;;  %v5305_v61 = vpack.c.bf16 %v2639_v56, %v2638_v47 }
 0x185   :  { %v4970_v62 = vpack.c.bf16 %v2505_v58, %v2504_v57  ;;  %v5780_v63 = vpop.f32.mrb[80].mxu0  ;;  %v5300_v0 = vpack.c.bf16 %v2637_v59, %v2636_v52  ;;  %v5912_v1 = vpop.f32.mrb[80].mxu1 }
 0x186   :  { %5465 = vst [vmem:[%s7308_s3 + $0x138] sm:$0xff] %v4975_v60   ;;  %5531 = vst [vmem:[%s7308_s3 + $0x348] sm:$0xff] %v5305_v61   ;;  %v1718_v2 = vadd.f32 %v6956_v50, %v5780_v63  ;;  %v1709_v3 = vpop.f32.mrb[81].mxu0  ;;  %v2246_v4 = vadd.f32 %v6956_v50, %v5912_v1  ;;  %v2237_v5 = vpop.f32.mrb[81].mxu1 }
 0x187   :  { %5464 = vst [vmem:[%s7308_s3 + $0x130] sm:$0xff] %v4970_v62   ;;  %5530 = vst [vmem:[%s7308_s3 + $0x340] sm:$0xff] %v5300_v0   ;;  %v1710_v6 = vadd.f32 %v6956_v50, %v1709_v3  ;;  %v5781_v7 = vpop.f32.mrb[82].mxu0  ;;  %v2238_v8 = vadd.f32 %v6956_v50, %v2237_v5  ;;  %v5913_v9 = vpop.f32.mrb[82].mxu1 }
 0x188   :  { %v1721_v10 = vadd.f32 %v6956_v50, %v5781_v7  ;;  %v1712_v11 = vpop.f32.mrb[83].mxu0  ;;  %v2642_v12 = vmax.f32 %v2246_v4, 0.0  ;;  %v2249_v13 = vadd.f32 %v6956_v50, %v5913_v9  ;;  %v2240_v14 = vpop.f32.mrb[83].mxu1  ;;  %v2510_v18 = vmax.f32 %v1718_v2, 0.0 }
 0x189   :  { %v1713_v15 = vadd.f32 %v6956_v50, %v1712_v11  ;;  %v2640_v16 = vmax.f32 %v2238_v8, 0.0  ;;  %v2241_v17 = vadd.f32 %v6956_v50, %v2240_v14  ;;  %v2508_v21 = vmax.f32 %v1710_v6, 0.0 }
 0x18a   :  { %v2511_v19 = vmax.f32 %v1721_v10, 0.0  ;;  %v2643_v20 = vmax.f32 %v2249_v13, 0.0 }
 0x18b   :  { %v2509_v22 = vmax.f32 %v1713_v15, 0.0  ;;  %v2641_v23 = vmax.f32 %v2241_v17, 0.0 }
 0x18c   :  { %v4985_v24 = vpack.c.bf16 %v2511_v19, %v2510_v18  ;;  %v5315_v25 = vpack.c.bf16 %v2643_v20, %v2642_v12 }
 0x18d   :  { %v4980_v26 = vpack.c.bf16 %v2509_v22, %v2508_v21  ;;  %v5784_v27 = vpop.f32.mrb[84].mxu0  ;;  %v5310_v28 = vpack.c.bf16 %v2641_v23, %v2640_v16  ;;  %v5916_v29 = vpop.f32.mrb[84].mxu1 }
 0x18e   :  { %5467 = vst [vmem:[%s7308_s3 + $0x148] sm:$0xff] %v4985_v24   ;;  %5533 = vst [vmem:[%s7308_s3 + $0x358] sm:$0xff] %v5315_v25   ;;  %v1734_v30 = vadd.f32 %v6956_v50, %v5784_v27  ;;  %v1725_v31 = vpop.f32.mrb[85].mxu0  ;;  %v2262_v32 = vadd.f32 %v6956_v50, %v5916_v29  ;;  %v2253_v33 = vpop.f32.mrb[85].mxu1 }
 0x18f   :  { %5466 = vst [vmem:[%s7308_s3 + $0x140] sm:$0xff] %v4980_v26   ;;  %5532 = vst [vmem:[%s7308_s3 + $0x350] sm:$0xff] %v5310_v28   ;;  %v1726_v34 = vadd.f32 %v6956_v50, %v1725_v31  ;;  %v5785_v35 = vpop.f32.mrb[86].mxu0  ;;  %v2254_v36 = vadd.f32 %v6956_v50, %v2253_v33  ;;  %v5917_v37 = vpop.f32.mrb[86].mxu1 }
 0x190   :  { %v1737_v38 = vadd.f32 %v6956_v50, %v5785_v35  ;;  %v1728_v39 = vpop.f32.mrb[87].mxu0  ;;  %v2646_v40 = vmax.f32 %v2262_v32, 0.0  ;;  %v2265_v41 = vadd.f32 %v6956_v50, %v5917_v37  ;;  %v2256_v42 = vpop.f32.mrb[87].mxu1  ;;  %v2514_v46 = vmax.f32 %v1734_v30, 0.0 }
 0x191   :  { %v1729_v43 = vadd.f32 %v6956_v50, %v1728_v39  ;;  %v2644_v44 = vmax.f32 %v2254_v36, 0.0  ;;  %v2257_v45 = vadd.f32 %v6956_v50, %v2256_v42  ;;  %v2512_v49 = vmax.f32 %v1726_v34, 0.0 }
 0x192   :  { %v2515_v47 = vmax.f32 %v1737_v38, 0.0  ;;  %v2647_v48 = vmax.f32 %v2265_v41, 0.0 }
 0x193   :  { %v2513_v51 = vmax.f32 %v1729_v43, 0.0  ;;  %v2645_v52 = vmax.f32 %v2257_v45, 0.0 }
 0x194   :  { %v4995_v53 = vpack.c.bf16 %v2515_v47, %v2514_v46  ;;  %v5325_v54 = vpack.c.bf16 %v2647_v48, %v2646_v40 }
 0x195   :  { %v4990_v55 = vpack.c.bf16 %v2513_v51, %v2512_v49  ;;  %v5788_v56 = vpop.f32.mrb[88].mxu0  ;;  %v5320_v57 = vpack.c.bf16 %v2645_v52, %v2644_v44  ;;  %v5920_v58 = vpop.f32.mrb[88].mxu1 }
 0x196   :  { %5469 = vst [vmem:[%s7308_s3 + $0x158] sm:$0xff] %v4995_v53   ;;  %5535 = vst [vmem:[%s7308_s3 + $0x368] sm:$0xff] %v5325_v54   ;;  %v1750_v59 = vadd.f32 %v6956_v50, %v5788_v56  ;;  %v1741_v60 = vpop.f32.mrb[89].mxu0  ;;  %v2278_v61 = vadd.f32 %v6956_v50, %v5920_v58  ;;  %v2269_v62 = vpop.f32.mrb[89].mxu1 }
 0x197   :  { %5468 = vst [vmem:[%s7308_s3 + $0x150] sm:$0xff] %v4990_v55   ;;  %5534 = vst [vmem:[%s7308_s3 + $0x360] sm:$0xff] %v5320_v57   ;;  %v1742_v63 = vadd.f32 %v6956_v50, %v1741_v60  ;;  %v5789_v0 = vpop.f32.mrb[90].mxu0  ;;  %v2270_v1 = vadd.f32 %v6956_v50, %v2269_v62  ;;  %v5921_v2 = vpop.f32.mrb[90].mxu1 }
 0x198   :  { %v1753_v3 = vadd.f32 %v6956_v50, %v5789_v0  ;;  %v1744_v4 = vpop.f32.mrb[91].mxu0  ;;  %v2650_v5 = vmax.f32 %v2278_v61, 0.0  ;;  %v2281_v6 = vadd.f32 %v6956_v50, %v5921_v2  ;;  %v2272_v7 = vpop.f32.mrb[91].mxu1  ;;  %v2518_v11 = vmax.f32 %v1750_v59, 0.0 }
 0x199   :  { %v1745_v8 = vadd.f32 %v6956_v50, %v1744_v4  ;;  %v2648_v9 = vmax.f32 %v2270_v1, 0.0  ;;  %v2273_v10 = vadd.f32 %v6956_v50, %v2272_v7  ;;  %v2516_v14 = vmax.f32 %v1742_v63, 0.0 }
 0x19a   :  { %v2519_v12 = vmax.f32 %v1753_v3, 0.0  ;;  %v2651_v13 = vmax.f32 %v2281_v6, 0.0 }
 0x19b   :  { %v2517_v15 = vmax.f32 %v1745_v8, 0.0  ;;  %v2649_v16 = vmax.f32 %v2273_v10, 0.0 }
 0x19c   :  { %v5005_v17 = vpack.c.bf16 %v2519_v12, %v2518_v11  ;;  %v5335_v18 = vpack.c.bf16 %v2651_v13, %v2650_v5 }
 0x19d   :  { %v5000_v19 = vpack.c.bf16 %v2517_v15, %v2516_v14  ;;  %v5792_v20 = vpop.f32.mrb[92].mxu0  ;;  %v5330_v21 = vpack.c.bf16 %v2649_v16, %v2648_v9  ;;  %v5924_v22 = vpop.f32.mrb[92].mxu1 }
 0x19e   :  { %5471 = vst [vmem:[%s7308_s3 + $0x168] sm:$0xff] %v5005_v17   ;;  %5537 = vst [vmem:[%s7308_s3 + $0x378] sm:$0xff] %v5335_v18   ;;  %v1766_v23 = vadd.f32 %v6956_v50, %v5792_v20  ;;  %v1757_v24 = vpop.f32.mrb[93].mxu0  ;;  %v2294_v25 = vadd.f32 %v6956_v50, %v5924_v22  ;;  %v2285_v26 = vpop.f32.mrb[93].mxu1 }
 0x19f   :  { %5470 = vst [vmem:[%s7308_s3 + $0x160] sm:$0xff] %v5000_v19   ;;  %5536 = vst [vmem:[%s7308_s3 + $0x370] sm:$0xff] %v5330_v21   ;;  %v1758_v27 = vadd.f32 %v6956_v50, %v1757_v24  ;;  %v5793_v28 = vpop.f32.mrb[94].mxu0  ;;  %v2286_v29 = vadd.f32 %v6956_v50, %v2285_v26  ;;  %v5925_v30 = vpop.f32.mrb[94].mxu1 }
 0x1a0   :  { %v1769_v31 = vadd.f32 %v6956_v50, %v5793_v28  ;;  %v1760_v32 = vpop.f32.mrb[95].mxu0  ;;  %v2654_v33 = vmax.f32 %v2294_v25, 0.0  ;;  %v2297_v34 = vadd.f32 %v6956_v50, %v5925_v30  ;;  %v2288_v35 = vpop.f32.mrb[95].mxu1  ;;  %v2522_v39 = vmax.f32 %v1766_v23, 0.0 }
 0x1a1   :  { %v1761_v36 = vadd.f32 %v6956_v50, %v1760_v32  ;;  %v2652_v37 = vmax.f32 %v2286_v29, 0.0  ;;  %v2289_v38 = vadd.f32 %v6956_v50, %v2288_v35  ;;  %v2520_v42 = vmax.f32 %v1758_v27, 0.0 }
 0x1a2   :  { %v2523_v40 = vmax.f32 %v1769_v31, 0.0  ;;  %v2655_v41 = vmax.f32 %v2297_v34, 0.0 }
 0x1a3   :  { %v2521_v43 = vmax.f32 %v1761_v36, 0.0  ;;  %v2653_v44 = vmax.f32 %v2289_v38, 0.0 }
 0x1a4   :  { %v5015_v45 = vpack.c.bf16 %v2523_v40, %v2522_v39  ;;  %v5345_v46 = vpack.c.bf16 %v2655_v41, %v2654_v33 }
 0x1a5   :  { %v5010_v47 = vpack.c.bf16 %v2521_v43, %v2520_v42  ;;  %v5796_v48 = vpop.f32.mrb[96].mxu0  ;;  %v5340_v49 = vpack.c.bf16 %v2653_v44, %v2652_v37  ;;  %v5928_v51 = vpop.f32.mrb[96].mxu1 }
 0x1a6   :  { %5473 = vst [vmem:[%s7308_s3 + $0x178] sm:$0xff] %v5015_v45   ;;  %5539 = vst [vmem:[%s7308_s3 + $0x388] sm:$0xff] %v5345_v46   ;;  %v1782_v52 = vadd.f32 %v6956_v50, %v5796_v48  ;;  %v1773_v53 = vpop.f32.mrb[97].mxu0  ;;  %v2310_v54 = vadd.f32 %v6956_v50, %v5928_v51  ;;  %v2301_v55 = vpop.f32.mrb[97].mxu1 }
 0x1a7   :  { %5472 = vst [vmem:[%s7308_s3 + $0x170] sm:$0xff] %v5010_v47   ;;  %5538 = vst [vmem:[%s7308_s3 + $0x380] sm:$0xff] %v5340_v49   ;;  %v1774_v56 = vadd.f32 %v6956_v50, %v1773_v53  ;;  %v5797_v57 = vpop.f32.mrb[98].mxu0  ;;  %v2302_v58 = vadd.f32 %v6956_v50, %v2301_v55  ;;  %v5929_v59 = vpop.f32.mrb[98].mxu1 }
 0x1a8   :  { %v1785_v60 = vadd.f32 %v6956_v50, %v5797_v57  ;;  %v1776_v61 = vpop.f32.mrb[99].mxu0  ;;  %v2658_v62 = vmax.f32 %v2310_v54, 0.0  ;;  %v2313_v63 = vadd.f32 %v6956_v50, %v5929_v59  ;;  %v2304_v0 = vpop.f32.mrb[99].mxu1  ;;  %v2526_v4 = vmax.f32 %v1782_v52, 0.0 }
 0x1a9   :  { %v1777_v1 = vadd.f32 %v6956_v50, %v1776_v61  ;;  %v2656_v2 = vmax.f32 %v2302_v58, 0.0  ;;  %v2305_v3 = vadd.f32 %v6956_v50, %v2304_v0  ;;  %v2524_v7 = vmax.f32 %v1774_v56, 0.0 }
 0x1aa   :  { %v2527_v5 = vmax.f32 %v1785_v60, 0.0  ;;  %v2659_v6 = vmax.f32 %v2313_v63, 0.0 }
 0x1ab   :  { %v2525_v8 = vmax.f32 %v1777_v1, 0.0  ;;  %v2657_v9 = vmax.f32 %v2305_v3, 0.0 }
 0x1ac   :  { %v5025_v10 = vpack.c.bf16 %v2527_v5, %v2526_v4  ;;  %v5355_v11 = vpack.c.bf16 %v2659_v6, %v2658_v62 }
 0x1ad   :  { %v5020_v12 = vpack.c.bf16 %v2525_v8, %v2524_v7  ;;  %v5800_v13 = vpop.f32.mrb[100].mxu0  ;;  %v5350_v14 = vpack.c.bf16 %v2657_v9, %v2656_v2  ;;  %v5932_v15 = vpop.f32.mrb[100].mxu1 }
 0x1ae   :  { %5475 = vst [vmem:[%s7308_s3 + $0x188] sm:$0xff] %v5025_v10   ;;  %5541 = vst [vmem:[%s7308_s3 + $0x398] sm:$0xff] %v5355_v11   ;;  %v1798_v16 = vadd.f32 %v6956_v50, %v5800_v13  ;;  %v1789_v17 = vpop.f32.mrb[101].mxu0  ;;  %v2326_v18 = vadd.f32 %v6956_v50, %v5932_v15  ;;  %v2317_v19 = vpop.f32.mrb[101].mxu1 }
 0x1af   :  { %5474 = vst [vmem:[%s7308_s3 + $0x180] sm:$0xff] %v5020_v12   ;;  %5540 = vst [vmem:[%s7308_s3 + $0x390] sm:$0xff] %v5350_v14   ;;  %v1790_v20 = vadd.f32 %v6956_v50, %v1789_v17  ;;  %v5801_v21 = vpop.f32.mrb[102].mxu0  ;;  %v2318_v22 = vadd.f32 %v6956_v50, %v2317_v19  ;;  %v5933_v23 = vpop.f32.mrb[102].mxu1 }
 0x1b0   :  { %v1801_v24 = vadd.f32 %v6956_v50, %v5801_v21  ;;  %v1792_v25 = vpop.f32.mrb[103].mxu0  ;;  %v2662_v26 = vmax.f32 %v2326_v18, 0.0  ;;  %v2329_v27 = vadd.f32 %v6956_v50, %v5933_v23  ;;  %v2320_v28 = vpop.f32.mrb[103].mxu1  ;;  %v2530_v32 = vmax.f32 %v1798_v16, 0.0 }
 0x1b1   :  { %v1793_v29 = vadd.f32 %v6956_v50, %v1792_v25  ;;  %v2660_v30 = vmax.f32 %v2318_v22, 0.0  ;;  %v2321_v31 = vadd.f32 %v6956_v50, %v2320_v28  ;;  %v2528_v35 = vmax.f32 %v1790_v20, 0.0 }
 0x1b2   :  { %v2531_v33 = vmax.f32 %v1801_v24, 0.0  ;;  %v2663_v34 = vmax.f32 %v2329_v27, 0.0 }
 0x1b3   :  { %v2529_v36 = vmax.f32 %v1793_v29, 0.0  ;;  %v2661_v37 = vmax.f32 %v2321_v31, 0.0 }
 0x1b4   :  { %v5035_v38 = vpack.c.bf16 %v2531_v33, %v2530_v32  ;;  %v5365_v39 = vpack.c.bf16 %v2663_v34, %v2662_v26 }
 0x1b5   :  { %v5030_v40 = vpack.c.bf16 %v2529_v36, %v2528_v35  ;;  %v5804_v41 = vpop.f32.mrb[104].mxu0  ;;  %v5360_v42 = vpack.c.bf16 %v2661_v37, %v2660_v30  ;;  %v5936_v43 = vpop.f32.mrb[104].mxu1 }
 0x1b6   :  { %5477 = vst [vmem:[%s7308_s3 + $0x198] sm:$0xff] %v5035_v38   ;;  %5543 = vst [vmem:[%s7308_s3 + $0x3a8] sm:$0xff] %v5365_v39   ;;  %v1814_v44 = vadd.f32 %v6956_v50, %v5804_v41  ;;  %v1805_v45 = vpop.f32.mrb[105].mxu0  ;;  %v2342_v46 = vadd.f32 %v6956_v50, %v5936_v43  ;;  %v2333_v47 = vpop.f32.mrb[105].mxu1 }
 0x1b7   :  { %5476 = vst [vmem:[%s7308_s3 + $0x190] sm:$0xff] %v5030_v40   ;;  %5542 = vst [vmem:[%s7308_s3 + $0x3a0] sm:$0xff] %v5360_v42   ;;  %v1806_v48 = vadd.f32 %v6956_v50, %v1805_v45  ;;  %v5805_v49 = vpop.f32.mrb[106].mxu0  ;;  %v2334_v51 = vadd.f32 %v6956_v50, %v2333_v47  ;;  %v5937_v52 = vpop.f32.mrb[106].mxu1 }
 0x1b8   :  { %v1817_v53 = vadd.f32 %v6956_v50, %v5805_v49  ;;  %v1808_v54 = vpop.f32.mrb[107].mxu0  ;;  %v2666_v55 = vmax.f32 %v2342_v46, 0.0  ;;  %v2345_v56 = vadd.f32 %v6956_v50, %v5937_v52  ;;  %v2336_v57 = vpop.f32.mrb[107].mxu1  ;;  %v2534_v61 = vmax.f32 %v1814_v44, 0.0 }
 0x1b9   :  { %v1809_v58 = vadd.f32 %v6956_v50, %v1808_v54  ;;  %v2664_v59 = vmax.f32 %v2334_v51, 0.0  ;;  %v2337_v60 = vadd.f32 %v6956_v50, %v2336_v57  ;;  %v2532_v0 = vmax.f32 %v1806_v48, 0.0 }
 0x1ba   :  { %v2535_v62 = vmax.f32 %v1817_v53, 0.0  ;;  %v2667_v63 = vmax.f32 %v2345_v56, 0.0 }
 0x1bb   :  { %v2533_v1 = vmax.f32 %v1809_v58, 0.0  ;;  %v2665_v2 = vmax.f32 %v2337_v60, 0.0 }
 0x1bc   :  { %v5045_v3 = vpack.c.bf16 %v2535_v62, %v2534_v61  ;;  %v5375_v4 = vpack.c.bf16 %v2667_v63, %v2666_v55 }
 0x1bd   :  { %v5040_v5 = vpack.c.bf16 %v2533_v1, %v2532_v0  ;;  %v5808_v6 = vpop.f32.mrb[108].mxu0  ;;  %v5370_v7 = vpack.c.bf16 %v2665_v2, %v2664_v59  ;;  %v5940_v8 = vpop.f32.mrb[108].mxu1 }
 0x1be   :  { %5479 = vst [vmem:[%s7308_s3 + $0x1a8] sm:$0xff] %v5045_v3   ;;  %5545 = vst [vmem:[%s7308_s3 + $0x3b8] sm:$0xff] %v5375_v4   ;;  %v1830_v9 = vadd.f32 %v6956_v50, %v5808_v6  ;;  %v1821_v10 = vpop.f32.mrb[109].mxu0  ;;  %v2358_v11 = vadd.f32 %v6956_v50, %v5940_v8  ;;  %v2349_v12 = vpop.f32.mrb[109].mxu1 }
 0x1bf   :  { %5478 = vst [vmem:[%s7308_s3 + $0x1a0] sm:$0xff] %v5040_v5   ;;  %5544 = vst [vmem:[%s7308_s3 + $0x3b0] sm:$0xff] %v5370_v7   ;;  %v1822_v13 = vadd.f32 %v6956_v50, %v1821_v10  ;;  %v5809_v14 = vpop.f32.mrb[110].mxu0  ;;  %v2350_v15 = vadd.f32 %v6956_v50, %v2349_v12  ;;  %v5941_v16 = vpop.f32.mrb[110].mxu1 }
 0x1c0   :  { %v1833_v17 = vadd.f32 %v6956_v50, %v5809_v14  ;;  %v1824_v18 = vpop.f32.mrb[111].mxu0  ;;  %v2670_v19 = vmax.f32 %v2358_v11, 0.0  ;;  %v2361_v20 = vadd.f32 %v6956_v50, %v5941_v16  ;;  %v2352_v21 = vpop.f32.mrb[111].mxu1  ;;  %v2538_v25 = vmax.f32 %v1830_v9, 0.0 }
 0x1c1   :  { %v1825_v22 = vadd.f32 %v6956_v50, %v1824_v18  ;;  %v2668_v23 = vmax.f32 %v2350_v15, 0.0  ;;  %v2353_v24 = vadd.f32 %v6956_v50, %v2352_v21  ;;  %v2536_v28 = vmax.f32 %v1822_v13, 0.0 }
 0x1c2   :  { %v2539_v26 = vmax.f32 %v1833_v17, 0.0  ;;  %v2671_v27 = vmax.f32 %v2361_v20, 0.0 }
 0x1c3   :  { %v2537_v29 = vmax.f32 %v1825_v22, 0.0  ;;  %v2669_v30 = vmax.f32 %v2353_v24, 0.0 }
 0x1c4   :  { %v5055_v31 = vpack.c.bf16 %v2539_v26, %v2538_v25  ;;  %v5385_v32 = vpack.c.bf16 %v2671_v27, %v2670_v19 }
 0x1c5   :  { %v5050_v33 = vpack.c.bf16 %v2537_v29, %v2536_v28  ;;  %v5812_v34 = vpop.f32.mrb[112].mxu0  ;;  %v5380_v35 = vpack.c.bf16 %v2669_v30, %v2668_v23  ;;  %v5944_v36 = vpop.f32.mrb[112].mxu1 }
 0x1c6   :  { %5481 = vst [vmem:[%s7308_s3 + $0x1b8] sm:$0xff] %v5055_v31   ;;  %5547 = vst [vmem:[%s7308_s3 + $0x3c8] sm:$0xff] %v5385_v32   ;;  %v1846_v37 = vadd.f32 %v6956_v50, %v5812_v34  ;;  %v1837_v38 = vpop.f32.mrb[113].mxu0  ;;  %v2374_v39 = vadd.f32 %v6956_v50, %v5944_v36  ;;  %v2365_v40 = vpop.f32.mrb[113].mxu1 }
 0x1c7   :  { %5480 = vst [vmem:[%s7308_s3 + $0x1b0] sm:$0xff] %v5050_v33   ;;  %5546 = vst [vmem:[%s7308_s3 + $0x3c0] sm:$0xff] %v5380_v35   ;;  %v1838_v41 = vadd.f32 %v6956_v50, %v1837_v38  ;;  %v5813_v42 = vpop.f32.mrb[114].mxu0  ;;  %v2366_v43 = vadd.f32 %v6956_v50, %v2365_v40  ;;  %v5945_v44 = vpop.f32.mrb[114].mxu1 }
 0x1c8   :  { %v1849_v45 = vadd.f32 %v6956_v50, %v5813_v42  ;;  %v1840_v46 = vpop.f32.mrb[115].mxu0  ;;  %v2674_v47 = vmax.f32 %v2374_v39, 0.0  ;;  %v2377_v48 = vadd.f32 %v6956_v50, %v5945_v44  ;;  %v2368_v49 = vpop.f32.mrb[115].mxu1  ;;  %v2542_v54 = vmax.f32 %v1846_v37, 0.0 }
 0x1c9   :  { %v1841_v51 = vadd.f32 %v6956_v50, %v1840_v46  ;;  %v2672_v52 = vmax.f32 %v2366_v43, 0.0  ;;  %v2369_v53 = vadd.f32 %v6956_v50, %v2368_v49  ;;  %v2540_v57 = vmax.f32 %v1838_v41, 0.0 }
 0x1ca   :  { %v2543_v55 = vmax.f32 %v1849_v45, 0.0  ;;  %v2675_v56 = vmax.f32 %v2377_v48, 0.0 }
 0x1cb   :  { %v2541_v58 = vmax.f32 %v1841_v51, 0.0  ;;  %v2673_v59 = vmax.f32 %v2369_v53, 0.0 }
 0x1cc   :  { %v5065_v60 = vpack.c.bf16 %v2543_v55, %v2542_v54  ;;  %v5395_v61 = vpack.c.bf16 %v2675_v56, %v2674_v47 }
 0x1cd   :  { %v5060_v62 = vpack.c.bf16 %v2541_v58, %v2540_v57  ;;  %v5816_v63 = vpop.f32.mrb[116].mxu0  ;;  %v5390_v0 = vpack.c.bf16 %v2673_v59, %v2672_v52  ;;  %v5948_v1 = vpop.f32.mrb[116].mxu1 }
 0x1ce   :  { %5483 = vst [vmem:[%s7308_s3 + $0x1c8] sm:$0xff] %v5065_v60   ;;  %5549 = vst [vmem:[%s7308_s3 + $0x3d8] sm:$0xff] %v5395_v61   ;;  %v1862_v2 = vadd.f32 %v6956_v50, %v5816_v63  ;;  %v1853_v3 = vpop.f32.mrb[117].mxu0  ;;  %v2390_v4 = vadd.f32 %v6956_v50, %v5948_v1  ;;  %v2381_v5 = vpop.f32.mrb[117].mxu1 }
 0x1cf   :  { %5482 = vst [vmem:[%s7308_s3 + $0x1c0] sm:$0xff] %v5060_v62   ;;  %5548 = vst [vmem:[%s7308_s3 + $0x3d0] sm:$0xff] %v5390_v0   ;;  %v1854_v6 = vadd.f32 %v6956_v50, %v1853_v3  ;;  %v5817_v7 = vpop.f32.mrb[118].mxu0  ;;  %v2382_v8 = vadd.f32 %v6956_v50, %v2381_v5  ;;  %v5949_v9 = vpop.f32.mrb[118].mxu1 }
 0x1d0   :  { %v1865_v10 = vadd.f32 %v6956_v50, %v5817_v7  ;;  %v1856_v11 = vpop.f32.mrb[119].mxu0  ;;  %v2678_v12 = vmax.f32 %v2390_v4, 0.0  ;;  %v2393_v13 = vadd.f32 %v6956_v50, %v5949_v9  ;;  %v2384_v14 = vpop.f32.mrb[119].mxu1  ;;  %v2546_v18 = vmax.f32 %v1862_v2, 0.0 }
 0x1d1   :  { %v1857_v15 = vadd.f32 %v6956_v50, %v1856_v11  ;;  %v2676_v16 = vmax.f32 %v2382_v8, 0.0  ;;  %v2385_v17 = vadd.f32 %v6956_v50, %v2384_v14  ;;  %v2544_v21 = vmax.f32 %v1854_v6, 0.0 }
 0x1d2   :  { %v2547_v19 = vmax.f32 %v1865_v10, 0.0  ;;  %v2679_v20 = vmax.f32 %v2393_v13, 0.0 }
 0x1d3   :  { %v2545_v22 = vmax.f32 %v1857_v15, 0.0  ;;  %v2677_v23 = vmax.f32 %v2385_v17, 0.0 }
 0x1d4   :  { %v5075_v24 = vpack.c.bf16 %v2547_v19, %v2546_v18  ;;  %v5405_v25 = vpack.c.bf16 %v2679_v20, %v2678_v12 }
 0x1d5   :  { %v5070_v26 = vpack.c.bf16 %v2545_v22, %v2544_v21  ;;  %v5820_v27 = vpop.f32.mrb[120].mxu0  ;;  %v5400_v28 = vpack.c.bf16 %v2677_v23, %v2676_v16  ;;  %v5952_v29 = vpop.f32.mrb[120].mxu1 }
 0x1d6   :  { %5485 = vst [vmem:[%s7308_s3 + $0x1d8] sm:$0xff] %v5075_v24   ;;  %5551 = vst [vmem:[%s7308_s3 + $0x3e8] sm:$0xff] %v5405_v25   ;;  %v1878_v30 = vadd.f32 %v6956_v50, %v5820_v27  ;;  %v1869_v31 = vpop.f32.mrb[121].mxu0  ;;  %v2406_v32 = vadd.f32 %v6956_v50, %v5952_v29  ;;  %v2397_v33 = vpop.f32.mrb[121].mxu1 }
 0x1d7   :  { %5484 = vst [vmem:[%s7308_s3 + $0x1d0] sm:$0xff] %v5070_v26   ;;  %5550 = vst [vmem:[%s7308_s3 + $0x3e0] sm:$0xff] %v5400_v28   ;;  %v1870_v34 = vadd.f32 %v6956_v50, %v1869_v31  ;;  %v5821_v35 = vpop.f32.mrb[122].mxu0  ;;  %v2398_v36 = vadd.f32 %v6956_v50, %v2397_v33  ;;  %v5953_v37 = vpop.f32.mrb[122].mxu1 }
 0x1d8   :  { %v1881_v38 = vadd.f32 %v6956_v50, %v5821_v35  ;;  %v1872_v39 = vpop.f32.mrb[123].mxu0  ;;  %v2682_v40 = vmax.f32 %v2406_v32, 0.0  ;;  %v2409_v41 = vadd.f32 %v6956_v50, %v5953_v37  ;;  %v2400_v42 = vpop.f32.mrb[123].mxu1  ;;  %v2550_v46 = vmax.f32 %v1878_v30, 0.0 }
 0x1d9   :  { %v1873_v43 = vadd.f32 %v6956_v50, %v1872_v39  ;;  %v2680_v44 = vmax.f32 %v2398_v36, 0.0  ;;  %v2401_v45 = vadd.f32 %v6956_v50, %v2400_v42  ;;  %v2548_v49 = vmax.f32 %v1870_v34, 0.0  ;;  %v6101_v50 = vld [vmem:[%s7307_s2] ss:$0 sm:$0xff] }
 0x1da   :  { %v2551_v47 = vmax.f32 %v1881_v38, 0.0  ;;  %v2683_v48 = vmax.f32 %v2409_v41, 0.0 }
 0x1db   :  { %v2549_v51 = vmax.f32 %v1873_v43, 0.0  ;;  %v2681_v52 = vmax.f32 %v2401_v45, 0.0 }
 0x1dc   :  { %v5085_v53 = vpack.c.bf16 %v2551_v47, %v2550_v46  ;;  %v5415_v54 = vpack.c.bf16 %v2683_v48, %v2682_v40 }
 0x1dd   :  { %v5080_v55 = vpack.c.bf16 %v2549_v51, %v2548_v49  ;;  %v5824_v56 = vpop.f32.mrb[124].mxu0  ;;  %v5410_v57 = vpack.c.bf16 %v2681_v52, %v2680_v44  ;;  %v5956_v58 = vpop.f32.mrb[124].mxu1 }
 0x1de   :  { %5487 = vst [vmem:[%s7308_s3 + $0x1e8] sm:$0xff] %v5085_v53   ;;  %5553 = vst [vmem:[%s7308_s3 + $0x3f8] sm:$0xff] %v5415_v54   ;;  %v1894_v59 = vadd.f32 %v6101_v50, %v5824_v56  ;;  %v1885_v60 = vpop.f32.mrb[125].mxu0  ;;  %v2422_v61 = vadd.f32 %v6101_v50, %v5956_v58  ;;  %v2413_v62 = vpop.f32.mrb[125].mxu1 }
 0x1df   :  { %5486 = vst [vmem:[%s7308_s3 + $0x1e0] sm:$0xff] %v5080_v55   ;;  %5552 = vst [vmem:[%s7308_s3 + $0x3f0] sm:$0xff] %v5410_v57   ;;  %v1886_v63 = vadd.f32 %v6101_v50, %v1885_v60  ;;  %v5825_v0 = vpop.f32.mrb[126].mxu0  ;;  %v2414_v1 = vadd.f32 %v6101_v50, %v2413_v62  ;;  %v5957_v2 = vpop.f32.mrb[126].mxu1 }
 0x1e0   :  { %v1897_v3 = vadd.f32 %v6101_v50, %v5825_v0  ;;  %v1888_v4 = vpop.f32.mrb[127].mxu0  ;;  %v2686_v5 = vmax.f32 %v2422_v61, 0.0  ;;  %v2425_v6 = vadd.f32 %v6101_v50, %v5957_v2  ;;  %v2416_v7 = vpop.f32.mrb[127].mxu1  ;;  %v2554_v11 = vmax.f32 %v1894_v59, 0.0 }
 0x1e1   :  { %v1889_v8 = vadd.f32 %v6101_v50, %v1888_v4  ;;  %v2684_v9 = vmax.f32 %v2414_v1, 0.0  ;;  %v2417_v10 = vadd.f32 %v6101_v50, %v2416_v7  ;;  %v2552_v14 = vmax.f32 %v1886_v63, 0.0 }
 0x1e2   :  { %v2555_v12 = vmax.f32 %v1897_v3, 0.0  ;;  %v2687_v13 = vmax.f32 %v2425_v6, 0.0 }
 0x1e3   :  { %v2553_v15 = vmax.f32 %v1889_v8, 0.0  ;;  %v2685_v16 = vmax.f32 %v2417_v10, 0.0 }
 0x1e4   :  { %v5095_v17 = vpack.c.bf16 %v2555_v12, %v2554_v11  ;;  %v5425_v18 = vpack.c.bf16 %v2687_v13, %v2686_v5 }
 0x1e5   :  { %v5090_v19 = vpack.c.bf16 %v2553_v15, %v2552_v14  ;;  %v5828_v20 = vpop.f32.mrb[128].mxu0  ;;  %v5420_v21 = vpack.c.bf16 %v2685_v16, %v2684_v9 }
 0x1e6   :  { %5489 = vst [vmem:[%s7308_s3 + $0x1f8] sm:$0xff] %v5095_v17   ;;  %5555 = vst [vmem:[%s7308_s3 + $0x408] sm:$0xff] %v5425_v18   ;;  %v1910_v22 = vadd.f32 %v6101_v50, %v5828_v20  ;;  %v1901_v23 = vpop.f32.mrb[129].mxu0 }
 0x1e7   :  { %5488 = vst [vmem:[%s7308_s3 + $0x1f0] sm:$0xff] %v5090_v19   ;;  %5554 = vst [vmem:[%s7308_s3 + $0x400] sm:$0xff] %v5420_v21   ;;  %v1902_v24 = vadd.f32 %v6101_v50, %v1901_v23  ;;  %v5829_v25 = vpop.f32.mrb[130].mxu0 }
 0x1e8   :  { %v1913_v26 = vadd.f32 %v6101_v50, %v5829_v25  ;;  %v1904_v27 = vpop.f32.mrb[131].mxu0  ;;  %v2558_v29 = vmax.f32 %v1910_v22, 0.0 }
 0x1e9   :  { %v1905_v28 = vadd.f32 %v6101_v50, %v1904_v27  ;;  %v2556_v31 = vmax.f32 %v1902_v24, 0.0 }
 0x1ea   :  { %v2559_v30 = vmax.f32 %v1913_v26, 0.0 }
 0x1eb   :  { %v2557_v32 = vmax.f32 %v1905_v28, 0.0 }
 0x1ec   :  { %v5105_v33 = vpack.c.bf16 %v2559_v30, %v2558_v29 }
 0x1ed   :  { %v5100_v34 = vpack.c.bf16 %v2557_v32, %v2556_v31 }
 0x1ee   :  { %5491 = vst [vmem:[%s7308_s3 + $0x208] sm:$0xff] %v5105_v33  }
 0x1ef   :  { %5490 = vst [vmem:[%s7308_s3 + $0x200] sm:$0xff] %v5100_v34  }

// kernel: deep_q_network_forward.6
= control target key start
LH: loop header
LB: loop body
LE: loop exit
PB: predicated region body
PF: predicated region fallthrough
CT: control target
= control target key end

     0   :  { %v2465_v0 = vmov 0   ;;  %s3078_s1 = inlined_call_operand.vmem [shape: bf16[512,128], index: 1, kind: input, shape index: {}]   ;;  %s3079_s0 = inlined_call_operand.vmem [shape: bf16[432,512], index: 0, kind: input, shape index: {}]   ;;  %s3080_s2 = inlined_call_operand.vmem [shape: f32[1,128], index: 2, kind: input, shape index: {}]   ;;  %s3081_s3 = inlined_call_operand.vmem [shape: bf16[432,128], index: 3, kind: output, shape index: {}]  }
   0x1   :  { %926 = vmatprep.subr.bf16.mxu1 %v2465_v0  ;;  %1175 = vmatprep.subr.bf16.mxu0 %v2465_v0  ;;  %v2271_v1 = vld [vmem:[%s3078_s1] sm:$0xff]   ;;  %v2273_v3 = vld [vmem:[%s3078_s1 + $0x8] sm:$0xff]   ;;  %v2275_v5 = vld [vmem:[%s3078_s1 + $0x10] sm:$0xff]  }
   0x2   :  { %v2272_v2 = vld [vmem:[%s3078_s1 + $0x80] sm:$0xff]   ;;  %927 = vmatpush1.bf16.msra.mxu1 %v2271_v1  ;;  %v2274_v4 = vld [vmem:[%s3078_s1 + $0x88] sm:$0xff]   ;;  %v2276_v6 = vld [vmem:[%s3078_s1 + $0x90] sm:$0xff]  }
   0x3   :  { %1176 = vmatpush1.bf16.msra.mxu0 %v2272_v2  ;;  %928 = vmatprep.subr.bf16.mxu1 %v2465_v0  ;;  %v2277_v7 = vld [vmem:[%s3078_s1 + $0x18] sm:$0xff]   ;;  %v2279_v9 = vld [vmem:[%s3078_s1 + $0x20] sm:$0xff]   ;;  %v2281_v11 = vld [vmem:[%s3078_s1 + $0x28] sm:$0xff]  }
   0x4   :  { %1177 = vmatprep.subr.bf16.mxu0 %v2465_v0  ;;  %v2278_v8 = vld [vmem:[%s3078_s1 + $0x98] sm:$0xff]   ;;  %v2280_v10 = vld [vmem:[%s3078_s1 + $0xa0] sm:$0xff]   ;;  %v2282_v12 = vld [vmem:[%s3078_s1 + $0xa8] sm:$0xff]  }
   0x5   :  { %v2283_v13 = vld [vmem:[%s3078_s1 + $0x30] sm:$0xff]   ;;  %v2285_v15 = vld [vmem:[%s3078_s1 + $0x38] sm:$0xff]   ;;  %v2287_v17 = vld [vmem:[%s3078_s1 + $0x40] sm:$0xff]  }
   0x6   :  { %929 = vmatpush1.bf16.msra.mxu1 %v2273_v3  ;;  %v2284_v14 = vld [vmem:[%s3078_s1 + $0xb0] sm:$0xff]   ;;  %v2286_v16 = vld [vmem:[%s3078_s1 + $0xb8] sm:$0xff]   ;;  %v2288_v18 = vld [vmem:[%s3078_s1 + $0xc0] sm:$0xff]  }
   0x7   :  { %1178 = vmatpush1.bf16.msra.mxu0 %v2274_v4  ;;  %930 = vmatprep.subr.bf16.mxu1 %v2465_v0  ;;  %v2305_v19 = vld [vmem:[%s3079_s0 + $0x4] ss:$16 sps:$4 sm:$0xff]   ;;  %v2289_v20 = vld [vmem:[%s3078_s1 + $0x48] sm:$0xff]   ;;  %v2293_v25 = vld [vmem:[%s3078_s1 + $0x58] sm:$0xff]  }
   0x8   :  { %1179 = vmatprep.subr.bf16.mxu0 %v2465_v0  ;;  %v2308_v21 = vld [vmem:[%s3079_s0 + $0xc] ss:$16 sps:$4 sm:$0xff]   ;;  %958 = vmatprep.mubr.bf16.mxu1 %v2305_v19  ;;  %v2291_v23 = vld [vmem:[%s3078_s1 + $0x50] sm:$0xff]   ;;  %v2295_v27 = vld [vmem:[%s3078_s1 + $0x60] sm:$0xff]  }
   0x9   :  { %v2290_v22 = vld [vmem:[%s3078_s1 + $0xc8] sm:$0xff]   ;;  %1207 = vmatprep.mubr.bf16.mxu0 %v2308_v21  ;;  %v2292_v24 = vld [vmem:[%s3078_s1 + $0xd0] sm:$0xff]   ;;  %v2294_v26 = vld [vmem:[%s3078_s1 + $0xd8] sm:$0xff]  }
   0xa   :  { %931 = vmatpush1.bf16.msra.mxu1 %v2275_v5  ;;  %v2296_v28 = vld [vmem:[%s3078_s1 + $0xe0] sm:$0xff]   ;;  %v2297_v29 = vld [vmem:[%s3078_s1 + $0x68] sm:$0xff]   ;;  %v2299_v31 = vld [vmem:[%s3078_s1 + $0x70] sm:$0xff]  }
   0xb   :  { %1180 = vmatpush1.bf16.msra.mxu0 %v2276_v6  ;;  %932 = vmatprep.subr.bf16.mxu1 %v2465_v0  ;;  %v2298_v30 = vld [vmem:[%s3078_s1 + $0xe8] sm:$0xff]   ;;  %v2300_v32 = vld [vmem:[%s3078_s1 + $0xf0] sm:$0xff]   ;;  %v2301_v33 = vld [vmem:[%s3078_s1 + $0x78] sm:$0xff]  }
   0xc   :  { %1181 = vmatprep.subr.bf16.mxu0 %v2465_v0  ;;  %v2302_v34 = vld [vmem:[%s3078_s1 + $0xf8] sm:$0xff]   ;;  %v2303_v35 = vld [vmem:[%s3079_s0] ss:$16 sps:$4 sm:$0xff]   ;;  %v2309_v37 = vld [vmem:[%s3079_s0 + $0x24] ss:$16 sps:$4 sm:$0xff]  }
   0xd   :  { %v2306_v36 = vld [vmem:[%s3079_s0 + $0x8] ss:$16 sps:$4 sm:$0xff]   ;;  %v2311_v38 = vld [vmem:[%s3079_s0 + $0x2c] ss:$16 sps:$4 sm:$0xff]   ;;  %v2313_v39 = vld [vmem:[%s3079_s0 + $0x20] ss:$16 sps:$4 sm:$0xff]  }
   0xe   :  { %933 = vmatpush1.bf16.msra.mxu1 %v2277_v7  ;;  %v2314_v40 = vld [vmem:[%s3079_s0 + $0x28] ss:$16 sps:$4 sm:$0xff]   ;;  %v2315_v41 = vld [vmem:[%s3079_s0 + $0x44] ss:$16 sps:$4 sm:$0xff]   ;;  %v2317_v42 = vld [vmem:[%s3079_s0 + $0x4c] ss:$16 sps:$4 sm:$0xff]  }
   0xf   :  { %1182 = vmatpush1.bf16.msra.mxu0 %v2278_v8  ;;  %934 = vmatprep.subr.bf16.mxu1 %v2465_v0  ;;  %v2319_v43 = vld [vmem:[%s3079_s0 + $0x40] ss:$16 sps:$4 sm:$0xff]   ;;  %v2320_v44 = vld [vmem:[%s3079_s0 + $0x48] ss:$16 sps:$4 sm:$0xff]   ;;  %v2321_v45 = vld [vmem:[%s3079_s0 + $0x64] ss:$16 sps:$4 sm:$0xff]  }
  0x10   :  { %1183 = vmatprep.subr.bf16.mxu0 %v2465_v0  ;;  %v2323_v46 = vld [vmem:[%s3079_s0 + $0x6c] ss:$16 sps:$4 sm:$0xff]   ;;  %v2325_v47 = vld [vmem:[%s3079_s0 + $0x60] ss:$16 sps:$4 sm:$0xff]   ;;  %v2326_v48 = vld [vmem:[%s3079_s0 + $0x68] ss:$16 sps:$4 sm:$0xff]  }
  0x11   :  { %v2327_v49 = vld [vmem:[%s3079_s0 + $0x84] ss:$16 sps:$4 sm:$0xff]   ;;  %v2329_v50 = vld [vmem:[%s3079_s0 + $0x8c] ss:$16 sps:$4 sm:$0xff]   ;;  %v2331_v51 = vld [vmem:[%s3079_s0 + $0x80] ss:$16 sps:$4 sm:$0xff]  }
  0x12   :  { %935 = vmatpush1.bf16.msra.mxu1 %v2279_v9  ;;  %v2332_v52 = vld [vmem:[%s3079_s0 + $0x88] ss:$16 sps:$4 sm:$0xff]   ;;  %v2333_v53 = vld [vmem:[%s3079_s0 + $0xa4] ss:$16 sps:$4 sm:$0xff]   ;;  %v2335_v54 = vld [vmem:[%s3079_s0 + $0xac] ss:$16 sps:$4 sm:$0xff]  }
  0x13   :  { %1184 = vmatpush1.bf16.msra.mxu0 %v2280_v10  ;;  %936 = vmatprep.subr.bf16.mxu1 %v2465_v0  ;;  %v2337_v55 = vld [vmem:[%s3079_s0 + $0xa0] ss:$16 sps:$4 sm:$0xff]   ;;  %v2338_v56 = vld [vmem:[%s3079_s0 + $0xa8] ss:$16 sps:$4 sm:$0xff]   ;;  %v2339_v57 = vld [vmem:[%s3079_s0 + $0xc4] ss:$16 sps:$4 sm:$0xff]  }
  0x14   :  { %1185 = vmatprep.subr.bf16.mxu0 %v2465_v0  ;;  %v2341_v58 = vld [vmem:[%s3079_s0 + $0xcc] ss:$16 sps:$4 sm:$0xff]   ;;  %v2343_v59 = vld [vmem:[%s3079_s0 + $0xc0] ss:$16 sps:$4 sm:$0xff]   ;;  %v2344_v60 = vld [vmem:[%s3079_s0 + $0xc8] ss:$16 sps:$4 sm:$0xff]  }
  0x15   :  { %v2345_v61 = vld [vmem:[%s3079_s0 + $0xe4] ss:$16 sps:$4 sm:$0xff]   ;;  %v2347_v62 = vld [vmem:[%s3079_s0 + $0xec] ss:$16 sps:$4 sm:$0xff]   ;;  %v2349_v63 = vld [vmem:[%s3079_s0 + $0xe0] ss:$16 sps:$4 sm:$0xff]  }
  0x16   :  { %937 = vmatpush1.bf16.msra.mxu1 %v2281_v11  ;;  %v2351_v1 = vld [vmem:[%s3079_s0 + $0x104] ss:$16 sps:$4 sm:$0xff]   ;;  %v2353_v2 = vld [vmem:[%s3079_s0 + $0x10c] ss:$16 sps:$4 sm:$0xff]   ;;  %v2355_v3 = vld [vmem:[%s3079_s0 + $0x100] ss:$16 sps:$4 sm:$0xff]  }
  0x17   :  { %1186 = vmatpush1.bf16.msra.mxu0 %v2282_v12  ;;  %938 = vmatprep.subr.bf16.mxu1 %v2465_v0  ;;  %v2356_v4 = vld [vmem:[%s3079_s0 + $0x108] ss:$16 sps:$4 sm:$0xff]   ;;  %v2357_v5 = vld [vmem:[%s3079_s0 + $0x124] ss:$16 sps:$4 sm:$0xff]   ;;  %v2359_v6 = vld [vmem:[%s3079_s0 + $0x12c] ss:$16 sps:$4 sm:$0xff]  }
  0x18   :  { %1187 = vmatprep.subr.bf16.mxu0 %v2465_v0  ;;  %v2361_v7 = vld [vmem:[%s3079_s0 + $0x120] ss:$16 sps:$4 sm:$0xff]   ;;  %v2362_v8 = vld [vmem:[%s3079_s0 + $0x128] ss:$16 sps:$4 sm:$0xff]   ;;  %v2363_v9 = vld [vmem:[%s3079_s0 + $0x144] ss:$16 sps:$4 sm:$0xff]  }
  0x19   :  { %v2365_v10 = vld [vmem:[%s3079_s0 + $0x14c] ss:$16 sps:$4 sm:$0xff]   ;;  %v2367_v11 = vld [vmem:[%s3079_s0 + $0x140] ss:$16 sps:$4 sm:$0xff]   ;;  %v2368_v12 = vld [vmem:[%s3079_s0 + $0x148] ss:$16 sps:$4 sm:$0xff]  }
  0x1a   :  { %939 = vmatpush1.bf16.msra.mxu1 %v2283_v13  ;;  %v2369_v13 = vld [vmem:[%s3079_s0 + $0x164] ss:$16 sps:$4 sm:$0xff]   ;;  %v2379_v19 = vld [vmem:[%s3079_s0 + $0x180] ss:$16 sps:$4 sm:$0xff]  }
  0x1b   :  { %1188 = vmatpush1.bf16.msra.mxu0 %v2284_v14  ;;  %940 = vmatprep.subr.bf16.mxu1 %v2465_v0  ;;  %v2371_v14 = vld [vmem:[%s3079_s0 + $0x16c] ss:$16 sps:$4 sm:$0xff]   ;;  %v2381_v21 = vld [vmem:[%s3079_s0 + $0x1a4] ss:$16 sps:$4 sm:$0xff]  }
  0x1c   :  { %1189 = vmatprep.subr.bf16.mxu0 %v2465_v0 }
  0x1e   :  { %941 = vmatpush1.bf16.msra.mxu1 %v2285_v15  ;;  %v2373_v15 = vld [vmem:[%s3079_s0 + $0x160] ss:$16 sps:$4 sm:$0xff]  }
  0x1f   :  { %1190 = vmatpush1.bf16.msra.mxu0 %v2286_v16  ;;  %942 = vmatprep.subr.bf16.mxu1 %v2465_v0  ;;  %v2374_v16 = vld [vmem:[%s3079_s0 + $0x168] ss:$16 sps:$4 sm:$0xff]  }
  0x20   :  { %1191 = vmatprep.subr.bf16.mxu0 %v2465_v0 }
  0x22   :  { %943 = vmatpush1.bf16.msra.mxu1 %v2287_v17  ;;  %v2375_v17 = vld [vmem:[%s3079_s0 + $0x184] ss:$16 sps:$4 sm:$0xff]  }
  0x23   :  { %1192 = vmatpush1.bf16.msra.mxu0 %v2288_v18  ;;  %944 = vmatprep.subr.bf16.mxu1 %v2465_v0  ;;  %v2377_v18 = vld [vmem:[%s3079_s0 + $0x18c] ss:$16 sps:$4 sm:$0xff]  }
  0x24   :  { %1193 = vmatprep.subr.bf16.mxu0 %v2465_v0 }
  0x26   :  { %945 = vmatpush1.bf16.msra.mxu1 %v2289_v20  ;;  %v2380_v20 = vld [vmem:[%s3079_s0 + $0x188] ss:$16 sps:$4 sm:$0xff]  }
  0x27   :  { %1194 = vmatpush1.bf16.msra.mxu0 %v2290_v22  ;;  %946 = vmatprep.subr.bf16.mxu1 %v2465_v0  ;;  %v2383_v22 = vld [vmem:[%s3079_s0 + $0x1ac] ss:$16 sps:$4 sm:$0xff]  }
  0x28   :  { %1195 = vmatprep.subr.bf16.mxu0 %v2465_v0 }
  0x2a   :  { %947 = vmatpush1.bf16.msra.mxu1 %v2291_v23  ;;  %v2385_v23 = vld [vmem:[%s3079_s0 + $0x1a0] ss:$16 sps:$4 sm:$0xff]  }
  0x2b   :  { %1196 = vmatpush1.bf16.msra.mxu0 %v2292_v24  ;;  %948 = vmatprep.subr.bf16.mxu1 %v2465_v0  ;;  %v2386_v24 = vld [vmem:[%s3079_s0 + $0x1a8] ss:$16 sps:$4 sm:$0xff]  }
  0x2c   :  { %1197 = vmatprep.subr.bf16.mxu0 %v2465_v0 }
  0x2e   :  { %949 = vmatpush1.bf16.msra.mxu1 %v2293_v25  ;;  %v2387_v25 = vld [vmem:[%s3079_s0 + $0x1c4] ss:$16 sps:$4 sm:$0xff]  }
  0x2f   :  { %1198 = vmatpush1.bf16.msra.mxu0 %v2294_v26  ;;  %950 = vmatprep.subr.bf16.mxu1 %v2465_v0  ;;  %v2389_v26 = vld [vmem:[%s3079_s0 + $0x1cc] ss:$16 sps:$4 sm:$0xff]  }
  0x30   :  { %1199 = vmatprep.subr.bf16.mxu0 %v2465_v0 }
  0x32   :  { %951 = vmatpush1.bf16.msra.mxu1 %v2295_v27  ;;  %v2391_v27 = vld [vmem:[%s3079_s0 + $0x1c0] ss:$16 sps:$4 sm:$0xff]  }
  0x33   :  { %1200 = vmatpush1.bf16.msra.mxu0 %v2296_v28  ;;  %952 = vmatprep.subr.bf16.mxu1 %v2465_v0  ;;  %v2392_v28 = vld [vmem:[%s3079_s0 + $0x1c8] ss:$16 sps:$4 sm:$0xff]  }
  0x34   :  { %1201 = vmatprep.subr.bf16.mxu0 %v2465_v0 }
  0x36   :  { %953 = vmatpush1.bf16.msra.mxu1 %v2297_v29  ;;  %v2393_v29 = vld [vmem:[%s3079_s0 + $0x1e4] ss:$16 sps:$4 sm:$0xff]  }
  0x37   :  { %1202 = vmatpush1.bf16.msra.mxu0 %v2298_v30  ;;  %954 = vmatprep.subr.bf16.mxu1 %v2465_v0  ;;  %v2395_v30 = vld [vmem:[%s3079_s0 + $0x1ec] ss:$16 sps:$4 sm:$0xff]  }
  0x38   :  { %1203 = vmatprep.subr.bf16.mxu0 %v2465_v0 }
  0x3a   :  { %955 = vmatpush1.bf16.msra.mxu1 %v2299_v31  ;;  %v2397_v31 = vld [vmem:[%s3079_s0 + $0x1e0] ss:$16 sps:$4 sm:$0xff]  }
  0x3b   :  { %1204 = vmatpush1.bf16.msra.mxu0 %v2300_v32  ;;  %956 = vmatprep.subr.bf16.mxu1 %v2465_v0  ;;  %v2398_v32 = vld [vmem:[%s3079_s0 + $0x1e8] ss:$16 sps:$4 sm:$0xff]  }
  0x3c   :  { %1205 = vmatprep.subr.bf16.mxu0 %v2465_v0  ;;  %v2350_v0 = vld [vmem:[%s3079_s0 + $0xe8] ss:$16 sps:$4 sm:$0xff]  }
  0x3e   :  { %957 = vmatpush1.bf16.msra.mxu1 %v2301_v33  ;;  %v2399_v33 = vld [vmem:[%s3079_s0 + $0x204] ss:$16 sps:$4 sm:$0xff]  }
  0x3f   :  { %1206 = vmatpush1.bf16.msra.mxu0 %v2302_v34  ;;  %v2401_v34 = vld [vmem:[%s3079_s0 + $0x20c] ss:$16 sps:$4 sm:$0xff]  }
  0x41   :  { %959 = vmatmul.mubr.bf16.vlgmr.msra.gmra.mrb[0].mxu1 %v2303_v35  ;;  %v2403_v35 = vld [vmem:[%s3079_s0 + $0x200] ss:$16 sps:$4 sm:$0xff]  }
  0x42   :  { %1208 = vmatmul.mubr.bf16.vlgmr.msra.gmra.mrb[0].mxu0 %v2306_v36  ;;  %966 = vmatprep.mubr.bf16.mxu1 %v2309_v37  ;;  %v2404_v36 = vld [vmem:[%s3079_s0 + $0x208] ss:$16 sps:$4 sm:$0xff]   ;;  %v2405_v37 = vld [vmem:[%s3079_s0 + $0x224] ss:$16 sps:$4 sm:$0xff]  }
  0x43   :  { %1215 = vmatprep.mubr.bf16.mxu0 %v2311_v38  ;;  %v2407_v38 = vld [vmem:[%s3079_s0 + $0x22c] ss:$16 sps:$4 sm:$0xff]  }
  0x49   :  { %967 = vmatmul.mubr.bf16.gmra.mrb[4].mxu1 %v2313_v39  ;;  %v2409_v39 = vld [vmem:[%s3079_s0 + $0x220] ss:$16 sps:$4 sm:$0xff]  }
  0x4a   :  { %1216 = vmatmul.mubr.bf16.gmra.mrb[4].mxu0 %v2314_v40  ;;  %974 = vmatprep.mubr.bf16.mxu1 %v2315_v41  ;;  %v2410_v40 = vld [vmem:[%s3079_s0 + $0x228] ss:$16 sps:$4 sm:$0xff]   ;;  %v2411_v41 = vld [vmem:[%s3079_s0 + $0x244] ss:$16 sps:$4 sm:$0xff]  }
  0x4b   :  { %1223 = vmatprep.mubr.bf16.mxu0 %v2317_v42  ;;  %v2413_v42 = vld [vmem:[%s3079_s0 + $0x24c] ss:$16 sps:$4 sm:$0xff]  }
  0x51   :  { %975 = vmatmul.mubr.bf16.gmra.mrb[8].mxu1 %v2319_v43  ;;  %v2415_v43 = vld [vmem:[%s3079_s0 + $0x240] ss:$16 sps:$4 sm:$0xff]  }
  0x52   :  { %1224 = vmatmul.mubr.bf16.gmra.mrb[8].mxu0 %v2320_v44  ;;  %982 = vmatprep.mubr.bf16.mxu1 %v2321_v45  ;;  %v2416_v44 = vld [vmem:[%s3079_s0 + $0x248] ss:$16 sps:$4 sm:$0xff]   ;;  %v2417_v45 = vld [vmem:[%s3079_s0 + $0x264] ss:$16 sps:$4 sm:$0xff]  }
  0x53   :  { %1231 = vmatprep.mubr.bf16.mxu0 %v2323_v46  ;;  %v2419_v46 = vld [vmem:[%s3079_s0 + $0x26c] ss:$16 sps:$4 sm:$0xff]  }
  0x59   :  { %983 = vmatmul.mubr.bf16.gmra.mrb[12].mxu1 %v2325_v47  ;;  %v2421_v47 = vld [vmem:[%s3079_s0 + $0x260] ss:$16 sps:$4 sm:$0xff]  }
  0x5a   :  { %1232 = vmatmul.mubr.bf16.gmra.mrb[12].mxu0 %v2326_v48  ;;  %990 = vmatprep.mubr.bf16.mxu1 %v2327_v49  ;;  %v2422_v48 = vld [vmem:[%s3079_s0 + $0x268] ss:$16 sps:$4 sm:$0xff]   ;;  %v2423_v49 = vld [vmem:[%s3079_s0 + $0x284] ss:$16 sps:$4 sm:$0xff]  }
  0x5b   :  { %1239 = vmatprep.mubr.bf16.mxu0 %v2329_v50  ;;  %v2425_v50 = vld [vmem:[%s3079_s0 + $0x28c] ss:$16 sps:$4 sm:$0xff]  }
  0x61   :  { %991 = vmatmul.mubr.bf16.gmra.mrb[16].mxu1 %v2331_v51  ;;  %v2427_v51 = vld [vmem:[%s3079_s0 + $0x280] ss:$16 sps:$4 sm:$0xff]  }
  0x62   :  { %1240 = vmatmul.mubr.bf16.gmra.mrb[16].mxu0 %v2332_v52  ;;  %998 = vmatprep.mubr.bf16.mxu1 %v2333_v53  ;;  %v2428_v52 = vld [vmem:[%s3079_s0 + $0x288] ss:$16 sps:$4 sm:$0xff]   ;;  %v2429_v53 = vld [vmem:[%s3079_s0 + $0x2a4] ss:$16 sps:$4 sm:$0xff]  }
  0x63   :  { %1247 = vmatprep.mubr.bf16.mxu0 %v2335_v54  ;;  %v2431_v54 = vld [vmem:[%s3079_s0 + $0x2ac] ss:$16 sps:$4 sm:$0xff]  }
  0x69   :  { %999 = vmatmul.mubr.bf16.gmra.mrb[20].mxu1 %v2337_v55  ;;  %v2433_v55 = vld [vmem:[%s3079_s0 + $0x2a0] ss:$16 sps:$4 sm:$0xff]  }
  0x6a   :  { %1248 = vmatmul.mubr.bf16.gmra.mrb[20].mxu0 %v2338_v56  ;;  %1006 = vmatprep.mubr.bf16.mxu1 %v2339_v57  ;;  %v2434_v56 = vld [vmem:[%s3079_s0 + $0x2a8] ss:$16 sps:$4 sm:$0xff]   ;;  %v2435_v57 = vld [vmem:[%s3079_s0 + $0x2c4] ss:$16 sps:$4 sm:$0xff]  }
  0x6b   :  { %1255 = vmatprep.mubr.bf16.mxu0 %v2341_v58  ;;  %v2437_v58 = vld [vmem:[%s3079_s0 + $0x2cc] ss:$16 sps:$4 sm:$0xff]  }
  0x71   :  { %1007 = vmatmul.mubr.bf16.gmra.mrb[24].mxu1 %v2343_v59  ;;  %v2439_v59 = vld [vmem:[%s3079_s0 + $0x2c0] ss:$16 sps:$4 sm:$0xff]  }
  0x72   :  { %1256 = vmatmul.mubr.bf16.gmra.mrb[24].mxu0 %v2344_v60  ;;  %1014 = vmatprep.mubr.bf16.mxu1 %v2345_v61  ;;  %v2440_v60 = vld [vmem:[%s3079_s0 + $0x2c8] ss:$16 sps:$4 sm:$0xff]   ;;  %v2441_v61 = vld [vmem:[%s3079_s0 + $0x2e4] ss:$16 sps:$4 sm:$0xff]  }
  0x73   :  { %1263 = vmatprep.mubr.bf16.mxu0 %v2347_v62  ;;  %v2443_v62 = vld [vmem:[%s3079_s0 + $0x2ec] ss:$16 sps:$4 sm:$0xff]  }
  0x79   :  { %1015 = vmatmul.mubr.bf16.gmra.mrb[28].mxu1 %v2349_v63  ;;  %v2445_v63 = vld [vmem:[%s3079_s0 + $0x2e0] ss:$16 sps:$4 sm:$0xff]  }
  0x7a   :  { %1264 = vmatmul.mubr.bf16.gmra.mrb[28].mxu0 %v2350_v0  ;;  %1022 = vmatprep.mubr.bf16.mxu1 %v2351_v1  ;;  %v2446_v0 = vld [vmem:[%s3079_s0 + $0x2e8] ss:$16 sps:$4 sm:$0xff]   ;;  %v2447_v1 = vld [vmem:[%s3079_s0 + $0x304] ss:$16 sps:$4 sm:$0xff]  }
  0x7b   :  { %1271 = vmatprep.mubr.bf16.mxu0 %v2353_v2  ;;  %v2449_v2 = vld [vmem:[%s3079_s0 + $0x30c] ss:$16 sps:$4 sm:$0xff]  }
  0x81   :  { %1023 = vmatmul.mubr.bf16.gmra.mrb[32].mxu1 %v2355_v3  ;;  %v2451_v3 = vld [vmem:[%s3079_s0 + $0x300] ss:$16 sps:$4 sm:$0xff]  }
  0x82   :  { %1272 = vmatmul.mubr.bf16.gmra.mrb[32].mxu0 %v2356_v4  ;;  %1030 = vmatprep.mubr.bf16.mxu1 %v2357_v5  ;;  %v2452_v4 = vld [vmem:[%s3079_s0 + $0x308] ss:$16 sps:$4 sm:$0xff]   ;;  %v2453_v5 = vld [vmem:[%s3079_s0 + $0x324] ss:$16 sps:$4 sm:$0xff]  }
  0x83   :  { %1279 = vmatprep.mubr.bf16.mxu0 %v2359_v6  ;;  %v2455_v6 = vld [vmem:[%s3079_s0 + $0x32c] ss:$16 sps:$4 sm:$0xff]  }
  0x89   :  { %1031 = vmatmul.mubr.bf16.gmra.mrb[36].mxu1 %v2361_v7  ;;  %v2457_v7 = vld [vmem:[%s3079_s0 + $0x320] ss:$16 sps:$4 sm:$0xff]  }
  0x8a   :  { %1280 = vmatmul.mubr.bf16.gmra.mrb[36].mxu0 %v2362_v8  ;;  %1038 = vmatprep.mubr.bf16.mxu1 %v2363_v9  ;;  %v2458_v8 = vld [vmem:[%s3079_s0 + $0x328] ss:$16 sps:$4 sm:$0xff]   ;;  %v2459_v9 = vld [vmem:[%s3079_s0 + $0x344] ss:$16 sps:$4 sm:$0xff]  }
  0x8b   :  { %1287 = vmatprep.mubr.bf16.mxu0 %v2365_v10  ;;  %v2461_v10 = vld [vmem:[%s3079_s0 + $0x34c] ss:$16 sps:$4 sm:$0xff]  }
  0x91   :  { %1039 = vmatmul.mubr.bf16.gmra.mrb[40].mxu1 %v2367_v11  ;;  %v2463_v11 = vld [vmem:[%s3079_s0 + $0x340] ss:$16 sps:$4 sm:$0xff]  }
  0x92   :  { %1288 = vmatmul.mubr.bf16.gmra.mrb[40].mxu0 %v2368_v12  ;;  %1046 = vmatprep.mubr.bf16.mxu1 %v2369_v13  ;;  %v2464_v12 = vld [vmem:[%s3079_s0 + $0x348] ss:$16 sps:$4 sm:$0xff]   ;;  %v2941_v13 = vld [vmem:[%s3080_s2] ss:$0 sm:$0xff] }
  0x93   :  { %1295 = vmatprep.mubr.bf16.mxu0 %v2371_v14 }
  0x99   :  { %1047 = vmatmul.mubr.bf16.gmra.mrb[44].mxu1 %v2373_v15 }
  0x9a   :  { %1296 = vmatmul.mubr.bf16.gmra.mrb[44].mxu0 %v2374_v16  ;;  %1054 = vmatprep.mubr.bf16.mxu1 %v2375_v17 }
  0x9b   :  { %1303 = vmatprep.mubr.bf16.mxu0 %v2377_v18 }
  0xa1   :  { %1055 = vmatmul.mubr.bf16.gmra.mrb[48].mxu1 %v2379_v19 }
  0xa2   :  { %1304 = vmatmul.mubr.bf16.gmra.mrb[48].mxu0 %v2380_v20  ;;  %1062 = vmatprep.mubr.bf16.mxu1 %v2381_v21 }
  0xa3   :  { %1311 = vmatprep.mubr.bf16.mxu0 %v2383_v22 }
  0xa9   :  { %1063 = vmatmul.mubr.bf16.gmra.mrb[52].mxu1 %v2385_v23 }
  0xaa   :  { %1312 = vmatmul.mubr.bf16.gmra.mrb[52].mxu0 %v2386_v24  ;;  %1070 = vmatprep.mubr.bf16.mxu1 %v2387_v25 }
  0xab   :  { %1319 = vmatprep.mubr.bf16.mxu0 %v2389_v26 }
  0xb1   :  { %1071 = vmatmul.mubr.bf16.gmra.mrb[56].mxu1 %v2391_v27 }
  0xb2   :  { %1320 = vmatmul.mubr.bf16.gmra.mrb[56].mxu0 %v2392_v28  ;;  %1078 = vmatprep.mubr.bf16.mxu1 %v2393_v29 }
  0xb3   :  { %1327 = vmatprep.mubr.bf16.mxu0 %v2395_v30 }
  0xb9   :  { %1079 = vmatmul.mubr.bf16.gmra.mrb[60].mxu1 %v2397_v31 }
  0xba   :  { %1328 = vmatmul.mubr.bf16.gmra.mrb[60].mxu0 %v2398_v32  ;;  %1086 = vmatprep.mubr.bf16.mxu1 %v2399_v33 }
  0xbb   :  { %1335 = vmatprep.mubr.bf16.mxu0 %v2401_v34 }
  0xc1   :  { %1087 = vmatmul.mubr.bf16.gmra.mrb[64].mxu1 %v2403_v35 }
  0xc2   :  { %1336 = vmatmul.mubr.bf16.gmra.mrb[64].mxu0 %v2404_v36  ;;  %1094 = vmatprep.mubr.bf16.mxu1 %v2405_v37 }
  0xc3   :  { %1343 = vmatprep.mubr.bf16.mxu0 %v2407_v38 }
  0xc9   :  { %1095 = vmatmul.mubr.bf16.gmra.mrb[68].mxu1 %v2409_v39 }
  0xca   :  { %1344 = vmatmul.mubr.bf16.gmra.mrb[68].mxu0 %v2410_v40  ;;  %1102 = vmatprep.mubr.bf16.mxu1 %v2411_v41 }
  0xcb   :  { %1351 = vmatprep.mubr.bf16.mxu0 %v2413_v42 }
  0xd1   :  { %1103 = vmatmul.mubr.bf16.gmra.mrb[72].mxu1 %v2415_v43 }
  0xd2   :  { %1352 = vmatmul.mubr.bf16.gmra.mrb[72].mxu0 %v2416_v44  ;;  %1110 = vmatprep.mubr.bf16.mxu1 %v2417_v45 }
  0xd3   :  { %1359 = vmatprep.mubr.bf16.mxu0 %v2419_v46 }
  0xd9   :  { %1111 = vmatmul.mubr.bf16.gmra.mrb[76].mxu1 %v2421_v47 }
  0xda   :  { %1360 = vmatmul.mubr.bf16.gmra.mrb[76].mxu0 %v2422_v48  ;;  %1118 = vmatprep.mubr.bf16.mxu1 %v2423_v49 }
  0xdb   :  { %1367 = vmatprep.mubr.bf16.mxu0 %v2425_v50 }
  0xe1   :  { %1119 = vmatmul.mubr.bf16.gmra.mrb[80].mxu1 %v2427_v51 }
  0xe2   :  { %1368 = vmatmul.mubr.bf16.gmra.mrb[80].mxu0 %v2428_v52  ;;  %1126 = vmatprep.mubr.bf16.mxu1 %v2429_v53 }
  0xe3   :  { %1375 = vmatprep.mubr.bf16.mxu0 %v2431_v54 }
  0xe9   :  { %1127 = vmatmul.mubr.bf16.gmra.mrb[84].mxu1 %v2433_v55 }
  0xea   :  { %1376 = vmatmul.mubr.bf16.gmra.mrb[84].mxu0 %v2434_v56  ;;  %1134 = vmatprep.mubr.bf16.mxu1 %v2435_v57 }
  0xeb   :  { %1383 = vmatprep.mubr.bf16.mxu0 %v2437_v58 }
  0xf1   :  { %1135 = vmatmul.mubr.bf16.gmra.mrb[88].mxu1 %v2439_v59 }
  0xf2   :  { %1384 = vmatmul.mubr.bf16.gmra.mrb[88].mxu0 %v2440_v60  ;;  %1142 = vmatprep.mubr.bf16.mxu1 %v2441_v61 }
  0xf3   :  { %1391 = vmatprep.mubr.bf16.mxu0 %v2443_v62 }
  0xf9   :  { %1143 = vmatmul.mubr.bf16.gmra.mrb[92].mxu1 %v2445_v63 }
  0xfa   :  { %1392 = vmatmul.mubr.bf16.gmra.mrb[92].mxu0 %v2446_v0  ;;  %1150 = vmatprep.mubr.bf16.mxu1 %v2447_v1 }
  0xfb   :  { %1399 = vmatprep.mubr.bf16.mxu0 %v2449_v2 }
 0x101   :  { %1151 = vmatmul.mubr.bf16.gmra.mrb[96].mxu1 %v2451_v3 }
 0x102   :  { %1400 = vmatmul.mubr.bf16.gmra.mrb[96].mxu0 %v2452_v4  ;;  %1158 = vmatprep.mubr.bf16.mxu1 %v2453_v5 }
 0x103   :  { %1407 = vmatprep.mubr.bf16.mxu0 %v2455_v6 }
 0x109   :  { %1159 = vmatmul.mubr.bf16.gmra.mrb[100].mxu1 %v2457_v7 }
 0x10a   :  { %1408 = vmatmul.mubr.bf16.gmra.mrb[100].mxu0 %v2458_v8  ;;  %1166 = vmatprep.mubr.bf16.mxu1 %v2459_v9 }
 0x10b   :  { %1415 = vmatprep.mubr.bf16.mxu0 %v2461_v10 }
 0x111   :  { %1167 = vmatmul.mubr.bf16.gmra.mrb[104].mxu1 %v2463_v11 }
 0x112   :  { %1416 = vmatmul.mubr.bf16.gmra.mrb[104].mxu0 %v2464_v12 }
 0x114   :  { %v960_v14 = vpop.f32.mrb[0].mxu1 }
 0x115   :  { %v961_v15 = vadd.f32 %v2941_v13, %v960_v14  ;;  %v1209_v16 = vpop.f32.mrb[0].mxu0  ;;  %v962_v17 = vpop.f32.mrb[1].mxu1 }
 0x116   :  { %v1211_v18 = vpop.f32.mrb[1].mxu0  ;;  %v963_v19 = vpop.f32.mrb[2].mxu1 }
 0x117   :  { %v1210_v20 = vadd.f32 %v1209_v16, %v961_v15  ;;  %v964_v21 = vadd.f32 %v2941_v13, %v963_v19  ;;  %v1212_v22 = vpop.f32.mrb[2].mxu0  ;;  %v965_v23 = vpop.f32.mrb[3].mxu1 }
 0x118   :  { %v1214_v24 = vpop.f32.mrb[3].mxu0 }
 0x119   :  { %v1213_v25 = vadd.f32 %v1212_v22, %v964_v21  ;;  %v1424_v26 = vmax.f32 %v1210_v20, 0.0 }
 0x11b   :  { %v1425_v27 = vmax.f32 %v1213_v25, 0.0 }
 0x11c   :  { %v968_v28 = vpop.f32.mrb[4].mxu1 }
 0x11d   :  { %v2004_v29 = vpack.c.bf16 %v1425_v27, %v1424_v26  ;;  %v969_v30 = vadd.f32 %v2941_v13, %v968_v28  ;;  %v1217_v31 = vpop.f32.mrb[4].mxu0  ;;  %v970_v32 = vpop.f32.mrb[5].mxu1 }
 0x11e   :  { %v1219_v33 = vpop.f32.mrb[5].mxu0  ;;  %v971_v34 = vpop.f32.mrb[6].mxu1 }
 0x11f   :  { %2005 = vst [vmem:[%s3081_s3] sm:$0xff] %v2004_v29   ;;  %v1218_v35 = vadd.f32 %v1217_v31, %v969_v30  ;;  %v972_v36 = vadd.f32 %v2941_v13, %v971_v34  ;;  %v1220_v37 = vpop.f32.mrb[6].mxu0  ;;  %v973_v38 = vpop.f32.mrb[7].mxu1 }
 0x120   :  { %v1222_v39 = vpop.f32.mrb[7].mxu0 }
 0x121   :  { %v1221_v40 = vadd.f32 %v1220_v37, %v972_v36  ;;  %v1426_v41 = vmax.f32 %v1218_v35, 0.0 }
 0x123   :  { %v1427_v42 = vmax.f32 %v1221_v40, 0.0 }
 0x124   :  { %v976_v43 = vpop.f32.mrb[8].mxu1 }
 0x125   :  { %v2009_v44 = vpack.c.bf16 %v1427_v42, %v1426_v41  ;;  %v977_v45 = vadd.f32 %v2941_v13, %v976_v43  ;;  %v1225_v46 = vpop.f32.mrb[8].mxu0  ;;  %v978_v47 = vpop.f32.mrb[9].mxu1 }
 0x126   :  { %v1227_v48 = vpop.f32.mrb[9].mxu0  ;;  %v979_v49 = vpop.f32.mrb[10].mxu1 }
 0x127   :  { %2136 = vst [vmem:[%s3081_s3 + $0x8] sm:$0xff] %v2009_v44   ;;  %v1226_v50 = vadd.f32 %v1225_v46, %v977_v45  ;;  %v980_v51 = vadd.f32 %v2941_v13, %v979_v49  ;;  %v1228_v52 = vpop.f32.mrb[10].mxu0  ;;  %v981_v53 = vpop.f32.mrb[11].mxu1 }
 0x128   :  { %v1230_v54 = vpop.f32.mrb[11].mxu0 }
 0x129   :  { %v1229_v55 = vadd.f32 %v1228_v52, %v980_v51  ;;  %v1428_v56 = vmax.f32 %v1226_v50, 0.0 }
 0x12b   :  { %v1429_v57 = vmax.f32 %v1229_v55, 0.0 }
 0x12c   :  { %v984_v58 = vpop.f32.mrb[12].mxu1 }
 0x12d   :  { %v2014_v59 = vpack.c.bf16 %v1429_v57, %v1428_v56  ;;  %v985_v60 = vadd.f32 %v2941_v13, %v984_v58  ;;  %v1233_v61 = vpop.f32.mrb[12].mxu0  ;;  %v986_v62 = vpop.f32.mrb[13].mxu1 }
 0x12e   :  { %v1235_v63 = vpop.f32.mrb[13].mxu0  ;;  %v987_v0 = vpop.f32.mrb[14].mxu1 }
 0x12f   :  { %2137 = vst [vmem:[%s3081_s3 + $0x10] sm:$0xff] %v2014_v59   ;;  %v1234_v1 = vadd.f32 %v1233_v61, %v985_v60  ;;  %v988_v2 = vadd.f32 %v2941_v13, %v987_v0  ;;  %v1236_v3 = vpop.f32.mrb[14].mxu0  ;;  %v989_v4 = vpop.f32.mrb[15].mxu1 }
 0x130   :  { %v1238_v5 = vpop.f32.mrb[15].mxu0 }
 0x131   :  { %v1237_v6 = vadd.f32 %v1236_v3, %v988_v2  ;;  %v1430_v7 = vmax.f32 %v1234_v1, 0.0 }
 0x133   :  { %v1431_v8 = vmax.f32 %v1237_v6, 0.0 }
 0x134   :  { %v992_v9 = vpop.f32.mrb[16].mxu1 }
 0x135   :  { %v2019_v10 = vpack.c.bf16 %v1431_v8, %v1430_v7  ;;  %v993_v11 = vadd.f32 %v2941_v13, %v992_v9  ;;  %v1241_v12 = vpop.f32.mrb[16].mxu0  ;;  %v994_v14 = vpop.f32.mrb[17].mxu1 }
 0x136   :  { %v1243_v15 = vpop.f32.mrb[17].mxu0  ;;  %v995_v16 = vpop.f32.mrb[18].mxu1 }
 0x137   :  { %2138 = vst [vmem:[%s3081_s3 + $0x18] sm:$0xff] %v2019_v10   ;;  %v1242_v17 = vadd.f32 %v1241_v12, %v993_v11  ;;  %v996_v18 = vadd.f32 %v2941_v13, %v995_v16  ;;  %v1244_v19 = vpop.f32.mrb[18].mxu0  ;;  %v997_v20 = vpop.f32.mrb[19].mxu1 }
 0x138   :  { %v1246_v21 = vpop.f32.mrb[19].mxu0 }
 0x139   :  { %v1245_v22 = vadd.f32 %v1244_v19, %v996_v18  ;;  %v1432_v23 = vmax.f32 %v1242_v17, 0.0 }
 0x13b   :  { %v1433_v24 = vmax.f32 %v1245_v22, 0.0 }
 0x13c   :  { %v1000_v25 = vpop.f32.mrb[20].mxu1 }
 0x13d   :  { %v2024_v26 = vpack.c.bf16 %v1433_v24, %v1432_v23  ;;  %v1001_v27 = vadd.f32 %v2941_v13, %v1000_v25  ;;  %v1249_v28 = vpop.f32.mrb[20].mxu0  ;;  %v1002_v29 = vpop.f32.mrb[21].mxu1 }
 0x13e   :  { %v1251_v30 = vpop.f32.mrb[21].mxu0  ;;  %v1003_v31 = vpop.f32.mrb[22].mxu1 }
 0x13f   :  { %2139 = vst [vmem:[%s3081_s3 + $0x20] sm:$0xff] %v2024_v26   ;;  %v1250_v32 = vadd.f32 %v1249_v28, %v1001_v27  ;;  %v1004_v33 = vadd.f32 %v2941_v13, %v1003_v31  ;;  %v1252_v34 = vpop.f32.mrb[22].mxu0  ;;  %v1005_v35 = vpop.f32.mrb[23].mxu1 }
 0x140   :  { %v1254_v36 = vpop.f32.mrb[23].mxu0 }
 0x141   :  { %v1253_v37 = vadd.f32 %v1252_v34, %v1004_v33  ;;  %v1434_v38 = vmax.f32 %v1250_v32, 0.0 }
 0x143   :  { %v1435_v39 = vmax.f32 %v1253_v37, 0.0 }
 0x144   :  { %v1008_v40 = vpop.f32.mrb[24].mxu1 }
 0x145   :  { %v2029_v41 = vpack.c.bf16 %v1435_v39, %v1434_v38  ;;  %v1009_v42 = vadd.f32 %v2941_v13, %v1008_v40  ;;  %v1257_v43 = vpop.f32.mrb[24].mxu0  ;;  %v1010_v44 = vpop.f32.mrb[25].mxu1 }
 0x146   :  { %v1259_v45 = vpop.f32.mrb[25].mxu0  ;;  %v1011_v46 = vpop.f32.mrb[26].mxu1 }
 0x147   :  { %2140 = vst [vmem:[%s3081_s3 + $0x28] sm:$0xff] %v2029_v41   ;;  %v1258_v47 = vadd.f32 %v1257_v43, %v1009_v42  ;;  %v1012_v48 = vadd.f32 %v2941_v13, %v1011_v46  ;;  %v1260_v49 = vpop.f32.mrb[26].mxu0  ;;  %v1013_v50 = vpop.f32.mrb[27].mxu1 }
 0x148   :  { %v1262_v51 = vpop.f32.mrb[27].mxu0 }
 0x149   :  { %v1261_v52 = vadd.f32 %v1260_v49, %v1012_v48  ;;  %v1436_v53 = vmax.f32 %v1258_v47, 0.0 }
 0x14b   :  { %v1437_v54 = vmax.f32 %v1261_v52, 0.0 }
 0x14c   :  { %v1016_v55 = vpop.f32.mrb[28].mxu1 }
 0x14d   :  { %v2034_v56 = vpack.c.bf16 %v1437_v54, %v1436_v53  ;;  %v1017_v57 = vadd.f32 %v2941_v13, %v1016_v55  ;;  %v1265_v58 = vpop.f32.mrb[28].mxu0  ;;  %v1018_v59 = vpop.f32.mrb[29].mxu1 }
 0x14e   :  { %v1267_v60 = vpop.f32.mrb[29].mxu0  ;;  %v1019_v61 = vpop.f32.mrb[30].mxu1 }
 0x14f   :  { %2141 = vst [vmem:[%s3081_s3 + $0x30] sm:$0xff] %v2034_v56   ;;  %v1266_v62 = vadd.f32 %v1265_v58, %v1017_v57  ;;  %v1020_v63 = vadd.f32 %v2941_v13, %v1019_v61  ;;  %v1268_v0 = vpop.f32.mrb[30].mxu0  ;;  %v1021_v1 = vpop.f32.mrb[31].mxu1 }
 0x150   :  { %v1270_v2 = vpop.f32.mrb[31].mxu0 }
 0x151   :  { %v1269_v3 = vadd.f32 %v1268_v0, %v1020_v63  ;;  %v1438_v4 = vmax.f32 %v1266_v62, 0.0 }
 0x153   :  { %v1439_v5 = vmax.f32 %v1269_v3, 0.0 }
 0x154   :  { %v1024_v6 = vpop.f32.mrb[32].mxu1 }
 0x155   :  { %v2039_v7 = vpack.c.bf16 %v1439_v5, %v1438_v4  ;;  %v1025_v8 = vadd.f32 %v2941_v13, %v1024_v6  ;;  %v1273_v9 = vpop.f32.mrb[32].mxu0  ;;  %v1026_v10 = vpop.f32.mrb[33].mxu1 }
 0x156   :  { %v1275_v11 = vpop.f32.mrb[33].mxu0  ;;  %v1027_v12 = vpop.f32.mrb[34].mxu1 }
 0x157   :  { %2142 = vst [vmem:[%s3081_s3 + $0x38] sm:$0xff] %v2039_v7   ;;  %v1274_v14 = vadd.f32 %v1273_v9, %v1025_v8  ;;  %v1028_v15 = vadd.f32 %v2941_v13, %v1027_v12  ;;  %v1276_v16 = vpop.f32.mrb[34].mxu0  ;;  %v1029_v17 = vpop.f32.mrb[35].mxu1 }
 0x158   :  { %v1278_v18 = vpop.f32.mrb[35].mxu0 }
 0x159   :  { %v1277_v19 = vadd.f32 %v1276_v16, %v1028_v15  ;;  %v1440_v20 = vmax.f32 %v1274_v14, 0.0 }
 0x15b   :  { %v1441_v21 = vmax.f32 %v1277_v19, 0.0 }
 0x15c   :  { %v1032_v22 = vpop.f32.mrb[36].mxu1 }
 0x15d   :  { %v2044_v23 = vpack.c.bf16 %v1441_v21, %v1440_v20  ;;  %v1033_v24 = vadd.f32 %v2941_v13, %v1032_v22  ;;  %v1281_v25 = vpop.f32.mrb[36].mxu0  ;;  %v1034_v26 = vpop.f32.mrb[37].mxu1 }
 0x15e   :  { %v1283_v27 = vpop.f32.mrb[37].mxu0  ;;  %v1035_v28 = vpop.f32.mrb[38].mxu1 }
 0x15f   :  { %2143 = vst [vmem:[%s3081_s3 + $0x40] sm:$0xff] %v2044_v23   ;;  %v1282_v29 = vadd.f32 %v1281_v25, %v1033_v24  ;;  %v1036_v30 = vadd.f32 %v2941_v13, %v1035_v28  ;;  %v1284_v31 = vpop.f32.mrb[38].mxu0  ;;  %v1037_v32 = vpop.f32.mrb[39].mxu1 }
 0x160   :  { %v1286_v33 = vpop.f32.mrb[39].mxu0 }
 0x161   :  { %v1285_v34 = vadd.f32 %v1284_v31, %v1036_v30  ;;  %v1442_v35 = vmax.f32 %v1282_v29, 0.0 }
 0x163   :  { %v1443_v36 = vmax.f32 %v1285_v34, 0.0 }
 0x164   :  { %v1040_v37 = vpop.f32.mrb[40].mxu1 }
 0x165   :  { %v2049_v38 = vpack.c.bf16 %v1443_v36, %v1442_v35  ;;  %v1041_v39 = vadd.f32 %v2941_v13, %v1040_v37  ;;  %v1289_v40 = vpop.f32.mrb[40].mxu0  ;;  %v1042_v41 = vpop.f32.mrb[41].mxu1 }
 0x166   :  { %v1291_v42 = vpop.f32.mrb[41].mxu0  ;;  %v1043_v43 = vpop.f32.mrb[42].mxu1 }
 0x167   :  { %2144 = vst [vmem:[%s3081_s3 + $0x48] sm:$0xff] %v2049_v38   ;;  %v1290_v44 = vadd.f32 %v1289_v40, %v1041_v39  ;;  %v1044_v45 = vadd.f32 %v2941_v13, %v1043_v43  ;;  %v1292_v46 = vpop.f32.mrb[42].mxu0  ;;  %v1045_v47 = vpop.f32.mrb[43].mxu1 }
 0x168   :  { %v1294_v48 = vpop.f32.mrb[43].mxu0 }
 0x169   :  { %v1293_v49 = vadd.f32 %v1292_v46, %v1044_v45  ;;  %v1444_v50 = vmax.f32 %v1290_v44, 0.0 }
 0x16b   :  { %v1445_v51 = vmax.f32 %v1293_v49, 0.0 }
 0x16c   :  { %v1048_v52 = vpop.f32.mrb[44].mxu1 }
 0x16d   :  { %v2054_v53 = vpack.c.bf16 %v1445_v51, %v1444_v50  ;;  %v1049_v54 = vadd.f32 %v2941_v13, %v1048_v52  ;;  %v1297_v55 = vpop.f32.mrb[44].mxu0  ;;  %v1050_v56 = vpop.f32.mrb[45].mxu1 }
 0x16e   :  { %v1299_v57 = vpop.f32.mrb[45].mxu0  ;;  %v1051_v58 = vpop.f32.mrb[46].mxu1 }
 0x16f   :  { %2145 = vst [vmem:[%s3081_s3 + $0x50] sm:$0xff] %v2054_v53   ;;  %v1298_v59 = vadd.f32 %v1297_v55, %v1049_v54  ;;  %v1052_v60 = vadd.f32 %v2941_v13, %v1051_v58  ;;  %v1300_v61 = vpop.f32.mrb[46].mxu0  ;;  %v1053_v62 = vpop.f32.mrb[47].mxu1 }
 0x170   :  { %v1302_v63 = vpop.f32.mrb[47].mxu0 }
 0x171   :  { %v1301_v0 = vadd.f32 %v1300_v61, %v1052_v60  ;;  %v1446_v1 = vmax.f32 %v1298_v59, 0.0 }
 0x173   :  { %v1447_v2 = vmax.f32 %v1301_v0, 0.0 }
 0x174   :  { %v1056_v3 = vpop.f32.mrb[48].mxu1 }
 0x175   :  { %v2059_v4 = vpack.c.bf16 %v1447_v2, %v1446_v1  ;;  %v1057_v5 = vadd.f32 %v2941_v13, %v1056_v3  ;;  %v1305_v6 = vpop.f32.mrb[48].mxu0  ;;  %v1058_v7 = vpop.f32.mrb[49].mxu1 }
 0x176   :  { %v1307_v8 = vpop.f32.mrb[49].mxu0  ;;  %v1059_v9 = vpop.f32.mrb[50].mxu1 }
 0x177   :  { %2146 = vst [vmem:[%s3081_s3 + $0x58] sm:$0xff] %v2059_v4   ;;  %v1306_v10 = vadd.f32 %v1305_v6, %v1057_v5  ;;  %v1060_v11 = vadd.f32 %v2941_v13, %v1059_v9  ;;  %v1308_v12 = vpop.f32.mrb[50].mxu0  ;;  %v1061_v14 = vpop.f32.mrb[51].mxu1 }
 0x178   :  { %v1310_v15 = vpop.f32.mrb[51].mxu0 }
 0x179   :  { %v1309_v16 = vadd.f32 %v1308_v12, %v1060_v11  ;;  %v1448_v17 = vmax.f32 %v1306_v10, 0.0 }
 0x17b   :  { %v1449_v18 = vmax.f32 %v1309_v16, 0.0 }
 0x17c   :  { %v1064_v19 = vpop.f32.mrb[52].mxu1 }
 0x17d   :  { %v2064_v20 = vpack.c.bf16 %v1449_v18, %v1448_v17  ;;  %v1065_v21 = vadd.f32 %v2941_v13, %v1064_v19  ;;  %v1313_v22 = vpop.f32.mrb[52].mxu0  ;;  %v1066_v23 = vpop.f32.mrb[53].mxu1 }
 0x17e   :  { %v1315_v24 = vpop.f32.mrb[53].mxu0  ;;  %v1067_v25 = vpop.f32.mrb[54].mxu1 }
 0x17f   :  { %2147 = vst [vmem:[%s3081_s3 + $0x60] sm:$0xff] %v2064_v20   ;;  %v1314_v26 = vadd.f32 %v1313_v22, %v1065_v21  ;;  %v1068_v27 = vadd.f32 %v2941_v13, %v1067_v25  ;;  %v1316_v28 = vpop.f32.mrb[54].mxu0  ;;  %v1069_v29 = vpop.f32.mrb[55].mxu1 }
 0x180   :  { %v1318_v30 = vpop.f32.mrb[55].mxu0 }
 0x181   :  { %v1317_v31 = vadd.f32 %v1316_v28, %v1068_v27  ;;  %v1450_v32 = vmax.f32 %v1314_v26, 0.0 }
 0x183   :  { %v1451_v33 = vmax.f32 %v1317_v31, 0.0 }
 0x184   :  { %v1072_v34 = vpop.f32.mrb[56].mxu1 }
 0x185   :  { %v2069_v35 = vpack.c.bf16 %v1451_v33, %v1450_v32  ;;  %v1073_v36 = vadd.f32 %v2941_v13, %v1072_v34  ;;  %v1321_v37 = vpop.f32.mrb[56].mxu0  ;;  %v1074_v38 = vpop.f32.mrb[57].mxu1 }
 0x186   :  { %v1323_v39 = vpop.f32.mrb[57].mxu0  ;;  %v1075_v40 = vpop.f32.mrb[58].mxu1 }
 0x187   :  { %2148 = vst [vmem:[%s3081_s3 + $0x68] sm:$0xff] %v2069_v35   ;;  %v1322_v41 = vadd.f32 %v1321_v37, %v1073_v36  ;;  %v1076_v42 = vadd.f32 %v2941_v13, %v1075_v40  ;;  %v1324_v43 = vpop.f32.mrb[58].mxu0  ;;  %v1077_v44 = vpop.f32.mrb[59].mxu1 }
 0x188   :  { %v1326_v45 = vpop.f32.mrb[59].mxu0 }
 0x189   :  { %v1325_v46 = vadd.f32 %v1324_v43, %v1076_v42  ;;  %v1452_v47 = vmax.f32 %v1322_v41, 0.0 }
 0x18b   :  { %v1453_v48 = vmax.f32 %v1325_v46, 0.0 }
 0x18c   :  { %v1080_v49 = vpop.f32.mrb[60].mxu1 }
 0x18d   :  { %v2074_v50 = vpack.c.bf16 %v1453_v48, %v1452_v47  ;;  %v1081_v51 = vadd.f32 %v2941_v13, %v1080_v49  ;;  %v1329_v52 = vpop.f32.mrb[60].mxu0  ;;  %v1082_v53 = vpop.f32.mrb[61].mxu1 }
 0x18e   :  { %v1331_v54 = vpop.f32.mrb[61].mxu0  ;;  %v1083_v55 = vpop.f32.mrb[62].mxu1 }
 0x18f   :  { %2149 = vst [vmem:[%s3081_s3 + $0x70] sm:$0xff] %v2074_v50   ;;  %v1330_v56 = vadd.f32 %v1329_v52, %v1081_v51  ;;  %v1084_v57 = vadd.f32 %v2941_v13, %v1083_v55  ;;  %v1332_v58 = vpop.f32.mrb[62].mxu0  ;;  %v1085_v59 = vpop.f32.mrb[63].mxu1 }
 0x190   :  { %v1334_v60 = vpop.f32.mrb[63].mxu0 }
 0x191   :  { %v1333_v61 = vadd.f32 %v1332_v58, %v1084_v57  ;;  %v1454_v62 = vmax.f32 %v1330_v56, 0.0 }
 0x193   :  { %v1455_v63 = vmax.f32 %v1333_v61, 0.0 }
 0x194   :  { %v1088_v0 = vpop.f32.mrb[64].mxu1 }
 0x195   :  { %v2079_v1 = vpack.c.bf16 %v1455_v63, %v1454_v62  ;;  %v1089_v2 = vadd.f32 %v2941_v13, %v1088_v0  ;;  %v1337_v3 = vpop.f32.mrb[64].mxu0  ;;  %v1090_v4 = vpop.f32.mrb[65].mxu1 }
 0x196   :  { %v1339_v5 = vpop.f32.mrb[65].mxu0  ;;  %v1091_v6 = vpop.f32.mrb[66].mxu1 }
 0x197   :  { %2150 = vst [vmem:[%s3081_s3 + $0x78] sm:$0xff] %v2079_v1   ;;  %v1338_v7 = vadd.f32 %v1337_v3, %v1089_v2  ;;  %v1092_v8 = vadd.f32 %v2941_v13, %v1091_v6  ;;  %v1340_v9 = vpop.f32.mrb[66].mxu0  ;;  %v1093_v10 = vpop.f32.mrb[67].mxu1 }
 0x198   :  { %v1342_v11 = vpop.f32.mrb[67].mxu0 }
 0x199   :  { %v1341_v12 = vadd.f32 %v1340_v9, %v1092_v8  ;;  %v1456_v14 = vmax.f32 %v1338_v7, 0.0 }
 0x19b   :  { %v1457_v15 = vmax.f32 %v1341_v12, 0.0 }
 0x19c   :  { %v1096_v16 = vpop.f32.mrb[68].mxu1 }
 0x19d   :  { %v2084_v17 = vpack.c.bf16 %v1457_v15, %v1456_v14  ;;  %v1097_v18 = vadd.f32 %v2941_v13, %v1096_v16  ;;  %v1345_v19 = vpop.f32.mrb[68].mxu0  ;;  %v1098_v20 = vpop.f32.mrb[69].mxu1 }
 0x19e   :  { %v1347_v21 = vpop.f32.mrb[69].mxu0  ;;  %v1099_v22 = vpop.f32.mrb[70].mxu1 }
 0x19f   :  { %2151 = vst [vmem:[%s3081_s3 + $0x80] sm:$0xff] %v2084_v17   ;;  %v1346_v23 = vadd.f32 %v1345_v19, %v1097_v18  ;;  %v1100_v24 = vadd.f32 %v2941_v13, %v1099_v22  ;;  %v1348_v25 = vpop.f32.mrb[70].mxu0  ;;  %v1101_v26 = vpop.f32.mrb[71].mxu1 }
 0x1a0   :  { %v1350_v27 = vpop.f32.mrb[71].mxu0 }
 0x1a1   :  { %v1349_v28 = vadd.f32 %v1348_v25, %v1100_v24  ;;  %v1458_v29 = vmax.f32 %v1346_v23, 0.0 }
 0x1a3   :  { %v1459_v30 = vmax.f32 %v1349_v28, 0.0 }
 0x1a4   :  { %v1104_v31 = vpop.f32.mrb[72].mxu1 }
 0x1a5   :  { %v2089_v32 = vpack.c.bf16 %v1459_v30, %v1458_v29  ;;  %v1105_v33 = vadd.f32 %v2941_v13, %v1104_v31  ;;  %v1353_v34 = vpop.f32.mrb[72].mxu0  ;;  %v1106_v35 = vpop.f32.mrb[73].mxu1 }
 0x1a6   :  { %v1355_v36 = vpop.f32.mrb[73].mxu0  ;;  %v1107_v37 = vpop.f32.mrb[74].mxu1 }
 0x1a7   :  { %2152 = vst [vmem:[%s3081_s3 + $0x88] sm:$0xff] %v2089_v32   ;;  %v1354_v38 = vadd.f32 %v1353_v34, %v1105_v33  ;;  %v1108_v39 = vadd.f32 %v2941_v13, %v1107_v37  ;;  %v1356_v40 = vpop.f32.mrb[74].mxu0  ;;  %v1109_v41 = vpop.f32.mrb[75].mxu1 }
 0x1a8   :  { %v1358_v42 = vpop.f32.mrb[75].mxu0 }
 0x1a9   :  { %v1357_v43 = vadd.f32 %v1356_v40, %v1108_v39  ;;  %v1460_v44 = vmax.f32 %v1354_v38, 0.0 }
 0x1ab   :  { %v1461_v45 = vmax.f32 %v1357_v43, 0.0 }
 0x1ac   :  { %v1112_v46 = vpop.f32.mrb[76].mxu1 }
 0x1ad   :  { %v2094_v47 = vpack.c.bf16 %v1461_v45, %v1460_v44  ;;  %v1113_v48 = vadd.f32 %v2941_v13, %v1112_v46  ;;  %v1361_v49 = vpop.f32.mrb[76].mxu0  ;;  %v1114_v50 = vpop.f32.mrb[77].mxu1 }
 0x1ae   :  { %v1363_v51 = vpop.f32.mrb[77].mxu0  ;;  %v1115_v52 = vpop.f32.mrb[78].mxu1 }
 0x1af   :  { %2153 = vst [vmem:[%s3081_s3 + $0x90] sm:$0xff] %v2094_v47   ;;  %v1362_v53 = vadd.f32 %v1361_v49, %v1113_v48  ;;  %v1116_v54 = vadd.f32 %v2941_v13, %v1115_v52  ;;  %v1364_v55 = vpop.f32.mrb[78].mxu0  ;;  %v1117_v56 = vpop.f32.mrb[79].mxu1 }
 0x1b0   :  { %v1366_v57 = vpop.f32.mrb[79].mxu0 }
 0x1b1   :  { %v1365_v58 = vadd.f32 %v1364_v55, %v1116_v54  ;;  %v1462_v59 = vmax.f32 %v1362_v53, 0.0 }
 0x1b3   :  { %v1463_v60 = vmax.f32 %v1365_v58, 0.0 }
 0x1b4   :  { %v1120_v61 = vpop.f32.mrb[80].mxu1 }
 0x1b5   :  { %v2099_v62 = vpack.c.bf16 %v1463_v60, %v1462_v59  ;;  %v1121_v63 = vadd.f32 %v2941_v13, %v1120_v61  ;;  %v1369_v0 = vpop.f32.mrb[80].mxu0  ;;  %v1122_v1 = vpop.f32.mrb[81].mxu1 }
 0x1b6   :  { %v1371_v2 = vpop.f32.mrb[81].mxu0  ;;  %v1123_v3 = vpop.f32.mrb[82].mxu1 }
 0x1b7   :  { %2154 = vst [vmem:[%s3081_s3 + $0x98] sm:$0xff] %v2099_v62   ;;  %v1370_v4 = vadd.f32 %v1369_v0, %v1121_v63  ;;  %v1124_v5 = vadd.f32 %v2941_v13, %v1123_v3  ;;  %v1372_v6 = vpop.f32.mrb[82].mxu0  ;;  %v1125_v7 = vpop.f32.mrb[83].mxu1 }
 0x1b8   :  { %v1374_v8 = vpop.f32.mrb[83].mxu0 }
 0x1b9   :  { %v1373_v9 = vadd.f32 %v1372_v6, %v1124_v5  ;;  %v1464_v10 = vmax.f32 %v1370_v4, 0.0 }
 0x1bb   :  { %v1465_v11 = vmax.f32 %v1373_v9, 0.0 }
 0x1bc   :  { %v1128_v12 = vpop.f32.mrb[84].mxu1 }
 0x1bd   :  { %v2104_v14 = vpack.c.bf16 %v1465_v11, %v1464_v10  ;;  %v1129_v15 = vadd.f32 %v2941_v13, %v1128_v12  ;;  %v1377_v16 = vpop.f32.mrb[84].mxu0  ;;  %v1130_v17 = vpop.f32.mrb[85].mxu1 }
 0x1be   :  { %v1379_v18 = vpop.f32.mrb[85].mxu0  ;;  %v1131_v19 = vpop.f32.mrb[86].mxu1 }
 0x1bf   :  { %2155 = vst [vmem:[%s3081_s3 + $0xa0] sm:$0xff] %v2104_v14   ;;  %v1378_v20 = vadd.f32 %v1377_v16, %v1129_v15  ;;  %v1132_v21 = vadd.f32 %v2941_v13, %v1131_v19  ;;  %v1380_v22 = vpop.f32.mrb[86].mxu0  ;;  %v1133_v23 = vpop.f32.mrb[87].mxu1 }
 0x1c0   :  { %v1382_v24 = vpop.f32.mrb[87].mxu0 }
 0x1c1   :  { %v1381_v25 = vadd.f32 %v1380_v22, %v1132_v21  ;;  %v1466_v26 = vmax.f32 %v1378_v20, 0.0 }
 0x1c3   :  { %v1467_v27 = vmax.f32 %v1381_v25, 0.0 }
 0x1c4   :  { %v1136_v28 = vpop.f32.mrb[88].mxu1 }
 0x1c5   :  { %v2109_v29 = vpack.c.bf16 %v1467_v27, %v1466_v26  ;;  %v1137_v30 = vadd.f32 %v2941_v13, %v1136_v28  ;;  %v1385_v31 = vpop.f32.mrb[88].mxu0  ;;  %v1138_v32 = vpop.f32.mrb[89].mxu1 }
 0x1c6   :  { %v1387_v33 = vpop.f32.mrb[89].mxu0  ;;  %v1139_v34 = vpop.f32.mrb[90].mxu1 }
 0x1c7   :  { %2156 = vst [vmem:[%s3081_s3 + $0xa8] sm:$0xff] %v2109_v29   ;;  %v1386_v35 = vadd.f32 %v1385_v31, %v1137_v30  ;;  %v1140_v36 = vadd.f32 %v2941_v13, %v1139_v34  ;;  %v1388_v37 = vpop.f32.mrb[90].mxu0  ;;  %v1141_v38 = vpop.f32.mrb[91].mxu1 }
 0x1c8   :  { %v1390_v39 = vpop.f32.mrb[91].mxu0 }
 0x1c9   :  { %v1389_v40 = vadd.f32 %v1388_v37, %v1140_v36  ;;  %v1468_v41 = vmax.f32 %v1386_v35, 0.0 }
 0x1cb   :  { %v1469_v42 = vmax.f32 %v1389_v40, 0.0 }
 0x1cc   :  { %v1144_v43 = vpop.f32.mrb[92].mxu1 }
 0x1cd   :  { %v2114_v44 = vpack.c.bf16 %v1469_v42, %v1468_v41  ;;  %v1145_v45 = vadd.f32 %v2941_v13, %v1144_v43  ;;  %v1393_v46 = vpop.f32.mrb[92].mxu0  ;;  %v1146_v47 = vpop.f32.mrb[93].mxu1 }
 0x1ce   :  { %v1395_v48 = vpop.f32.mrb[93].mxu0  ;;  %v1147_v49 = vpop.f32.mrb[94].mxu1 }
 0x1cf   :  { %2157 = vst [vmem:[%s3081_s3 + $0xb0] sm:$0xff] %v2114_v44   ;;  %v1394_v50 = vadd.f32 %v1393_v46, %v1145_v45  ;;  %v1148_v51 = vadd.f32 %v2941_v13, %v1147_v49  ;;  %v1396_v52 = vpop.f32.mrb[94].mxu0  ;;  %v1149_v53 = vpop.f32.mrb[95].mxu1 }
 0x1d0   :  { %v1398_v54 = vpop.f32.mrb[95].mxu0 }
 0x1d1   :  { %v1397_v55 = vadd.f32 %v1396_v52, %v1148_v51  ;;  %v1470_v56 = vmax.f32 %v1394_v50, 0.0 }
 0x1d3   :  { %v1471_v57 = vmax.f32 %v1397_v55, 0.0 }
 0x1d4   :  { %v1152_v58 = vpop.f32.mrb[96].mxu1 }
 0x1d5   :  { %v2119_v59 = vpack.c.bf16 %v1471_v57, %v1470_v56  ;;  %v1153_v60 = vadd.f32 %v2941_v13, %v1152_v58  ;;  %v1401_v61 = vpop.f32.mrb[96].mxu0  ;;  %v1154_v62 = vpop.f32.mrb[97].mxu1 }
 0x1d6   :  { %v1403_v63 = vpop.f32.mrb[97].mxu0  ;;  %v1155_v0 = vpop.f32.mrb[98].mxu1 }
 0x1d7   :  { %2158 = vst [vmem:[%s3081_s3 + $0xb8] sm:$0xff] %v2119_v59   ;;  %v1402_v1 = vadd.f32 %v1401_v61, %v1153_v60  ;;  %v1156_v2 = vadd.f32 %v2941_v13, %v1155_v0  ;;  %v1404_v3 = vpop.f32.mrb[98].mxu0  ;;  %v1157_v4 = vpop.f32.mrb[99].mxu1 }
 0x1d8   :  { %v1406_v5 = vpop.f32.mrb[99].mxu0 }
 0x1d9   :  { %v1405_v6 = vadd.f32 %v1404_v3, %v1156_v2  ;;  %v1472_v7 = vmax.f32 %v1402_v1, 0.0 }
 0x1db   :  { %v1473_v8 = vmax.f32 %v1405_v6, 0.0 }
 0x1dc   :  { %v1160_v9 = vpop.f32.mrb[100].mxu1 }
 0x1dd   :  { %v2124_v10 = vpack.c.bf16 %v1473_v8, %v1472_v7  ;;  %v1161_v11 = vadd.f32 %v2941_v13, %v1160_v9  ;;  %v1409_v12 = vpop.f32.mrb[100].mxu0  ;;  %v1162_v14 = vpop.f32.mrb[101].mxu1 }
 0x1de   :  { %v1411_v15 = vpop.f32.mrb[101].mxu0  ;;  %v1163_v16 = vpop.f32.mrb[102].mxu1 }
 0x1df   :  { %2159 = vst [vmem:[%s3081_s3 + $0xc0] sm:$0xff] %v2124_v10   ;;  %v1410_v17 = vadd.f32 %v1409_v12, %v1161_v11  ;;  %v1164_v18 = vadd.f32 %v2941_v13, %v1163_v16  ;;  %v1412_v19 = vpop.f32.mrb[102].mxu0  ;;  %v1165_v20 = vpop.f32.mrb[103].mxu1 }
 0x1e0   :  { %v1414_v21 = vpop.f32.mrb[103].mxu0 }
 0x1e1   :  { %v1413_v22 = vadd.f32 %v1412_v19, %v1164_v18  ;;  %v1474_v23 = vmax.f32 %v1410_v17, 0.0 }
 0x1e3   :  { %v1475_v24 = vmax.f32 %v1413_v22, 0.0 }
 0x1e4   :  { %v1168_v25 = vpop.f32.mrb[104].mxu1 }
 0x1e5   :  { %v2129_v26 = vpack.c.bf16 %v1475_v24, %v1474_v23  ;;  %v1169_v27 = vadd.f32 %v2941_v13, %v1168_v25  ;;  %v1417_v28 = vpop.f32.mrb[104].mxu0  ;;  %v1170_v29 = vpop.f32.mrb[105].mxu1 }
 0x1e6   :  { %v1419_v30 = vpop.f32.mrb[105].mxu0  ;;  %v1171_v31 = vpop.f32.mrb[106].mxu1 }
 0x1e7   :  { %2160 = vst [vmem:[%s3081_s3 + $0xc8] sm:$0xff] %v2129_v26   ;;  %v1418_v32 = vadd.f32 %v1417_v28, %v1169_v27  ;;  %v1172_v33 = vadd.f32 %v2941_v13, %v1171_v31  ;;  %v1420_v34 = vpop.f32.mrb[106].mxu0  ;;  %v1173_v35 = vpop.f32.mrb[107].mxu1 }
 0x1e8   :  { %v1422_v36 = vpop.f32.mrb[107].mxu0 }
 0x1e9   :  { %v1421_v37 = vadd.f32 %v1420_v34, %v1172_v33  ;;  %v1476_v38 = vmax.f32 %v1418_v32, 0.0 }
 0x1eb   :  { %v1477_v39 = vmax.f32 %v1421_v37, 0.0 }
 0x1ed   :  { %v2134_v40 = vpack.c.bf16 %v1477_v39, %v1476_v38 }
 0x1ef   :  { %2161 = vst [vmem:[%s3081_s3 + $0xd0] sm:$0xff] %v2134_v40  }

// kernel: deep_q_network_forward.7
= control target key start
LH: loop header
LB: loop body
LE: loop exit
PB: predicated region body
PF: predicated region fallthrough
CT: control target
= control target key end

     0   :  { %v2547_v0 = vmov 0   ;;  %v2548_v39 = vmov 0.0   ;;  %vm2549_vm0 = vmmov 0   ;;  %vm899_vm1 = vcmask 523264   ;;  %s3278_s1 = inlined_call_operand.vmem [shape: bf16[576,128], index: 1, kind: input, shape index: {}]   ;;  %s3279_s0 = inlined_call_operand.vmem [shape: bf16[304,576], index: 0, kind: input, shape index: {}]   ;;  %s3280_s2 = inlined_call_operand.vmem [shape: f32[1,128], index: 2, kind: input, shape index: {}]   ;;  %s3281_s3 = inlined_call_operand.vmem [shape: bf16[304,128], index: 3, kind: output, shape index: {}]  }
   0x1   :  { %957 = vmatprep.subr.bf16.mxu1 %v2547_v0  ;;  %1142 = vmatprep.subr.bf16.mxu0 %v2547_v0  ;;  %v2378_v1 = vld [vmem:[%s3278_s1] sm:$0xff]   ;;  %v2380_v3 = vld [vmem:[%s3278_s1 + $0x8] sm:$0xff]   ;;  %v2382_v5 = vld [vmem:[%s3278_s1 + $0x10] sm:$0xff]  }
   0x2   :  { %v2578_v2 = vld [vmem:[%s3278_s1 + $0x80] sm:$0xff]   ;;  %958 = vmatpush1.bf16.msra.mxu1 %v2378_v1  ;;  %v2588_v4 = vld [vmem:[%s3278_s1 + $0x88] sm:$0xff]   ;;  %v2599_v6 = vld [vmem:[%s3278_s1 + $0x90] sm:$0xff]  }
   0x3   :  { %1143 = vmatpush1.bf16.msra.mxu0 %v2578_v2  ;;  %959 = vmatprep.subr.bf16.mxu1 %v2547_v0  ;;  %v2384_v7 = vld [vmem:[%s3278_s1 + $0x18] sm:$0xff]   ;;  %v2386_v9 = vld [vmem:[%s3278_s1 + $0x20] sm:$0xff]   ;;  %v2388_v11 = vld [vmem:[%s3278_s1 + $0x28] sm:$0xff]  }
   0x4   :  { %1144 = vmatprep.subr.bf16.mxu0 %v2547_v0  ;;  %v2610_v8 = vld [vmem:[%s3278_s1 + $0x98] sm:$0xff]   ;;  %v2621_v10 = vld [vmem:[%s3278_s1 + $0xa0] sm:$0xff]   ;;  %v2632_v12 = vld [vmem:[%s3278_s1 + $0xa8] sm:$0xff]  }
   0x5   :  { %v2390_v13 = vld [vmem:[%s3278_s1 + $0x30] sm:$0xff]   ;;  %v2392_v15 = vld [vmem:[%s3278_s1 + $0x38] sm:$0xff]   ;;  %v2394_v17 = vld [vmem:[%s3278_s1 + $0x40] sm:$0xff]  }
   0x6   :  { %960 = vmatpush1.bf16.msra.mxu1 %v2380_v3  ;;  %v2643_v14 = vld [vmem:[%s3278_s1 + $0xb0] sm:$0xff]   ;;  %v2654_v16 = vld [vmem:[%s3278_s1 + $0xb8] sm:$0xff]   ;;  %v2665_v18 = vld [vmem:[%s3278_s1 + $0xc0] sm:$0xff]  }
   0x7   :  { %1145 = vmatpush1.bf16.msra.mxu0 %v2588_v4  ;;  %961 = vmatprep.subr.bf16.mxu1 %v2547_v0  ;;  %v2412_v19 = vld [vmem:[%s3279_s0 + $0x4] ss:$20 sps:$4 sm:$0xff]   ;;  %v2396_v20 = vld [vmem:[%s3278_s1 + $0x48] sm:$0xff]   ;;  %v2398_v23 = vld [vmem:[%s3278_s1 + $0x50] sm:$0xff]  }
   0x8   :  { %1146 = vmatprep.subr.bf16.mxu0 %v2547_v0  ;;  %v2415_v21 = vld [vmem:[%s3279_s0 + $0xc] ss:$20 sps:$4 sm:$0xff]   ;;  %989 = vmatprep.mubr.bf16.mxu1 %v2412_v19  ;;  %v2693_v24 = vld [vmem:[%s3278_s1 + $0xd0] sm:$0xff]   ;;  %v2400_v25 = vld [vmem:[%s3278_s1 + $0x58] sm:$0xff]  }
   0x9   :  { %v2682_v22 = vld [vmem:[%s3278_s1 + $0xc8] sm:$0xff]   ;;  %1174 = vmatprep.mubr.bf16.mxu0 %v2415_v21  ;;  %v2704_v26 = vld [vmem:[%s3278_s1 + $0xd8] sm:$0xff]   ;;  %v2402_v27 = vld [vmem:[%s3278_s1 + $0x60] sm:$0xff]  }
   0xa   :  { %962 = vmatpush1.bf16.msra.mxu1 %v2382_v5  ;;  %v2715_v28 = vld [vmem:[%s3278_s1 + $0xe0] sm:$0xff]   ;;  %v2404_v29 = vld [vmem:[%s3278_s1 + $0x68] sm:$0xff]   ;;  %v2406_v31 = vld [vmem:[%s3278_s1 + $0x70] sm:$0xff]  }
   0xb   :  { %1147 = vmatpush1.bf16.msra.mxu0 %v2599_v6  ;;  %963 = vmatprep.subr.bf16.mxu1 %v2547_v0  ;;  %v2726_v30 = vld [vmem:[%s3278_s1 + $0xe8] sm:$0xff]   ;;  %v2737_v32 = vld [vmem:[%s3278_s1 + $0xf0] sm:$0xff]   ;;  %v2408_v33 = vld [vmem:[%s3278_s1 + $0x78] sm:$0xff]  }
   0xc   :  { %1148 = vmatprep.subr.bf16.mxu0 %v2547_v0  ;;  %v2748_v34 = vld [vmem:[%s3278_s1 + $0xf8] sm:$0xff]   ;;  %v2410_v35 = vld [vmem:[%s3279_s0] ss:$20 sps:$4 sm:$0xff]   ;;  %v2429_v41 = vld [vmem:[%s3278_s1 + $0x108] sm:$0xff]  }
   0xd   :  { %v2413_v36 = vld [vmem:[%s3279_s0 + $0x8] ss:$20 sps:$4 sm:$0xff]   ;;  %v2417_v37 = vld [vmem:[%s3279_s0 + $0x2c] ss:$20 sps:$4 sm:$0xff]   ;;  %v2422_v43 = vld [vmem:[%s3279_s0 + $0x30] ss:$20 sps:$4 sm:$0xff]  }
   0xe   :  { %964 = vmatpush1.bf16.msra.mxu1 %v2384_v7  ;;  %v2416_v38 = vld [vmem:[%s3278_s1 + $0x100] sm:$0xff]   ;;  %v2419_v40 = vld [vmem:[%s3279_s0 + $0x34] ss:$20 sps:$4 sm:$0xff]   ;;  %v2425_v45 = vld [vmem:[%s3279_s0 + $0x5c] ss:$20 sps:$4 sm:$0xff]  }
   0xf   :  { %1149 = vmatpush1.bf16.msra.mxu0 %v2610_v8  ;;  %965 = vmatprep.subr.bf16.mxu1 %v2547_v0  ;;  %v2421_v42 = vld [vmem:[%s3279_s0 + $0x28] ss:$20 sps:$4 sm:$0xff]   ;;  %v2448_v46 = vld [vmem:[%s3278_s1 + $0x110] sm:$0xff]   ;;  %v2428_v49 = vld [vmem:[%s3279_s0 + $0x58] ss:$20 sps:$4 sm:$0xff]  }
  0x10   :  { %1150 = vmatprep.subr.bf16.mxu0 %v2547_v0  ;;  %v2423_v44 = vld [vmem:[%s3279_s0 + $0x54] ss:$20 sps:$4 sm:$0xff]   ;;  %v2461_v47 = vld [vmem:[%s3278_s1 + $0x118] sm:$0xff]   ;;  %v2427_v48 = vld [vmem:[%s3279_s0 + $0x50] ss:$20 sps:$4 sm:$0xff]  }
  0x11   :  { %v2430_v50 = vld [vmem:[%s3279_s0 + $0x7c] ss:$20 sps:$4 sm:$0xff]   ;;  %v2432_v51 = vld [vmem:[%s3279_s0 + $0x84] ss:$20 sps:$4 sm:$0xff]   ;;  %v2435_v53 = vld [vmem:[%s3279_s0 + $0x80] ss:$20 sps:$4 sm:$0xff]  }
  0x12   :  { %966 = vmatpush1.bf16.msra.mxu1 %v2386_v9  ;;  %v2434_v52 = vld [vmem:[%s3279_s0 + $0x78] ss:$20 sps:$4 sm:$0xff]   ;;  %v2440_v56 = vld [vmem:[%s3279_s0 + $0xa0] ss:$20 sps:$4 sm:$0xff]   ;;  %v2441_v57 = vld [vmem:[%s3279_s0 + $0xa8] ss:$20 sps:$4 sm:$0xff]  }
  0x13   :  { %1151 = vmatpush1.bf16.msra.mxu0 %v2621_v10  ;;  %967 = vmatprep.subr.bf16.mxu1 %v2547_v0  ;;  %v2436_v54 = vld [vmem:[%s3279_s0 + $0xa4] ss:$20 sps:$4 sm:$0xff]   ;;  %v2438_v55 = vld [vmem:[%s3279_s0 + $0xac] ss:$20 sps:$4 sm:$0xff]   ;;  %v2444_v59 = vld [vmem:[%s3279_s0 + $0xd4] ss:$20 sps:$4 sm:$0xff]  }
  0x14   :  { %1152 = vmatprep.subr.bf16.mxu0 %v2547_v0  ;;  %v2442_v58 = vld [vmem:[%s3279_s0 + $0xcc] ss:$20 sps:$4 sm:$0xff]   ;;  %v2446_v60 = vld [vmem:[%s3279_s0 + $0xc8] ss:$20 sps:$4 sm:$0xff]   ;;  %v2447_v61 = vld [vmem:[%s3279_s0 + $0xd0] ss:$20 sps:$4 sm:$0xff]  }
  0x15   :  { %v2449_v62 = vld [vmem:[%s3279_s0 + $0xf4] ss:$20 sps:$4 sm:$0xff]   ;;  %v2451_v63 = vld [vmem:[%s3279_s0 + $0xfc] ss:$20 sps:$4 sm:$0xff]   ;;  %v2459_v5 = vld [vmem:[%s3279_s0 + $0x118] ss:$20 sps:$4 sm:$0xff]  }
  0x16   :  { %968 = vmatpush1.bf16.msra.mxu1 %v2388_v11  ;;  %v2453_v1 = vld [vmem:[%s3279_s0 + $0xf0] ss:$20 sps:$4 sm:$0xff]   ;;  %v2466_v9 = vld [vmem:[%s3279_s0 + $0x140] ss:$20 sps:$4 sm:$0xff]   ;;  %v2481_v19 = vld [vmem:[%s3279_s0 + $0x38] ss:$20 sps:$4 sm:$0xff]  }
  0x17   :  { %1153 = vmatpush1.bf16.msra.mxu0 %v2632_v12  ;;  %969 = vmatprep.subr.bf16.mxu1 %v2547_v0  ;;  %v2455_v3 = vld [vmem:[%s3279_s0 + $0x11c] ss:$20 sps:$4 sm:$0xff]   ;;  %v2462_v7 = vld [vmem:[%s3279_s0 + $0x144] ss:$20 sps:$4 sm:$0xff]   ;;  %v2468_v11 = vld [vmem:[%s3279_s0 + $0x16c] ss:$20 sps:$4 sm:$0xff]  }
  0x18   :  { %1154 = vmatprep.subr.bf16.mxu0 %v2547_v0  ;;  %v2484_v21 = vld [vmem:[%s3279_s0 + $0x1e0] ss:$20 sps:$4 sm:$0xff]  }
  0x1a   :  { %970 = vmatpush1.bf16.msra.mxu1 %v2390_v13  ;;  %v2473_v13 = vld [vmem:[%s3279_s0 + $0x170] ss:$20 sps:$4 sm:$0xff]  }
  0x1b   :  { %1155 = vmatpush1.bf16.msra.mxu0 %v2643_v14  ;;  %971 = vmatprep.subr.bf16.mxu1 %v2547_v0 }
  0x1c   :  { %1156 = vmatprep.subr.bf16.mxu0 %v2547_v0 }
  0x1e   :  { %972 = vmatpush1.bf16.msra.mxu1 %v2392_v15  ;;  %v2476_v15 = vld [vmem:[%s3279_s0 + $0x190] ss:$20 sps:$4 sm:$0xff]  }
  0x1f   :  { %1157 = vmatpush1.bf16.msra.mxu0 %v2654_v16  ;;  %973 = vmatprep.subr.bf16.mxu1 %v2547_v0 }
  0x20   :  { %1158 = vmatprep.subr.bf16.mxu0 %v2547_v0 }
  0x22   :  { %974 = vmatpush1.bf16.msra.mxu1 %v2394_v17  ;;  %v2478_v17 = vld [vmem:[%s3279_s0 + $0x1bc] ss:$20 sps:$4 sm:$0xff]  }
  0x23   :  { %1159 = vmatpush1.bf16.msra.mxu0 %v2665_v18  ;;  %975 = vmatprep.subr.bf16.mxu1 %v2547_v0 }
  0x24   :  { %1160 = vmatprep.subr.bf16.mxu0 %v2547_v0 }
  0x26   :  { %976 = vmatpush1.bf16.msra.mxu1 %v2396_v20  ;;  %v2482_v20 = vld [vmem:[%s3279_s0 + $0x1e4] ss:$20 sps:$4 sm:$0xff]  }
  0x27   :  { %1161 = vmatpush1.bf16.msra.mxu0 %v2682_v22  ;;  %977 = vmatprep.subr.bf16.mxu1 %v2547_v0 }
  0x28   :  { %1162 = vmatprep.subr.bf16.mxu0 %v2547_v0 }
  0x2a   :  { %978 = vmatpush1.bf16.msra.mxu1 %v2398_v23  ;;  %v2486_v23 = vld [vmem:[%s3279_s0 + $0x20c] ss:$20 sps:$4 sm:$0xff]  }
  0x2b   :  { %1163 = vmatpush1.bf16.msra.mxu0 %v2693_v24  ;;  %979 = vmatprep.subr.bf16.mxu1 %v2547_v0 }
  0x2c   :  { %1164 = vmatprep.subr.bf16.mxu0 %v2547_v0 }
  0x2e   :  { %980 = vmatpush1.bf16.msra.mxu1 %v2400_v25  ;;  %v2489_v25 = vld [vmem:[%s3279_s0 + $0x88] ss:$20 sps:$4 sm:$0xff]  }
  0x2f   :  { %1165 = vmatpush1.bf16.msra.mxu0 %v2704_v26  ;;  %981 = vmatprep.subr.bf16.mxu1 %v2547_v0 }
  0x30   :  { %1166 = vmatprep.subr.bf16.mxu0 %v2547_v0 }
  0x32   :  { %982 = vmatpush1.bf16.msra.mxu1 %v2402_v27  ;;  %v2492_v27 = vld [vmem:[%s3279_s0 + $0x230] ss:$20 sps:$4 sm:$0xff]  }
  0x33   :  { %1167 = vmatpush1.bf16.msra.mxu0 %v2715_v28  ;;  %983 = vmatprep.subr.bf16.mxu1 %v2547_v0 }
  0x34   :  { %1168 = vmatprep.subr.bf16.mxu0 %v2547_v0 }
  0x36   :  { %984 = vmatpush1.bf16.msra.mxu1 %v2404_v29  ;;  %v2494_v29 = vld [vmem:[%s3279_s0 + $0x25c] ss:$20 sps:$4 sm:$0xff]  }
  0x37   :  { %1169 = vmatpush1.bf16.msra.mxu0 %v2726_v30  ;;  %985 = vmatprep.subr.bf16.mxu1 %v2547_v0 }
  0x38   :  { %1170 = vmatprep.subr.bf16.mxu0 %v2547_v0 }
  0x3a   :  { %986 = vmatpush1.bf16.msra.mxu1 %v2406_v31  ;;  %v2497_v31 = vld [vmem:[%s3279_s0 + $0xd8] ss:$20 sps:$4 sm:$0xff]  }
  0x3b   :  { %1171 = vmatpush1.bf16.msra.mxu0 %v2737_v32  ;;  %987 = vmatprep.subr.bf16.mxu1 %v2547_v0 }
  0x3c   :  { %1172 = vmatprep.subr.bf16.mxu0 %v2547_v0 }
  0x3e   :  { %988 = vmatpush1.bf16.msra.mxu1 %v2408_v33  ;;  %v2500_v33 = vld [vmem:[%s3279_s0 + $0x280] ss:$20 sps:$4 sm:$0xff]  }
  0x3f   :  { %1173 = vmatpush1.bf16.msra.mxu0 %v2748_v34  ;;  %2191 = vmatprep.subr.bf16.mxu1 %v2547_v0 }
  0x40   :  { %2107 = vmatprep.subr.bf16.mxu0 %v2548_v39 }
  0x41   :  { %990 = vmatmul.mubr.bf16.vlgmr.msra.gmra.mrb[0].mxu1 %v2410_v35  ;;  %v2502_v35 = vld [vmem:[%s3279_s0 + $0x2ac] ss:$20 sps:$4 sm:$0xff]  }
  0x42   :  { %1175 = vmatmul.mubr.bf16.vlgmr.msra.gmra.mrb[0].mxu0 %v2413_v36  ;;  %997 = vmatprep.mubr.bf16.mxu1 %v2417_v37  ;;  %v2504_v36 = vld [vmem:[%s3279_s0 + $0x2a8] ss:$20 sps:$4 sm:$0xff]  }
  0x43   :  { %2108 = vmatpush3.bf16.msra.mxu0 %v2416_v38  ;;  %2207 = vmatpush1.bf16.msra.mxu1 %v2578_v2  ;;  %v2454_v2 = vld [vmem:[%s3279_s0 + $0xf8] ss:$20 sps:$4 sm:$0xff]   ;;  %v2505_v37 = vld [vmem:[%s3279_s0 + $0x128] ss:$20 sps:$4 sm:$0xff]  }
  0x44   :  { %1182 = vmatprep.mubr.bf16.mxu0 %v2419_v40  ;;  %2192 = vmatprep.subr.bf16.mxu1 %v2547_v0  ;;  %v2506_v38 = vld [vmem:[%s3279_s0 + $0x2d4] ss:$20 sps:$4 sm:$0xff]   ;;  %v2508_v40 = vld [vmem:[%s3279_s0 + $0x2d0] ss:$20 sps:$4 sm:$0xff]  }
  0x45   :  { %2109 = vmatprep.subr.bf16.mxu0 %v2548_v39 }
  0x47   :  { %2208 = vmatpush1.bf16.msra.mxu1 %v2588_v4  ;;  %2110 = vmatpush3.bf16.msra.mxu0 %v2429_v41  ;;  %v2457_v4 = vld [vmem:[%s3279_s0 + $0x124] ss:$20 sps:$4 sm:$0xff]  }
  0x48   :  { %2193 = vmatprep.subr.bf16.mxu1 %v2547_v0  ;;  %2111 = vmatprep.subr.bf16.mxu0 %v2548_v39  ;;  %v2509_v41 = vld [vmem:[%s3279_s0 + $0x150] ss:$20 sps:$4 sm:$0xff]  }
  0x49   :  { %998 = vmatmul.mubr.bf16.gmra.mrb[4].mxu1 %v2421_v42  ;;  %v2512_v42 = vld [vmem:[%s3279_s0 + $0x19c] ss:$20 sps:$4 sm:$0xff]  }
  0x4a   :  { %1183 = vmatmul.mubr.bf16.gmra.mrb[4].mxu0 %v2422_v43  ;;  %1005 = vmatprep.mubr.bf16.mxu1 %v2423_v44  ;;  %v2510_v43 = vld [vmem:[%s3279_s0 + $0x198] ss:$20 sps:$4 sm:$0xff]  }
  0x4b   :  { %1190 = vmatprep.mubr.bf16.mxu0 %v2425_v45  ;;  %2209 = vmatpush1.bf16.msra.mxu1 %v2599_v6  ;;  %v2460_v6 = vld [vmem:[%s3279_s0 + $0x120] ss:$20 sps:$4 sm:$0xff]   ;;  %v2513_v44 = vld [vmem:[%s3279_s0 + $0x178] ss:$20 sps:$4 sm:$0xff]  }
  0x4c   :  { %2194 = vmatprep.subr.bf16.mxu1 %v2547_v0  ;;  %2112 = vmatpush3.bf16.msra.mxu0 %v2448_v46  ;;  %v2514_v45 = vld [vmem:[%s3279_s0 + $0x1c4] ss:$20 sps:$4 sm:$0xff]   ;;  %v2516_v46 = vld [vmem:[%s3279_s0 + $0x1c0] ss:$20 sps:$4 sm:$0xff]  }
  0x4d   :  { %2113 = vmatprep.subr.bf16.mxu0 %v2548_v39 }
  0x4f   :  { %2210 = vmatpush1.bf16.msra.mxu1 %v2610_v8  ;;  %v2464_v8 = vld [vmem:[%s3279_s0 + $0x14c] ss:$20 sps:$4 sm:$0xff]  }
  0x50   :  { %2195 = vmatprep.subr.bf16.mxu1 %v2547_v0  ;;  %2114 = vmatpush3.bf16.msra.mxu0 %v2461_v47  ;;  %v2517_v47 = vld [vmem:[%s3279_s0 + $0x1a0] ss:$20 sps:$4 sm:$0xff]  }
  0x51   :  { %1006 = vmatmul.mubr.bf16.gmra.mrb[8].mxu1 %v2427_v48  ;;  %v2518_v48 = vld [vmem:[%s3279_s0 + $0x1ec] ss:$20 sps:$4 sm:$0xff]  }
  0x52   :  { %1191 = vmatmul.mubr.bf16.gmra.mrb[8].mxu0 %v2428_v49  ;;  %1013 = vmatprep.mubr.bf16.mxu1 %v2430_v50  ;;  %v2520_v49 = vld [vmem:[%s3279_s0 + $0x1e8] ss:$20 sps:$4 sm:$0xff]  }
  0x53   :  { %1198 = vmatprep.mubr.bf16.mxu0 %v2432_v51  ;;  %2211 = vmatpush1.bf16.msra.mxu1 %v2621_v10  ;;  %v2467_v10 = vld [vmem:[%s3279_s0 + $0x148] ss:$20 sps:$4 sm:$0xff]  }
  0x54   :  { %2196 = vmatprep.subr.bf16.mxu1 %v2547_v0  ;;  %v2521_v50 = vld [vmem:[%s3279_s0 + $0x1c8] ss:$20 sps:$4 sm:$0xff]  }
  0x55   :  { %v2522_v51 = vld [vmem:[%s3279_s0 + $0x214] ss:$20 sps:$4 sm:$0xff]  }
  0x57   :  { %2212 = vmatpush1.bf16.msra.mxu1 %v2632_v12  ;;  %v2470_v12 = vld [vmem:[%s3279_s0 + $0x174] ss:$20 sps:$4 sm:$0xff]  }
  0x58   :  { %2197 = vmatprep.subr.bf16.mxu1 %v2547_v0 }
  0x59   :  { %1014 = vmatmul.mubr.bf16.gmra.mrb[12].mxu1 %v2434_v52  ;;  %v2524_v52 = vld [vmem:[%s3279_s0 + $0x210] ss:$20 sps:$4 sm:$0xff]  }
  0x5a   :  { %1199 = vmatmul.mubr.bf16.gmra.mrb[12].mxu0 %v2435_v53  ;;  %1021 = vmatprep.mubr.bf16.mxu1 %v2436_v54  ;;  %v2525_v53 = vld [vmem:[%s3279_s0 + $0x1f0] ss:$20 sps:$4 sm:$0xff]  }
  0x5b   :  { %1206 = vmatprep.mubr.bf16.mxu0 %v2438_v55  ;;  %2213 = vmatpush1.bf16.msra.mxu1 %v2643_v14  ;;  %v2474_v14 = vld [vmem:[%s3279_s0 + $0x194] ss:$20 sps:$4 sm:$0xff]   ;;  %v2526_v54 = vld [vmem:[%s3279_s0 + $0x23c] ss:$20 sps:$4 sm:$0xff]   ;;  %v2528_v55 = vld [vmem:[%s3279_s0 + $0x238] ss:$20 sps:$4 sm:$0xff]  }
  0x5c   :  { %2198 = vmatprep.subr.bf16.mxu1 %v2547_v0 }
  0x5f   :  { %2214 = vmatpush1.bf16.msra.mxu1 %v2654_v16  ;;  %v2477_v16 = vld [vmem:[%s3279_s0 + $0x10] ss:$20 sps:$4 sm:$0xff]  }
  0x60   :  { %2199 = vmatprep.subr.bf16.mxu1 %v2547_v0 }
  0x61   :  { %1022 = vmatmul.mubr.bf16.gmra.mrb[16].mxu1 %v2440_v56  ;;  %v2529_v56 = vld [vmem:[%s3279_s0 + $0x218] ss:$20 sps:$4 sm:$0xff]  }
  0x62   :  { %1207 = vmatmul.mubr.bf16.gmra.mrb[16].mxu0 %v2441_v57  ;;  %1029 = vmatprep.mubr.bf16.mxu1 %v2442_v58  ;;  %v2530_v57 = vld [vmem:[%s3279_s0 + $0x264] ss:$20 sps:$4 sm:$0xff]   ;;  %v2532_v58 = vld [vmem:[%s3279_s0 + $0x260] ss:$20 sps:$4 sm:$0xff]  }
  0x63   :  { %1214 = vmatprep.mubr.bf16.mxu0 %v2444_v59  ;;  %2215 = vmatpush1.bf16.msra.mxu1 %v2665_v18  ;;  %v2480_v18 = vld [vmem:[%s3279_s0 + $0x1b8] ss:$20 sps:$4 sm:$0xff]   ;;  %v2533_v59 = vld [vmem:[%s3279_s0 + $0x240] ss:$20 sps:$4 sm:$0xff]  }
  0x64   :  { %2200 = vmatprep.subr.bf16.mxu1 %v2547_v0 }
  0x67   :  { %2216 = vmatpush1.bf16.msra.mxu1 %v2682_v22  ;;  %v2485_v22 = vld [vmem:[%s3279_s0 + $0x60] ss:$20 sps:$4 sm:$0xff]  }
  0x68   :  { %2201 = vmatprep.subr.bf16.mxu1 %v2547_v0 }
  0x69   :  { %1030 = vmatmul.mubr.bf16.gmra.mrb[20].mxu1 %v2446_v60  ;;  %v2534_v60 = vld [vmem:[%s3279_s0 + $0x28c] ss:$20 sps:$4 sm:$0xff]  }
  0x6a   :  { %1215 = vmatmul.mubr.bf16.gmra.mrb[20].mxu0 %v2447_v61  ;;  %1037 = vmatprep.mubr.bf16.mxu1 %v2449_v62  ;;  %v2536_v61 = vld [vmem:[%s3279_s0 + $0x288] ss:$20 sps:$4 sm:$0xff]  }
  0x6b   :  { %1222 = vmatprep.mubr.bf16.mxu0 %v2451_v63  ;;  %2217 = vmatpush1.bf16.msra.mxu1 %v2693_v24  ;;  %v2488_v24 = vld [vmem:[%s3279_s0 + $0x208] ss:$20 sps:$4 sm:$0xff]  }
  0x6c   :  { %2202 = vmatprep.subr.bf16.mxu1 %v2547_v0  ;;  %v2537_v62 = vld [vmem:[%s3279_s0 + $0x268] ss:$20 sps:$4 sm:$0xff]  }
  0x6d   :  { %v2538_v63 = vld [vmem:[%s3279_s0 + $0x2b4] ss:$20 sps:$4 sm:$0xff]  }
  0x6f   :  { %2218 = vmatpush1.bf16.msra.mxu1 %v2704_v26  ;;  %v2490_v26 = vld [vmem:[%s3279_s0 + $0x234] ss:$20 sps:$4 sm:$0xff]  }
  0x70   :  { %2203 = vmatprep.subr.bf16.mxu1 %v2547_v0 }
  0x71   :  { %1038 = vmatmul.mubr.bf16.gmra.mrb[24].mxu1 %v2453_v1  ;;  %v2540_v1 = vld [vmem:[%s3279_s0 + $0x2b0] ss:$20 sps:$4 sm:$0xff]  }
  0x72   :  { %1223 = vmatmul.mubr.bf16.gmra.mrb[24].mxu0 %v2454_v2  ;;  %1045 = vmatprep.mubr.bf16.mxu1 %v2455_v3  ;;  %v2541_v2 = vld [vmem:[%s3279_s0 + $0x290] ss:$20 sps:$4 sm:$0xff]  }
  0x73   :  { %1230 = vmatprep.mubr.bf16.mxu0 %v2457_v4  ;;  %2219 = vmatpush1.bf16.msra.mxu1 %v2715_v28  ;;  %v2493_v28 = vld [vmem:[%s3279_s0 + $0xb0] ss:$20 sps:$4 sm:$0xff]  }
  0x74   :  { %2204 = vmatprep.subr.bf16.mxu1 %v2547_v0  ;;  %v2542_v3 = vld [vmem:[%s3279_s0 + $0x2dc] ss:$20 sps:$4 sm:$0xff]  }
  0x77   :  { %2220 = vmatpush1.bf16.msra.mxu1 %v2726_v30  ;;  %v2496_v30 = vld [vmem:[%s3279_s0 + $0x258] ss:$20 sps:$4 sm:$0xff]  }
  0x78   :  { %2205 = vmatprep.subr.bf16.mxu1 %v2547_v0 }
  0x79   :  { %1046 = vmatmul.mubr.bf16.gmra.mrb[28].mxu1 %v2459_v5 }
  0x7a   :  { %1231 = vmatmul.mubr.bf16.gmra.mrb[28].mxu0 %v2460_v6  ;;  %1053 = vmatprep.mubr.bf16.mxu1 %v2462_v7  ;;  %v2544_v6 = vld [vmem:[%s3279_s0 + $0x2d8] ss:$20 sps:$4 sm:$0xff]  }
  0x7b   :  { %1238 = vmatprep.mubr.bf16.mxu0 %v2464_v8  ;;  %2221 = vmatpush1.bf16.msra.mxu1 %v2737_v32  ;;  %v2498_v32 = vld [vmem:[%s3279_s0 + $0x284] ss:$20 sps:$4 sm:$0xff]  }
  0x7c   :  { %2206 = vmatprep.subr.bf16.mxu1 %v2547_v0  ;;  %v2472_v0 = vld [vmem:[%s3279_s0 + $0x168] ss:$20 sps:$4 sm:$0xff]   ;;  %v2545_v7 = vld [vmem:[%s3279_s0 + $0x2b8] ss:$20 sps:$4 sm:$0xff]  }
  0x7f   :  { %2222 = vmatpush1.bf16.msra.mxu1 %v2748_v34  ;;  %v2501_v34 = vld [vmem:[%s3279_s0 + $0x100] ss:$20 sps:$4 sm:$0xff]  }
  0x81   :  { %1054 = vmatmul.mubr.bf16.gmra.mrb[32].mxu1 %v2466_v9 }
  0x82   :  { %1239 = vmatmul.mubr.bf16.gmra.mrb[32].mxu0 %v2467_v10  ;;  %1061 = vmatprep.mubr.bf16.mxu1 %v2468_v11 }
  0x83   :  { %1246 = vmatprep.mubr.bf16.mxu0 %v2470_v12  ;;  %v2546_v12 = vld [vmem:[%s3279_s0 + $0x2e0] ss:$20 sps:$4 sm:$0xff]  }
  0x89   :  { %1062 = vmatmul.mubr.bf16.gmra.mrb[36].mxu1 %v2472_v0 }
  0x8a   :  { %1247 = vmatmul.mubr.bf16.gmra.mrb[36].mxu0 %v2473_v13  ;;  %1069 = vmatprep.mubr.bf16.mxu1 %v2474_v14 }
  0x8b   :  { %2115 = vmatprep.mubr.msk.bf16.mxu0 %vm2549_vm0, %v2548_v39 }
  0x91   :  { %1070 = vmatmul.mubr.bf16.gmra.mrb[40].mxu1 %v2476_v15 }
  0x92   :  { %2116 = vmatmul.mubr.msk.bf16.vlgmr.msra.gmra.mrb[0].mxu0 %vm899_vm1, %v2477_v16  ;;  %1077 = vmatprep.mubr.bf16.mxu1 %v2478_v17 }
  0x93   :  { %2119 = vmatprep.mubr.msk.bf16.mxu0 %vm2549_vm0, %v2548_v39 }
  0x99   :  { %1078 = vmatmul.mubr.bf16.gmra.mrb[44].mxu1 %v2480_v18 }
  0x9a   :  { %2120 = vmatmul.mubr.msk.bf16.gmra.mrb[4].mxu0 %vm899_vm1, %v2481_v19  ;;  %1085 = vmatprep.mubr.bf16.mxu1 %v2482_v20 }
  0x9b   :  { %2123 = vmatprep.mubr.msk.bf16.mxu0 %vm2549_vm0, %v2548_v39 }
  0xa1   :  { %1086 = vmatmul.mubr.bf16.gmra.mrb[48].mxu1 %v2484_v21 }
  0xa2   :  { %2124 = vmatmul.mubr.msk.bf16.gmra.mrb[8].mxu0 %vm899_vm1, %v2485_v22  ;;  %1093 = vmatprep.mubr.bf16.mxu1 %v2486_v23 }
  0xa3   :  { %2127 = vmatprep.mubr.msk.bf16.mxu0 %vm2549_vm0, %v2548_v39 }
  0xa9   :  { %1094 = vmatmul.mubr.bf16.gmra.mrb[52].mxu1 %v2488_v24 }
  0xaa   :  { %2128 = vmatmul.mubr.msk.bf16.gmra.mrb[12].mxu0 %vm899_vm1, %v2489_v25  ;;  %1101 = vmatprep.mubr.bf16.mxu1 %v2490_v26 }
  0xab   :  { %2131 = vmatprep.mubr.msk.bf16.mxu0 %vm2549_vm0, %v2548_v39 }
  0xb1   :  { %1102 = vmatmul.mubr.bf16.gmra.mrb[56].mxu1 %v2492_v27 }
  0xb2   :  { %2132 = vmatmul.mubr.msk.bf16.gmra.mrb[16].mxu0 %vm899_vm1, %v2493_v28  ;;  %1109 = vmatprep.mubr.bf16.mxu1 %v2494_v29 }
  0xb3   :  { %2135 = vmatprep.mubr.msk.bf16.mxu0 %vm2549_vm0, %v2548_v39 }
  0xb9   :  { %1110 = vmatmul.mubr.bf16.gmra.mrb[60].mxu1 %v2496_v30 }
  0xba   :  { %2136 = vmatmul.mubr.msk.bf16.gmra.mrb[20].mxu0 %vm899_vm1, %v2497_v31  ;;  %1117 = vmatprep.mubr.bf16.mxu1 %v2498_v32 }
  0xbb   :  { %2139 = vmatprep.mubr.msk.bf16.mxu0 %vm2549_vm0, %v2548_v39 }
  0xc1   :  { %1118 = vmatmul.mubr.bf16.gmra.mrb[64].mxu1 %v2500_v33 }
  0xc2   :  { %2140 = vmatmul.mubr.msk.bf16.gmra.mrb[24].mxu0 %vm899_vm1, %v2501_v34  ;;  %1125 = vmatprep.mubr.bf16.mxu1 %v2502_v35 }
  0xc3   :  { %2143 = vmatprep.mubr.msk.bf16.mxu0 %vm2549_vm0, %v2548_v39 }
  0xc9   :  { %1126 = vmatmul.mubr.bf16.gmra.mrb[68].mxu1 %v2504_v36 }
  0xca   :  { %2144 = vmatmul.mubr.msk.bf16.gmra.mrb[28].mxu0 %vm899_vm1, %v2505_v37  ;;  %1133 = vmatprep.mubr.bf16.mxu1 %v2506_v38 }
  0xcb   :  { %2147 = vmatprep.mubr.msk.bf16.mxu0 %vm2549_vm0, %v2548_v39 }
  0xd1   :  { %1134 = vmatmul.mubr.bf16.gmra.mrb[72].mxu1 %v2508_v40 }
  0xd2   :  { %2148 = vmatmul.mubr.msk.bf16.gmra.mrb[32].mxu0 %vm899_vm1, %v2509_v41  ;;  %1254 = vmatprep.mubr.bf16.mxu1 %v2512_v42 }
  0xd3   :  { %2151 = vmatprep.mubr.msk.bf16.mxu0 %vm2549_vm0, %v2548_v39 }
  0xd9   :  { %1255 = vmatmul.mubr.bf16.vlgmr.msra.gmra.mrb[40].mxu1 %v2510_v43 }
  0xda   :  { %2152 = vmatmul.mubr.msk.bf16.gmra.mrb[36].mxu0 %vm899_vm1, %v2513_v44  ;;  %1262 = vmatprep.mubr.bf16.mxu1 %v2514_v45 }
  0xdb   :  { %2155 = vmatprep.mubr.msk.bf16.mxu0 %vm2549_vm0, %v2548_v39 }
  0xe1   :  { %1263 = vmatmul.mubr.bf16.gmra.mrb[44].mxu1 %v2516_v46  ;;  %v3167_v46 = vld [vmem:[%s3280_s2] ss:$0 sm:$0xff] }
  0xe2   :  { %2156 = vmatmul.mubr.msk.bf16.gmra.mrb[40].mxu0 %vm899_vm1, %v2517_v47  ;;  %1270 = vmatprep.mubr.bf16.mxu1 %v2518_v48 }
  0xe3   :  { %2159 = vmatprep.mubr.msk.bf16.mxu0 %vm2549_vm0, %v2548_v39 }
  0xe9   :  { %1271 = vmatmul.mubr.bf16.gmra.mrb[48].mxu1 %v2520_v49 }
  0xea   :  { %2160 = vmatmul.mubr.msk.bf16.gmra.mrb[44].mxu0 %vm899_vm1, %v2521_v50  ;;  %1278 = vmatprep.mubr.bf16.mxu1 %v2522_v51 }
  0xeb   :  { %2163 = vmatprep.mubr.msk.bf16.mxu0 %vm2549_vm0, %v2548_v39 }
  0xf1   :  { %1279 = vmatmul.mubr.bf16.gmra.mrb[52].mxu1 %v2524_v52 }
  0xf2   :  { %2164 = vmatmul.mubr.msk.bf16.gmra.mrb[48].mxu0 %vm899_vm1, %v2525_v53  ;;  %1286 = vmatprep.mubr.bf16.mxu1 %v2526_v54 }
  0xf3   :  { %2167 = vmatprep.mubr.msk.bf16.mxu0 %vm2549_vm0, %v2548_v39 }
  0xf9   :  { %1287 = vmatmul.mubr.bf16.gmra.mrb[56].mxu1 %v2528_v55 }
  0xfa   :  { %2168 = vmatmul.mubr.msk.bf16.gmra.mrb[52].mxu0 %vm899_vm1, %v2529_v56  ;;  %1294 = vmatprep.mubr.bf16.mxu1 %v2530_v57 }
  0xfb   :  { %2171 = vmatprep.mubr.msk.bf16.mxu0 %vm2549_vm0, %v2548_v39 }
 0x101   :  { %1295 = vmatmul.mubr.bf16.gmra.mrb[60].mxu1 %v2532_v58 }
 0x102   :  { %2172 = vmatmul.mubr.msk.bf16.gmra.mrb[56].mxu0 %vm899_vm1, %v2533_v59  ;;  %1302 = vmatprep.mubr.bf16.mxu1 %v2534_v60 }
 0x103   :  { %2175 = vmatprep.mubr.msk.bf16.mxu0 %vm2549_vm0, %v2548_v39 }
 0x109   :  { %1303 = vmatmul.mubr.bf16.gmra.mrb[64].mxu1 %v2536_v61 }
 0x10a   :  { %2176 = vmatmul.mubr.msk.bf16.gmra.mrb[60].mxu0 %vm899_vm1, %v2537_v62  ;;  %1310 = vmatprep.mubr.bf16.mxu1 %v2538_v63 }
 0x10b   :  { %2179 = vmatprep.mubr.msk.bf16.mxu0 %vm2549_vm0, %v2548_v39 }
 0x111   :  { %1311 = vmatmul.mubr.bf16.gmra.mrb[68].mxu1 %v2540_v1 }
 0x112   :  { %2180 = vmatmul.mubr.msk.bf16.gmra.mrb[64].mxu0 %vm899_vm1, %v2541_v2  ;;  %1318 = vmatprep.mubr.bf16.mxu1 %v2542_v3 }
 0x113   :  { %2183 = vmatprep.mubr.msk.bf16.mxu0 %vm2549_vm0, %v2548_v39 }
 0x114   :  { %v991_v4 = vpop.f32.mrb[0].mxu1 }
 0x115   :  { %v993_v5 = vpop.f32.mrb[1].mxu1  ;;  %v992_v47 = vadd.f32 %v3167_v46, %v991_v4 }
 0x116   :  { %v994_v8 = vpop.f32.mrb[2].mxu1 }
 0x117   :  { %v996_v9 = vpop.f32.mrb[3].mxu1  ;;  %v995_v49 = vadd.f32 %v3167_v46, %v994_v8 }
 0x119   :  { %1319 = vmatmul.mubr.bf16.gmra.mrb[72].mxu1 %v2544_v6 }
 0x11a   :  { %2184 = vmatmul.mubr.msk.bf16.gmra.mrb[68].mxu0 %vm899_vm1, %v2545_v7 }
 0x11b   :  { %2187 = vmatprep.mubr.msk.bf16.mxu0 %vm2549_vm0, %v2548_v39 }
 0x11c   :  { %v999_v10 = vpop.f32.mrb[4].mxu1 }
 0x11d   :  { %v1001_v11 = vpop.f32.mrb[5].mxu1  ;;  %v1000_v57 = vadd.f32 %v3167_v46, %v999_v10 }
 0x11e   :  { %v1002_v0 = vpop.f32.mrb[6].mxu1 }
 0x11f   :  { %v1004_v13 = vpop.f32.mrb[7].mxu1  ;;  %v1003_v60 = vadd.f32 %v3167_v46, %v1002_v0 }
 0x122   :  { %2188 = vmatmul.mubr.msk.bf16.gmra.mrb[72].mxu0 %vm899_vm1, %v2546_v12 }
 0x124   :  { %v1007_v14 = vpop.f32.mrb[8].mxu1 }
 0x125   :  { %v1009_v15 = vpop.f32.mrb[9].mxu1  ;;  %v1008_v5 = vadd.f32 %v3167_v46, %v1007_v14 }
 0x126   :  { %v1010_v16 = vpop.f32.mrb[10].mxu1 }
 0x127   :  { %v1012_v17 = vpop.f32.mrb[11].mxu1  ;;  %v1011_v8 = vadd.f32 %v3167_v46, %v1010_v16 }
 0x12c   :  { %v3136_v18 = vpop.f32.mrb[12].mxu1 }
 0x12d   :  { %v1017_v19 = vpop.f32.mrb[13].mxu1  ;;  %v1016_v17 = vadd.f32 %v3167_v46, %v3136_v18 }
 0x12e   :  { %v3138_v20 = vpop.f32.mrb[14].mxu1 }
 0x12f   :  { %v1020_v39 = vpop.f32.mrb[15].mxu1 }
 0x130   :  { %v1019_v39 = vadd.f32 %v3167_v46, %v3138_v20 }
 0x134   :  { %v3140_v21 = vpop.f32.mrb[16].mxu1 }
 0x135   :  { %v1025_v22 = vpop.f32.mrb[17].mxu1 }
 0x136   :  { %v3142_v23 = vpop.f32.mrb[18].mxu1 }
 0x137   :  { %v1028_v24 = vpop.f32.mrb[19].mxu1 }
 0x13c   :  { %v3144_v25 = vpop.f32.mrb[20].mxu1 }
 0x13d   :  { %v1033_v26 = vpop.f32.mrb[21].mxu1 }
 0x13e   :  { %v3146_v27 = vpop.f32.mrb[22].mxu1 }
 0x13f   :  { %v1036_v28 = vpop.f32.mrb[23].mxu1 }
 0x144   :  { %v3148_v29 = vpop.f32.mrb[24].mxu1 }
 0x145   :  { %v1041_v30 = vpop.f32.mrb[25].mxu1 }
 0x146   :  { %v3150_v31 = vpop.f32.mrb[26].mxu1 }
 0x147   :  { %v1044_v32 = vpop.f32.mrb[27].mxu1 }
 0x14c   :  { %v3152_v33 = vpop.f32.mrb[28].mxu1 }
 0x14d   :  { %v1049_v34 = vpop.f32.mrb[29].mxu1 }
 0x14e   :  { %v3154_v35 = vpop.f32.mrb[30].mxu1  ;;  %v1024_v34 = vadd.f32 %v3167_v46, %v3140_v21 }
 0x14f   :  { %v1052_v36 = vpop.f32.mrb[31].mxu1 }
 0x154   :  { %v3156_v37 = vpop.f32.mrb[32].mxu1 }
 0x155   :  { %v1057_v38 = vpop.f32.mrb[33].mxu1 }
 0x156   :  { %v3158_v40 = vpop.f32.mrb[34].mxu1  ;;  %v1027_v38 = vadd.f32 %v3167_v46, %v3142_v23 }
 0x157   :  { %v1060_v41 = vpop.f32.mrb[35].mxu1 }
 0x15c   :  { %v3160_v42 = vpop.f32.mrb[36].mxu1 }
 0x15d   :  { %v1065_v43 = vpop.f32.mrb[37].mxu1 }
 0x15e   :  { %v3162_v44 = vpop.f32.mrb[38].mxu1 }
 0x15f   :  { %v1068_v45 = vpop.f32.mrb[39].mxu1 }
 0x165   :  { %v1361_v48 = vpop.f32.mrb[0].mxu0 }
 0x166   :  { %v2224_v50 = vadd.f32 %v1361_v48, %v992_v47  ;;  %v2117_v51 = vpop.f32.mrb[1].mxu0 }
 0x167   :  { %v1364_v52 = vpop.f32.mrb[2].mxu0 }
 0x168   :  { %v2226_v53 = vadd.f32 %v1364_v52, %v995_v49  ;;  %v2118_v54 = vpop.f32.mrb[3].mxu0  ;;  %v1512_v55 = vmax.f32 %v2224_v50, 0.0  ;;  %v1032_v50 = vadd.f32 %v3167_v46, %v3144_v25  ;;  %v1035_v52 = vadd.f32 %v3167_v46, %v3146_v27 }
 0x16a   :  { %v1513_v56 = vmax.f32 %v2226_v53, 0.0 }
 0x16c   :  { %v1974_v58 = vpack.c.bf16 %v1513_v56, %v1512_v55 }
 0x16d   :  { %v1369_v59 = vpop.f32.mrb[4].mxu0 }
 0x16e   :  { %1975 = vst [vmem:[%s3281_s3] sm:$0xff] %v1974_v58   ;;  %v2228_v61 = vadd.f32 %v1369_v59, %v1000_v57  ;;  %v2121_v62 = vpop.f32.mrb[5].mxu0  ;;  %v1040_v59 = vadd.f32 %v3167_v46, %v3148_v29 }
 0x16f   :  { %v1372_v63 = vpop.f32.mrb[6].mxu0 }
 0x170   :  { %v2230_v1 = vadd.f32 %v1372_v63, %v1003_v60  ;;  %v2122_v2 = vpop.f32.mrb[7].mxu0  ;;  %v1514_v3 = vmax.f32 %v2228_v61, 0.0  ;;  %v1043_v61 = vadd.f32 %v3167_v46, %v3150_v31 }
 0x172   :  { %v1515_v4 = vmax.f32 %v2230_v1, 0.0 }
 0x174   :  { %v1979_v6 = vpack.c.bf16 %v1515_v4, %v1514_v3 }
 0x175   :  { %v1377_v7 = vpop.f32.mrb[8].mxu0 }
 0x176   :  { %2066 = vst [vmem:[%s3281_s3 + $0x8] sm:$0xff] %v1979_v6   ;;  %v2232_v9 = vadd.f32 %v1377_v7, %v1008_v5  ;;  %v2125_v10 = vpop.f32.mrb[9].mxu0  ;;  %v1048_v5 = vadd.f32 %v3167_v46, %v3152_v33  ;;  %v1051_v7 = vadd.f32 %v3167_v46, %v3154_v35 }
 0x177   :  { %v1380_v11 = vpop.f32.mrb[10].mxu0 }
 0x178   :  { %v2234_v12 = vadd.f32 %v1380_v11, %v1011_v8  ;;  %v2126_v0 = vpop.f32.mrb[11].mxu0  ;;  %v1516_v13 = vmax.f32 %v2232_v9, 0.0 }
 0x17a   :  { %v1517_v15 = vmax.f32 %v2234_v12, 0.0 }
 0x17c   :  { %v1984_v19 = vpack.c.bf16 %v1517_v15, %v1516_v13  ;;  %v1056_v13 = vadd.f32 %v3167_v46, %v3156_v37 }
 0x17d   :  { %v1385_v14 = vpop.f32.mrb[12].mxu0 }
 0x17e   :  { %2067 = vst [vmem:[%s3281_s3 + $0x10] sm:$0xff] %v1984_v19   ;;  %v2236_v16 = vadd.f32 %v1385_v14, %v1016_v17  ;;  %v2129_v22 = vpop.f32.mrb[13].mxu0  ;;  %v1059_v17 = vadd.f32 %v3167_v46, %v3158_v40  ;;  %v1067_v40 = vadd.f32 %v3167_v46, %v3162_v44 }
 0x17f   :  { %v1388_v24 = vpop.f32.mrb[14].mxu0 }
 0x180   :  { %v2238_v26 = vadd.f32 %v1388_v24, %v1019_v39  ;;  %v2130_v28 = vpop.f32.mrb[15].mxu0  ;;  %v1518_v30 = vmax.f32 %v2236_v16, 0.0 }
 0x182   :  { %v1519_v32 = vmax.f32 %v2238_v26, 0.0  ;;  %v1064_v26 = vadd.f32 %v3167_v46, %v3160_v42 }
 0x184   :  { %v1989_v18 = vpack.c.bf16 %v1519_v32, %v1518_v30 }
 0x185   :  { %v1393_v36 = vpop.f32.mrb[16].mxu0 }
 0x186   :  { %2068 = vst [vmem:[%s3281_s3 + $0x18] sm:$0xff] %v1989_v18   ;;  %v2240_v20 = vadd.f32 %v1393_v36, %v1024_v34  ;;  %v2133_v41 = vpop.f32.mrb[17].mxu0 }
 0x187   :  { %v1396_v43 = vpop.f32.mrb[18].mxu0 }
 0x188   :  { %v2242_v45 = vadd.f32 %v1396_v43, %v1027_v38  ;;  %v2134_v47 = vpop.f32.mrb[19].mxu0  ;;  %v1520_v48 = vmax.f32 %v2240_v20, 0.0 }
 0x18a   :  { %v1521_v49 = vmax.f32 %v2242_v45, 0.0 }
 0x18c   :  { %v1994_v21 = vpack.c.bf16 %v1521_v49, %v1520_v48 }
 0x18d   :  { %v1401_v51 = vpop.f32.mrb[20].mxu0 }
 0x18e   :  { %2069 = vst [vmem:[%s3281_s3 + $0x20] sm:$0xff] %v1994_v21   ;;  %v2244_v23 = vadd.f32 %v1401_v51, %v1032_v50  ;;  %v2137_v53 = vpop.f32.mrb[21].mxu0 }
 0x18f   :  { %v1404_v54 = vpop.f32.mrb[22].mxu0 }
 0x190   :  { %v2246_v55 = vadd.f32 %v1404_v54, %v1035_v52  ;;  %v2138_v56 = vpop.f32.mrb[23].mxu0  ;;  %v1522_v57 = vmax.f32 %v2244_v23, 0.0 }
 0x192   :  { %v1523_v58 = vmax.f32 %v2246_v55, 0.0 }
 0x194   :  { %v1999_v25 = vpack.c.bf16 %v1523_v58, %v1522_v57 }
 0x195   :  { %v1409_v60 = vpop.f32.mrb[24].mxu0 }
 0x196   :  { %2070 = vst [vmem:[%s3281_s3 + $0x28] sm:$0xff] %v1999_v25   ;;  %v2248_v27 = vadd.f32 %v1409_v60, %v1040_v59  ;;  %v2141_v62 = vpop.f32.mrb[25].mxu0 }
 0x197   :  { %v1412_v63 = vpop.f32.mrb[26].mxu0 }
 0x198   :  { %v2250_v1 = vadd.f32 %v1412_v63, %v1043_v61  ;;  %v2142_v2 = vpop.f32.mrb[27].mxu0  ;;  %v1524_v3 = vmax.f32 %v2248_v27, 0.0 }
 0x19a   :  { %v1525_v4 = vmax.f32 %v2250_v1, 0.0 }
 0x19c   :  { %v2004_v29 = vpack.c.bf16 %v1525_v4, %v1524_v3 }
 0x19d   :  { %v1417_v6 = vpop.f32.mrb[28].mxu0 }
 0x19e   :  { %2071 = vst [vmem:[%s3281_s3 + $0x30] sm:$0xff] %v2004_v29   ;;  %v2252_v31 = vadd.f32 %v1417_v6, %v1048_v5  ;;  %v2145_v8 = vpop.f32.mrb[29].mxu0 }
 0x19f   :  { %v1420_v9 = vpop.f32.mrb[30].mxu0 }
 0x1a0   :  { %v2254_v10 = vadd.f32 %v1420_v9, %v1051_v7  ;;  %v2146_v11 = vpop.f32.mrb[31].mxu0  ;;  %v1526_v12 = vmax.f32 %v2252_v31, 0.0 }
 0x1a2   :  { %v1527_v0 = vmax.f32 %v2254_v10, 0.0 }
 0x1a4   :  { %v2009_v33 = vpack.c.bf16 %v1527_v0, %v1526_v12 }
 0x1a5   :  { %v1425_v15 = vpop.f32.mrb[32].mxu0 }
 0x1a6   :  { %2072 = vst [vmem:[%s3281_s3 + $0x38] sm:$0xff] %v2009_v33   ;;  %v2256_v35 = vadd.f32 %v1425_v15, %v1056_v13  ;;  %v2149_v19 = vpop.f32.mrb[33].mxu0 }
 0x1a7   :  { %v1428_v14 = vpop.f32.mrb[34].mxu0 }
 0x1a8   :  { %v2258_v39 = vadd.f32 %v1428_v14, %v1059_v17  ;;  %v2150_v16 = vpop.f32.mrb[35].mxu0  ;;  %v1528_v22 = vmax.f32 %v2256_v35, 0.0 }
 0x1aa   :  { %v1529_v24 = vmax.f32 %v2258_v39, 0.0 }
 0x1ac   :  { %v2014_v37 = vpack.c.bf16 %v1529_v24, %v1528_v22  ;;  %v1256_v28 = vpop.f32.mrb[40].mxu1 }
 0x1ad   :  { %v1433_v30 = vpop.f32.mrb[36].mxu0  ;;  %v1258_v32 = vpop.f32.mrb[41].mxu1  ;;  %v2263_v47 = vadd.f32 %v3167_v46, %v1256_v28 }
 0x1ae   :  { %2073 = vst [vmem:[%s3281_s3 + $0x40] sm:$0xff] %v2014_v37   ;;  %v2260_v34 = vadd.f32 %v1433_v30, %v1064_v26  ;;  %v2153_v18 = vpop.f32.mrb[37].mxu0  ;;  %v1259_v36 = vpop.f32.mrb[42].mxu1 }
 0x1af   :  { %v1436_v38 = vpop.f32.mrb[38].mxu0  ;;  %v1261_v20 = vpop.f32.mrb[43].mxu1  ;;  %v2265_v44 = vadd.f32 %v3167_v46, %v1259_v36 }
 0x1b0   :  { %v2262_v41 = vadd.f32 %v1436_v38, %v1067_v40  ;;  %v2154_v43 = vpop.f32.mrb[39].mxu0  ;;  %v1530_v45 = vmax.f32 %v2260_v34, 0.0 }
 0x1b2   :  { %v1531_v42 = vmax.f32 %v2262_v41, 0.0 }
 0x1b4   :  { %v2019_v48 = vpack.c.bf16 %v1531_v42, %v1530_v45  ;;  %v1264_v49 = vpop.f32.mrb[44].mxu1 }
 0x1b5   :  { %v1441_v50 = vpop.f32.mrb[40].mxu0  ;;  %v1266_v21 = vpop.f32.mrb[45].mxu1  ;;  %v2267_v59 = vadd.f32 %v3167_v46, %v1264_v49 }
 0x1b6   :  { %2074 = vst [vmem:[%s3281_s3 + $0x48] sm:$0xff] %v2019_v48   ;;  %v2264_v51 = vadd.f32 %v2263_v47, %v1441_v50  ;;  %v2157_v52 = vpop.f32.mrb[41].mxu0  ;;  %v1267_v23 = vpop.f32.mrb[46].mxu1 }
 0x1b7   :  { %v1444_v53 = vpop.f32.mrb[42].mxu0  ;;  %v1269_v54 = vpop.f32.mrb[47].mxu1  ;;  %v2269_v62 = vadd.f32 %v3167_v46, %v1267_v23 }
 0x1b8   :  { %v2266_v55 = vadd.f32 %v2265_v44, %v1444_v53  ;;  %v2158_v56 = vpop.f32.mrb[43].mxu0  ;;  %v1532_v57 = vmax.f32 %v2264_v51, 0.0 }
 0x1ba   :  { %v1533_v58 = vmax.f32 %v2266_v55, 0.0 }
 0x1bc   :  { %v2024_v25 = vpack.c.bf16 %v1533_v58, %v1532_v57  ;;  %v1272_v60 = vpop.f32.mrb[48].mxu1 }
 0x1bd   :  { %v1449_v61 = vpop.f32.mrb[44].mxu0  ;;  %v1274_v27 = vpop.f32.mrb[49].mxu1  ;;  %v2271_v31 = vadd.f32 %v3167_v46, %v1272_v60 }
 0x1be   :  { %2075 = vst [vmem:[%s3281_s3 + $0x50] sm:$0xff] %v2024_v25   ;;  %v2268_v63 = vadd.f32 %v2267_v59, %v1449_v61  ;;  %v2161_v1 = vpop.f32.mrb[45].mxu0  ;;  %v1275_v2 = vpop.f32.mrb[50].mxu1 }
 0x1bf   :  { %v1452_v3 = vpop.f32.mrb[46].mxu0  ;;  %v1277_v4 = vpop.f32.mrb[51].mxu1  ;;  %v2273_v12 = vadd.f32 %v3167_v46, %v1275_v2 }
 0x1c0   :  { %v2270_v5 = vadd.f32 %v2269_v62, %v1452_v3  ;;  %v2162_v29 = vpop.f32.mrb[47].mxu0  ;;  %v1534_v6 = vmax.f32 %v2268_v63, 0.0 }
 0x1c2   :  { %v1535_v7 = vmax.f32 %v2270_v5, 0.0 }
 0x1c4   :  { %v2029_v8 = vpack.c.bf16 %v1535_v7, %v1534_v6  ;;  %v1280_v9 = vpop.f32.mrb[52].mxu1 }
 0x1c5   :  { %v1457_v10 = vpop.f32.mrb[48].mxu0  ;;  %v1282_v11 = vpop.f32.mrb[53].mxu1  ;;  %v2275_v16 = vadd.f32 %v3167_v46, %v1280_v9 }
 0x1c6   :  { %2076 = vst [vmem:[%s3281_s3 + $0x58] sm:$0xff] %v2029_v8   ;;  %v2272_v0 = vadd.f32 %v2271_v31, %v1457_v10  ;;  %v2165_v13 = vpop.f32.mrb[49].mxu0  ;;  %v1283_v33 = vpop.f32.mrb[54].mxu1 }
 0x1c7   :  { %v1460_v15 = vpop.f32.mrb[50].mxu0  ;;  %v1285_v17 = vpop.f32.mrb[55].mxu1  ;;  %v2277_v28 = vadd.f32 %v3167_v46, %v1283_v33 }
 0x1c8   :  { %v2274_v35 = vadd.f32 %v2273_v12, %v1460_v15  ;;  %v2166_v19 = vpop.f32.mrb[51].mxu0  ;;  %v1536_v14 = vmax.f32 %v2272_v0, 0.0 }
 0x1ca   :  { %v1537_v39 = vmax.f32 %v2274_v35, 0.0 }
 0x1cc   :  { %v2034_v22 = vpack.c.bf16 %v1537_v39, %v1536_v14  ;;  %v1288_v24 = vpop.f32.mrb[56].mxu1 }
 0x1cd   :  { %v1465_v26 = vpop.f32.mrb[52].mxu0  ;;  %v1290_v37 = vpop.f32.mrb[57].mxu1  ;;  %v2279_v43 = vadd.f32 %v3167_v46, %v1288_v24 }
 0x1ce   :  { %2077 = vst [vmem:[%s3281_s3 + $0x60] sm:$0xff] %v2034_v22   ;;  %v2276_v30 = vadd.f32 %v2275_v16, %v1465_v26  ;;  %v2169_v32 = vpop.f32.mrb[53].mxu0  ;;  %v1291_v40 = vpop.f32.mrb[58].mxu1 }
 0x1cf   :  { %v1468_v34 = vpop.f32.mrb[54].mxu0  ;;  %v1293_v18 = vpop.f32.mrb[59].mxu1  ;;  %v2281_v49 = vadd.f32 %v3167_v46, %v1291_v40 }
 0x1d0   :  { %v2278_v36 = vadd.f32 %v2277_v28, %v1468_v34  ;;  %v2170_v38 = vpop.f32.mrb[55].mxu0  ;;  %v1538_v20 = vmax.f32 %v2276_v30, 0.0 }
 0x1d2   :  { %v1539_v41 = vmax.f32 %v2278_v36, 0.0 }
 0x1d4   :  { %v2039_v45 = vpack.c.bf16 %v1539_v41, %v1538_v20  ;;  %v1296_v42 = vpop.f32.mrb[60].mxu1 }
 0x1d5   :  { %v1473_v47 = vpop.f32.mrb[56].mxu0  ;;  %v1298_v48 = vpop.f32.mrb[61].mxu1  ;;  %v2283_v56 = vadd.f32 %v3167_v46, %v1296_v42 }
 0x1d6   :  { %2078 = vst [vmem:[%s3281_s3 + $0x68] sm:$0xff] %v2039_v45   ;;  %v2280_v50 = vadd.f32 %v2279_v43, %v1473_v47  ;;  %v2173_v21 = vpop.f32.mrb[57].mxu0  ;;  %v1299_v44 = vpop.f32.mrb[62].mxu1 }
 0x1d7   :  { %v1476_v51 = vpop.f32.mrb[58].mxu0  ;;  %v1301_v52 = vpop.f32.mrb[63].mxu1  ;;  %v2285_v60 = vadd.f32 %v3167_v46, %v1299_v44 }
 0x1d8   :  { %v2282_v23 = vadd.f32 %v2281_v49, %v1476_v51  ;;  %v2174_v53 = vpop.f32.mrb[59].mxu0  ;;  %v1540_v54 = vmax.f32 %v2280_v50, 0.0 }
 0x1da   :  { %v1541_v55 = vmax.f32 %v2282_v23, 0.0 }
 0x1dc   :  { %v2044_v57 = vpack.c.bf16 %v1541_v55, %v1540_v54  ;;  %v1304_v58 = vpop.f32.mrb[64].mxu1 }
 0x1dd   :  { %v1481_v59 = vpop.f32.mrb[60].mxu0  ;;  %v1306_v25 = vpop.f32.mrb[65].mxu1  ;;  %v2287_v29 = vadd.f32 %v3167_v46, %v1304_v58 }
 0x1de   :  { %2079 = vst [vmem:[%s3281_s3 + $0x70] sm:$0xff] %v2044_v57   ;;  %v2284_v61 = vadd.f32 %v2283_v56, %v1481_v59  ;;  %v2177_v27 = vpop.f32.mrb[61].mxu0  ;;  %v1307_v62 = vpop.f32.mrb[66].mxu1 }
 0x1df   :  { %v1484_v63 = vpop.f32.mrb[62].mxu0  ;;  %v1309_v1 = vpop.f32.mrb[67].mxu1  ;;  %v2289_v9 = vadd.f32 %v3167_v46, %v1307_v62 }
 0x1e0   :  { %v2286_v2 = vadd.f32 %v2285_v60, %v1484_v63  ;;  %v2178_v3 = vpop.f32.mrb[63].mxu0  ;;  %v1542_v4 = vmax.f32 %v2284_v61, 0.0 }
 0x1e2   :  { %v1543_v5 = vmax.f32 %v2286_v2, 0.0 }
 0x1e4   :  { %v2049_v6 = vpack.c.bf16 %v1543_v5, %v1542_v4  ;;  %v1312_v7 = vpop.f32.mrb[68].mxu1 }
 0x1e5   :  { %v1489_v31 = vpop.f32.mrb[64].mxu0  ;;  %v1314_v8 = vpop.f32.mrb[69].mxu1  ;;  %v2291_v19 = vadd.f32 %v3167_v46, %v1312_v7 }
 0x1e6   :  { %2080 = vst [vmem:[%s3281_s3 + $0x78] sm:$0xff] %v2049_v6   ;;  %v2288_v10 = vadd.f32 %v2287_v29, %v1489_v31  ;;  %v2181_v11 = vpop.f32.mrb[65].mxu0  ;;  %v1315_v12 = vpop.f32.mrb[70].mxu1 }
 0x1e7   :  { %v1492_v0 = vpop.f32.mrb[66].mxu0  ;;  %v1317_v13 = vpop.f32.mrb[71].mxu1  ;;  %v2293_v24 = vadd.f32 %v3167_v46, %v1315_v12 }
 0x1e8   :  { %v2290_v33 = vadd.f32 %v2289_v9, %v1492_v0  ;;  %v2182_v15 = vpop.f32.mrb[67].mxu0  ;;  %v1544_v17 = vmax.f32 %v2288_v10, 0.0 }
 0x1ea   :  { %v1545_v35 = vmax.f32 %v2290_v33, 0.0 }
 0x1ec   :  { %v2054_v14 = vpack.c.bf16 %v1545_v35, %v1544_v17  ;;  %v1320_v39 = vpop.f32.mrb[72].mxu1 }
 0x1ed   :  { %v1497_v16 = vpop.f32.mrb[68].mxu0  ;;  %v1322_v22 = vpop.f32.mrb[73].mxu1  ;;  %v2295_v38 = vadd.f32 %v3167_v46, %v1320_v39 }
 0x1ee   :  { %2081 = vst [vmem:[%s3281_s3 + $0x80] sm:$0xff] %v2054_v14   ;;  %v2292_v26 = vadd.f32 %v2291_v19, %v1497_v16  ;;  %v2185_v37 = vpop.f32.mrb[69].mxu0  ;;  %v1323_v28 = vpop.f32.mrb[74].mxu1 }
 0x1ef   :  { %v1500_v30 = vpop.f32.mrb[70].mxu0  ;;  %v1325_v32 = vpop.f32.mrb[75].mxu1  ;;  %v2297_v43 = vadd.f32 %v3167_v46, %v1323_v28 }
 0x1f0   :  { %v2294_v40 = vadd.f32 %v2293_v24, %v1500_v30  ;;  %v2186_v34 = vpop.f32.mrb[71].mxu0  ;;  %v1546_v18 = vmax.f32 %v2292_v26, 0.0 }
 0x1f2   :  { %v1547_v36 = vmax.f32 %v2294_v40, 0.0 }
 0x1f4   :  { %v2059_v20 = vpack.c.bf16 %v1547_v36, %v1546_v18 }
 0x1f5   :  { %v1505_v41 = vpop.f32.mrb[72].mxu0 }
 0x1f6   :  { %2082 = vst [vmem:[%s3281_s3 + $0x88] sm:$0xff] %v2059_v20   ;;  %v2296_v45 = vadd.f32 %v2295_v38, %v1505_v41  ;;  %v2189_v42 = vpop.f32.mrb[73].mxu0 }
 0x1f7   :  { %v1508_v47 = vpop.f32.mrb[74].mxu0 }
 0x1f8   :  { %v2298_v48 = vadd.f32 %v2297_v43, %v1508_v47  ;;  %v2190_v49 = vpop.f32.mrb[75].mxu0  ;;  %v1548_v50 = vmax.f32 %v2296_v45, 0.0 }
 0x1fa   :  { %v1549_v21 = vmax.f32 %v2298_v48, 0.0 }
 0x1fc   :  { %v2064_v44 = vpack.c.bf16 %v1549_v21, %v1548_v50 }
 0x1fe   :  { %2083 = vst [vmem:[%s3281_s3 + $0x90] sm:$0xff] %v2064_v44  }

// kernel: deep_q_network_forward.9
= control target key start
LH: loop header
LB: loop body
LE: loop exit
PB: predicated region body
PF: predicated region fallthrough
CT: control target
= control target key end

     0   :  { %s646_s1 = inlined_call_operand.vmem [shape: bf16[512,128], index: 1, kind: input, shape index: {}]   ;;  %s647_s0 = inlined_call_operand.vmem [shape: bf16[16,512], index: 0, kind: input, shape index: {}]   ;;  %s648_s2 = inlined_call_operand.vmem [shape: f32[1,128], index: 2, kind: input, shape index: {}]   ;;  %s649_s3 = inlined_call_operand.vmem [shape: f32[16,128], index: 3, kind: output, shape index: {}]  }
   0x1   :  { %v471_v0 = vld [vmem:[%s646_s1 + $0x40] sm:$0xff]   ;;  %v475_v4 = vld [vmem:[%s646_s1 + $0x48] sm:$0xff]   ;;  %v479_v8 = vld [vmem:[%s646_s1 + $0x50] sm:$0xff]  }
   0x2   :  { %v472_v1 = vld [vmem:[%s646_s1 + $0xc0] sm:$0xff]   ;;  %427 = vmatprep.subr.bf16.mxu0 %v471_v0  ;;  %v476_v5 = vld [vmem:[%s646_s1 + $0xc8] sm:$0xff]   ;;  %v480_v9 = vld [vmem:[%s646_s1 + $0xd0] sm:$0xff]  }
   0x3   :  { %v473_v2 = vld [vmem:[%s646_s1] sm:$0xff]   ;;  %449 = vmatprep.subr.bf16.mxu1 %v472_v1  ;;  %v477_v6 = vld [vmem:[%s646_s1 + $0x8] sm:$0xff]   ;;  %v481_v10 = vld [vmem:[%s646_s1 + $0x10] sm:$0xff]  }
   0x4   :  { %v474_v3 = vld [vmem:[%s646_s1 + $0x80] sm:$0xff]   ;;  %428 = vmatpush3.bf16.msra.mxu0 %v473_v2  ;;  %v478_v7 = vld [vmem:[%s646_s1 + $0x88] sm:$0xff]   ;;  %v482_v11 = vld [vmem:[%s646_s1 + $0x90] sm:$0xff]  }
   0x5   :  { %450 = vmatpush3.bf16.msra.mxu1 %v474_v3  ;;  %429 = vmatprep.subr.bf16.mxu0 %v475_v4  ;;  %v483_v12 = vld [vmem:[%s646_s1 + $0x58] sm:$0xff]   ;;  %v487_v16 = vld [vmem:[%s646_s1 + $0x60] sm:$0xff]   ;;  %v491_v20 = vld [vmem:[%s646_s1 + $0x68] sm:$0xff]  }
   0x6   :  { %451 = vmatprep.subr.bf16.mxu1 %v476_v5  ;;  %v484_v13 = vld [vmem:[%s646_s1 + $0xd8] sm:$0xff]   ;;  %v488_v17 = vld [vmem:[%s646_s1 + $0xe0] sm:$0xff]   ;;  %v492_v21 = vld [vmem:[%s646_s1 + $0xe8] sm:$0xff]  }
   0x7   :  { %v485_v14 = vld [vmem:[%s646_s1 + $0x18] sm:$0xff]   ;;  %v489_v18 = vld [vmem:[%s646_s1 + $0x20] sm:$0xff]   ;;  %v493_v22 = vld [vmem:[%s646_s1 + $0x28] sm:$0xff]  }
   0x8   :  { %430 = vmatpush3.bf16.msra.mxu0 %v477_v6  ;;  %v486_v15 = vld [vmem:[%s646_s1 + $0x98] sm:$0xff]   ;;  %v490_v19 = vld [vmem:[%s646_s1 + $0xa0] sm:$0xff]   ;;  %v494_v23 = vld [vmem:[%s646_s1 + $0xa8] sm:$0xff]  }
   0x9   :  { %452 = vmatpush3.bf16.msra.mxu1 %v478_v7  ;;  %431 = vmatprep.subr.bf16.mxu0 %v479_v8  ;;  %v495_v24 = vld [vmem:[%s646_s1 + $0x70] sm:$0xff]   ;;  %v499_v28 = vld [vmem:[%s646_s1 + $0x78] sm:$0xff]   ;;  %v390_v38 = vld [vmem:[%s648_s2] ss:$0 sm:$0xff] }
   0xa   :  { %453 = vmatprep.subr.bf16.mxu1 %v480_v9  ;;  %v496_v25 = vld [vmem:[%s646_s1 + $0xf0] sm:$0xff]   ;;  %v500_v29 = vld [vmem:[%s646_s1 + $0xf8] sm:$0xff]  }
   0xb   :  { %v497_v26 = vld [vmem:[%s646_s1 + $0x30] sm:$0xff]   ;;  %v501_v30 = vld [vmem:[%s646_s1 + $0x38] sm:$0xff]  }
   0xc   :  { %432 = vmatpush3.bf16.msra.mxu0 %v481_v10  ;;  %v498_v27 = vld [vmem:[%s646_s1 + $0xb0] sm:$0xff]   ;;  %v502_v31 = vld [vmem:[%s646_s1 + $0xb8] sm:$0xff]  }
   0xd   :  { %454 = vmatpush3.bf16.msra.mxu1 %v482_v11  ;;  %433 = vmatprep.subr.bf16.mxu0 %v483_v12  ;;  %v503_v32 = vld [vmem:[%s647_s0] ss:$16 sps:$4 sm:$0xff]   ;;  %v505_v33 = vld [vmem:[%s647_s0 + $0x4] ss:$16 sps:$4 sm:$0xff]   ;;  %v506_v34 = vld [vmem:[%s647_s0 + $0x8] ss:$16 sps:$4 sm:$0xff]  }
   0xe   :  { %455 = vmatprep.subr.bf16.mxu1 %v484_v13  ;;  %v508_v35 = vld [vmem:[%s647_s0 + $0xc] ss:$16 sps:$4 sm:$0xff]   ;;  %334 = vmatprep.mubr.bf16.mxu0 %v505_v33 }
   0xf   :  { %375 = vmatprep.mubr.bf16.mxu1 %v508_v35 }
  0x10   :  { %434 = vmatpush3.bf16.msra.mxu0 %v485_v14 }
  0x11   :  { %456 = vmatpush3.bf16.msra.mxu1 %v486_v15  ;;  %435 = vmatprep.subr.bf16.mxu0 %v487_v16 }
  0x12   :  { %457 = vmatprep.subr.bf16.mxu1 %v488_v17 }
  0x14   :  { %436 = vmatpush3.bf16.msra.mxu0 %v489_v18 }
  0x15   :  { %458 = vmatpush3.bf16.msra.mxu1 %v490_v19  ;;  %437 = vmatprep.subr.bf16.mxu0 %v491_v20 }
  0x16   :  { %459 = vmatprep.subr.bf16.mxu1 %v492_v21 }
  0x18   :  { %438 = vmatpush3.bf16.msra.mxu0 %v493_v22 }
  0x19   :  { %460 = vmatpush3.bf16.msra.mxu1 %v494_v23  ;;  %439 = vmatprep.subr.bf16.mxu0 %v495_v24 }
  0x1a   :  { %461 = vmatprep.subr.bf16.mxu1 %v496_v25 }
  0x1c   :  { %440 = vmatpush3.bf16.msra.mxu0 %v497_v26 }
  0x1d   :  { %462 = vmatpush3.bf16.msra.mxu1 %v498_v27  ;;  %441 = vmatprep.subr.bf16.mxu0 %v499_v28 }
  0x1e   :  { %463 = vmatprep.subr.bf16.mxu1 %v500_v29 }
  0x20   :  { %442 = vmatpush3.bf16.msra.mxu0 %v501_v30 }
  0x21   :  { %464 = vmatpush3.bf16.msra.mxu1 %v502_v31 }
  0x23   :  { %335 = vmatmul.mubr.bf16.vlgmr.msra.gmra.mrb[0].mxu0 %v503_v32 }
  0x24   :  { %376 = vmatmul.mubr.bf16.vlgmr.msra.gmra.mrb[0].mxu1 %v506_v34 }
  0xf6   :  { %v443_v36 = vpop.f32.mrb[0].mxu0 }
  0xf7   :  { %v465_v37 = vpop.f32.mrb[0].mxu1  ;;  %v444_v39 = vpop.f32.mrb[1].mxu0 }
  0xf8   :  { %v445_v40 = vadd.f32 %v444_v39, %v443_v36  ;;  %v466_v41 = vpop.f32.mrb[1].mxu1  ;;  %v446_v42 = vpop.f32.mrb[2].mxu0 }
  0xf9   :  { %v467_v43 = vadd.f32 %v466_v41, %v465_v37  ;;  %v468_v44 = vpop.f32.mrb[2].mxu1  ;;  %v447_v45 = vpop.f32.mrb[3].mxu0 }
  0xfa   :  { %v337_v46 = vadd.f32 %v445_v40, %v390_v38  ;;  %v448_v47 = vadd.f32 %v447_v45, %v446_v42  ;;  %v469_v48 = vpop.f32.mrb[3].mxu1 }
  0xfb   :  { %v470_v49 = vadd.f32 %v469_v48, %v468_v44 }
  0xfc   :  { %v378_v50 = vadd.f32 %v467_v43, %v337_v46  ;;  %v340_v51 = vadd.f32 %v448_v47, %v390_v38 }
  0xfe   :  { %384 = vst [vmem:[%s649_s3] sm:$0xff] %v378_v50  ;;  %v381_v52 = vadd.f32 %v470_v49, %v340_v51 }
 0x100   :  { %385 = vst [vmem:[%s649_s3 + $0x8] sm:$0xff] %v381_v52 }

// kernel: deep_q_network_forward.8
= control target key start
LH: loop header
LB: loop body
LE: loop exit
PB: predicated region body
PF: predicated region fallthrough
CT: control target
= control target key end

     0   :  { %s13167_s12 = smov 0   ;;  %s13169_s13 = smov 0   ;;  %s14587_s0 = inlined_call_operand.vmem [shape: bf16[16,19456], index: 0, kind: input, shape index: {}]   ;;  %s14588_s1 = inlined_call_operand.vmem [shape: bf16[19456,512], index: 1, kind: input, shape index: {}]   ;;  %s14589_s2 = inlined_call_operand.vmem [shape: f32[1,512], index: 2, kind: input, shape index: {}]   ;;  %s14590_s3 = inlined_call_operand.vmem [shape: bf16[16,512], index: 3, kind: output, shape index: {}]  }
   0x1   :  { %s13171_s14 = smov 0   ;;  %s13173_s15 = smov 0  }
   0x2   :  { %s13175_s16 = smov 0  }
   0x3 LB: > { %s25_s17 = sadd.s32 1, %s13140_s15  ;;  %p48_p1 = scmp.ne.s32.totalorder %s13132_s13, %s13128_s12  ;;  %s13144_s16 = sphi %s13175_s16, %s13_s16   ;;  %s13140_s15 = sphi %s13173_s15, %s14594_s15   ;;  %s13136_s14 = sphi %s13171_s14, %s14593_s14   ;;  %s13132_s13 = sphi %s13169_s13, %s14592_s13   ;;  %s13128_s12 = sphi %s13167_s12, %s14591_s12  }
   0x4   : > { %p26_p0 = scmp.ge.s32.totalorder %s25_s17, 4  ;;  %p49_p2 = scmp.eq.s32.totalorder %s13144_s16, 0 }
   0x5   : > { %s41_s19 = sadd.s32 1, %s13132_s13  ;;  %p9763_p5 = scmp.ge.s32.totalorder %s13144_s16, 4 }
   0x6   : > { %s14596_s17 = smov (%p26_p0, %s25_s17), 0  ;;  %p50_p3 = por %p49_p2, %p48_p1 }
   0x7   : > { %s37_s18 = ssub.s32 %s13140_s15, %s14596_s17  ;;  %164 = sbr.rel (%p9763_p5) target bundleno = 38 (0x26), region = 20 }
   0x8   : > { %p39_p4 = scmp.eq.s32.totalorder %s37_s18, 0 }
   0xa   : > { %s13202_s20 = scalar_select %p39_p4, %s13132_s13, %s41_s19  }
   0xe   : > { %167 = sbr.rel (!%p50_p3) target bundleno = 38 (0x26), region = 24  ;;  %s169_s21 = sand.u32 (%p50_p3), 1, %s13132_s13  }
   0xf   : > { %s11032_s22 = smul.u32 (%p50_p3), 152, %s13140_s15 }
  0x10   : > { %s11182_s23 = smul.u32 (%p50_p3), 304, %s169_s21 }
  0x11   : > { %s13210_s26 = scalar_lea.vmem (%p50_p3), %s14587_s0, %s11032_s22 }
  0x12   : > { %v190_v0 = vld [vmem:[%s13210_s26] sm:$0xff] (%p50_p3)  ;;  %v192_v1 = vld [vmem:[%s13210_s26 + $0x8] sm:$0xff] (%p50_p3)  ;;  %v194_v2 = vld [vmem:[%s13210_s26 + $0x10] sm:$0xff] (%p50_p3)  ;;  %s13215_s27 = scalar_lea.vmem (%p50_p3), [#allocation3], %s11182_s23 }
  0x13   : > { %191 = vst [vmem:[%s13215_s27] sm:$0xff] (%p50_p3), %v190_v0  ;;  %193 = vst [vmem:[%s13215_s27 + $0x8] sm:$0xff] (%p50_p3), %v192_v1  ;;  %v196_v3 = vld [vmem:[%s13210_s26 + $0x18] sm:$0xff] (%p50_p3)  ;;  %v198_v4 = vld [vmem:[%s13210_s26 + $0x20] sm:$0xff] (%p50_p3) }
  0x14   : > { %195 = vst [vmem:[%s13215_s27 + $0x10] sm:$0xff] (%p50_p3), %v194_v2  ;;  %v200_v5 = vld [vmem:[%s13210_s26 + $0x28] sm:$0xff] (%p50_p3)  ;;  %197 = vst [vmem:[%s13215_s27 + $0x18] sm:$0xff] (%p50_p3), %v196_v3  ;;  %v202_v6 = vld [vmem:[%s13210_s26 + $0x30] sm:$0xff] (%p50_p3) }
  0x15   : > { %199 = vst [vmem:[%s13215_s27 + $0x20] sm:$0xff] %v198_v4  ;;  %201 = vst [vmem:[%s13215_s27 + $0x28] sm:$0xff] %v200_v5  ;;  %v204_v7 = vld [vmem:[%s13210_s26 + $0x38] sm:$0xff]  ;;  %v206_v8 = vld [vmem:[%s13210_s26 + $0x40] sm:$0xff] }
  0x16   : > { %203 = vst [vmem:[%s13215_s27 + $0x30] sm:$0xff] %v202_v6  ;;  %205 = vst [vmem:[%s13215_s27 + $0x38] sm:$0xff] %v204_v7  ;;  %v208_v9 = vld [vmem:[%s13210_s26 + $0x48] sm:$0xff]  ;;  %v210_v10 = vld [vmem:[%s13210_s26 + $0x50] sm:$0xff] }
  0x17   : > { %207 = vst [vmem:[%s13215_s27 + $0x40] sm:$0xff] %v206_v8  ;;  %v212_v11 = vld [vmem:[%s13210_s26 + $0x58] sm:$0xff]  ;;  %209 = vst [vmem:[%s13215_s27 + $0x48] sm:$0xff] %v208_v9  ;;  %v214_v12 = vld [vmem:[%s13210_s26 + $0x60] sm:$0xff] }
  0x18   : > { %211 = vst [vmem:[%s13215_s27 + $0x50] sm:$0xff] %v210_v10  ;;  %213 = vst [vmem:[%s13215_s27 + $0x58] sm:$0xff] %v212_v11  ;;  %v216_v13 = vld [vmem:[%s13210_s26 + $0x68] sm:$0xff]  ;;  %v218_v14 = vld [vmem:[%s13210_s26 + $0x70] sm:$0xff] }
  0x19   : > { %215 = vst [vmem:[%s13215_s27 + $0x60] sm:$0xff] %v214_v12  ;;  %217 = vst [vmem:[%s13215_s27 + $0x68] sm:$0xff] %v216_v13  ;;  %v220_v15 = vld [vmem:[%s13210_s26 + $0x78] sm:$0xff]  ;;  %v222_v16 = vld [vmem:[%s13210_s26 + $0x80] sm:$0xff] }
  0x1a   : > { %219 = vst [vmem:[%s13215_s27 + $0x70] sm:$0xff] %v218_v14  ;;  %v224_v17 = vld [vmem:[%s13210_s26 + $0x88] sm:$0xff]  ;;  %221 = vst [vmem:[%s13215_s27 + $0x78] sm:$0xff] %v220_v15  ;;  %v226_v18 = vld [vmem:[%s13210_s26 + $0x90] sm:$0xff] }
  0x1b   : > { %223 = vst [vmem:[%s13215_s27 + $0x80] sm:$0xff] %v222_v16  ;;  %225 = vst [vmem:[%s13215_s27 + $0x88] sm:$0xff] %v224_v17  ;;  %v228_v19 = vld [vmem:[%s13210_s26 + $0x260] sm:$0xff]  ;;  %v230_v20 = vld [vmem:[%s13210_s26 + $0x268] sm:$0xff] }
  0x1c   : > { %227 = vst [vmem:[%s13215_s27 + $0x90] sm:$0xff] %v226_v18  ;;  %229 = vst [vmem:[%s13215_s27 + $0x98] sm:$0xff] %v228_v19  ;;  %v232_v21 = vld [vmem:[%s13210_s26 + $0x270] sm:$0xff]  ;;  %v234_v22 = vld [vmem:[%s13210_s26 + $0x278] sm:$0xff] }
  0x1d   : > { %231 = vst [vmem:[%s13215_s27 + $0xa0] sm:$0xff] %v230_v20  ;;  %v236_v23 = vld [vmem:[%s13210_s26 + $0x280] sm:$0xff]  ;;  %233 = vst [vmem:[%s13215_s27 + $0xa8] sm:$0xff] %v232_v21  ;;  %v238_v24 = vld [vmem:[%s13210_s26 + $0x288] sm:$0xff] }
  0x1e   : > { %235 = vst [vmem:[%s13215_s27 + $0xb0] sm:$0xff] %v234_v22  ;;  %237 = vst [vmem:[%s13215_s27 + $0xb8] sm:$0xff] %v236_v23  ;;  %v240_v25 = vld [vmem:[%s13210_s26 + $0x290] sm:$0xff]  ;;  %v242_v26 = vld [vmem:[%s13210_s26 + $0x298] sm:$0xff] }
  0x1f   : > { %239 = vst [vmem:[%s13215_s27 + $0xc0] sm:$0xff] %v238_v24  ;;  %241 = vst [vmem:[%s13215_s27 + $0xc8] sm:$0xff] %v240_v25  ;;  %v244_v27 = vld [vmem:[%s13210_s26 + $0x2a0] sm:$0xff]  ;;  %v246_v28 = vld [vmem:[%s13210_s26 + $0x2a8] sm:$0xff] }
  0x20   : > { %243 = vst [vmem:[%s13215_s27 + $0xd0] sm:$0xff] %v242_v26  ;;  %v248_v29 = vld [vmem:[%s13210_s26 + $0x2b0] sm:$0xff]  ;;  %245 = vst [vmem:[%s13215_s27 + $0xd8] sm:$0xff] %v244_v27  ;;  %v250_v30 = vld [vmem:[%s13210_s26 + $0x2b8] sm:$0xff] }
  0x21   : > { %247 = vst [vmem:[%s13215_s27 + $0xe0] sm:$0xff] %v246_v28  ;;  %249 = vst [vmem:[%s13215_s27 + $0xe8] sm:$0xff] %v248_v29  ;;  %v252_v31 = vld [vmem:[%s13210_s26 + $0x2c0] sm:$0xff]  ;;  %v254_v32 = vld [vmem:[%s13210_s26 + $0x2c8] sm:$0xff] }
  0x22   : > { %251 = vst [vmem:[%s13215_s27 + $0xf0] sm:$0xff] %v250_v30  ;;  %253 = vst [vmem:[%s13215_s27 + $0xf8] sm:$0xff] %v252_v31  ;;  %v256_v33 = vld [vmem:[%s13210_s26 + $0x2d0] sm:$0xff]  ;;  %v258_v34 = vld [vmem:[%s13210_s26 + $0x2d8] sm:$0xff] }
  0x23   : > { %255 = vst [vmem:[%s13215_s27 + $0x100] sm:$0xff] %v254_v32  ;;  %v260_v35 = vld [vmem:[%s13210_s26 + $0x2e0] sm:$0xff]  ;;  %257 = vst [vmem:[%s13215_s27 + $0x108] sm:$0xff] %v256_v33  ;;  %v262_v36 = vld [vmem:[%s13210_s26 + $0x2e8] sm:$0xff] }
  0x24   : > { %259 = vst [vmem:[%s13215_s27 + $0x110] sm:$0xff] %v258_v34  ;;  %261 = vst [vmem:[%s13215_s27 + $0x118] sm:$0xff] %v260_v35  ;;  %v264_v37 = vld [vmem:[%s13210_s26 + $0x2f0] sm:$0xff] }
  0x25   : > { %263 = vst [vmem:[%s13215_s27 + $0x120] sm:$0xff] %v262_v36  ;;  %265 = vst [vmem:[%s13215_s27 + $0x128] sm:$0xff] %v264_v37 }
  0x26 PF: > { %p9765_p6 = scmp.ge.s32.totalorder %s13144_s16, 1  ;;  %p285_p7 = scmp.lt.s32.totalorder %s13144_s16, 5 }
  0x28   : > { %p286_p8 = pnand %p9765_p6, %p285_p7 }
  0x29   : > { %s292_s28 = sand.u32 (!%p286_p8), 1, %s13128_s12   ;;  %s336_s29 = smul.u32 (!%p286_p8), 608, %s13136_s14 }
  0x2a   : > { %289 = sbr.rel (%p286_p8) target bundleno = 1505 (0x5e1), region = 51  ;;  %p9768_p10 = scmp.ne.s32.totalorder (!%p286_p8), %s13136_s14, 0 }
  0x2b   : > { %s11183_s30 = smul.u32 (!%p286_p8), 304, %s292_s28  ;;  %p338_p9 = scmp.lt.s32.totalorder (!%p286_p8), %s336_s29, 2431 }
  0x2d   : > { %s13299_s8 = scalar_lea.vmem (!%p286_p8), [#allocation3], %s11183_s30 }
  0x31   : > { %s14598_s29 = smov (!%p338_p9, %s336_s29), 2431  ;;  %368 = sbr.rel (%p9768_p10) target bundleno = 56 (0x38), region = 59 }
  0x32   : > { %s11033_s4 = sshll.u32 %s14598_s29, 4  ;;  %v13146_v38 = vmov (!%p9768_p10), 0.0  }
  0x33   : > { %s13297_s7 = scalar_lea.vmem %s14588_s1, %s11033_s4  ;;  %369 = vst [vmem:[#allocation2] sm:$0xff] (!%p9768_p10), %v13146_v38  ;;  %370 = vst [vmem:[#allocation2 + $0x8] sm:$0xff] (!%p9768_p10), %v13146_v38 }
  0x34   : > { %371 = vst [vmem:[#allocation2 + $0x10] sm:$0xff] (!%p9768_p10), %v13146_v38  ;;  %372 = vst [vmem:[#allocation2 + $0x18] sm:$0xff] (!%p9768_p10), %v13146_v38 }
  0x35   : > { %373 = vst [vmem:[#allocation2 + $0x20] sm:$0xff] (!%p9768_p10), %v13146_v38  ;;  %374 = vst [vmem:[#allocation2 + $0x28] sm:$0xff] (!%p9768_p10), %v13146_v38 }
  0x36   : > { %375 = vst [vmem:[#allocation2 + $0x30] sm:$0xff] (!%p9768_p10), %v13146_v38  ;;  %376 = vst [vmem:[#allocation2 + $0x38] sm:$0xff] (!%p9768_p10), %v13146_v38 }
  0x38 PF: > { %v11225_v39 = vld [vmem:[%s13297_s7 + $0x4] ss:$16 sps:$4 sm:$0xff]   ;;  %v11227_v40 = vld [vmem:[%s13297_s7 + $0xc] ss:$16 sps:$4 sm:$0xff]   ;;  %v11229_v41 = vld [vmem:[%s13297_s7] ss:$16 sps:$4 sm:$0xff]  }
  0x39   : > { %7909 = vmatprep.subr.bf16.mxu0 %v11225_v39  ;;  %v11230_v42 = vld [vmem:[%s13297_s7 + $0x8] ss:$16 sps:$4 sm:$0xff]   ;;  %8726 = vmatprep.subr.bf16.mxu1 %v11227_v40  ;;  %v11231_v43 = vld [vmem:[%s13297_s7 + $0x24] ss:$16 sps:$4 sm:$0xff]   ;;  %v11233_v44 = vld [vmem:[%s13297_s7 + $0x2c] ss:$16 sps:$4 sm:$0xff]  }
  0x3a   : > { %7910 = vmatpush1.bf16.msra.mxu0 %v11229_v41  ;;  %8727 = vmatpush1.bf16.msra.mxu1 %v11230_v42  ;;  %v11235_v45 = vld [vmem:[%s13297_s7 + $0x20] ss:$16 sps:$4 sm:$0xff]   ;;  %v11236_v46 = vld [vmem:[%s13297_s7 + $0x28] ss:$16 sps:$4 sm:$0xff]   ;;  %v11237_v47 = vld [vmem:[%s13297_s7 + $0x44] ss:$16 sps:$4 sm:$0xff]  }
  0x3b   : > { %7911 = vmatprep.subr.bf16.mxu0 %v11231_v43  ;;  %8728 = vmatprep.subr.bf16.mxu1 %v11233_v44  ;;  %v11239_v48 = vld [vmem:[%s13297_s7 + $0x4c] ss:$16 sps:$4 sm:$0xff]   ;;  %v11241_v49 = vld [vmem:[%s13297_s7 + $0x40] ss:$16 sps:$4 sm:$0xff]   ;;  %v11242_v50 = vld [vmem:[%s13297_s7 + $0x48] ss:$16 sps:$4 sm:$0xff]  }
  0x3c   : > { %v11243_v51 = vld [vmem:[%s13297_s7 + $0x64] ss:$16 sps:$4 sm:$0xff]   ;;  %v11245_v52 = vld [vmem:[%s13297_s7 + $0x6c] ss:$16 sps:$4 sm:$0xff]   ;;  %v11247_v53 = vld [vmem:[%s13297_s7 + $0x60] ss:$16 sps:$4 sm:$0xff]  }
  0x3d   : > { %v11248_v54 = vld [vmem:[%s13297_s7 + $0x68] ss:$16 sps:$4 sm:$0xff]   ;;  %v11249_v55 = vld [vmem:[%s13297_s7 + $0x84] ss:$16 sps:$4 sm:$0xff]   ;;  %v11251_v56 = vld [vmem:[%s13297_s7 + $0x8c] ss:$16 sps:$4 sm:$0xff]  }
  0x3e   : > { %7912 = vmatpush1.bf16.msra.mxu0 %v11235_v45  ;;  %8729 = vmatpush1.bf16.msra.mxu1 %v11236_v46  ;;  %v11253_v57 = vld [vmem:[%s13297_s7 + $0x80] ss:$16 sps:$4 sm:$0xff]   ;;  %v11254_v58 = vld [vmem:[%s13297_s7 + $0x88] ss:$16 sps:$4 sm:$0xff]   ;;  %v11255_v59 = vld [vmem:[%s13297_s7 + $0xa4] ss:$16 sps:$4 sm:$0xff]  }
  0x3f   : > { %7913 = vmatprep.subr.bf16.mxu0 %v11237_v47  ;;  %8730 = vmatprep.subr.bf16.mxu1 %v11239_v48  ;;  %v11257_v60 = vld [vmem:[%s13297_s7 + $0xac] ss:$16 sps:$4 sm:$0xff]   ;;  %v11259_v61 = vld [vmem:[%s13297_s7 + $0xa0] ss:$16 sps:$4 sm:$0xff]   ;;  %v11260_v62 = vld [vmem:[%s13297_s7 + $0xa8] ss:$16 sps:$4 sm:$0xff]  }
  0x40   : > { %v11261_v63 = vld [vmem:[%s13297_s7 + $0xc4] ss:$16 sps:$4 sm:$0xff]   ;;  %v11263_v0 = vld [vmem:[%s13297_s7 + $0xcc] ss:$16 sps:$4 sm:$0xff]   ;;  %v11265_v1 = vld [vmem:[%s13297_s7 + $0xc0] ss:$16 sps:$4 sm:$0xff]  }
  0x41   : > { %v11266_v2 = vld [vmem:[%s13297_s7 + $0xc8] ss:$16 sps:$4 sm:$0xff]   ;;  %v11267_v3 = vld [vmem:[%s13297_s7 + $0xe4] ss:$16 sps:$4 sm:$0xff]   ;;  %v11269_v4 = vld [vmem:[%s13297_s7 + $0xec] ss:$16 sps:$4 sm:$0xff]  }
  0x42   : > { %7914 = vmatpush1.bf16.msra.mxu0 %v11241_v49  ;;  %8731 = vmatpush1.bf16.msra.mxu1 %v11242_v50  ;;  %v11271_v5 = vld [vmem:[%s13297_s7 + $0xe0] ss:$16 sps:$4 sm:$0xff]   ;;  %v11272_v6 = vld [vmem:[%s13297_s7 + $0xe8] ss:$16 sps:$4 sm:$0xff]   ;;  %v11273_v7 = vld [vmem:[%s13297_s7 + $0x104] ss:$16 sps:$4 sm:$0xff]  }
  0x43   : > { %7915 = vmatprep.subr.bf16.mxu0 %v11243_v51  ;;  %8732 = vmatprep.subr.bf16.mxu1 %v11245_v52  ;;  %v11275_v8 = vld [vmem:[%s13297_s7 + $0x10c] ss:$16 sps:$4 sm:$0xff]   ;;  %v11277_v9 = vld [vmem:[%s13297_s7 + $0x100] ss:$16 sps:$4 sm:$0xff]   ;;  %v11278_v10 = vld [vmem:[%s13297_s7 + $0x108] ss:$16 sps:$4 sm:$0xff]  }
  0x44   : > { %v11279_v11 = vld [vmem:[%s13297_s7 + $0x124] ss:$16 sps:$4 sm:$0xff]   ;;  %v11281_v12 = vld [vmem:[%s13297_s7 + $0x12c] ss:$16 sps:$4 sm:$0xff]   ;;  %v11283_v13 = vld [vmem:[%s13297_s7 + $0x120] ss:$16 sps:$4 sm:$0xff]  }
  0x45   : > { %v11284_v14 = vld [vmem:[%s13297_s7 + $0x128] ss:$16 sps:$4 sm:$0xff]   ;;  %v11285_v15 = vld [vmem:[%s13297_s7 + $0x144] ss:$16 sps:$4 sm:$0xff]   ;;  %v11287_v16 = vld [vmem:[%s13297_s7 + $0x14c] ss:$16 sps:$4 sm:$0xff]  }
  0x46   : > { %7916 = vmatpush1.bf16.msra.mxu0 %v11247_v53  ;;  %8733 = vmatpush1.bf16.msra.mxu1 %v11248_v54  ;;  %v11289_v17 = vld [vmem:[%s13297_s7 + $0x140] ss:$16 sps:$4 sm:$0xff]   ;;  %v11290_v18 = vld [vmem:[%s13297_s7 + $0x148] ss:$16 sps:$4 sm:$0xff]   ;;  %v11291_v19 = vld [vmem:[%s13297_s7 + $0x164] ss:$16 sps:$4 sm:$0xff]  }
  0x47   : > { %7917 = vmatprep.subr.bf16.mxu0 %v11249_v55  ;;  %8734 = vmatprep.subr.bf16.mxu1 %v11251_v56  ;;  %v11293_v20 = vld [vmem:[%s13297_s7 + $0x16c] ss:$16 sps:$4 sm:$0xff]   ;;  %v11295_v21 = vld [vmem:[%s13297_s7 + $0x160] ss:$16 sps:$4 sm:$0xff]   ;;  %v11296_v22 = vld [vmem:[%s13297_s7 + $0x168] ss:$16 sps:$4 sm:$0xff]  }
  0x48   : > { %v11323_v23 = vld [vmem:[%s13299_s8 + $0x4] ss:$152 sps:$4 sm:$0xff]   ;;  %v11301_v26 = vld [vmem:[%s13297_s7 + $0x180] ss:$16 sps:$4 sm:$0xff]   ;;  %v11302_v27 = vld [vmem:[%s13297_s7 + $0x188] ss:$16 sps:$4 sm:$0xff]  }
  0x49   : > { %v11297_v24 = vld [vmem:[%s13297_s7 + $0x184] ss:$16 sps:$4 sm:$0xff]   ;;  %v11299_v25 = vld [vmem:[%s13297_s7 + $0x18c] ss:$16 sps:$4 sm:$0xff]   ;;  %7941 = vmatprep.mubr.bf16.mxu0 %v11323_v23  ;;  %8758 = vmatprep.mubr.bf16.mxu1 %v11323_v23  ;;  %v11307_v30 = vld [vmem:[%s13297_s7 + $0x1a0] ss:$16 sps:$4 sm:$0xff]  }
  0x4a   : > { %7918 = vmatpush1.bf16.msra.mxu0 %v11253_v57  ;;  %8735 = vmatpush1.bf16.msra.mxu1 %v11254_v58  ;;  %v11303_v28 = vld [vmem:[%s13297_s7 + $0x1a4] ss:$16 sps:$4 sm:$0xff]   ;;  %v11305_v29 = vld [vmem:[%s13297_s7 + $0x1ac] ss:$16 sps:$4 sm:$0xff]   ;;  %v11308_v31 = vld [vmem:[%s13297_s7 + $0x1a8] ss:$16 sps:$4 sm:$0xff]  }
  0x4b   : > { %7919 = vmatprep.subr.bf16.mxu0 %v11255_v59  ;;  %8736 = vmatprep.subr.bf16.mxu1 %v11257_v60  ;;  %v11309_v32 = vld [vmem:[%s13297_s7 + $0x1c4] ss:$16 sps:$4 sm:$0xff]   ;;  %v11311_v33 = vld [vmem:[%s13297_s7 + $0x1cc] ss:$16 sps:$4 sm:$0xff]   ;;  %v11313_v34 = vld [vmem:[%s13297_s7 + $0x1c0] ss:$16 sps:$4 sm:$0xff]  }
  0x4c   : > { %v11314_v35 = vld [vmem:[%s13297_s7 + $0x1c8] ss:$16 sps:$4 sm:$0xff]   ;;  %v11315_v36 = vld [vmem:[%s13297_s7 + $0x1e4] ss:$16 sps:$4 sm:$0xff]   ;;  %v11317_v37 = vld [vmem:[%s13297_s7 + $0x1ec] ss:$16 sps:$4 sm:$0xff]  }
  0x4d   : > { %v11319_v38 = vld [vmem:[%s13297_s7 + $0x1e0] ss:$16 sps:$4 sm:$0xff]   ;;  %v11320_v39 = vld [vmem:[%s13297_s7 + $0x1e8] ss:$16 sps:$4 sm:$0xff]   ;;  %v11326_v40 = vld [vmem:[%s13297_s7 + $0x204] ss:$16 sps:$4 sm:$0xff]  }
  0x4e   : > { %7920 = vmatpush1.bf16.msra.mxu0 %v11259_v61  ;;  %8737 = vmatpush1.bf16.msra.mxu1 %v11260_v62  ;;  %v11329_v41 = vld [vmem:[%s13297_s7 + $0x20c] ss:$16 sps:$4 sm:$0xff]   ;;  %v11321_v42 = vld [vmem:[%s13299_s8] ss:$152 sps:$4 sm:$0xff]   ;;  %v11332_v45 = vld [vmem:[%s13297_s7 + $0x224] ss:$16 sps:$4 sm:$0xff]  }
  0x4f   : > { %7921 = vmatprep.subr.bf16.mxu0 %v11261_v63  ;;  %8738 = vmatprep.subr.bf16.mxu1 %v11263_v0  ;;  %v11324_v43 = vld [vmem:[%s13297_s7 + $0x200] ss:$16 sps:$4 sm:$0xff]   ;;  %v11327_v44 = vld [vmem:[%s13297_s7 + $0x208] ss:$16 sps:$4 sm:$0xff]   ;;  %v11335_v46 = vld [vmem:[%s13297_s7 + $0x22c] ss:$16 sps:$4 sm:$0xff]  }
  0x50   : > { %v11330_v47 = vld [vmem:[%s13297_s7 + $0x220] ss:$16 sps:$4 sm:$0xff]   ;;  %v11333_v48 = vld [vmem:[%s13297_s7 + $0x228] ss:$16 sps:$4 sm:$0xff]   ;;  %v11338_v49 = vld [vmem:[%s13297_s7 + $0x244] ss:$16 sps:$4 sm:$0xff]  }
  0x51   : > { %v11341_v50 = vld [vmem:[%s13297_s7 + $0x24c] ss:$16 sps:$4 sm:$0xff]   ;;  %v11336_v51 = vld [vmem:[%s13297_s7 + $0x240] ss:$16 sps:$4 sm:$0xff]   ;;  %v11339_v52 = vld [vmem:[%s13297_s7 + $0x248] ss:$16 sps:$4 sm:$0xff]  }
  0x52   : > { %7922 = vmatpush1.bf16.msra.mxu0 %v11265_v1  ;;  %8739 = vmatpush1.bf16.msra.mxu1 %v11266_v2  ;;  %v11344_v53 = vld [vmem:[%s13297_s7 + $0x264] ss:$16 sps:$4 sm:$0xff]   ;;  %v11347_v54 = vld [vmem:[%s13297_s7 + $0x26c] ss:$16 sps:$4 sm:$0xff]   ;;  %v11342_v55 = vld [vmem:[%s13297_s7 + $0x260] ss:$16 sps:$4 sm:$0xff]  }
  0x53   : > { %7923 = vmatprep.subr.bf16.mxu0 %v11267_v3  ;;  %8740 = vmatprep.subr.bf16.mxu1 %v11269_v4  ;;  %v11345_v56 = vld [vmem:[%s13297_s7 + $0x268] ss:$16 sps:$4 sm:$0xff]   ;;  %v11350_v57 = vld [vmem:[%s13297_s7 + $0x284] ss:$16 sps:$4 sm:$0xff]   ;;  %v11353_v58 = vld [vmem:[%s13297_s7 + $0x28c] ss:$16 sps:$4 sm:$0xff]  }
  0x54   : > { %v11348_v59 = vld [vmem:[%s13297_s7 + $0x280] ss:$16 sps:$4 sm:$0xff]   ;;  %v11351_v60 = vld [vmem:[%s13297_s7 + $0x288] ss:$16 sps:$4 sm:$0xff]   ;;  %v11356_v61 = vld [vmem:[%s13297_s7 + $0x2a4] ss:$16 sps:$4 sm:$0xff]  }
  0x55   : > { %v11359_v62 = vld [vmem:[%s13297_s7 + $0x2ac] ss:$16 sps:$4 sm:$0xff]   ;;  %v11354_v63 = vld [vmem:[%s13297_s7 + $0x2a0] ss:$16 sps:$4 sm:$0xff]   ;;  %v11357_v0 = vld [vmem:[%s13297_s7 + $0x2a8] ss:$16 sps:$4 sm:$0xff]  }
  0x56   : > { %7924 = vmatpush1.bf16.msra.mxu0 %v11271_v5  ;;  %8741 = vmatpush1.bf16.msra.mxu1 %v11272_v6  ;;  %v11362_v1 = vld [vmem:[%s13297_s7 + $0x2c4] ss:$16 sps:$4 sm:$0xff]   ;;  %v11365_v2 = vld [vmem:[%s13297_s7 + $0x2cc] ss:$16 sps:$4 sm:$0xff]   ;;  %v11360_v3 = vld [vmem:[%s13297_s7 + $0x2c0] ss:$16 sps:$4 sm:$0xff]  }
  0x57   : > { %7925 = vmatprep.subr.bf16.mxu0 %v11273_v7  ;;  %8742 = vmatprep.subr.bf16.mxu1 %v11275_v8  ;;  %v11363_v4 = vld [vmem:[%s13297_s7 + $0x2c8] ss:$16 sps:$4 sm:$0xff]   ;;  %v11422_v5 = vld [vmem:[%s13299_s8 + $0xc] ss:$152 sps:$4 sm:$0xff]   ;;  %v11366_v8 = vld [vmem:[%s13297_s7 + $0x2e0] ss:$16 sps:$4 sm:$0xff]  }
  0x58   : > { %v11368_v6 = vld [vmem:[%s13297_s7 + $0x2e4] ss:$16 sps:$4 sm:$0xff]   ;;  %v11371_v7 = vld [vmem:[%s13297_s7 + $0x2ec] ss:$16 sps:$4 sm:$0xff]   ;;  %p11023_p11 = scmp.ne.s32.totalorder %s13136_s14, 3 }
  0x59   : > { %v11395_v23 = vld [vmem:[%s13297_s7 + $0x36c] ss:$16 sps:$4 sm:$0xff]  }
  0x5a   : > { %7926 = vmatpush1.bf16.msra.mxu0 %v11277_v9  ;;  %8743 = vmatpush1.bf16.msra.mxu1 %v11278_v10  ;;  %v11369_v9 = vld [vmem:[%s13297_s7 + $0x2e8] ss:$16 sps:$4 sm:$0xff]   ;;  %v11374_v10 = vld [vmem:[%s13297_s7 + $0x304] ss:$16 sps:$4 sm:$0xff]  }
  0x5b   : > { %7927 = vmatprep.subr.bf16.mxu0 %v11279_v11  ;;  %8744 = vmatprep.subr.bf16.mxu1 %v11281_v12  ;;  %v11377_v11 = vld [vmem:[%s13297_s7 + $0x30c] ss:$16 sps:$4 sm:$0xff]   ;;  %v11372_v12 = vld [vmem:[%s13297_s7 + $0x300] ss:$16 sps:$4 sm:$0xff]  }
  0x5e   : > { %7928 = vmatpush1.bf16.msra.mxu0 %v11283_v13  ;;  %8745 = vmatpush1.bf16.msra.mxu1 %v11284_v14  ;;  %v11375_v13 = vld [vmem:[%s13297_s7 + $0x308] ss:$16 sps:$4 sm:$0xff]   ;;  %v11380_v14 = vld [vmem:[%s13297_s7 + $0x324] ss:$16 sps:$4 sm:$0xff]  }
  0x5f   : > { %7929 = vmatprep.subr.bf16.mxu0 %v11285_v15  ;;  %8746 = vmatprep.subr.bf16.mxu1 %v11287_v16  ;;  %v11383_v15 = vld [vmem:[%s13297_s7 + $0x32c] ss:$16 sps:$4 sm:$0xff]   ;;  %v11378_v16 = vld [vmem:[%s13297_s7 + $0x320] ss:$16 sps:$4 sm:$0xff]  }
  0x62   : > { %7930 = vmatpush1.bf16.msra.mxu0 %v11289_v17  ;;  %8747 = vmatpush1.bf16.msra.mxu1 %v11290_v18  ;;  %v11381_v17 = vld [vmem:[%s13297_s7 + $0x328] ss:$16 sps:$4 sm:$0xff]   ;;  %v11386_v18 = vld [vmem:[%s13297_s7 + $0x344] ss:$16 sps:$4 sm:$0xff]  }
  0x63   : > { %7931 = vmatprep.subr.bf16.mxu0 %v11291_v19  ;;  %8748 = vmatprep.subr.bf16.mxu1 %v11293_v20  ;;  %v11389_v19 = vld [vmem:[%s13297_s7 + $0x34c] ss:$16 sps:$4 sm:$0xff]   ;;  %v11384_v20 = vld [vmem:[%s13297_s7 + $0x340] ss:$16 sps:$4 sm:$0xff]  }
  0x66   : > { %7932 = vmatpush1.bf16.msra.mxu0 %v11295_v21  ;;  %8749 = vmatpush1.bf16.msra.mxu1 %v11296_v22  ;;  %v11387_v21 = vld [vmem:[%s13297_s7 + $0x348] ss:$16 sps:$4 sm:$0xff]   ;;  %v11392_v22 = vld [vmem:[%s13297_s7 + $0x364] ss:$16 sps:$4 sm:$0xff]  }
  0x67   : > { %7933 = vmatprep.subr.bf16.mxu0 %v11297_v24  ;;  %8750 = vmatprep.subr.bf16.mxu1 %v11299_v25  ;;  %v11390_v24 = vld [vmem:[%s13297_s7 + $0x360] ss:$16 sps:$4 sm:$0xff]   ;;  %v11393_v25 = vld [vmem:[%s13297_s7 + $0x368] ss:$16 sps:$4 sm:$0xff]  }
  0x6a   : > { %7934 = vmatpush1.bf16.msra.mxu0 %v11301_v26  ;;  %8751 = vmatpush1.bf16.msra.mxu1 %v11302_v27  ;;  %v11398_v26 = vld [vmem:[%s13297_s7 + $0x384] ss:$16 sps:$4 sm:$0xff]   ;;  %v11401_v27 = vld [vmem:[%s13297_s7 + $0x38c] ss:$16 sps:$4 sm:$0xff]  }
  0x6b   : > { %7935 = vmatprep.subr.bf16.mxu0 %v11303_v28  ;;  %8752 = vmatprep.subr.bf16.mxu1 %v11305_v29  ;;  %v11396_v28 = vld [vmem:[%s13297_s7 + $0x380] ss:$16 sps:$4 sm:$0xff]   ;;  %v11399_v29 = vld [vmem:[%s13297_s7 + $0x388] ss:$16 sps:$4 sm:$0xff]  }
  0x6e   : > { %7936 = vmatpush1.bf16.msra.mxu0 %v11307_v30  ;;  %8753 = vmatpush1.bf16.msra.mxu1 %v11308_v31  ;;  %v11404_v30 = vld [vmem:[%s13297_s7 + $0x3a4] ss:$16 sps:$4 sm:$0xff]   ;;  %v11407_v31 = vld [vmem:[%s13297_s7 + $0x3ac] ss:$16 sps:$4 sm:$0xff]  }
  0x6f   : > { %7937 = vmatprep.subr.bf16.mxu0 %v11309_v32  ;;  %8754 = vmatprep.subr.bf16.mxu1 %v11311_v33  ;;  %v11402_v32 = vld [vmem:[%s13297_s7 + $0x3a0] ss:$16 sps:$4 sm:$0xff]   ;;  %v11405_v33 = vld [vmem:[%s13297_s7 + $0x3a8] ss:$16 sps:$4 sm:$0xff]  }
  0x72   : > { %7938 = vmatpush1.bf16.msra.mxu0 %v11313_v34  ;;  %8755 = vmatpush1.bf16.msra.mxu1 %v11314_v35  ;;  %v11410_v34 = vld [vmem:[%s13297_s7 + $0x3c4] ss:$16 sps:$4 sm:$0xff]   ;;  %v11413_v35 = vld [vmem:[%s13297_s7 + $0x3cc] ss:$16 sps:$4 sm:$0xff]  }
  0x73   : > { %7939 = vmatprep.subr.bf16.mxu0 %v11315_v36  ;;  %8756 = vmatprep.subr.bf16.mxu1 %v11317_v37  ;;  %v11408_v36 = vld [vmem:[%s13297_s7 + $0x3c0] ss:$16 sps:$4 sm:$0xff]   ;;  %v11411_v37 = vld [vmem:[%s13297_s7 + $0x3c8] ss:$16 sps:$4 sm:$0xff]  }
  0x76   : > { %7940 = vmatpush1.bf16.msra.mxu0 %v11319_v38  ;;  %8757 = vmatpush1.bf16.msra.mxu1 %v11320_v39  ;;  %v11416_v38 = vld [vmem:[%s13297_s7 + $0x3e4] ss:$16 sps:$4 sm:$0xff]   ;;  %v11419_v39 = vld [vmem:[%s13297_s7 + $0x3ec] ss:$16 sps:$4 sm:$0xff]  }
  0x77   : > { %7952 = vmatprep.subr.bf16.mxu0 %v11326_v40  ;;  %8769 = vmatprep.subr.bf16.mxu1 %v11329_v41  ;;  %v11414_v40 = vld [vmem:[%s13297_s7 + $0x3e0] ss:$16 sps:$4 sm:$0xff]   ;;  %v11417_v41 = vld [vmem:[%s13297_s7 + $0x3e8] ss:$16 sps:$4 sm:$0xff]  }
  0x79   : > { %7942 = vmatmul.mubr.bf16.vlgmr.msra.gmra.mrb[0].mxu0 %v11321_v42  ;;  %8759 = vmatmul.mubr.bf16.vlgmr.msra.gmra.mrb[0].mxu1 %v11321_v42  ;;  %v11425_v42 = vld [vmem:[%s13297_s7 + $0x404] ss:$16 sps:$4 sm:$0xff]  }
  0x7a   : > { %7953 = vmatpush1.bf16.msra.mxu0 %v11324_v43  ;;  %8770 = vmatpush1.bf16.msra.mxu1 %v11327_v44  ;;  %v11428_v43 = vld [vmem:[%s13297_s7 + $0x40c] ss:$16 sps:$4 sm:$0xff]   ;;  %v11420_v44 = vld [vmem:[%s13299_s8 + $0x8] ss:$152 sps:$4 sm:$0xff]  }
  0x7b   : > { %7954 = vmatprep.subr.bf16.mxu0 %v11332_v45  ;;  %8771 = vmatprep.subr.bf16.mxu1 %v11335_v46  ;;  %v11423_v45 = vld [vmem:[%s13297_s7 + $0x400] ss:$16 sps:$4 sm:$0xff]   ;;  %v11426_v46 = vld [vmem:[%s13297_s7 + $0x408] ss:$16 sps:$4 sm:$0xff]  }
  0x7c   : > { %7984 = vmatprep.mubr.bf16.mxu0 %v11422_v5  ;;  %8801 = vmatprep.mubr.bf16.mxu1 %v11422_v5  ;;  %v11464_v5 = vld [vmem:[%s13297_s7 + $0x4cc] ss:$16 sps:$4 sm:$0xff]  }
  0x7e   : > { %7955 = vmatpush1.bf16.msra.mxu0 %v11330_v47  ;;  %8772 = vmatpush1.bf16.msra.mxu1 %v11333_v48  ;;  %v11431_v47 = vld [vmem:[%s13297_s7 + $0x424] ss:$16 sps:$4 sm:$0xff]   ;;  %v11434_v48 = vld [vmem:[%s13297_s7 + $0x42c] ss:$16 sps:$4 sm:$0xff]  }
  0x7f   : > { %7956 = vmatprep.subr.bf16.mxu0 %v11338_v49  ;;  %8773 = vmatprep.subr.bf16.mxu1 %v11341_v50  ;;  %v11429_v49 = vld [vmem:[%s13297_s7 + $0x420] ss:$16 sps:$4 sm:$0xff]   ;;  %v11432_v50 = vld [vmem:[%s13297_s7 + $0x428] ss:$16 sps:$4 sm:$0xff]  }
  0x82   : > { %7957 = vmatpush1.bf16.msra.mxu0 %v11336_v51  ;;  %8774 = vmatpush1.bf16.msra.mxu1 %v11339_v52  ;;  %v11521_v51 = vld [vmem:[%s13299_s8 + $0x14] ss:$152 sps:$4 sm:$0xff]  }
  0x83   : > { %7958 = vmatprep.subr.bf16.mxu0 %v11344_v53  ;;  %8775 = vmatprep.subr.bf16.mxu1 %v11347_v54  ;;  %v11437_v52 = vld [vmem:[%s13297_s7 + $0x444] ss:$16 sps:$4 sm:$0xff]   ;;  %v11440_v53 = vld [vmem:[%s13297_s7 + $0x44c] ss:$16 sps:$4 sm:$0xff]   ;;  %v11435_v54 = vld [vmem:[%s13297_s7 + $0x440] ss:$16 sps:$4 sm:$0xff]  }
  0x86   : > { %7959 = vmatpush1.bf16.msra.mxu0 %v11342_v55  ;;  %8776 = vmatpush1.bf16.msra.mxu1 %v11345_v56  ;;  %v11438_v55 = vld [vmem:[%s13297_s7 + $0x448] ss:$16 sps:$4 sm:$0xff]   ;;  %v11443_v56 = vld [vmem:[%s13297_s7 + $0x464] ss:$16 sps:$4 sm:$0xff]  }
  0x87   : > { %7960 = vmatprep.subr.bf16.mxu0 %v11350_v57  ;;  %8777 = vmatprep.subr.bf16.mxu1 %v11353_v58  ;;  %v11446_v57 = vld [vmem:[%s13297_s7 + $0x46c] ss:$16 sps:$4 sm:$0xff]   ;;  %v11441_v58 = vld [vmem:[%s13297_s7 + $0x460] ss:$16 sps:$4 sm:$0xff]  }
  0x8a   : > { %7961 = vmatpush1.bf16.msra.mxu0 %v11348_v59  ;;  %8778 = vmatpush1.bf16.msra.mxu1 %v11351_v60  ;;  %v11444_v59 = vld [vmem:[%s13297_s7 + $0x468] ss:$16 sps:$4 sm:$0xff]   ;;  %v11449_v60 = vld [vmem:[%s13297_s7 + $0x484] ss:$16 sps:$4 sm:$0xff]  }
  0x8b   : > { %7962 = vmatprep.subr.bf16.mxu0 %v11356_v61  ;;  %8779 = vmatprep.subr.bf16.mxu1 %v11359_v62  ;;  %v11452_v61 = vld [vmem:[%s13297_s7 + $0x48c] ss:$16 sps:$4 sm:$0xff]   ;;  %v11447_v62 = vld [vmem:[%s13297_s7 + $0x480] ss:$16 sps:$4 sm:$0xff]  }
  0x8e   : > { %7963 = vmatpush1.bf16.msra.mxu0 %v11354_v63  ;;  %8780 = vmatpush1.bf16.msra.mxu1 %v11357_v0  ;;  %v11450_v63 = vld [vmem:[%s13297_s7 + $0x488] ss:$16 sps:$4 sm:$0xff]   ;;  %v11455_v0 = vld [vmem:[%s13297_s7 + $0x4a4] ss:$16 sps:$4 sm:$0xff]  }
  0x8f   : > { %7964 = vmatprep.subr.bf16.mxu0 %v11362_v1  ;;  %8781 = vmatprep.subr.bf16.mxu1 %v11365_v2  ;;  %v11458_v1 = vld [vmem:[%s13297_s7 + $0x4ac] ss:$16 sps:$4 sm:$0xff]   ;;  %v11453_v2 = vld [vmem:[%s13297_s7 + $0x4a0] ss:$16 sps:$4 sm:$0xff]  }
  0x92   : > { %7965 = vmatpush1.bf16.msra.mxu0 %v11360_v3  ;;  %8782 = vmatpush1.bf16.msra.mxu1 %v11363_v4  ;;  %v11456_v3 = vld [vmem:[%s13297_s7 + $0x4a8] ss:$16 sps:$4 sm:$0xff]   ;;  %v11461_v4 = vld [vmem:[%s13297_s7 + $0x4c4] ss:$16 sps:$4 sm:$0xff]  }
  0x93   : > { %7966 = vmatprep.subr.bf16.mxu0 %v11368_v6  ;;  %8783 = vmatprep.subr.bf16.mxu1 %v11371_v7  ;;  %v11459_v6 = vld [vmem:[%s13297_s7 + $0x4c0] ss:$16 sps:$4 sm:$0xff]   ;;  %v11462_v7 = vld [vmem:[%s13297_s7 + $0x4c8] ss:$16 sps:$4 sm:$0xff]  }
  0x96   : > { %7967 = vmatpush1.bf16.msra.mxu0 %v11366_v8  ;;  %8784 = vmatpush1.bf16.msra.mxu1 %v11369_v9  ;;  %v11467_v8 = vld [vmem:[%s13297_s7 + $0x4e4] ss:$16 sps:$4 sm:$0xff]   ;;  %v11470_v9 = vld [vmem:[%s13297_s7 + $0x4ec] ss:$16 sps:$4 sm:$0xff]  }
  0x97   : > { %7968 = vmatprep.subr.bf16.mxu0 %v11374_v10  ;;  %8785 = vmatprep.subr.bf16.mxu1 %v11377_v11  ;;  %v11465_v10 = vld [vmem:[%s13297_s7 + $0x4e0] ss:$16 sps:$4 sm:$0xff]   ;;  %v11468_v11 = vld [vmem:[%s13297_s7 + $0x4e8] ss:$16 sps:$4 sm:$0xff]  }
  0x9a   : > { %7969 = vmatpush1.bf16.msra.mxu0 %v11372_v12  ;;  %8786 = vmatpush1.bf16.msra.mxu1 %v11375_v13  ;;  %v11473_v12 = vld [vmem:[%s13297_s7 + $0x504] ss:$16 sps:$4 sm:$0xff]   ;;  %v11476_v13 = vld [vmem:[%s13297_s7 + $0x50c] ss:$16 sps:$4 sm:$0xff]  }
  0x9b   : > { %7970 = vmatprep.subr.bf16.mxu0 %v11380_v14  ;;  %8787 = vmatprep.subr.bf16.mxu1 %v11383_v15  ;;  %v11471_v14 = vld [vmem:[%s13297_s7 + $0x500] ss:$16 sps:$4 sm:$0xff]   ;;  %v11474_v15 = vld [vmem:[%s13297_s7 + $0x508] ss:$16 sps:$4 sm:$0xff]  }
  0x9e   : > { %7971 = vmatpush1.bf16.msra.mxu0 %v11378_v16  ;;  %8788 = vmatpush1.bf16.msra.mxu1 %v11381_v17  ;;  %v11479_v16 = vld [vmem:[%s13297_s7 + $0x524] ss:$16 sps:$4 sm:$0xff]   ;;  %v11482_v17 = vld [vmem:[%s13297_s7 + $0x52c] ss:$16 sps:$4 sm:$0xff]  }
  0x9f   : > { %7972 = vmatprep.subr.bf16.mxu0 %v11386_v18  ;;  %8789 = vmatprep.subr.bf16.mxu1 %v11389_v19  ;;  %v11477_v18 = vld [vmem:[%s13297_s7 + $0x520] ss:$16 sps:$4 sm:$0xff]   ;;  %v11480_v19 = vld [vmem:[%s13297_s7 + $0x528] ss:$16 sps:$4 sm:$0xff]  }
  0xa2   : > { %7973 = vmatpush1.bf16.msra.mxu0 %v11384_v20  ;;  %8790 = vmatpush1.bf16.msra.mxu1 %v11387_v21  ;;  %v11485_v20 = vld [vmem:[%s13297_s7 + $0x544] ss:$16 sps:$4 sm:$0xff]   ;;  %v11488_v21 = vld [vmem:[%s13297_s7 + $0x54c] ss:$16 sps:$4 sm:$0xff]  }
  0xa3   : > { %7974 = vmatprep.subr.bf16.mxu0 %v11392_v22  ;;  %8791 = vmatprep.subr.bf16.mxu1 %v11395_v23  ;;  %v11483_v22 = vld [vmem:[%s13297_s7 + $0x540] ss:$16 sps:$4 sm:$0xff]   ;;  %v11486_v23 = vld [vmem:[%s13297_s7 + $0x548] ss:$16 sps:$4 sm:$0xff]  }
  0xa6   : > { %7975 = vmatpush1.bf16.msra.mxu0 %v11390_v24  ;;  %8792 = vmatpush1.bf16.msra.mxu1 %v11393_v25  ;;  %v11491_v24 = vld [vmem:[%s13297_s7 + $0x564] ss:$16 sps:$4 sm:$0xff]   ;;  %v11494_v25 = vld [vmem:[%s13297_s7 + $0x56c] ss:$16 sps:$4 sm:$0xff]  }
  0xa7   : > { %7976 = vmatprep.subr.bf16.mxu0 %v11398_v26  ;;  %8793 = vmatprep.subr.bf16.mxu1 %v11401_v27  ;;  %v11489_v26 = vld [vmem:[%s13297_s7 + $0x560] ss:$16 sps:$4 sm:$0xff]   ;;  %v11492_v27 = vld [vmem:[%s13297_s7 + $0x568] ss:$16 sps:$4 sm:$0xff]  }
  0xaa   : > { %7977 = vmatpush1.bf16.msra.mxu0 %v11396_v28  ;;  %8794 = vmatpush1.bf16.msra.mxu1 %v11399_v29  ;;  %v11497_v28 = vld [vmem:[%s13297_s7 + $0x584] ss:$16 sps:$4 sm:$0xff]   ;;  %v11500_v29 = vld [vmem:[%s13297_s7 + $0x58c] ss:$16 sps:$4 sm:$0xff]  }
  0xab   : > { %7978 = vmatprep.subr.bf16.mxu0 %v11404_v30  ;;  %8795 = vmatprep.subr.bf16.mxu1 %v11407_v31  ;;  %v11495_v30 = vld [vmem:[%s13297_s7 + $0x580] ss:$16 sps:$4 sm:$0xff]   ;;  %v11498_v31 = vld [vmem:[%s13297_s7 + $0x588] ss:$16 sps:$4 sm:$0xff]  }
  0xae   : > { %7979 = vmatpush1.bf16.msra.mxu0 %v11402_v32  ;;  %8796 = vmatpush1.bf16.msra.mxu1 %v11405_v33  ;;  %v11503_v32 = vld [vmem:[%s13297_s7 + $0x5a4] ss:$16 sps:$4 sm:$0xff]   ;;  %v11506_v33 = vld [vmem:[%s13297_s7 + $0x5ac] ss:$16 sps:$4 sm:$0xff]  }
  0xaf   : > { %7980 = vmatprep.subr.bf16.mxu0 %v11410_v34  ;;  %8797 = vmatprep.subr.bf16.mxu1 %v11413_v35  ;;  %v11501_v34 = vld [vmem:[%s13297_s7 + $0x5a0] ss:$16 sps:$4 sm:$0xff]   ;;  %v11504_v35 = vld [vmem:[%s13297_s7 + $0x5a8] ss:$16 sps:$4 sm:$0xff]  }
  0xb2   : > { %7981 = vmatpush1.bf16.msra.mxu0 %v11408_v36  ;;  %8798 = vmatpush1.bf16.msra.mxu1 %v11411_v37  ;;  %v11509_v36 = vld [vmem:[%s13297_s7 + $0x5c4] ss:$16 sps:$4 sm:$0xff]   ;;  %v11512_v37 = vld [vmem:[%s13297_s7 + $0x5cc] ss:$16 sps:$4 sm:$0xff]  }
  0xb3   : > { %7982 = vmatprep.subr.bf16.mxu0 %v11416_v38  ;;  %8799 = vmatprep.subr.bf16.mxu1 %v11419_v39  ;;  %v11507_v38 = vld [vmem:[%s13297_s7 + $0x5c0] ss:$16 sps:$4 sm:$0xff]   ;;  %v11510_v39 = vld [vmem:[%s13297_s7 + $0x5c8] ss:$16 sps:$4 sm:$0xff]  }
  0xb6   : > { %7983 = vmatpush1.bf16.msra.mxu0 %v11414_v40  ;;  %8800 = vmatpush1.bf16.msra.mxu1 %v11417_v41  ;;  %v11515_v40 = vld [vmem:[%s13297_s7 + $0x5e4] ss:$16 sps:$4 sm:$0xff]   ;;  %v11518_v41 = vld [vmem:[%s13297_s7 + $0x5ec] ss:$16 sps:$4 sm:$0xff]  }
  0xb7   : > { %7995 = vmatprep.subr.bf16.mxu0 %v11425_v42  ;;  %8812 = vmatprep.subr.bf16.mxu1 %v11428_v43  ;;  %v11513_v42 = vld [vmem:[%s13297_s7 + $0x5e0] ss:$16 sps:$4 sm:$0xff]   ;;  %v11516_v43 = vld [vmem:[%s13297_s7 + $0x5e8] ss:$16 sps:$4 sm:$0xff]  }
  0xb9   : > { %7985 = vmatmul.mubr.bf16.vlgmr.msra.gmra.mrb[0].mxu0 %v11420_v44  ;;  %8802 = vmatmul.mubr.bf16.vlgmr.msra.gmra.mrb[0].mxu1 %v11420_v44  ;;  %v11524_v44 = vld [vmem:[%s13297_s7 + $0x604] ss:$16 sps:$4 sm:$0xff]  }
  0xba   : > { %7996 = vmatpush1.bf16.msra.mxu0 %v11423_v45  ;;  %8813 = vmatpush1.bf16.msra.mxu1 %v11426_v46  ;;  %v11527_v45 = vld [vmem:[%s13297_s7 + $0x60c] ss:$16 sps:$4 sm:$0xff]   ;;  %v11519_v46 = vld [vmem:[%s13299_s8 + $0x10] ss:$152 sps:$4 sm:$0xff]  }
  0xbb   : > { %7997 = vmatprep.subr.bf16.mxu0 %v11431_v47  ;;  %8814 = vmatprep.subr.bf16.mxu1 %v11434_v48  ;;  %v11522_v47 = vld [vmem:[%s13297_s7 + $0x600] ss:$16 sps:$4 sm:$0xff]   ;;  %v11525_v48 = vld [vmem:[%s13297_s7 + $0x608] ss:$16 sps:$4 sm:$0xff]  }
  0xbc   : > { %8027 = vmatprep.mubr.bf16.mxu0 %v11521_v51  ;;  %8844 = vmatprep.mubr.bf16.mxu1 %v11521_v51  ;;  %v11620_v51 = vld [vmem:[%s13299_s8 + $0x1c] ss:$152 sps:$4 sm:$0xff]  }
  0xbe   : > { %7998 = vmatpush1.bf16.msra.mxu0 %v11429_v49  ;;  %8815 = vmatpush1.bf16.msra.mxu1 %v11432_v50  ;;  %v11530_v49 = vld [vmem:[%s13297_s7 + $0x624] ss:$16 sps:$4 sm:$0xff]   ;;  %v11533_v50 = vld [vmem:[%s13297_s7 + $0x62c] ss:$16 sps:$4 sm:$0xff]  }
  0xbf   : > { %7999 = vmatprep.subr.bf16.mxu0 %v11437_v52  ;;  %8816 = vmatprep.subr.bf16.mxu1 %v11440_v53  ;;  %v11528_v52 = vld [vmem:[%s13297_s7 + $0x620] ss:$16 sps:$4 sm:$0xff]   ;;  %v11531_v53 = vld [vmem:[%s13297_s7 + $0x628] ss:$16 sps:$4 sm:$0xff]  }
  0xc2   : > { %8000 = vmatpush1.bf16.msra.mxu0 %v11435_v54  ;;  %8817 = vmatpush1.bf16.msra.mxu1 %v11438_v55  ;;  %v11536_v54 = vld [vmem:[%s13297_s7 + $0x644] ss:$16 sps:$4 sm:$0xff]   ;;  %v11539_v55 = vld [vmem:[%s13297_s7 + $0x64c] ss:$16 sps:$4 sm:$0xff]  }
  0xc3   : > { %8001 = vmatprep.subr.bf16.mxu0 %v11443_v56  ;;  %8818 = vmatprep.subr.bf16.mxu1 %v11446_v57  ;;  %v11534_v56 = vld [vmem:[%s13297_s7 + $0x640] ss:$16 sps:$4 sm:$0xff]   ;;  %v11537_v57 = vld [vmem:[%s13297_s7 + $0x648] ss:$16 sps:$4 sm:$0xff]  }
  0xc6   : > { %8002 = vmatpush1.bf16.msra.mxu0 %v11441_v58  ;;  %8819 = vmatpush1.bf16.msra.mxu1 %v11444_v59  ;;  %v11542_v58 = vld [vmem:[%s13297_s7 + $0x664] ss:$16 sps:$4 sm:$0xff]   ;;  %v11545_v59 = vld [vmem:[%s13297_s7 + $0x66c] ss:$16 sps:$4 sm:$0xff]  }
  0xc7   : > { %8003 = vmatprep.subr.bf16.mxu0 %v11449_v60  ;;  %8820 = vmatprep.subr.bf16.mxu1 %v11452_v61  ;;  %v11540_v60 = vld [vmem:[%s13297_s7 + $0x660] ss:$16 sps:$4 sm:$0xff]   ;;  %v11543_v61 = vld [vmem:[%s13297_s7 + $0x668] ss:$16 sps:$4 sm:$0xff]  }
  0xca   : > { %8004 = vmatpush1.bf16.msra.mxu0 %v11447_v62  ;;  %8821 = vmatpush1.bf16.msra.mxu1 %v11450_v63  ;;  %v11548_v62 = vld [vmem:[%s13297_s7 + $0x684] ss:$16 sps:$4 sm:$0xff]   ;;  %v11551_v63 = vld [vmem:[%s13297_s7 + $0x68c] ss:$16 sps:$4 sm:$0xff]  }
  0xcb   : > { %8005 = vmatprep.subr.bf16.mxu0 %v11455_v0  ;;  %8822 = vmatprep.subr.bf16.mxu1 %v11458_v1  ;;  %v11546_v0 = vld [vmem:[%s13297_s7 + $0x680] ss:$16 sps:$4 sm:$0xff]   ;;  %v11549_v1 = vld [vmem:[%s13297_s7 + $0x688] ss:$16 sps:$4 sm:$0xff]  }
  0xce   : > { %8006 = vmatpush1.bf16.msra.mxu0 %v11453_v2  ;;  %8823 = vmatpush1.bf16.msra.mxu1 %v11456_v3  ;;  %v11554_v2 = vld [vmem:[%s13297_s7 + $0x6a4] ss:$16 sps:$4 sm:$0xff]   ;;  %v11557_v3 = vld [vmem:[%s13297_s7 + $0x6ac] ss:$16 sps:$4 sm:$0xff]  }
  0xcf   : > { %8007 = vmatprep.subr.bf16.mxu0 %v11461_v4  ;;  %8824 = vmatprep.subr.bf16.mxu1 %v11464_v5  ;;  %v11552_v4 = vld [vmem:[%s13297_s7 + $0x6a0] ss:$16 sps:$4 sm:$0xff]   ;;  %v11555_v5 = vld [vmem:[%s13297_s7 + $0x6a8] ss:$16 sps:$4 sm:$0xff]  }
  0xd2   : > { %8008 = vmatpush1.bf16.msra.mxu0 %v11459_v6  ;;  %8825 = vmatpush1.bf16.msra.mxu1 %v11462_v7  ;;  %v11560_v6 = vld [vmem:[%s13297_s7 + $0x6c4] ss:$16 sps:$4 sm:$0xff]   ;;  %v11563_v7 = vld [vmem:[%s13297_s7 + $0x6cc] ss:$16 sps:$4 sm:$0xff]  }
  0xd3   : > { %8009 = vmatprep.subr.bf16.mxu0 %v11467_v8  ;;  %8826 = vmatprep.subr.bf16.mxu1 %v11470_v9  ;;  %v11558_v8 = vld [vmem:[%s13297_s7 + $0x6c0] ss:$16 sps:$4 sm:$0xff]   ;;  %v11561_v9 = vld [vmem:[%s13297_s7 + $0x6c8] ss:$16 sps:$4 sm:$0xff]  }
  0xd6   : > { %8010 = vmatpush1.bf16.msra.mxu0 %v11465_v10  ;;  %8827 = vmatpush1.bf16.msra.mxu1 %v11468_v11  ;;  %v11566_v10 = vld [vmem:[%s13297_s7 + $0x6e4] ss:$16 sps:$4 sm:$0xff]   ;;  %v11569_v11 = vld [vmem:[%s13297_s7 + $0x6ec] ss:$16 sps:$4 sm:$0xff]  }
  0xd7   : > { %8011 = vmatprep.subr.bf16.mxu0 %v11473_v12  ;;  %8828 = vmatprep.subr.bf16.mxu1 %v11476_v13  ;;  %v11564_v12 = vld [vmem:[%s13297_s7 + $0x6e0] ss:$16 sps:$4 sm:$0xff]   ;;  %v11567_v13 = vld [vmem:[%s13297_s7 + $0x6e8] ss:$16 sps:$4 sm:$0xff]  }
  0xda   : > { %8012 = vmatpush1.bf16.msra.mxu0 %v11471_v14  ;;  %8829 = vmatpush1.bf16.msra.mxu1 %v11474_v15  ;;  %v11572_v14 = vld [vmem:[%s13297_s7 + $0x704] ss:$16 sps:$4 sm:$0xff]   ;;  %v11575_v15 = vld [vmem:[%s13297_s7 + $0x70c] ss:$16 sps:$4 sm:$0xff]  }
  0xdb   : > { %8013 = vmatprep.subr.bf16.mxu0 %v11479_v16  ;;  %8830 = vmatprep.subr.bf16.mxu1 %v11482_v17  ;;  %v11570_v16 = vld [vmem:[%s13297_s7 + $0x700] ss:$16 sps:$4 sm:$0xff]   ;;  %v11573_v17 = vld [vmem:[%s13297_s7 + $0x708] ss:$16 sps:$4 sm:$0xff]  }
  0xde   : > { %8014 = vmatpush1.bf16.msra.mxu0 %v11477_v18  ;;  %8831 = vmatpush1.bf16.msra.mxu1 %v11480_v19  ;;  %v11578_v18 = vld [vmem:[%s13297_s7 + $0x724] ss:$16 sps:$4 sm:$0xff]   ;;  %v11581_v19 = vld [vmem:[%s13297_s7 + $0x72c] ss:$16 sps:$4 sm:$0xff]  }
  0xdf   : > { %8015 = vmatprep.subr.bf16.mxu0 %v11485_v20  ;;  %8832 = vmatprep.subr.bf16.mxu1 %v11488_v21  ;;  %v11576_v20 = vld [vmem:[%s13297_s7 + $0x720] ss:$16 sps:$4 sm:$0xff]   ;;  %v11579_v21 = vld [vmem:[%s13297_s7 + $0x728] ss:$16 sps:$4 sm:$0xff]  }
  0xe2   : > { %8016 = vmatpush1.bf16.msra.mxu0 %v11483_v22  ;;  %8833 = vmatpush1.bf16.msra.mxu1 %v11486_v23  ;;  %v11584_v22 = vld [vmem:[%s13297_s7 + $0x744] ss:$16 sps:$4 sm:$0xff]   ;;  %v11587_v23 = vld [vmem:[%s13297_s7 + $0x74c] ss:$16 sps:$4 sm:$0xff]  }
  0xe3   : > { %8017 = vmatprep.subr.bf16.mxu0 %v11491_v24  ;;  %8834 = vmatprep.subr.bf16.mxu1 %v11494_v25  ;;  %v11582_v24 = vld [vmem:[%s13297_s7 + $0x740] ss:$16 sps:$4 sm:$0xff]   ;;  %v11585_v25 = vld [vmem:[%s13297_s7 + $0x748] ss:$16 sps:$4 sm:$0xff]  }
  0xe6   : > { %8018 = vmatpush1.bf16.msra.mxu0 %v11489_v26  ;;  %8835 = vmatpush1.bf16.msra.mxu1 %v11492_v27  ;;  %v11590_v26 = vld [vmem:[%s13297_s7 + $0x764] ss:$16 sps:$4 sm:$0xff]   ;;  %v11593_v27 = vld [vmem:[%s13297_s7 + $0x76c] ss:$16 sps:$4 sm:$0xff]  }
  0xe7   : > { %8019 = vmatprep.subr.bf16.mxu0 %v11497_v28  ;;  %8836 = vmatprep.subr.bf16.mxu1 %v11500_v29  ;;  %v11588_v28 = vld [vmem:[%s13297_s7 + $0x760] ss:$16 sps:$4 sm:$0xff]   ;;  %v11591_v29 = vld [vmem:[%s13297_s7 + $0x768] ss:$16 sps:$4 sm:$0xff]  }
  0xea   : > { %8020 = vmatpush1.bf16.msra.mxu0 %v11495_v30  ;;  %8837 = vmatpush1.bf16.msra.mxu1 %v11498_v31  ;;  %v11596_v30 = vld [vmem:[%s13297_s7 + $0x784] ss:$16 sps:$4 sm:$0xff]   ;;  %v11599_v31 = vld [vmem:[%s13297_s7 + $0x78c] ss:$16 sps:$4 sm:$0xff]  }
  0xeb   : > { %8021 = vmatprep.subr.bf16.mxu0 %v11503_v32  ;;  %8838 = vmatprep.subr.bf16.mxu1 %v11506_v33  ;;  %v11594_v32 = vld [vmem:[%s13297_s7 + $0x780] ss:$16 sps:$4 sm:$0xff]   ;;  %v11597_v33 = vld [vmem:[%s13297_s7 + $0x788] ss:$16 sps:$4 sm:$0xff]  }
  0xee   : > { %8022 = vmatpush1.bf16.msra.mxu0 %v11501_v34  ;;  %8839 = vmatpush1.bf16.msra.mxu1 %v11504_v35  ;;  %v11602_v34 = vld [vmem:[%s13297_s7 + $0x7a4] ss:$16 sps:$4 sm:$0xff]   ;;  %v11605_v35 = vld [vmem:[%s13297_s7 + $0x7ac] ss:$16 sps:$4 sm:$0xff]  }
  0xef   : > { %8023 = vmatprep.subr.bf16.mxu0 %v11509_v36  ;;  %8840 = vmatprep.subr.bf16.mxu1 %v11512_v37  ;;  %v11600_v36 = vld [vmem:[%s13297_s7 + $0x7a0] ss:$16 sps:$4 sm:$0xff]   ;;  %v11603_v37 = vld [vmem:[%s13297_s7 + $0x7a8] ss:$16 sps:$4 sm:$0xff]  }
  0xf2   : > { %8024 = vmatpush1.bf16.msra.mxu0 %v11507_v38  ;;  %8841 = vmatpush1.bf16.msra.mxu1 %v11510_v39  ;;  %v11608_v38 = vld [vmem:[%s13297_s7 + $0x7c4] ss:$16 sps:$4 sm:$0xff]   ;;  %v11611_v39 = vld [vmem:[%s13297_s7 + $0x7cc] ss:$16 sps:$4 sm:$0xff]  }
  0xf3   : > { %8025 = vmatprep.subr.bf16.mxu0 %v11515_v40  ;;  %8842 = vmatprep.subr.bf16.mxu1 %v11518_v41  ;;  %v11606_v40 = vld [vmem:[%s13297_s7 + $0x7c0] ss:$16 sps:$4 sm:$0xff]   ;;  %v11609_v41 = vld [vmem:[%s13297_s7 + $0x7c8] ss:$16 sps:$4 sm:$0xff]  }
  0xf6   : > { %8026 = vmatpush1.bf16.msra.mxu0 %v11513_v42  ;;  %8843 = vmatpush1.bf16.msra.mxu1 %v11516_v43  ;;  %v11614_v42 = vld [vmem:[%s13297_s7 + $0x7e4] ss:$16 sps:$4 sm:$0xff]   ;;  %v11617_v43 = vld [vmem:[%s13297_s7 + $0x7ec] ss:$16 sps:$4 sm:$0xff]  }
  0xf7   : > { %8038 = vmatprep.subr.bf16.mxu0 %v11524_v44  ;;  %8855 = vmatprep.subr.bf16.mxu1 %v11527_v45  ;;  %v11612_v44 = vld [vmem:[%s13297_s7 + $0x7e0] ss:$16 sps:$4 sm:$0xff]   ;;  %v11615_v45 = vld [vmem:[%s13297_s7 + $0x7e8] ss:$16 sps:$4 sm:$0xff]  }
  0xf9   : > { %8028 = vmatmul.mubr.bf16.vlgmr.msra.gmra.mrb[0].mxu0 %v11519_v46  ;;  %8845 = vmatmul.mubr.bf16.vlgmr.msra.gmra.mrb[0].mxu1 %v11519_v46  ;;  %v11623_v46 = vld [vmem:[%s13297_s7 + $0x804] ss:$16 sps:$4 sm:$0xff]  }
  0xfa   : > { %8039 = vmatpush1.bf16.msra.mxu0 %v11522_v47  ;;  %8856 = vmatpush1.bf16.msra.mxu1 %v11525_v48  ;;  %v11626_v47 = vld [vmem:[%s13297_s7 + $0x80c] ss:$16 sps:$4 sm:$0xff]   ;;  %v11618_v48 = vld [vmem:[%s13299_s8 + $0x18] ss:$152 sps:$4 sm:$0xff]  }
  0xfb   : > { %8040 = vmatprep.subr.bf16.mxu0 %v11530_v49  ;;  %8857 = vmatprep.subr.bf16.mxu1 %v11533_v50  ;;  %v11621_v49 = vld [vmem:[%s13297_s7 + $0x800] ss:$16 sps:$4 sm:$0xff]   ;;  %v11624_v50 = vld [vmem:[%s13297_s7 + $0x808] ss:$16 sps:$4 sm:$0xff]  }
  0xfc   : > { %8070 = vmatprep.mubr.bf16.mxu0 %v11620_v51  ;;  %8887 = vmatprep.mubr.bf16.mxu1 %v11620_v51  ;;  %v11629_v51 = vld [vmem:[%s13297_s7 + $0x824] ss:$16 sps:$4 sm:$0xff]  }
  0xfe   : > { %8041 = vmatpush1.bf16.msra.mxu0 %v11528_v52  ;;  %8858 = vmatpush1.bf16.msra.mxu1 %v11531_v53  ;;  %v11632_v52 = vld [vmem:[%s13297_s7 + $0x82c] ss:$16 sps:$4 sm:$0xff]  }
  0xff   : > { %8042 = vmatprep.subr.bf16.mxu0 %v11536_v54  ;;  %8859 = vmatprep.subr.bf16.mxu1 %v11539_v55  ;;  %v11719_v53 = vld [vmem:[%s13299_s8 + $0x24] ss:$152 sps:$4 sm:$0xff]   ;;  %v11627_v54 = vld [vmem:[%s13297_s7 + $0x820] ss:$16 sps:$4 sm:$0xff]   ;;  %v11630_v55 = vld [vmem:[%s13297_s7 + $0x828] ss:$16 sps:$4 sm:$0xff]  }
 0x102   : > { %8043 = vmatpush1.bf16.msra.mxu0 %v11534_v56  ;;  %8860 = vmatpush1.bf16.msra.mxu1 %v11537_v57  ;;  %v11635_v56 = vld [vmem:[%s13297_s7 + $0x844] ss:$16 sps:$4 sm:$0xff]   ;;  %v11638_v57 = vld [vmem:[%s13297_s7 + $0x84c] ss:$16 sps:$4 sm:$0xff]  }
 0x103   : > { %8044 = vmatprep.subr.bf16.mxu0 %v11542_v58  ;;  %8861 = vmatprep.subr.bf16.mxu1 %v11545_v59  ;;  %v11633_v58 = vld [vmem:[%s13297_s7 + $0x840] ss:$16 sps:$4 sm:$0xff]   ;;  %v11636_v59 = vld [vmem:[%s13297_s7 + $0x848] ss:$16 sps:$4 sm:$0xff]  }
 0x106   : > { %8045 = vmatpush1.bf16.msra.mxu0 %v11540_v60  ;;  %8862 = vmatpush1.bf16.msra.mxu1 %v11543_v61  ;;  %v11641_v60 = vld [vmem:[%s13297_s7 + $0x864] ss:$16 sps:$4 sm:$0xff]   ;;  %v11644_v61 = vld [vmem:[%s13297_s7 + $0x86c] ss:$16 sps:$4 sm:$0xff]  }
 0x107   : > { %8046 = vmatprep.subr.bf16.mxu0 %v11548_v62  ;;  %8863 = vmatprep.subr.bf16.mxu1 %v11551_v63  ;;  %v11639_v62 = vld [vmem:[%s13297_s7 + $0x860] ss:$16 sps:$4 sm:$0xff]   ;;  %v11642_v63 = vld [vmem:[%s13297_s7 + $0x868] ss:$16 sps:$4 sm:$0xff]  }
 0x10a   : > { %8047 = vmatpush1.bf16.msra.mxu0 %v11546_v0  ;;  %8864 = vmatpush1.bf16.msra.mxu1 %v11549_v1  ;;  %v11647_v0 = vld [vmem:[%s13297_s7 + $0x884] ss:$16 sps:$4 sm:$0xff]   ;;  %v11650_v1 = vld [vmem:[%s13297_s7 + $0x88c] ss:$16 sps:$4 sm:$0xff]  }
 0x10b   : > { %8048 = vmatprep.subr.bf16.mxu0 %v11554_v2  ;;  %8865 = vmatprep.subr.bf16.mxu1 %v11557_v3  ;;  %v11645_v2 = vld [vmem:[%s13297_s7 + $0x880] ss:$16 sps:$4 sm:$0xff]   ;;  %v11648_v3 = vld [vmem:[%s13297_s7 + $0x888] ss:$16 sps:$4 sm:$0xff]  }
 0x10e   : > { %8049 = vmatpush1.bf16.msra.mxu0 %v11552_v4  ;;  %8866 = vmatpush1.bf16.msra.mxu1 %v11555_v5  ;;  %v11653_v4 = vld [vmem:[%s13297_s7 + $0x8a4] ss:$16 sps:$4 sm:$0xff]   ;;  %v11656_v5 = vld [vmem:[%s13297_s7 + $0x8ac] ss:$16 sps:$4 sm:$0xff]  }
 0x10f   : > { %8050 = vmatprep.subr.bf16.mxu0 %v11560_v6  ;;  %8867 = vmatprep.subr.bf16.mxu1 %v11563_v7  ;;  %v11651_v6 = vld [vmem:[%s13297_s7 + $0x8a0] ss:$16 sps:$4 sm:$0xff]   ;;  %v11654_v7 = vld [vmem:[%s13297_s7 + $0x8a8] ss:$16 sps:$4 sm:$0xff]  }
 0x112   : > { %8051 = vmatpush1.bf16.msra.mxu0 %v11558_v8  ;;  %8868 = vmatpush1.bf16.msra.mxu1 %v11561_v9  ;;  %v11659_v8 = vld [vmem:[%s13297_s7 + $0x8c4] ss:$16 sps:$4 sm:$0xff]   ;;  %v11662_v9 = vld [vmem:[%s13297_s7 + $0x8cc] ss:$16 sps:$4 sm:$0xff]  }
 0x113   : > { %8052 = vmatprep.subr.bf16.mxu0 %v11566_v10  ;;  %8869 = vmatprep.subr.bf16.mxu1 %v11569_v11  ;;  %v11657_v10 = vld [vmem:[%s13297_s7 + $0x8c0] ss:$16 sps:$4 sm:$0xff]   ;;  %v11660_v11 = vld [vmem:[%s13297_s7 + $0x8c8] ss:$16 sps:$4 sm:$0xff]  }
 0x116   : > { %8053 = vmatpush1.bf16.msra.mxu0 %v11564_v12  ;;  %8870 = vmatpush1.bf16.msra.mxu1 %v11567_v13  ;;  %v11665_v12 = vld [vmem:[%s13297_s7 + $0x8e4] ss:$16 sps:$4 sm:$0xff]   ;;  %v11668_v13 = vld [vmem:[%s13297_s7 + $0x8ec] ss:$16 sps:$4 sm:$0xff]  }
 0x117   : > { %8054 = vmatprep.subr.bf16.mxu0 %v11572_v14  ;;  %8871 = vmatprep.subr.bf16.mxu1 %v11575_v15  ;;  %v11663_v14 = vld [vmem:[%s13297_s7 + $0x8e0] ss:$16 sps:$4 sm:$0xff]   ;;  %v11666_v15 = vld [vmem:[%s13297_s7 + $0x8e8] ss:$16 sps:$4 sm:$0xff]  }
 0x11a   : > { %8055 = vmatpush1.bf16.msra.mxu0 %v11570_v16  ;;  %8872 = vmatpush1.bf16.msra.mxu1 %v11573_v17  ;;  %v11671_v16 = vld [vmem:[%s13297_s7 + $0x904] ss:$16 sps:$4 sm:$0xff]   ;;  %v11674_v17 = vld [vmem:[%s13297_s7 + $0x90c] ss:$16 sps:$4 sm:$0xff]  }
 0x11b   : > { %8056 = vmatprep.subr.bf16.mxu0 %v11578_v18  ;;  %8873 = vmatprep.subr.bf16.mxu1 %v11581_v19  ;;  %v11669_v18 = vld [vmem:[%s13297_s7 + $0x900] ss:$16 sps:$4 sm:$0xff]   ;;  %v11672_v19 = vld [vmem:[%s13297_s7 + $0x908] ss:$16 sps:$4 sm:$0xff]  }
 0x11e   : > { %8057 = vmatpush1.bf16.msra.mxu0 %v11576_v20  ;;  %8874 = vmatpush1.bf16.msra.mxu1 %v11579_v21  ;;  %v11677_v20 = vld [vmem:[%s13297_s7 + $0x924] ss:$16 sps:$4 sm:$0xff]   ;;  %v11680_v21 = vld [vmem:[%s13297_s7 + $0x92c] ss:$16 sps:$4 sm:$0xff]  }
 0x11f   : > { %8058 = vmatprep.subr.bf16.mxu0 %v11584_v22  ;;  %8875 = vmatprep.subr.bf16.mxu1 %v11587_v23  ;;  %v11675_v22 = vld [vmem:[%s13297_s7 + $0x920] ss:$16 sps:$4 sm:$0xff]   ;;  %v11678_v23 = vld [vmem:[%s13297_s7 + $0x928] ss:$16 sps:$4 sm:$0xff]  }
 0x122   : > { %8059 = vmatpush1.bf16.msra.mxu0 %v11582_v24  ;;  %8876 = vmatpush1.bf16.msra.mxu1 %v11585_v25  ;;  %v11683_v24 = vld [vmem:[%s13297_s7 + $0x944] ss:$16 sps:$4 sm:$0xff]   ;;  %v11686_v25 = vld [vmem:[%s13297_s7 + $0x94c] ss:$16 sps:$4 sm:$0xff]  }
 0x123   : > { %8060 = vmatprep.subr.bf16.mxu0 %v11590_v26  ;;  %8877 = vmatprep.subr.bf16.mxu1 %v11593_v27  ;;  %v11681_v26 = vld [vmem:[%s13297_s7 + $0x940] ss:$16 sps:$4 sm:$0xff]   ;;  %v11684_v27 = vld [vmem:[%s13297_s7 + $0x948] ss:$16 sps:$4 sm:$0xff]  }
 0x126   : > { %8061 = vmatpush1.bf16.msra.mxu0 %v11588_v28  ;;  %8878 = vmatpush1.bf16.msra.mxu1 %v11591_v29  ;;  %v11689_v28 = vld [vmem:[%s13297_s7 + $0x964] ss:$16 sps:$4 sm:$0xff]   ;;  %v11692_v29 = vld [vmem:[%s13297_s7 + $0x96c] ss:$16 sps:$4 sm:$0xff]  }
 0x127   : > { %8062 = vmatprep.subr.bf16.mxu0 %v11596_v30  ;;  %8879 = vmatprep.subr.bf16.mxu1 %v11599_v31  ;;  %v11687_v30 = vld [vmem:[%s13297_s7 + $0x960] ss:$16 sps:$4 sm:$0xff]   ;;  %v11690_v31 = vld [vmem:[%s13297_s7 + $0x968] ss:$16 sps:$4 sm:$0xff]  }
 0x12a   : > { %8063 = vmatpush1.bf16.msra.mxu0 %v11594_v32  ;;  %8880 = vmatpush1.bf16.msra.mxu1 %v11597_v33  ;;  %v11695_v32 = vld [vmem:[%s13297_s7 + $0x984] ss:$16 sps:$4 sm:$0xff]   ;;  %v11698_v33 = vld [vmem:[%s13297_s7 + $0x98c] ss:$16 sps:$4 sm:$0xff]  }
 0x12b   : > { %8064 = vmatprep.subr.bf16.mxu0 %v11602_v34  ;;  %8881 = vmatprep.subr.bf16.mxu1 %v11605_v35  ;;  %v11693_v34 = vld [vmem:[%s13297_s7 + $0x980] ss:$16 sps:$4 sm:$0xff]   ;;  %v11696_v35 = vld [vmem:[%s13297_s7 + $0x988] ss:$16 sps:$4 sm:$0xff]  }
 0x12e   : > { %8065 = vmatpush1.bf16.msra.mxu0 %v11600_v36  ;;  %8882 = vmatpush1.bf16.msra.mxu1 %v11603_v37  ;;  %v11701_v36 = vld [vmem:[%s13297_s7 + $0x9a4] ss:$16 sps:$4 sm:$0xff]   ;;  %v11704_v37 = vld [vmem:[%s13297_s7 + $0x9ac] ss:$16 sps:$4 sm:$0xff]  }
 0x12f   : > { %8066 = vmatprep.subr.bf16.mxu0 %v11608_v38  ;;  %8883 = vmatprep.subr.bf16.mxu1 %v11611_v39  ;;  %v11699_v38 = vld [vmem:[%s13297_s7 + $0x9a0] ss:$16 sps:$4 sm:$0xff]   ;;  %v11702_v39 = vld [vmem:[%s13297_s7 + $0x9a8] ss:$16 sps:$4 sm:$0xff]  }
 0x132   : > { %8067 = vmatpush1.bf16.msra.mxu0 %v11606_v40  ;;  %8884 = vmatpush1.bf16.msra.mxu1 %v11609_v41  ;;  %v11707_v40 = vld [vmem:[%s13297_s7 + $0x9c4] ss:$16 sps:$4 sm:$0xff]   ;;  %v11710_v41 = vld [vmem:[%s13297_s7 + $0x9cc] ss:$16 sps:$4 sm:$0xff]  }
 0x133   : > { %8068 = vmatprep.subr.bf16.mxu0 %v11614_v42  ;;  %8885 = vmatprep.subr.bf16.mxu1 %v11617_v43  ;;  %v11705_v42 = vld [vmem:[%s13297_s7 + $0x9c0] ss:$16 sps:$4 sm:$0xff]   ;;  %v11708_v43 = vld [vmem:[%s13297_s7 + $0x9c8] ss:$16 sps:$4 sm:$0xff]  }
 0x136   : > { %8069 = vmatpush1.bf16.msra.mxu0 %v11612_v44  ;;  %8886 = vmatpush1.bf16.msra.mxu1 %v11615_v45  ;;  %v11713_v44 = vld [vmem:[%s13297_s7 + $0x9e4] ss:$16 sps:$4 sm:$0xff]   ;;  %v11716_v45 = vld [vmem:[%s13297_s7 + $0x9ec] ss:$16 sps:$4 sm:$0xff]  }
 0x137   : > { %8081 = vmatprep.subr.bf16.mxu0 %v11623_v46  ;;  %8898 = vmatprep.subr.bf16.mxu1 %v11626_v47  ;;  %v11711_v46 = vld [vmem:[%s13297_s7 + $0x9e0] ss:$16 sps:$4 sm:$0xff]   ;;  %v11714_v47 = vld [vmem:[%s13297_s7 + $0x9e8] ss:$16 sps:$4 sm:$0xff]  }
 0x139   : > { %8071 = vmatmul.mubr.bf16.vlgmr.msra.gmra.mrb[0].mxu0 %v11618_v48  ;;  %8888 = vmatmul.mubr.bf16.vlgmr.msra.gmra.mrb[0].mxu1 %v11618_v48  ;;  %v11717_v48 = vld [vmem:[%s13299_s8 + $0x20] ss:$152 sps:$4 sm:$0xff]  }
 0x13a   : > { %8082 = vmatpush1.bf16.msra.mxu0 %v11621_v49  ;;  %8899 = vmatpush1.bf16.msra.mxu1 %v11624_v50  ;;  %v11722_v49 = vld [vmem:[%s13297_s7 + $0xa04] ss:$16 sps:$4 sm:$0xff]   ;;  %v11725_v50 = vld [vmem:[%s13297_s7 + $0xa0c] ss:$16 sps:$4 sm:$0xff]  }
 0x13b   : > { %8083 = vmatprep.subr.bf16.mxu0 %v11629_v51  ;;  %8900 = vmatprep.subr.bf16.mxu1 %v11632_v52  ;;  %v11720_v51 = vld [vmem:[%s13297_s7 + $0xa00] ss:$16 sps:$4 sm:$0xff]   ;;  %v11723_v52 = vld [vmem:[%s13297_s7 + $0xa08] ss:$16 sps:$4 sm:$0xff]  }
 0x13c   : > { %8113 = vmatprep.mubr.bf16.mxu0 %v11719_v53  ;;  %8930 = vmatprep.mubr.bf16.mxu1 %v11719_v53  ;;  %v11728_v53 = vld [vmem:[%s13297_s7 + $0xa24] ss:$16 sps:$4 sm:$0xff]  }
 0x13e   : > { %8084 = vmatpush1.bf16.msra.mxu0 %v11627_v54  ;;  %8901 = vmatpush1.bf16.msra.mxu1 %v11630_v55  ;;  %v11731_v54 = vld [vmem:[%s13297_s7 + $0xa2c] ss:$16 sps:$4 sm:$0xff]  }
 0x13f   : > { %8085 = vmatprep.subr.bf16.mxu0 %v11635_v56  ;;  %8902 = vmatprep.subr.bf16.mxu1 %v11638_v57  ;;  %v11818_v55 = vld [vmem:[%s13299_s8 + $0x2c] ss:$152 sps:$4 sm:$0xff]   ;;  %v11726_v56 = vld [vmem:[%s13297_s7 + $0xa20] ss:$16 sps:$4 sm:$0xff]   ;;  %v11729_v57 = vld [vmem:[%s13297_s7 + $0xa28] ss:$16 sps:$4 sm:$0xff]  }
 0x142   : > { %8086 = vmatpush1.bf16.msra.mxu0 %v11633_v58  ;;  %8903 = vmatpush1.bf16.msra.mxu1 %v11636_v59  ;;  %v11734_v58 = vld [vmem:[%s13297_s7 + $0xa44] ss:$16 sps:$4 sm:$0xff]   ;;  %v11737_v59 = vld [vmem:[%s13297_s7 + $0xa4c] ss:$16 sps:$4 sm:$0xff]  }
 0x143   : > { %8087 = vmatprep.subr.bf16.mxu0 %v11641_v60  ;;  %8904 = vmatprep.subr.bf16.mxu1 %v11644_v61  ;;  %v11732_v60 = vld [vmem:[%s13297_s7 + $0xa40] ss:$16 sps:$4 sm:$0xff]   ;;  %v11735_v61 = vld [vmem:[%s13297_s7 + $0xa48] ss:$16 sps:$4 sm:$0xff]  }
 0x146   : > { %8088 = vmatpush1.bf16.msra.mxu0 %v11639_v62  ;;  %8905 = vmatpush1.bf16.msra.mxu1 %v11642_v63  ;;  %v11740_v62 = vld [vmem:[%s13297_s7 + $0xa64] ss:$16 sps:$4 sm:$0xff]   ;;  %v11743_v63 = vld [vmem:[%s13297_s7 + $0xa6c] ss:$16 sps:$4 sm:$0xff]  }
 0x147   : > { %8089 = vmatprep.subr.bf16.mxu0 %v11647_v0  ;;  %8906 = vmatprep.subr.bf16.mxu1 %v11650_v1  ;;  %v11738_v0 = vld [vmem:[%s13297_s7 + $0xa60] ss:$16 sps:$4 sm:$0xff]   ;;  %v11741_v1 = vld [vmem:[%s13297_s7 + $0xa68] ss:$16 sps:$4 sm:$0xff]  }
 0x14a   : > { %8090 = vmatpush1.bf16.msra.mxu0 %v11645_v2  ;;  %8907 = vmatpush1.bf16.msra.mxu1 %v11648_v3  ;;  %v11746_v2 = vld [vmem:[%s13297_s7 + $0xa84] ss:$16 sps:$4 sm:$0xff]   ;;  %v11749_v3 = vld [vmem:[%s13297_s7 + $0xa8c] ss:$16 sps:$4 sm:$0xff]  }
 0x14b   : > { %8091 = vmatprep.subr.bf16.mxu0 %v11653_v4  ;;  %8908 = vmatprep.subr.bf16.mxu1 %v11656_v5  ;;  %v11744_v4 = vld [vmem:[%s13297_s7 + $0xa80] ss:$16 sps:$4 sm:$0xff]   ;;  %v11747_v5 = vld [vmem:[%s13297_s7 + $0xa88] ss:$16 sps:$4 sm:$0xff]  }
 0x14e   : > { %8092 = vmatpush1.bf16.msra.mxu0 %v11651_v6  ;;  %8909 = vmatpush1.bf16.msra.mxu1 %v11654_v7  ;;  %v11752_v6 = vld [vmem:[%s13297_s7 + $0xaa4] ss:$16 sps:$4 sm:$0xff]   ;;  %v11755_v7 = vld [vmem:[%s13297_s7 + $0xaac] ss:$16 sps:$4 sm:$0xff]  }
 0x14f   : > { %8093 = vmatprep.subr.bf16.mxu0 %v11659_v8  ;;  %8910 = vmatprep.subr.bf16.mxu1 %v11662_v9  ;;  %v11750_v8 = vld [vmem:[%s13297_s7 + $0xaa0] ss:$16 sps:$4 sm:$0xff]   ;;  %v11753_v9 = vld [vmem:[%s13297_s7 + $0xaa8] ss:$16 sps:$4 sm:$0xff]  }
 0x152   : > { %8094 = vmatpush1.bf16.msra.mxu0 %v11657_v10  ;;  %8911 = vmatpush1.bf16.msra.mxu1 %v11660_v11  ;;  %v11758_v10 = vld [vmem:[%s13297_s7 + $0xac4] ss:$16 sps:$4 sm:$0xff]   ;;  %v11761_v11 = vld [vmem:[%s13297_s7 + $0xacc] ss:$16 sps:$4 sm:$0xff]  }
 0x153   : > { %8095 = vmatprep.subr.bf16.mxu0 %v11665_v12  ;;  %8912 = vmatprep.subr.bf16.mxu1 %v11668_v13  ;;  %v11756_v12 = vld [vmem:[%s13297_s7 + $0xac0] ss:$16 sps:$4 sm:$0xff]   ;;  %v11759_v13 = vld [vmem:[%s13297_s7 + $0xac8] ss:$16 sps:$4 sm:$0xff]  }
 0x156   : > { %8096 = vmatpush1.bf16.msra.mxu0 %v11663_v14  ;;  %8913 = vmatpush1.bf16.msra.mxu1 %v11666_v15  ;;  %v11764_v14 = vld [vmem:[%s13297_s7 + $0xae4] ss:$16 sps:$4 sm:$0xff]   ;;  %v11767_v15 = vld [vmem:[%s13297_s7 + $0xaec] ss:$16 sps:$4 sm:$0xff]  }
 0x157   : > { %8097 = vmatprep.subr.bf16.mxu0 %v11671_v16  ;;  %8914 = vmatprep.subr.bf16.mxu1 %v11674_v17  ;;  %v11762_v16 = vld [vmem:[%s13297_s7 + $0xae0] ss:$16 sps:$4 sm:$0xff]   ;;  %v11765_v17 = vld [vmem:[%s13297_s7 + $0xae8] ss:$16 sps:$4 sm:$0xff]  }
 0x15a   : > { %8098 = vmatpush1.bf16.msra.mxu0 %v11669_v18  ;;  %8915 = vmatpush1.bf16.msra.mxu1 %v11672_v19  ;;  %v11770_v18 = vld [vmem:[%s13297_s7 + $0xb04] ss:$16 sps:$4 sm:$0xff]   ;;  %v11773_v19 = vld [vmem:[%s13297_s7 + $0xb0c] ss:$16 sps:$4 sm:$0xff]  }
 0x15b   : > { %8099 = vmatprep.subr.bf16.mxu0 %v11677_v20  ;;  %8916 = vmatprep.subr.bf16.mxu1 %v11680_v21  ;;  %v11768_v20 = vld [vmem:[%s13297_s7 + $0xb00] ss:$16 sps:$4 sm:$0xff]   ;;  %v11771_v21 = vld [vmem:[%s13297_s7 + $0xb08] ss:$16 sps:$4 sm:$0xff]  }
 0x15e   : > { %8100 = vmatpush1.bf16.msra.mxu0 %v11675_v22  ;;  %8917 = vmatpush1.bf16.msra.mxu1 %v11678_v23  ;;  %v11776_v22 = vld [vmem:[%s13297_s7 + $0xb24] ss:$16 sps:$4 sm:$0xff]   ;;  %v11779_v23 = vld [vmem:[%s13297_s7 + $0xb2c] ss:$16 sps:$4 sm:$0xff]  }
 0x15f   : > { %8101 = vmatprep.subr.bf16.mxu0 %v11683_v24  ;;  %8918 = vmatprep.subr.bf16.mxu1 %v11686_v25  ;;  %v11774_v24 = vld [vmem:[%s13297_s7 + $0xb20] ss:$16 sps:$4 sm:$0xff]   ;;  %v11777_v25 = vld [vmem:[%s13297_s7 + $0xb28] ss:$16 sps:$4 sm:$0xff]  }
 0x162   : > { %8102 = vmatpush1.bf16.msra.mxu0 %v11681_v26  ;;  %8919 = vmatpush1.bf16.msra.mxu1 %v11684_v27  ;;  %v11782_v26 = vld [vmem:[%s13297_s7 + $0xb44] ss:$16 sps:$4 sm:$0xff]   ;;  %v11785_v27 = vld [vmem:[%s13297_s7 + $0xb4c] ss:$16 sps:$4 sm:$0xff]  }
 0x163   : > { %8103 = vmatprep.subr.bf16.mxu0 %v11689_v28  ;;  %8920 = vmatprep.subr.bf16.mxu1 %v11692_v29  ;;  %v11780_v28 = vld [vmem:[%s13297_s7 + $0xb40] ss:$16 sps:$4 sm:$0xff]   ;;  %v11783_v29 = vld [vmem:[%s13297_s7 + $0xb48] ss:$16 sps:$4 sm:$0xff]  }
 0x166   : > { %8104 = vmatpush1.bf16.msra.mxu0 %v11687_v30  ;;  %8921 = vmatpush1.bf16.msra.mxu1 %v11690_v31  ;;  %v11788_v30 = vld [vmem:[%s13297_s7 + $0xb64] ss:$16 sps:$4 sm:$0xff]   ;;  %v11791_v31 = vld [vmem:[%s13297_s7 + $0xb6c] ss:$16 sps:$4 sm:$0xff]  }
 0x167   : > { %8105 = vmatprep.subr.bf16.mxu0 %v11695_v32  ;;  %8922 = vmatprep.subr.bf16.mxu1 %v11698_v33  ;;  %v11786_v32 = vld [vmem:[%s13297_s7 + $0xb60] ss:$16 sps:$4 sm:$0xff]   ;;  %v11789_v33 = vld [vmem:[%s13297_s7 + $0xb68] ss:$16 sps:$4 sm:$0xff]  }
 0x16a   : > { %8106 = vmatpush1.bf16.msra.mxu0 %v11693_v34  ;;  %8923 = vmatpush1.bf16.msra.mxu1 %v11696_v35  ;;  %v11794_v34 = vld [vmem:[%s13297_s7 + $0xb84] ss:$16 sps:$4 sm:$0xff]   ;;  %v11797_v35 = vld [vmem:[%s13297_s7 + $0xb8c] ss:$16 sps:$4 sm:$0xff]  }
 0x16b   : > { %8107 = vmatprep.subr.bf16.mxu0 %v11701_v36  ;;  %8924 = vmatprep.subr.bf16.mxu1 %v11704_v37  ;;  %v11792_v36 = vld [vmem:[%s13297_s7 + $0xb80] ss:$16 sps:$4 sm:$0xff]   ;;  %v11795_v37 = vld [vmem:[%s13297_s7 + $0xb88] ss:$16 sps:$4 sm:$0xff]  }
 0x16e   : > { %8108 = vmatpush1.bf16.msra.mxu0 %v11699_v38  ;;  %8925 = vmatpush1.bf16.msra.mxu1 %v11702_v39  ;;  %v11800_v38 = vld [vmem:[%s13297_s7 + $0xba4] ss:$16 sps:$4 sm:$0xff]   ;;  %v11803_v39 = vld [vmem:[%s13297_s7 + $0xbac] ss:$16 sps:$4 sm:$0xff]  }
 0x16f   : > { %8109 = vmatprep.subr.bf16.mxu0 %v11707_v40  ;;  %8926 = vmatprep.subr.bf16.mxu1 %v11710_v41  ;;  %v11798_v40 = vld [vmem:[%s13297_s7 + $0xba0] ss:$16 sps:$4 sm:$0xff]   ;;  %v11801_v41 = vld [vmem:[%s13297_s7 + $0xba8] ss:$16 sps:$4 sm:$0xff]  }
 0x172   : > { %8110 = vmatpush1.bf16.msra.mxu0 %v11705_v42  ;;  %8927 = vmatpush1.bf16.msra.mxu1 %v11708_v43  ;;  %v11806_v42 = vld [vmem:[%s13297_s7 + $0xbc4] ss:$16 sps:$4 sm:$0xff]   ;;  %v11809_v43 = vld [vmem:[%s13297_s7 + $0xbcc] ss:$16 sps:$4 sm:$0xff]  }
 0x173   : > { %8111 = vmatprep.subr.bf16.mxu0 %v11713_v44  ;;  %8928 = vmatprep.subr.bf16.mxu1 %v11716_v45  ;;  %v11804_v44 = vld [vmem:[%s13297_s7 + $0xbc0] ss:$16 sps:$4 sm:$0xff]   ;;  %v11807_v45 = vld [vmem:[%s13297_s7 + $0xbc8] ss:$16 sps:$4 sm:$0xff]  }
 0x176   : > { %8112 = vmatpush1.bf16.msra.mxu0 %v11711_v46  ;;  %8929 = vmatpush1.bf16.msra.mxu1 %v11714_v47  ;;  %v11812_v46 = vld [vmem:[%s13297_s7 + $0xbe4] ss:$16 sps:$4 sm:$0xff]   ;;  %v11815_v47 = vld [vmem:[%s13297_s7 + $0xbec] ss:$16 sps:$4 sm:$0xff]  }
 0x177   : > { %8124 = vmatprep.subr.bf16.mxu0 %v11722_v49  ;;  %8941 = vmatprep.subr.bf16.mxu1 %v11725_v50  ;;  %v11813_v49 = vld [vmem:[%s13297_s7 + $0xbe8] ss:$16 sps:$4 sm:$0xff]  }
 0x178   : > { %v11816_v50 = vld [vmem:[%s13299_s8 + $0x28] ss:$152 sps:$4 sm:$0xff]  }
 0x179   : > { %8114 = vmatmul.mubr.bf16.vlgmr.msra.gmra.mrb[0].mxu0 %v11717_v48  ;;  %8931 = vmatmul.mubr.bf16.vlgmr.msra.gmra.mrb[0].mxu1 %v11717_v48  ;;  %v11810_v48 = vld [vmem:[%s13297_s7 + $0xbe0] ss:$16 sps:$4 sm:$0xff]  }
 0x17a   : > { %8125 = vmatpush1.bf16.msra.mxu0 %v11720_v51  ;;  %8942 = vmatpush1.bf16.msra.mxu1 %v11723_v52  ;;  %v11821_v51 = vld [vmem:[%s13297_s7 + $0xc04] ss:$16 sps:$4 sm:$0xff]   ;;  %v11824_v52 = vld [vmem:[%s13297_s7 + $0xc0c] ss:$16 sps:$4 sm:$0xff]  }
 0x17b   : > { %8126 = vmatprep.subr.bf16.mxu0 %v11728_v53  ;;  %8943 = vmatprep.subr.bf16.mxu1 %v11731_v54  ;;  %v11819_v53 = vld [vmem:[%s13297_s7 + $0xc00] ss:$16 sps:$4 sm:$0xff]   ;;  %v11822_v54 = vld [vmem:[%s13297_s7 + $0xc08] ss:$16 sps:$4 sm:$0xff]  }
 0x17c   : > { %8156 = vmatprep.mubr.bf16.mxu0 %v11818_v55  ;;  %8973 = vmatprep.mubr.bf16.mxu1 %v11818_v55  ;;  %v11827_v55 = vld [vmem:[%s13297_s7 + $0xc24] ss:$16 sps:$4 sm:$0xff]  }
 0x17e   : > { %8127 = vmatpush1.bf16.msra.mxu0 %v11726_v56  ;;  %8944 = vmatpush1.bf16.msra.mxu1 %v11729_v57  ;;  %v11830_v56 = vld [vmem:[%s13297_s7 + $0xc2c] ss:$16 sps:$4 sm:$0xff]  }
 0x17f   : > { %8128 = vmatprep.subr.bf16.mxu0 %v11734_v58  ;;  %8945 = vmatprep.subr.bf16.mxu1 %v11737_v59  ;;  %v11917_v57 = vld [vmem:[%s13299_s8 + $0x34] ss:$152 sps:$4 sm:$0xff]   ;;  %v11825_v58 = vld [vmem:[%s13297_s7 + $0xc20] ss:$16 sps:$4 sm:$0xff]   ;;  %v11828_v59 = vld [vmem:[%s13297_s7 + $0xc28] ss:$16 sps:$4 sm:$0xff]  }
 0x182   : > { %8129 = vmatpush1.bf16.msra.mxu0 %v11732_v60  ;;  %8946 = vmatpush1.bf16.msra.mxu1 %v11735_v61  ;;  %v11833_v60 = vld [vmem:[%s13297_s7 + $0xc44] ss:$16 sps:$4 sm:$0xff]   ;;  %v11836_v61 = vld [vmem:[%s13297_s7 + $0xc4c] ss:$16 sps:$4 sm:$0xff]  }
 0x183   : > { %8130 = vmatprep.subr.bf16.mxu0 %v11740_v62  ;;  %8947 = vmatprep.subr.bf16.mxu1 %v11743_v63  ;;  %v11831_v62 = vld [vmem:[%s13297_s7 + $0xc40] ss:$16 sps:$4 sm:$0xff]   ;;  %v11834_v63 = vld [vmem:[%s13297_s7 + $0xc48] ss:$16 sps:$4 sm:$0xff]  }
 0x186   : > { %8131 = vmatpush1.bf16.msra.mxu0 %v11738_v0  ;;  %8948 = vmatpush1.bf16.msra.mxu1 %v11741_v1  ;;  %v11839_v0 = vld [vmem:[%s13297_s7 + $0xc64] ss:$16 sps:$4 sm:$0xff]   ;;  %v11842_v1 = vld [vmem:[%s13297_s7 + $0xc6c] ss:$16 sps:$4 sm:$0xff]  }
 0x187   : > { %8132 = vmatprep.subr.bf16.mxu0 %v11746_v2  ;;  %8949 = vmatprep.subr.bf16.mxu1 %v11749_v3  ;;  %v11837_v2 = vld [vmem:[%s13297_s7 + $0xc60] ss:$16 sps:$4 sm:$0xff]   ;;  %v11840_v3 = vld [vmem:[%s13297_s7 + $0xc68] ss:$16 sps:$4 sm:$0xff]  }
 0x18a   : > { %8133 = vmatpush1.bf16.msra.mxu0 %v11744_v4  ;;  %8950 = vmatpush1.bf16.msra.mxu1 %v11747_v5  ;;  %v11845_v4 = vld [vmem:[%s13297_s7 + $0xc84] ss:$16 sps:$4 sm:$0xff]   ;;  %v11848_v5 = vld [vmem:[%s13297_s7 + $0xc8c] ss:$16 sps:$4 sm:$0xff]  }
 0x18b   : > { %8134 = vmatprep.subr.bf16.mxu0 %v11752_v6  ;;  %8951 = vmatprep.subr.bf16.mxu1 %v11755_v7  ;;  %v11843_v6 = vld [vmem:[%s13297_s7 + $0xc80] ss:$16 sps:$4 sm:$0xff]   ;;  %v11846_v7 = vld [vmem:[%s13297_s7 + $0xc88] ss:$16 sps:$4 sm:$0xff]  }
 0x18e   : > { %8135 = vmatpush1.bf16.msra.mxu0 %v11750_v8  ;;  %8952 = vmatpush1.bf16.msra.mxu1 %v11753_v9  ;;  %v11851_v8 = vld [vmem:[%s13297_s7 + $0xca4] ss:$16 sps:$4 sm:$0xff]   ;;  %v11854_v9 = vld [vmem:[%s13297_s7 + $0xcac] ss:$16 sps:$4 sm:$0xff]  }
 0x18f   : > { %8136 = vmatprep.subr.bf16.mxu0 %v11758_v10  ;;  %8953 = vmatprep.subr.bf16.mxu1 %v11761_v11  ;;  %v11849_v10 = vld [vmem:[%s13297_s7 + $0xca0] ss:$16 sps:$4 sm:$0xff]   ;;  %v11852_v11 = vld [vmem:[%s13297_s7 + $0xca8] ss:$16 sps:$4 sm:$0xff]  }
 0x192   : > { %8137 = vmatpush1.bf16.msra.mxu0 %v11756_v12  ;;  %8954 = vmatpush1.bf16.msra.mxu1 %v11759_v13  ;;  %v11857_v12 = vld [vmem:[%s13297_s7 + $0xcc4] ss:$16 sps:$4 sm:$0xff]   ;;  %v11860_v13 = vld [vmem:[%s13297_s7 + $0xccc] ss:$16 sps:$4 sm:$0xff]  }
 0x193   : > { %8138 = vmatprep.subr.bf16.mxu0 %v11764_v14  ;;  %8955 = vmatprep.subr.bf16.mxu1 %v11767_v15  ;;  %v11855_v14 = vld [vmem:[%s13297_s7 + $0xcc0] ss:$16 sps:$4 sm:$0xff]   ;;  %v11858_v15 = vld [vmem:[%s13297_s7 + $0xcc8] ss:$16 sps:$4 sm:$0xff]  }
 0x196   : > { %8139 = vmatpush1.bf16.msra.mxu0 %v11762_v16  ;;  %8956 = vmatpush1.bf16.msra.mxu1 %v11765_v17  ;;  %v11863_v16 = vld [vmem:[%s13297_s7 + $0xce4] ss:$16 sps:$4 sm:$0xff]   ;;  %v11866_v17 = vld [vmem:[%s13297_s7 + $0xcec] ss:$16 sps:$4 sm:$0xff]  }
 0x197   : > { %8140 = vmatprep.subr.bf16.mxu0 %v11770_v18  ;;  %8957 = vmatprep.subr.bf16.mxu1 %v11773_v19  ;;  %v11861_v18 = vld [vmem:[%s13297_s7 + $0xce0] ss:$16 sps:$4 sm:$0xff]   ;;  %v11864_v19 = vld [vmem:[%s13297_s7 + $0xce8] ss:$16 sps:$4 sm:$0xff]  }
 0x19a   : > { %8141 = vmatpush1.bf16.msra.mxu0 %v11768_v20  ;;  %8958 = vmatpush1.bf16.msra.mxu1 %v11771_v21  ;;  %v11869_v20 = vld [vmem:[%s13297_s7 + $0xd04] ss:$16 sps:$4 sm:$0xff]   ;;  %v11872_v21 = vld [vmem:[%s13297_s7 + $0xd0c] ss:$16 sps:$4 sm:$0xff]  }
 0x19b   : > { %8142 = vmatprep.subr.bf16.mxu0 %v11776_v22  ;;  %8959 = vmatprep.subr.bf16.mxu1 %v11779_v23  ;;  %v11867_v22 = vld [vmem:[%s13297_s7 + $0xd00] ss:$16 sps:$4 sm:$0xff]   ;;  %v11870_v23 = vld [vmem:[%s13297_s7 + $0xd08] ss:$16 sps:$4 sm:$0xff]  }
 0x19e   : > { %8143 = vmatpush1.bf16.msra.mxu0 %v11774_v24  ;;  %8960 = vmatpush1.bf16.msra.mxu1 %v11777_v25  ;;  %v11875_v24 = vld [vmem:[%s13297_s7 + $0xd24] ss:$16 sps:$4 sm:$0xff]   ;;  %v11878_v25 = vld [vmem:[%s13297_s7 + $0xd2c] ss:$16 sps:$4 sm:$0xff]  }
 0x19f   : > { %8144 = vmatprep.subr.bf16.mxu0 %v11782_v26  ;;  %8961 = vmatprep.subr.bf16.mxu1 %v11785_v27  ;;  %v11873_v26 = vld [vmem:[%s13297_s7 + $0xd20] ss:$16 sps:$4 sm:$0xff]   ;;  %v11876_v27 = vld [vmem:[%s13297_s7 + $0xd28] ss:$16 sps:$4 sm:$0xff]  }
 0x1a2   : > { %8145 = vmatpush1.bf16.msra.mxu0 %v11780_v28  ;;  %8962 = vmatpush1.bf16.msra.mxu1 %v11783_v29  ;;  %v11881_v28 = vld [vmem:[%s13297_s7 + $0xd44] ss:$16 sps:$4 sm:$0xff]   ;;  %v11884_v29 = vld [vmem:[%s13297_s7 + $0xd4c] ss:$16 sps:$4 sm:$0xff]  }
 0x1a3   : > { %8146 = vmatprep.subr.bf16.mxu0 %v11788_v30  ;;  %8963 = vmatprep.subr.bf16.mxu1 %v11791_v31  ;;  %v11879_v30 = vld [vmem:[%s13297_s7 + $0xd40] ss:$16 sps:$4 sm:$0xff]   ;;  %v11882_v31 = vld [vmem:[%s13297_s7 + $0xd48] ss:$16 sps:$4 sm:$0xff]  }
 0x1a6   : > { %8147 = vmatpush1.bf16.msra.mxu0 %v11786_v32  ;;  %8964 = vmatpush1.bf16.msra.mxu1 %v11789_v33  ;;  %v11887_v32 = vld [vmem:[%s13297_s7 + $0xd64] ss:$16 sps:$4 sm:$0xff]   ;;  %v11890_v33 = vld [vmem:[%s13297_s7 + $0xd6c] ss:$16 sps:$4 sm:$0xff]  }
 0x1a7   : > { %8148 = vmatprep.subr.bf16.mxu0 %v11794_v34  ;;  %8965 = vmatprep.subr.bf16.mxu1 %v11797_v35  ;;  %v11885_v34 = vld [vmem:[%s13297_s7 + $0xd60] ss:$16 sps:$4 sm:$0xff]   ;;  %v11888_v35 = vld [vmem:[%s13297_s7 + $0xd68] ss:$16 sps:$4 sm:$0xff]  }
 0x1aa   : > { %8149 = vmatpush1.bf16.msra.mxu0 %v11792_v36  ;;  %8966 = vmatpush1.bf16.msra.mxu1 %v11795_v37  ;;  %v11893_v36 = vld [vmem:[%s13297_s7 + $0xd84] ss:$16 sps:$4 sm:$0xff]   ;;  %v11896_v37 = vld [vmem:[%s13297_s7 + $0xd8c] ss:$16 sps:$4 sm:$0xff]  }
 0x1ab   : > { %8150 = vmatprep.subr.bf16.mxu0 %v11800_v38  ;;  %8967 = vmatprep.subr.bf16.mxu1 %v11803_v39  ;;  %v11891_v38 = vld [vmem:[%s13297_s7 + $0xd80] ss:$16 sps:$4 sm:$0xff]   ;;  %v11894_v39 = vld [vmem:[%s13297_s7 + $0xd88] ss:$16 sps:$4 sm:$0xff]  }
 0x1ae   : > { %8151 = vmatpush1.bf16.msra.mxu0 %v11798_v40  ;;  %8968 = vmatpush1.bf16.msra.mxu1 %v11801_v41  ;;  %v11899_v40 = vld [vmem:[%s13297_s7 + $0xda4] ss:$16 sps:$4 sm:$0xff]   ;;  %v11902_v41 = vld [vmem:[%s13297_s7 + $0xdac] ss:$16 sps:$4 sm:$0xff]  }
 0x1af   : > { %8152 = vmatprep.subr.bf16.mxu0 %v11806_v42  ;;  %8969 = vmatprep.subr.bf16.mxu1 %v11809_v43  ;;  %v11897_v42 = vld [vmem:[%s13297_s7 + $0xda0] ss:$16 sps:$4 sm:$0xff]   ;;  %v11900_v43 = vld [vmem:[%s13297_s7 + $0xda8] ss:$16 sps:$4 sm:$0xff]  }
 0x1b2   : > { %8153 = vmatpush1.bf16.msra.mxu0 %v11804_v44  ;;  %8970 = vmatpush1.bf16.msra.mxu1 %v11807_v45  ;;  %v11905_v44 = vld [vmem:[%s13297_s7 + $0xdc4] ss:$16 sps:$4 sm:$0xff]   ;;  %v11908_v45 = vld [vmem:[%s13297_s7 + $0xdcc] ss:$16 sps:$4 sm:$0xff]  }
 0x1b3   : > { %8154 = vmatprep.subr.bf16.mxu0 %v11812_v46  ;;  %8971 = vmatprep.subr.bf16.mxu1 %v11815_v47  ;;  %v11903_v46 = vld [vmem:[%s13297_s7 + $0xdc0] ss:$16 sps:$4 sm:$0xff]   ;;  %v11906_v47 = vld [vmem:[%s13297_s7 + $0xdc8] ss:$16 sps:$4 sm:$0xff]  }
 0x1b6   : > { %8155 = vmatpush1.bf16.msra.mxu0 %v11810_v48  ;;  %8972 = vmatpush1.bf16.msra.mxu1 %v11813_v49  ;;  %v11911_v48 = vld [vmem:[%s13297_s7 + $0xde4] ss:$16 sps:$4 sm:$0xff]   ;;  %v11914_v49 = vld [vmem:[%s13297_s7 + $0xdec] ss:$16 sps:$4 sm:$0xff]  }
 0x1b7   : > { %8167 = vmatprep.subr.bf16.mxu0 %v11821_v51  ;;  %8984 = vmatprep.subr.bf16.mxu1 %v11824_v52  ;;  %v11912_v51 = vld [vmem:[%s13297_s7 + $0xde8] ss:$16 sps:$4 sm:$0xff]  }
 0x1b8   : > { %v11915_v52 = vld [vmem:[%s13299_s8 + $0x30] ss:$152 sps:$4 sm:$0xff]  }
 0x1b9   : > { %8157 = vmatmul.mubr.bf16.vlgmr.msra.gmra.mrb[0].mxu0 %v11816_v50  ;;  %8974 = vmatmul.mubr.bf16.vlgmr.msra.gmra.mrb[0].mxu1 %v11816_v50  ;;  %v11909_v50 = vld [vmem:[%s13297_s7 + $0xde0] ss:$16 sps:$4 sm:$0xff]  }
 0x1ba   : > { %8168 = vmatpush1.bf16.msra.mxu0 %v11819_v53  ;;  %8985 = vmatpush1.bf16.msra.mxu1 %v11822_v54  ;;  %v11920_v53 = vld [vmem:[%s13297_s7 + $0xe04] ss:$16 sps:$4 sm:$0xff]   ;;  %v11923_v54 = vld [vmem:[%s13297_s7 + $0xe0c] ss:$16 sps:$4 sm:$0xff]  }
 0x1bb   : > { %8169 = vmatprep.subr.bf16.mxu0 %v11827_v55  ;;  %8986 = vmatprep.subr.bf16.mxu1 %v11830_v56  ;;  %v11918_v55 = vld [vmem:[%s13297_s7 + $0xe00] ss:$16 sps:$4 sm:$0xff]   ;;  %v11921_v56 = vld [vmem:[%s13297_s7 + $0xe08] ss:$16 sps:$4 sm:$0xff]  }
 0x1bc   : > { %8199 = vmatprep.mubr.bf16.mxu0 %v11917_v57  ;;  %9016 = vmatprep.mubr.bf16.mxu1 %v11917_v57  ;;  %v11926_v57 = vld [vmem:[%s13297_s7 + $0xe24] ss:$16 sps:$4 sm:$0xff]  }
 0x1be   : > { %8170 = vmatpush1.bf16.msra.mxu0 %v11825_v58  ;;  %8987 = vmatpush1.bf16.msra.mxu1 %v11828_v59  ;;  %v11929_v58 = vld [vmem:[%s13297_s7 + $0xe2c] ss:$16 sps:$4 sm:$0xff]  }
 0x1bf   : > { %8171 = vmatprep.subr.bf16.mxu0 %v11833_v60  ;;  %8988 = vmatprep.subr.bf16.mxu1 %v11836_v61  ;;  %v12016_v59 = vld [vmem:[%s13299_s8 + $0x3c] ss:$152 sps:$4 sm:$0xff]   ;;  %v11924_v60 = vld [vmem:[%s13297_s7 + $0xe20] ss:$16 sps:$4 sm:$0xff]   ;;  %v11927_v61 = vld [vmem:[%s13297_s7 + $0xe28] ss:$16 sps:$4 sm:$0xff]  }
 0x1c2   : > { %8172 = vmatpush1.bf16.msra.mxu0 %v11831_v62  ;;  %8989 = vmatpush1.bf16.msra.mxu1 %v11834_v63  ;;  %v11932_v62 = vld [vmem:[%s13297_s7 + $0xe44] ss:$16 sps:$4 sm:$0xff]   ;;  %v11935_v63 = vld [vmem:[%s13297_s7 + $0xe4c] ss:$16 sps:$4 sm:$0xff]  }
 0x1c3   : > { %8173 = vmatprep.subr.bf16.mxu0 %v11839_v0  ;;  %8990 = vmatprep.subr.bf16.mxu1 %v11842_v1  ;;  %v11930_v0 = vld [vmem:[%s13297_s7 + $0xe40] ss:$16 sps:$4 sm:$0xff]   ;;  %v11933_v1 = vld [vmem:[%s13297_s7 + $0xe48] ss:$16 sps:$4 sm:$0xff]  }
 0x1c6   : > { %8174 = vmatpush1.bf16.msra.mxu0 %v11837_v2  ;;  %8991 = vmatpush1.bf16.msra.mxu1 %v11840_v3  ;;  %v11938_v2 = vld [vmem:[%s13297_s7 + $0xe64] ss:$16 sps:$4 sm:$0xff]   ;;  %v11941_v3 = vld [vmem:[%s13297_s7 + $0xe6c] ss:$16 sps:$4 sm:$0xff]  }
 0x1c7   : > { %8175 = vmatprep.subr.bf16.mxu0 %v11845_v4  ;;  %8992 = vmatprep.subr.bf16.mxu1 %v11848_v5  ;;  %v11936_v4 = vld [vmem:[%s13297_s7 + $0xe60] ss:$16 sps:$4 sm:$0xff]   ;;  %v11939_v5 = vld [vmem:[%s13297_s7 + $0xe68] ss:$16 sps:$4 sm:$0xff]  }
 0x1ca   : > { %8176 = vmatpush1.bf16.msra.mxu0 %v11843_v6  ;;  %8993 = vmatpush1.bf16.msra.mxu1 %v11846_v7  ;;  %v11944_v6 = vld [vmem:[%s13297_s7 + $0xe84] ss:$16 sps:$4 sm:$0xff]   ;;  %v11947_v7 = vld [vmem:[%s13297_s7 + $0xe8c] ss:$16 sps:$4 sm:$0xff]  }
 0x1cb   : > { %8177 = vmatprep.subr.bf16.mxu0 %v11851_v8  ;;  %8994 = vmatprep.subr.bf16.mxu1 %v11854_v9  ;;  %v11942_v8 = vld [vmem:[%s13297_s7 + $0xe80] ss:$16 sps:$4 sm:$0xff]   ;;  %v11945_v9 = vld [vmem:[%s13297_s7 + $0xe88] ss:$16 sps:$4 sm:$0xff]  }
 0x1ce   : > { %8178 = vmatpush1.bf16.msra.mxu0 %v11849_v10  ;;  %8995 = vmatpush1.bf16.msra.mxu1 %v11852_v11  ;;  %v11950_v10 = vld [vmem:[%s13297_s7 + $0xea4] ss:$16 sps:$4 sm:$0xff]   ;;  %v11953_v11 = vld [vmem:[%s13297_s7 + $0xeac] ss:$16 sps:$4 sm:$0xff]  }
 0x1cf   : > { %8179 = vmatprep.subr.bf16.mxu0 %v11857_v12  ;;  %8996 = vmatprep.subr.bf16.mxu1 %v11860_v13  ;;  %v11948_v12 = vld [vmem:[%s13297_s7 + $0xea0] ss:$16 sps:$4 sm:$0xff]   ;;  %v11951_v13 = vld [vmem:[%s13297_s7 + $0xea8] ss:$16 sps:$4 sm:$0xff]  }
 0x1d2   : > { %8180 = vmatpush1.bf16.msra.mxu0 %v11855_v14  ;;  %8997 = vmatpush1.bf16.msra.mxu1 %v11858_v15  ;;  %v11956_v14 = vld [vmem:[%s13297_s7 + $0xec4] ss:$16 sps:$4 sm:$0xff]   ;;  %v11959_v15 = vld [vmem:[%s13297_s7 + $0xecc] ss:$16 sps:$4 sm:$0xff]  }
 0x1d3   : > { %8181 = vmatprep.subr.bf16.mxu0 %v11863_v16  ;;  %8998 = vmatprep.subr.bf16.mxu1 %v11866_v17  ;;  %v11954_v16 = vld [vmem:[%s13297_s7 + $0xec0] ss:$16 sps:$4 sm:$0xff]   ;;  %v11957_v17 = vld [vmem:[%s13297_s7 + $0xec8] ss:$16 sps:$4 sm:$0xff]  }
 0x1d6   : > { %8182 = vmatpush1.bf16.msra.mxu0 %v11861_v18  ;;  %8999 = vmatpush1.bf16.msra.mxu1 %v11864_v19  ;;  %v11962_v18 = vld [vmem:[%s13297_s7 + $0xee4] ss:$16 sps:$4 sm:$0xff]   ;;  %v11965_v19 = vld [vmem:[%s13297_s7 + $0xeec] ss:$16 sps:$4 sm:$0xff]  }
 0x1d7   : > { %8183 = vmatprep.subr.bf16.mxu0 %v11869_v20  ;;  %9000 = vmatprep.subr.bf16.mxu1 %v11872_v21  ;;  %v11960_v20 = vld [vmem:[%s13297_s7 + $0xee0] ss:$16 sps:$4 sm:$0xff]   ;;  %v11963_v21 = vld [vmem:[%s13297_s7 + $0xee8] ss:$16 sps:$4 sm:$0xff]  }
 0x1da   : > { %8184 = vmatpush1.bf16.msra.mxu0 %v11867_v22  ;;  %9001 = vmatpush1.bf16.msra.mxu1 %v11870_v23  ;;  %v11968_v22 = vld [vmem:[%s13297_s7 + $0xf04] ss:$16 sps:$4 sm:$0xff]   ;;  %v11971_v23 = vld [vmem:[%s13297_s7 + $0xf0c] ss:$16 sps:$4 sm:$0xff]  }
 0x1db   : > { %8185 = vmatprep.subr.bf16.mxu0 %v11875_v24  ;;  %9002 = vmatprep.subr.bf16.mxu1 %v11878_v25  ;;  %v11966_v24 = vld [vmem:[%s13297_s7 + $0xf00] ss:$16 sps:$4 sm:$0xff]   ;;  %v11969_v25 = vld [vmem:[%s13297_s7 + $0xf08] ss:$16 sps:$4 sm:$0xff]  }
 0x1de   : > { %8186 = vmatpush1.bf16.msra.mxu0 %v11873_v26  ;;  %9003 = vmatpush1.bf16.msra.mxu1 %v11876_v27  ;;  %v11974_v26 = vld [vmem:[%s13297_s7 + $0xf24] ss:$16 sps:$4 sm:$0xff]   ;;  %v11977_v27 = vld [vmem:[%s13297_s7 + $0xf2c] ss:$16 sps:$4 sm:$0xff]  }
 0x1df   : > { %8187 = vmatprep.subr.bf16.mxu0 %v11881_v28  ;;  %9004 = vmatprep.subr.bf16.mxu1 %v11884_v29  ;;  %v11972_v28 = vld [vmem:[%s13297_s7 + $0xf20] ss:$16 sps:$4 sm:$0xff]   ;;  %v11975_v29 = vld [vmem:[%s13297_s7 + $0xf28] ss:$16 sps:$4 sm:$0xff]  }
 0x1e2   : > { %8188 = vmatpush1.bf16.msra.mxu0 %v11879_v30  ;;  %9005 = vmatpush1.bf16.msra.mxu1 %v11882_v31  ;;  %v11980_v30 = vld [vmem:[%s13297_s7 + $0xf44] ss:$16 sps:$4 sm:$0xff]   ;;  %v11983_v31 = vld [vmem:[%s13297_s7 + $0xf4c] ss:$16 sps:$4 sm:$0xff]  }
 0x1e3   : > { %8189 = vmatprep.subr.bf16.mxu0 %v11887_v32  ;;  %9006 = vmatprep.subr.bf16.mxu1 %v11890_v33  ;;  %v11978_v32 = vld [vmem:[%s13297_s7 + $0xf40] ss:$16 sps:$4 sm:$0xff]   ;;  %v11981_v33 = vld [vmem:[%s13297_s7 + $0xf48] ss:$16 sps:$4 sm:$0xff]  }
 0x1e6   : > { %8190 = vmatpush1.bf16.msra.mxu0 %v11885_v34  ;;  %9007 = vmatpush1.bf16.msra.mxu1 %v11888_v35  ;;  %v11986_v34 = vld [vmem:[%s13297_s7 + $0xf64] ss:$16 sps:$4 sm:$0xff]   ;;  %v11989_v35 = vld [vmem:[%s13297_s7 + $0xf6c] ss:$16 sps:$4 sm:$0xff]  }
 0x1e7   : > { %8191 = vmatprep.subr.bf16.mxu0 %v11893_v36  ;;  %9008 = vmatprep.subr.bf16.mxu1 %v11896_v37  ;;  %v11984_v36 = vld [vmem:[%s13297_s7 + $0xf60] ss:$16 sps:$4 sm:$0xff]   ;;  %v11987_v37 = vld [vmem:[%s13297_s7 + $0xf68] ss:$16 sps:$4 sm:$0xff]  }
 0x1ea   : > { %8192 = vmatpush1.bf16.msra.mxu0 %v11891_v38  ;;  %9009 = vmatpush1.bf16.msra.mxu1 %v11894_v39  ;;  %v11992_v38 = vld [vmem:[%s13297_s7 + $0xf84] ss:$16 sps:$4 sm:$0xff]   ;;  %v11995_v39 = vld [vmem:[%s13297_s7 + $0xf8c] ss:$16 sps:$4 sm:$0xff]  }
 0x1eb   : > { %8193 = vmatprep.subr.bf16.mxu0 %v11899_v40  ;;  %9010 = vmatprep.subr.bf16.mxu1 %v11902_v41  ;;  %v11990_v40 = vld [vmem:[%s13297_s7 + $0xf80] ss:$16 sps:$4 sm:$0xff]   ;;  %v11993_v41 = vld [vmem:[%s13297_s7 + $0xf88] ss:$16 sps:$4 sm:$0xff]  }
 0x1ee   : > { %8194 = vmatpush1.bf16.msra.mxu0 %v11897_v42  ;;  %9011 = vmatpush1.bf16.msra.mxu1 %v11900_v43  ;;  %v11998_v42 = vld [vmem:[%s13297_s7 + $0xfa4] ss:$16 sps:$4 sm:$0xff]   ;;  %v12001_v43 = vld [vmem:[%s13297_s7 + $0xfac] ss:$16 sps:$4 sm:$0xff]  }
 0x1ef   : > { %8195 = vmatprep.subr.bf16.mxu0 %v11905_v44  ;;  %9012 = vmatprep.subr.bf16.mxu1 %v11908_v45  ;;  %v11996_v44 = vld [vmem:[%s13297_s7 + $0xfa0] ss:$16 sps:$4 sm:$0xff]   ;;  %v11999_v45 = vld [vmem:[%s13297_s7 + $0xfa8] ss:$16 sps:$4 sm:$0xff]  }
 0x1f2   : > { %8196 = vmatpush1.bf16.msra.mxu0 %v11903_v46  ;;  %9013 = vmatpush1.bf16.msra.mxu1 %v11906_v47  ;;  %v12004_v46 = vld [vmem:[%s13297_s7 + $0xfc4] ss:$16 sps:$4 sm:$0xff]   ;;  %v12007_v47 = vld [vmem:[%s13297_s7 + $0xfcc] ss:$16 sps:$4 sm:$0xff]  }
 0x1f3   : > { %8197 = vmatprep.subr.bf16.mxu0 %v11911_v48  ;;  %9014 = vmatprep.subr.bf16.mxu1 %v11914_v49  ;;  %v12002_v48 = vld [vmem:[%s13297_s7 + $0xfc0] ss:$16 sps:$4 sm:$0xff]   ;;  %v12005_v49 = vld [vmem:[%s13297_s7 + $0xfc8] ss:$16 sps:$4 sm:$0xff]  }
 0x1f6   : > { %8198 = vmatpush1.bf16.msra.mxu0 %v11909_v50  ;;  %9015 = vmatpush1.bf16.msra.mxu1 %v11912_v51  ;;  %v12010_v50 = vld [vmem:[%s13297_s7 + $0xfe4] ss:$16 sps:$4 sm:$0xff]   ;;  %v12013_v51 = vld [vmem:[%s13297_s7 + $0xfec] ss:$16 sps:$4 sm:$0xff]  }
 0x1f7   : > { %8210 = vmatprep.subr.bf16.mxu0 %v11920_v53  ;;  %9027 = vmatprep.subr.bf16.mxu1 %v11923_v54  ;;  %v12011_v53 = vld [vmem:[%s13297_s7 + $0xfe8] ss:$16 sps:$4 sm:$0xff]  }
 0x1f8   : > { %v12014_v54 = vld [vmem:[%s13299_s8 + $0x38] ss:$152 sps:$4 sm:$0xff]  }
 0x1f9   : > { %8200 = vmatmul.mubr.bf16.vlgmr.msra.gmra.mrb[0].mxu0 %v11915_v52  ;;  %9017 = vmatmul.mubr.bf16.vlgmr.msra.gmra.mrb[0].mxu1 %v11915_v52  ;;  %v12008_v52 = vld [vmem:[%s13297_s7 + $0xfe0] ss:$16 sps:$4 sm:$0xff]  }
 0x1fa   : > { %8211 = vmatpush1.bf16.msra.mxu0 %v11918_v55  ;;  %9028 = vmatpush1.bf16.msra.mxu1 %v11921_v56  ;;  %v12019_v55 = vld [vmem:[%s13297_s7 + $0x1004] ss:$16 sps:$4 sm:$0xff]   ;;  %v12022_v56 = vld [vmem:[%s13297_s7 + $0x100c] ss:$16 sps:$4 sm:$0xff]  }
 0x1fb   : > { %8212 = vmatprep.subr.bf16.mxu0 %v11926_v57  ;;  %9029 = vmatprep.subr.bf16.mxu1 %v11929_v58  ;;  %v12017_v57 = vld [vmem:[%s13297_s7 + $0x1000] ss:$16 sps:$4 sm:$0xff]   ;;  %v12020_v58 = vld [vmem:[%s13297_s7 + $0x1008] ss:$16 sps:$4 sm:$0xff]  }
 0x1fc   : > { %8242 = vmatprep.mubr.bf16.mxu0 %v12016_v59  ;;  %9059 = vmatprep.mubr.bf16.mxu1 %v12016_v59  ;;  %v12025_v59 = vld [vmem:[%s13297_s7 + $0x1024] ss:$16 sps:$4 sm:$0xff]  }
 0x1fe   : > { %8213 = vmatpush1.bf16.msra.mxu0 %v11924_v60  ;;  %9030 = vmatpush1.bf16.msra.mxu1 %v11927_v61  ;;  %v12028_v60 = vld [vmem:[%s13297_s7 + $0x102c] ss:$16 sps:$4 sm:$0xff]  }
 0x1ff   : > { %8214 = vmatprep.subr.bf16.mxu0 %v11932_v62  ;;  %9031 = vmatprep.subr.bf16.mxu1 %v11935_v63  ;;  %v12115_v61 = vld [vmem:[%s13299_s8 + $0x44] ss:$152 sps:$4 sm:$0xff]   ;;  %v12023_v62 = vld [vmem:[%s13297_s7 + $0x1020] ss:$16 sps:$4 sm:$0xff]   ;;  %v12026_v63 = vld [vmem:[%s13297_s7 + $0x1028] ss:$16 sps:$4 sm:$0xff]  }
 0x202   : > { %8215 = vmatpush1.bf16.msra.mxu0 %v11930_v0  ;;  %9032 = vmatpush1.bf16.msra.mxu1 %v11933_v1  ;;  %v12031_v0 = vld [vmem:[%s13297_s7 + $0x1044] ss:$16 sps:$4 sm:$0xff]   ;;  %v12034_v1 = vld [vmem:[%s13297_s7 + $0x104c] ss:$16 sps:$4 sm:$0xff]  }
 0x203   : > { %8216 = vmatprep.subr.bf16.mxu0 %v11938_v2  ;;  %9033 = vmatprep.subr.bf16.mxu1 %v11941_v3  ;;  %v12029_v2 = vld [vmem:[%s13297_s7 + $0x1040] ss:$16 sps:$4 sm:$0xff]   ;;  %v12032_v3 = vld [vmem:[%s13297_s7 + $0x1048] ss:$16 sps:$4 sm:$0xff]  }
 0x206   : > { %8217 = vmatpush1.bf16.msra.mxu0 %v11936_v4  ;;  %9034 = vmatpush1.bf16.msra.mxu1 %v11939_v5  ;;  %v12037_v4 = vld [vmem:[%s13297_s7 + $0x1064] ss:$16 sps:$4 sm:$0xff]   ;;  %v12040_v5 = vld [vmem:[%s13297_s7 + $0x106c] ss:$16 sps:$4 sm:$0xff]  }
 0x207   : > { %8218 = vmatprep.subr.bf16.mxu0 %v11944_v6  ;;  %9035 = vmatprep.subr.bf16.mxu1 %v11947_v7  ;;  %v12035_v6 = vld [vmem:[%s13297_s7 + $0x1060] ss:$16 sps:$4 sm:$0xff]   ;;  %v12038_v7 = vld [vmem:[%s13297_s7 + $0x1068] ss:$16 sps:$4 sm:$0xff]  }
 0x20a   : > { %8219 = vmatpush1.bf16.msra.mxu0 %v11942_v8  ;;  %9036 = vmatpush1.bf16.msra.mxu1 %v11945_v9  ;;  %v12043_v8 = vld [vmem:[%s13297_s7 + $0x1084] ss:$16 sps:$4 sm:$0xff]   ;;  %v12046_v9 = vld [vmem:[%s13297_s7 + $0x108c] ss:$16 sps:$4 sm:$0xff]  }
 0x20b   : > { %8220 = vmatprep.subr.bf16.mxu0 %v11950_v10  ;;  %9037 = vmatprep.subr.bf16.mxu1 %v11953_v11  ;;  %v12041_v10 = vld [vmem:[%s13297_s7 + $0x1080] ss:$16 sps:$4 sm:$0xff]   ;;  %v12044_v11 = vld [vmem:[%s13297_s7 + $0x1088] ss:$16 sps:$4 sm:$0xff]  }
 0x20e   : > { %8221 = vmatpush1.bf16.msra.mxu0 %v11948_v12  ;;  %9038 = vmatpush1.bf16.msra.mxu1 %v11951_v13  ;;  %v12049_v12 = vld [vmem:[%s13297_s7 + $0x10a4] ss:$16 sps:$4 sm:$0xff]   ;;  %v12052_v13 = vld [vmem:[%s13297_s7 + $0x10ac] ss:$16 sps:$4 sm:$0xff]  }
 0x20f   : > { %8222 = vmatprep.subr.bf16.mxu0 %v11956_v14  ;;  %9039 = vmatprep.subr.bf16.mxu1 %v11959_v15  ;;  %v12047_v14 = vld [vmem:[%s13297_s7 + $0x10a0] ss:$16 sps:$4 sm:$0xff]   ;;  %v12050_v15 = vld [vmem:[%s13297_s7 + $0x10a8] ss:$16 sps:$4 sm:$0xff]  }
 0x212   : > { %8223 = vmatpush1.bf16.msra.mxu0 %v11954_v16  ;;  %9040 = vmatpush1.bf16.msra.mxu1 %v11957_v17  ;;  %v12055_v16 = vld [vmem:[%s13297_s7 + $0x10c4] ss:$16 sps:$4 sm:$0xff]   ;;  %v12058_v17 = vld [vmem:[%s13297_s7 + $0x10cc] ss:$16 sps:$4 sm:$0xff]  }
 0x213   : > { %8224 = vmatprep.subr.bf16.mxu0 %v11962_v18  ;;  %9041 = vmatprep.subr.bf16.mxu1 %v11965_v19  ;;  %v12053_v18 = vld [vmem:[%s13297_s7 + $0x10c0] ss:$16 sps:$4 sm:$0xff]   ;;  %v12056_v19 = vld [vmem:[%s13297_s7 + $0x10c8] ss:$16 sps:$4 sm:$0xff]  }
 0x216   : > { %8225 = vmatpush1.bf16.msra.mxu0 %v11960_v20  ;;  %9042 = vmatpush1.bf16.msra.mxu1 %v11963_v21  ;;  %v12061_v20 = vld [vmem:[%s13297_s7 + $0x10e4] ss:$16 sps:$4 sm:$0xff]   ;;  %v12064_v21 = vld [vmem:[%s13297_s7 + $0x10ec] ss:$16 sps:$4 sm:$0xff]  }
 0x217   : > { %8226 = vmatprep.subr.bf16.mxu0 %v11968_v22  ;;  %9043 = vmatprep.subr.bf16.mxu1 %v11971_v23  ;;  %v12059_v22 = vld [vmem:[%s13297_s7 + $0x10e0] ss:$16 sps:$4 sm:$0xff]   ;;  %v12062_v23 = vld [vmem:[%s13297_s7 + $0x10e8] ss:$16 sps:$4 sm:$0xff]  }
 0x21a   : > { %8227 = vmatpush1.bf16.msra.mxu0 %v11966_v24  ;;  %9044 = vmatpush1.bf16.msra.mxu1 %v11969_v25  ;;  %v12067_v24 = vld [vmem:[%s13297_s7 + $0x1104] ss:$16 sps:$4 sm:$0xff]   ;;  %v12070_v25 = vld [vmem:[%s13297_s7 + $0x110c] ss:$16 sps:$4 sm:$0xff]  }
 0x21b   : > { %8228 = vmatprep.subr.bf16.mxu0 %v11974_v26  ;;  %9045 = vmatprep.subr.bf16.mxu1 %v11977_v27  ;;  %v12065_v26 = vld [vmem:[%s13297_s7 + $0x1100] ss:$16 sps:$4 sm:$0xff]   ;;  %v12068_v27 = vld [vmem:[%s13297_s7 + $0x1108] ss:$16 sps:$4 sm:$0xff]  }
 0x21e   : > { %8229 = vmatpush1.bf16.msra.mxu0 %v11972_v28  ;;  %9046 = vmatpush1.bf16.msra.mxu1 %v11975_v29  ;;  %v12073_v28 = vld [vmem:[%s13297_s7 + $0x1124] ss:$16 sps:$4 sm:$0xff]   ;;  %v12076_v29 = vld [vmem:[%s13297_s7 + $0x112c] ss:$16 sps:$4 sm:$0xff]  }
 0x21f   : > { %8230 = vmatprep.subr.bf16.mxu0 %v11980_v30  ;;  %9047 = vmatprep.subr.bf16.mxu1 %v11983_v31  ;;  %v12071_v30 = vld [vmem:[%s13297_s7 + $0x1120] ss:$16 sps:$4 sm:$0xff]   ;;  %v12074_v31 = vld [vmem:[%s13297_s7 + $0x1128] ss:$16 sps:$4 sm:$0xff]  }
 0x222   : > { %8231 = vmatpush1.bf16.msra.mxu0 %v11978_v32  ;;  %9048 = vmatpush1.bf16.msra.mxu1 %v11981_v33  ;;  %v12079_v32 = vld [vmem:[%s13297_s7 + $0x1144] ss:$16 sps:$4 sm:$0xff]   ;;  %v12082_v33 = vld [vmem:[%s13297_s7 + $0x114c] ss:$16 sps:$4 sm:$0xff]  }
 0x223   : > { %8232 = vmatprep.subr.bf16.mxu0 %v11986_v34  ;;  %9049 = vmatprep.subr.bf16.mxu1 %v11989_v35  ;;  %v12077_v34 = vld [vmem:[%s13297_s7 + $0x1140] ss:$16 sps:$4 sm:$0xff]   ;;  %v12080_v35 = vld [vmem:[%s13297_s7 + $0x1148] ss:$16 sps:$4 sm:$0xff]  }
 0x226   : > { %8233 = vmatpush1.bf16.msra.mxu0 %v11984_v36  ;;  %9050 = vmatpush1.bf16.msra.mxu1 %v11987_v37  ;;  %v12085_v36 = vld [vmem:[%s13297_s7 + $0x1164] ss:$16 sps:$4 sm:$0xff]   ;;  %v12088_v37 = vld [vmem:[%s13297_s7 + $0x116c] ss:$16 sps:$4 sm:$0xff]  }
 0x227   : > { %8234 = vmatprep.subr.bf16.mxu0 %v11992_v38  ;;  %9051 = vmatprep.subr.bf16.mxu1 %v11995_v39  ;;  %v12083_v38 = vld [vmem:[%s13297_s7 + $0x1160] ss:$16 sps:$4 sm:$0xff]   ;;  %v12086_v39 = vld [vmem:[%s13297_s7 + $0x1168] ss:$16 sps:$4 sm:$0xff]  }
 0x22a   : > { %8235 = vmatpush1.bf16.msra.mxu0 %v11990_v40  ;;  %9052 = vmatpush1.bf16.msra.mxu1 %v11993_v41  ;;  %v12091_v40 = vld [vmem:[%s13297_s7 + $0x1184] ss:$16 sps:$4 sm:$0xff]   ;;  %v12094_v41 = vld [vmem:[%s13297_s7 + $0x118c] ss:$16 sps:$4 sm:$0xff]  }
 0x22b   : > { %8236 = vmatprep.subr.bf16.mxu0 %v11998_v42  ;;  %9053 = vmatprep.subr.bf16.mxu1 %v12001_v43  ;;  %v12089_v42 = vld [vmem:[%s13297_s7 + $0x1180] ss:$16 sps:$4 sm:$0xff]   ;;  %v12092_v43 = vld [vmem:[%s13297_s7 + $0x1188] ss:$16 sps:$4 sm:$0xff]  }
 0x22e   : > { %8237 = vmatpush1.bf16.msra.mxu0 %v11996_v44  ;;  %9054 = vmatpush1.bf16.msra.mxu1 %v11999_v45  ;;  %v12097_v44 = vld [vmem:[%s13297_s7 + $0x11a4] ss:$16 sps:$4 sm:$0xff]   ;;  %v12100_v45 = vld [vmem:[%s13297_s7 + $0x11ac] ss:$16 sps:$4 sm:$0xff]  }
 0x22f   : > { %8238 = vmatprep.subr.bf16.mxu0 %v12004_v46  ;;  %9055 = vmatprep.subr.bf16.mxu1 %v12007_v47  ;;  %v12095_v46 = vld [vmem:[%s13297_s7 + $0x11a0] ss:$16 sps:$4 sm:$0xff]   ;;  %v12098_v47 = vld [vmem:[%s13297_s7 + $0x11a8] ss:$16 sps:$4 sm:$0xff]  }
 0x232   : > { %8239 = vmatpush1.bf16.msra.mxu0 %v12002_v48  ;;  %9056 = vmatpush1.bf16.msra.mxu1 %v12005_v49  ;;  %v12103_v48 = vld [vmem:[%s13297_s7 + $0x11c4] ss:$16 sps:$4 sm:$0xff]   ;;  %v12106_v49 = vld [vmem:[%s13297_s7 + $0x11cc] ss:$16 sps:$4 sm:$0xff]  }
 0x233   : > { %8240 = vmatprep.subr.bf16.mxu0 %v12010_v50  ;;  %9057 = vmatprep.subr.bf16.mxu1 %v12013_v51  ;;  %v12101_v50 = vld [vmem:[%s13297_s7 + $0x11c0] ss:$16 sps:$4 sm:$0xff]   ;;  %v12104_v51 = vld [vmem:[%s13297_s7 + $0x11c8] ss:$16 sps:$4 sm:$0xff]  }
 0x236   : > { %8241 = vmatpush1.bf16.msra.mxu0 %v12008_v52  ;;  %9058 = vmatpush1.bf16.msra.mxu1 %v12011_v53  ;;  %v12109_v52 = vld [vmem:[%s13297_s7 + $0x11e4] ss:$16 sps:$4 sm:$0xff]   ;;  %v12112_v53 = vld [vmem:[%s13297_s7 + $0x11ec] ss:$16 sps:$4 sm:$0xff]  }
 0x237   : > { %8253 = vmatprep.subr.bf16.mxu0 %v12019_v55  ;;  %9070 = vmatprep.subr.bf16.mxu1 %v12022_v56  ;;  %v12110_v55 = vld [vmem:[%s13297_s7 + $0x11e8] ss:$16 sps:$4 sm:$0xff]  }
 0x238   : > { %v12113_v56 = vld [vmem:[%s13299_s8 + $0x40] ss:$152 sps:$4 sm:$0xff]  }
 0x239   : > { %8243 = vmatmul.mubr.bf16.vlgmr.msra.gmra.mrb[0].mxu0 %v12014_v54  ;;  %9060 = vmatmul.mubr.bf16.vlgmr.msra.gmra.mrb[0].mxu1 %v12014_v54  ;;  %v12107_v54 = vld [vmem:[%s13297_s7 + $0x11e0] ss:$16 sps:$4 sm:$0xff]  }
 0x23a   : > { %8254 = vmatpush1.bf16.msra.mxu0 %v12017_v57  ;;  %9071 = vmatpush1.bf16.msra.mxu1 %v12020_v58  ;;  %v12118_v57 = vld [vmem:[%s13297_s7 + $0x1204] ss:$16 sps:$4 sm:$0xff]   ;;  %v12121_v58 = vld [vmem:[%s13297_s7 + $0x120c] ss:$16 sps:$4 sm:$0xff]  }
 0x23b   : > { %8255 = vmatprep.subr.bf16.mxu0 %v12025_v59  ;;  %9072 = vmatprep.subr.bf16.mxu1 %v12028_v60  ;;  %v12116_v59 = vld [vmem:[%s13297_s7 + $0x1200] ss:$16 sps:$4 sm:$0xff]   ;;  %v12119_v60 = vld [vmem:[%s13297_s7 + $0x1208] ss:$16 sps:$4 sm:$0xff]  }
 0x23c   : > { %8285 = vmatprep.mubr.bf16.mxu0 %v12115_v61  ;;  %9102 = vmatprep.mubr.bf16.mxu1 %v12115_v61  ;;  %v12124_v61 = vld [vmem:[%s13297_s7 + $0x1224] ss:$16 sps:$4 sm:$0xff]  }
 0x23e   : > { %8256 = vmatpush1.bf16.msra.mxu0 %v12023_v62  ;;  %9073 = vmatpush1.bf16.msra.mxu1 %v12026_v63  ;;  %v12127_v62 = vld [vmem:[%s13297_s7 + $0x122c] ss:$16 sps:$4 sm:$0xff]  }
 0x23f   : > { %8257 = vmatprep.subr.bf16.mxu0 %v12031_v0  ;;  %9074 = vmatprep.subr.bf16.mxu1 %v12034_v1  ;;  %v12214_v63 = vld [vmem:[%s13299_s8 + $0x4c] ss:$152 sps:$4 sm:$0xff]   ;;  %v12122_v0 = vld [vmem:[%s13297_s7 + $0x1220] ss:$16 sps:$4 sm:$0xff]   ;;  %v12125_v1 = vld [vmem:[%s13297_s7 + $0x1228] ss:$16 sps:$4 sm:$0xff]  }
 0x242   : > { %8258 = vmatpush1.bf16.msra.mxu0 %v12029_v2  ;;  %9075 = vmatpush1.bf16.msra.mxu1 %v12032_v3  ;;  %v12130_v2 = vld [vmem:[%s13297_s7 + $0x1244] ss:$16 sps:$4 sm:$0xff]   ;;  %v12133_v3 = vld [vmem:[%s13297_s7 + $0x124c] ss:$16 sps:$4 sm:$0xff]  }
 0x243   : > { %8259 = vmatprep.subr.bf16.mxu0 %v12037_v4  ;;  %9076 = vmatprep.subr.bf16.mxu1 %v12040_v5  ;;  %v12128_v4 = vld [vmem:[%s13297_s7 + $0x1240] ss:$16 sps:$4 sm:$0xff]   ;;  %v12131_v5 = vld [vmem:[%s13297_s7 + $0x1248] ss:$16 sps:$4 sm:$0xff]  }
 0x246   : > { %8260 = vmatpush1.bf16.msra.mxu0 %v12035_v6  ;;  %9077 = vmatpush1.bf16.msra.mxu1 %v12038_v7  ;;  %v12136_v6 = vld [vmem:[%s13297_s7 + $0x1264] ss:$16 sps:$4 sm:$0xff]   ;;  %v12139_v7 = vld [vmem:[%s13297_s7 + $0x126c] ss:$16 sps:$4 sm:$0xff]  }
 0x247   : > { %8261 = vmatprep.subr.bf16.mxu0 %v12043_v8  ;;  %9078 = vmatprep.subr.bf16.mxu1 %v12046_v9  ;;  %v12134_v8 = vld [vmem:[%s13297_s7 + $0x1260] ss:$16 sps:$4 sm:$0xff]   ;;  %v12137_v9 = vld [vmem:[%s13297_s7 + $0x1268] ss:$16 sps:$4 sm:$0xff]  }
 0x24a   : > { %8262 = vmatpush1.bf16.msra.mxu0 %v12041_v10  ;;  %9079 = vmatpush1.bf16.msra.mxu1 %v12044_v11  ;;  %v12142_v10 = vld [vmem:[%s13297_s7 + $0x1284] ss:$16 sps:$4 sm:$0xff]   ;;  %v12145_v11 = vld [vmem:[%s13297_s7 + $0x128c] ss:$16 sps:$4 sm:$0xff]  }
 0x24b   : > { %8263 = vmatprep.subr.bf16.mxu0 %v12049_v12  ;;  %9080 = vmatprep.subr.bf16.mxu1 %v12052_v13  ;;  %v12140_v12 = vld [vmem:[%s13297_s7 + $0x1280] ss:$16 sps:$4 sm:$0xff]   ;;  %v12143_v13 = vld [vmem:[%s13297_s7 + $0x1288] ss:$16 sps:$4 sm:$0xff]  }
 0x24e   : > { %8264 = vmatpush1.bf16.msra.mxu0 %v12047_v14  ;;  %9081 = vmatpush1.bf16.msra.mxu1 %v12050_v15  ;;  %v12148_v14 = vld [vmem:[%s13297_s7 + $0x12a4] ss:$16 sps:$4 sm:$0xff]   ;;  %v12151_v15 = vld [vmem:[%s13297_s7 + $0x12ac] ss:$16 sps:$4 sm:$0xff]  }
 0x24f   : > { %8265 = vmatprep.subr.bf16.mxu0 %v12055_v16  ;;  %9082 = vmatprep.subr.bf16.mxu1 %v12058_v17  ;;  %v12146_v16 = vld [vmem:[%s13297_s7 + $0x12a0] ss:$16 sps:$4 sm:$0xff]   ;;  %v12149_v17 = vld [vmem:[%s13297_s7 + $0x12a8] ss:$16 sps:$4 sm:$0xff]  }
 0x252   : > { %8266 = vmatpush1.bf16.msra.mxu0 %v12053_v18  ;;  %9083 = vmatpush1.bf16.msra.mxu1 %v12056_v19  ;;  %v12154_v18 = vld [vmem:[%s13297_s7 + $0x12c4] ss:$16 sps:$4 sm:$0xff]   ;;  %v12157_v19 = vld [vmem:[%s13297_s7 + $0x12cc] ss:$16 sps:$4 sm:$0xff]  }
 0x253   : > { %8267 = vmatprep.subr.bf16.mxu0 %v12061_v20  ;;  %9084 = vmatprep.subr.bf16.mxu1 %v12064_v21  ;;  %v12152_v20 = vld [vmem:[%s13297_s7 + $0x12c0] ss:$16 sps:$4 sm:$0xff]   ;;  %v12155_v21 = vld [vmem:[%s13297_s7 + $0x12c8] ss:$16 sps:$4 sm:$0xff]  }
 0x256   : > { %8268 = vmatpush1.bf16.msra.mxu0 %v12059_v22  ;;  %9085 = vmatpush1.bf16.msra.mxu1 %v12062_v23  ;;  %v12160_v22 = vld [vmem:[%s13297_s7 + $0x12e4] ss:$16 sps:$4 sm:$0xff]   ;;  %v12163_v23 = vld [vmem:[%s13297_s7 + $0x12ec] ss:$16 sps:$4 sm:$0xff]  }
 0x257   : > { %8269 = vmatprep.subr.bf16.mxu0 %v12067_v24  ;;  %9086 = vmatprep.subr.bf16.mxu1 %v12070_v25  ;;  %v12158_v24 = vld [vmem:[%s13297_s7 + $0x12e0] ss:$16 sps:$4 sm:$0xff]   ;;  %v12161_v25 = vld [vmem:[%s13297_s7 + $0x12e8] ss:$16 sps:$4 sm:$0xff]  }
 0x25a   : > { %8270 = vmatpush1.bf16.msra.mxu0 %v12065_v26  ;;  %9087 = vmatpush1.bf16.msra.mxu1 %v12068_v27  ;;  %v12166_v26 = vld [vmem:[%s13297_s7 + $0x1304] ss:$16 sps:$4 sm:$0xff]   ;;  %v12169_v27 = vld [vmem:[%s13297_s7 + $0x130c] ss:$16 sps:$4 sm:$0xff]  }
 0x25b   : > { %8271 = vmatprep.subr.bf16.mxu0 %v12073_v28  ;;  %9088 = vmatprep.subr.bf16.mxu1 %v12076_v29  ;;  %v12164_v28 = vld [vmem:[%s13297_s7 + $0x1300] ss:$16 sps:$4 sm:$0xff]   ;;  %v12167_v29 = vld [vmem:[%s13297_s7 + $0x1308] ss:$16 sps:$4 sm:$0xff]  }
 0x25e   : > { %8272 = vmatpush1.bf16.msra.mxu0 %v12071_v30  ;;  %9089 = vmatpush1.bf16.msra.mxu1 %v12074_v31  ;;  %v12172_v30 = vld [vmem:[%s13297_s7 + $0x1324] ss:$16 sps:$4 sm:$0xff]   ;;  %v12175_v31 = vld [vmem:[%s13297_s7 + $0x132c] ss:$16 sps:$4 sm:$0xff]  }
 0x25f   : > { %8273 = vmatprep.subr.bf16.mxu0 %v12079_v32  ;;  %9090 = vmatprep.subr.bf16.mxu1 %v12082_v33  ;;  %v12170_v32 = vld [vmem:[%s13297_s7 + $0x1320] ss:$16 sps:$4 sm:$0xff]   ;;  %v12173_v33 = vld [vmem:[%s13297_s7 + $0x1328] ss:$16 sps:$4 sm:$0xff]  }
 0x262   : > { %8274 = vmatpush1.bf16.msra.mxu0 %v12077_v34  ;;  %9091 = vmatpush1.bf16.msra.mxu1 %v12080_v35  ;;  %v12178_v34 = vld [vmem:[%s13297_s7 + $0x1344] ss:$16 sps:$4 sm:$0xff]   ;;  %v12181_v35 = vld [vmem:[%s13297_s7 + $0x134c] ss:$16 sps:$4 sm:$0xff]  }
 0x263   : > { %8275 = vmatprep.subr.bf16.mxu0 %v12085_v36  ;;  %9092 = vmatprep.subr.bf16.mxu1 %v12088_v37  ;;  %v12176_v36 = vld [vmem:[%s13297_s7 + $0x1340] ss:$16 sps:$4 sm:$0xff]   ;;  %v12179_v37 = vld [vmem:[%s13297_s7 + $0x1348] ss:$16 sps:$4 sm:$0xff]  }
 0x266   : > { %8276 = vmatpush1.bf16.msra.mxu0 %v12083_v38  ;;  %9093 = vmatpush1.bf16.msra.mxu1 %v12086_v39  ;;  %v12184_v38 = vld [vmem:[%s13297_s7 + $0x1364] ss:$16 sps:$4 sm:$0xff]   ;;  %v12187_v39 = vld [vmem:[%s13297_s7 + $0x136c] ss:$16 sps:$4 sm:$0xff]  }
 0x267   : > { %8277 = vmatprep.subr.bf16.mxu0 %v12091_v40  ;;  %9094 = vmatprep.subr.bf16.mxu1 %v12094_v41  ;;  %v12182_v40 = vld [vmem:[%s13297_s7 + $0x1360] ss:$16 sps:$4 sm:$0xff]   ;;  %v12185_v41 = vld [vmem:[%s13297_s7 + $0x1368] ss:$16 sps:$4 sm:$0xff]  }
 0x26a   : > { %8278 = vmatpush1.bf16.msra.mxu0 %v12089_v42  ;;  %9095 = vmatpush1.bf16.msra.mxu1 %v12092_v43  ;;  %v12190_v42 = vld [vmem:[%s13297_s7 + $0x1384] ss:$16 sps:$4 sm:$0xff]   ;;  %v12193_v43 = vld [vmem:[%s13297_s7 + $0x138c] ss:$16 sps:$4 sm:$0xff]  }
 0x26b   : > { %8279 = vmatprep.subr.bf16.mxu0 %v12097_v44  ;;  %9096 = vmatprep.subr.bf16.mxu1 %v12100_v45  ;;  %v12188_v44 = vld [vmem:[%s13297_s7 + $0x1380] ss:$16 sps:$4 sm:$0xff]   ;;  %v12191_v45 = vld [vmem:[%s13297_s7 + $0x1388] ss:$16 sps:$4 sm:$0xff]  }
 0x26e   : > { %8280 = vmatpush1.bf16.msra.mxu0 %v12095_v46  ;;  %9097 = vmatpush1.bf16.msra.mxu1 %v12098_v47  ;;  %v12196_v46 = vld [vmem:[%s13297_s7 + $0x13a4] ss:$16 sps:$4 sm:$0xff]   ;;  %v12199_v47 = vld [vmem:[%s13297_s7 + $0x13ac] ss:$16 sps:$4 sm:$0xff]  }
 0x26f   : > { %8281 = vmatprep.subr.bf16.mxu0 %v12103_v48  ;;  %9098 = vmatprep.subr.bf16.mxu1 %v12106_v49  ;;  %v12194_v48 = vld [vmem:[%s13297_s7 + $0x13a0] ss:$16 sps:$4 sm:$0xff]   ;;  %v12197_v49 = vld [vmem:[%s13297_s7 + $0x13a8] ss:$16 sps:$4 sm:$0xff]  }
 0x272   : > { %8282 = vmatpush1.bf16.msra.mxu0 %v12101_v50  ;;  %9099 = vmatpush1.bf16.msra.mxu1 %v12104_v51  ;;  %v12202_v50 = vld [vmem:[%s13297_s7 + $0x13c4] ss:$16 sps:$4 sm:$0xff]   ;;  %v12205_v51 = vld [vmem:[%s13297_s7 + $0x13cc] ss:$16 sps:$4 sm:$0xff]  }
 0x273   : > { %8283 = vmatprep.subr.bf16.mxu0 %v12109_v52  ;;  %9100 = vmatprep.subr.bf16.mxu1 %v12112_v53  ;;  %v12200_v52 = vld [vmem:[%s13297_s7 + $0x13c0] ss:$16 sps:$4 sm:$0xff]   ;;  %v12203_v53 = vld [vmem:[%s13297_s7 + $0x13c8] ss:$16 sps:$4 sm:$0xff]  }
 0x276   : > { %8284 = vmatpush1.bf16.msra.mxu0 %v12107_v54  ;;  %9101 = vmatpush1.bf16.msra.mxu1 %v12110_v55  ;;  %v12208_v54 = vld [vmem:[%s13297_s7 + $0x13e4] ss:$16 sps:$4 sm:$0xff]   ;;  %v12211_v55 = vld [vmem:[%s13297_s7 + $0x13ec] ss:$16 sps:$4 sm:$0xff]  }
 0x277   : > { %8296 = vmatprep.subr.bf16.mxu0 %v12118_v57  ;;  %9113 = vmatprep.subr.bf16.mxu1 %v12121_v58  ;;  %v12209_v57 = vld [vmem:[%s13297_s7 + $0x13e8] ss:$16 sps:$4 sm:$0xff]  }
 0x278   : > { %v12212_v58 = vld [vmem:[%s13299_s8 + $0x48] ss:$152 sps:$4 sm:$0xff]  }
 0x279   : > { %8286 = vmatmul.mubr.bf16.vlgmr.msra.gmra.mrb[0].mxu0 %v12113_v56  ;;  %9103 = vmatmul.mubr.bf16.vlgmr.msra.gmra.mrb[0].mxu1 %v12113_v56  ;;  %v12206_v56 = vld [vmem:[%s13297_s7 + $0x13e0] ss:$16 sps:$4 sm:$0xff]  }
 0x27a   : > { %8297 = vmatpush1.bf16.msra.mxu0 %v12116_v59  ;;  %9114 = vmatpush1.bf16.msra.mxu1 %v12119_v60  ;;  %v12217_v59 = vld [vmem:[%s13297_s7 + $0x1404] ss:$16 sps:$4 sm:$0xff]   ;;  %v12220_v60 = vld [vmem:[%s13297_s7 + $0x140c] ss:$16 sps:$4 sm:$0xff]  }
 0x27b   : > { %8298 = vmatprep.subr.bf16.mxu0 %v12124_v61  ;;  %9115 = vmatprep.subr.bf16.mxu1 %v12127_v62  ;;  %v12215_v61 = vld [vmem:[%s13297_s7 + $0x1400] ss:$16 sps:$4 sm:$0xff]   ;;  %v12218_v62 = vld [vmem:[%s13297_s7 + $0x1408] ss:$16 sps:$4 sm:$0xff]  }
 0x27c   : > { %8328 = vmatprep.mubr.bf16.mxu0 %v12214_v63  ;;  %9145 = vmatprep.mubr.bf16.mxu1 %v12214_v63  ;;  %v12223_v63 = vld [vmem:[%s13297_s7 + $0x1424] ss:$16 sps:$4 sm:$0xff]  }
 0x27e   : > { %8299 = vmatpush1.bf16.msra.mxu0 %v12122_v0  ;;  %9116 = vmatpush1.bf16.msra.mxu1 %v12125_v1  ;;  %v12226_v0 = vld [vmem:[%s13297_s7 + $0x142c] ss:$16 sps:$4 sm:$0xff]  }
 0x27f   : > { %8300 = vmatprep.subr.bf16.mxu0 %v12130_v2  ;;  %9117 = vmatprep.subr.bf16.mxu1 %v12133_v3  ;;  %v12313_v1 = vld [vmem:[%s13299_s8 + $0x54] ss:$152 sps:$4 sm:$0xff]   ;;  %v12221_v2 = vld [vmem:[%s13297_s7 + $0x1420] ss:$16 sps:$4 sm:$0xff]   ;;  %v12224_v3 = vld [vmem:[%s13297_s7 + $0x1428] ss:$16 sps:$4 sm:$0xff]  }
 0x282   : > { %8301 = vmatpush1.bf16.msra.mxu0 %v12128_v4  ;;  %9118 = vmatpush1.bf16.msra.mxu1 %v12131_v5  ;;  %v12229_v4 = vld [vmem:[%s13297_s7 + $0x1444] ss:$16 sps:$4 sm:$0xff]   ;;  %v12232_v5 = vld [vmem:[%s13297_s7 + $0x144c] ss:$16 sps:$4 sm:$0xff]  }
 0x283   : > { %8302 = vmatprep.subr.bf16.mxu0 %v12136_v6  ;;  %9119 = vmatprep.subr.bf16.mxu1 %v12139_v7  ;;  %v12227_v6 = vld [vmem:[%s13297_s7 + $0x1440] ss:$16 sps:$4 sm:$0xff]   ;;  %v12230_v7 = vld [vmem:[%s13297_s7 + $0x1448] ss:$16 sps:$4 sm:$0xff]  }
 0x286   : > { %8303 = vmatpush1.bf16.msra.mxu0 %v12134_v8  ;;  %9120 = vmatpush1.bf16.msra.mxu1 %v12137_v9  ;;  %v12235_v8 = vld [vmem:[%s13297_s7 + $0x1464] ss:$16 sps:$4 sm:$0xff]   ;;  %v12238_v9 = vld [vmem:[%s13297_s7 + $0x146c] ss:$16 sps:$4 sm:$0xff]  }
 0x287   : > { %8304 = vmatprep.subr.bf16.mxu0 %v12142_v10  ;;  %9121 = vmatprep.subr.bf16.mxu1 %v12145_v11  ;;  %v12233_v10 = vld [vmem:[%s13297_s7 + $0x1460] ss:$16 sps:$4 sm:$0xff]   ;;  %v12236_v11 = vld [vmem:[%s13297_s7 + $0x1468] ss:$16 sps:$4 sm:$0xff]  }
 0x28a   : > { %8305 = vmatpush1.bf16.msra.mxu0 %v12140_v12  ;;  %9122 = vmatpush1.bf16.msra.mxu1 %v12143_v13  ;;  %v12241_v12 = vld [vmem:[%s13297_s7 + $0x1484] ss:$16 sps:$4 sm:$0xff]   ;;  %v12244_v13 = vld [vmem:[%s13297_s7 + $0x148c] ss:$16 sps:$4 sm:$0xff]  }
 0x28b   : > { %8306 = vmatprep.subr.bf16.mxu0 %v12148_v14  ;;  %9123 = vmatprep.subr.bf16.mxu1 %v12151_v15  ;;  %v12239_v14 = vld [vmem:[%s13297_s7 + $0x1480] ss:$16 sps:$4 sm:$0xff]   ;;  %v12242_v15 = vld [vmem:[%s13297_s7 + $0x1488] ss:$16 sps:$4 sm:$0xff]  }
 0x28e   : > { %8307 = vmatpush1.bf16.msra.mxu0 %v12146_v16  ;;  %9124 = vmatpush1.bf16.msra.mxu1 %v12149_v17  ;;  %v12247_v16 = vld [vmem:[%s13297_s7 + $0x14a4] ss:$16 sps:$4 sm:$0xff]   ;;  %v12250_v17 = vld [vmem:[%s13297_s7 + $0x14ac] ss:$16 sps:$4 sm:$0xff]  }
 0x28f   : > { %8308 = vmatprep.subr.bf16.mxu0 %v12154_v18  ;;  %9125 = vmatprep.subr.bf16.mxu1 %v12157_v19  ;;  %v12245_v18 = vld [vmem:[%s13297_s7 + $0x14a0] ss:$16 sps:$4 sm:$0xff]   ;;  %v12248_v19 = vld [vmem:[%s13297_s7 + $0x14a8] ss:$16 sps:$4 sm:$0xff]  }
 0x292   : > { %8309 = vmatpush1.bf16.msra.mxu0 %v12152_v20  ;;  %9126 = vmatpush1.bf16.msra.mxu1 %v12155_v21  ;;  %v12253_v20 = vld [vmem:[%s13297_s7 + $0x14c4] ss:$16 sps:$4 sm:$0xff]   ;;  %v12256_v21 = vld [vmem:[%s13297_s7 + $0x14cc] ss:$16 sps:$4 sm:$0xff]  }
 0x293   : > { %8310 = vmatprep.subr.bf16.mxu0 %v12160_v22  ;;  %9127 = vmatprep.subr.bf16.mxu1 %v12163_v23  ;;  %v12251_v22 = vld [vmem:[%s13297_s7 + $0x14c0] ss:$16 sps:$4 sm:$0xff]   ;;  %v12254_v23 = vld [vmem:[%s13297_s7 + $0x14c8] ss:$16 sps:$4 sm:$0xff]  }
 0x296   : > { %8311 = vmatpush1.bf16.msra.mxu0 %v12158_v24  ;;  %9128 = vmatpush1.bf16.msra.mxu1 %v12161_v25  ;;  %v12259_v24 = vld [vmem:[%s13297_s7 + $0x14e4] ss:$16 sps:$4 sm:$0xff]   ;;  %v12262_v25 = vld [vmem:[%s13297_s7 + $0x14ec] ss:$16 sps:$4 sm:$0xff]  }
 0x297   : > { %8312 = vmatprep.subr.bf16.mxu0 %v12166_v26  ;;  %9129 = vmatprep.subr.bf16.mxu1 %v12169_v27  ;;  %v12257_v26 = vld [vmem:[%s13297_s7 + $0x14e0] ss:$16 sps:$4 sm:$0xff]   ;;  %v12260_v27 = vld [vmem:[%s13297_s7 + $0x14e8] ss:$16 sps:$4 sm:$0xff]  }
 0x29a   : > { %8313 = vmatpush1.bf16.msra.mxu0 %v12164_v28  ;;  %9130 = vmatpush1.bf16.msra.mxu1 %v12167_v29  ;;  %v12265_v28 = vld [vmem:[%s13297_s7 + $0x1504] ss:$16 sps:$4 sm:$0xff]   ;;  %v12268_v29 = vld [vmem:[%s13297_s7 + $0x150c] ss:$16 sps:$4 sm:$0xff]  }
 0x29b   : > { %8314 = vmatprep.subr.bf16.mxu0 %v12172_v30  ;;  %9131 = vmatprep.subr.bf16.mxu1 %v12175_v31  ;;  %v12263_v30 = vld [vmem:[%s13297_s7 + $0x1500] ss:$16 sps:$4 sm:$0xff]   ;;  %v12266_v31 = vld [vmem:[%s13297_s7 + $0x1508] ss:$16 sps:$4 sm:$0xff]  }
 0x29e   : > { %8315 = vmatpush1.bf16.msra.mxu0 %v12170_v32  ;;  %9132 = vmatpush1.bf16.msra.mxu1 %v12173_v33  ;;  %v12271_v32 = vld [vmem:[%s13297_s7 + $0x1524] ss:$16 sps:$4 sm:$0xff]   ;;  %v12274_v33 = vld [vmem:[%s13297_s7 + $0x152c] ss:$16 sps:$4 sm:$0xff]  }
 0x29f   : > { %8316 = vmatprep.subr.bf16.mxu0 %v12178_v34  ;;  %9133 = vmatprep.subr.bf16.mxu1 %v12181_v35  ;;  %v12269_v34 = vld [vmem:[%s13297_s7 + $0x1520] ss:$16 sps:$4 sm:$0xff]   ;;  %v12272_v35 = vld [vmem:[%s13297_s7 + $0x1528] ss:$16 sps:$4 sm:$0xff]  }
 0x2a2   : > { %8317 = vmatpush1.bf16.msra.mxu0 %v12176_v36  ;;  %9134 = vmatpush1.bf16.msra.mxu1 %v12179_v37  ;;  %v12277_v36 = vld [vmem:[%s13297_s7 + $0x1544] ss:$16 sps:$4 sm:$0xff]   ;;  %v12280_v37 = vld [vmem:[%s13297_s7 + $0x154c] ss:$16 sps:$4 sm:$0xff]  }
 0x2a3   : > { %8318 = vmatprep.subr.bf16.mxu0 %v12184_v38  ;;  %9135 = vmatprep.subr.bf16.mxu1 %v12187_v39  ;;  %v12275_v38 = vld [vmem:[%s13297_s7 + $0x1540] ss:$16 sps:$4 sm:$0xff]   ;;  %v12278_v39 = vld [vmem:[%s13297_s7 + $0x1548] ss:$16 sps:$4 sm:$0xff]  }
 0x2a6   : > { %8319 = vmatpush1.bf16.msra.mxu0 %v12182_v40  ;;  %9136 = vmatpush1.bf16.msra.mxu1 %v12185_v41  ;;  %v12283_v40 = vld [vmem:[%s13297_s7 + $0x1564] ss:$16 sps:$4 sm:$0xff]   ;;  %v12286_v41 = vld [vmem:[%s13297_s7 + $0x156c] ss:$16 sps:$4 sm:$0xff]  }
 0x2a7   : > { %8320 = vmatprep.subr.bf16.mxu0 %v12190_v42  ;;  %9137 = vmatprep.subr.bf16.mxu1 %v12193_v43  ;;  %v12281_v42 = vld [vmem:[%s13297_s7 + $0x1560] ss:$16 sps:$4 sm:$0xff]   ;;  %v12284_v43 = vld [vmem:[%s13297_s7 + $0x1568] ss:$16 sps:$4 sm:$0xff]  }
 0x2aa   : > { %8321 = vmatpush1.bf16.msra.mxu0 %v12188_v44  ;;  %9138 = vmatpush1.bf16.msra.mxu1 %v12191_v45  ;;  %v12289_v44 = vld [vmem:[%s13297_s7 + $0x1584] ss:$16 sps:$4 sm:$0xff]   ;;  %v12292_v45 = vld [vmem:[%s13297_s7 + $0x158c] ss:$16 sps:$4 sm:$0xff]  }
 0x2ab   : > { %8322 = vmatprep.subr.bf16.mxu0 %v12196_v46  ;;  %9139 = vmatprep.subr.bf16.mxu1 %v12199_v47  ;;  %v12287_v46 = vld [vmem:[%s13297_s7 + $0x1580] ss:$16 sps:$4 sm:$0xff]   ;;  %v12290_v47 = vld [vmem:[%s13297_s7 + $0x1588] ss:$16 sps:$4 sm:$0xff]  }
 0x2ae   : > { %8323 = vmatpush1.bf16.msra.mxu0 %v12194_v48  ;;  %9140 = vmatpush1.bf16.msra.mxu1 %v12197_v49  ;;  %v12295_v48 = vld [vmem:[%s13297_s7 + $0x15a4] ss:$16 sps:$4 sm:$0xff]   ;;  %v12298_v49 = vld [vmem:[%s13297_s7 + $0x15ac] ss:$16 sps:$4 sm:$0xff]  }
 0x2af   : > { %8324 = vmatprep.subr.bf16.mxu0 %v12202_v50  ;;  %9141 = vmatprep.subr.bf16.mxu1 %v12205_v51  ;;  %v12293_v50 = vld [vmem:[%s13297_s7 + $0x15a0] ss:$16 sps:$4 sm:$0xff]   ;;  %v12296_v51 = vld [vmem:[%s13297_s7 + $0x15a8] ss:$16 sps:$4 sm:$0xff]  }
 0x2b2   : > { %8325 = vmatpush1.bf16.msra.mxu0 %v12200_v52  ;;  %9142 = vmatpush1.bf16.msra.mxu1 %v12203_v53  ;;  %v12301_v52 = vld [vmem:[%s13297_s7 + $0x15c4] ss:$16 sps:$4 sm:$0xff]   ;;  %v12304_v53 = vld [vmem:[%s13297_s7 + $0x15cc] ss:$16 sps:$4 sm:$0xff]  }
 0x2b3   : > { %8326 = vmatprep.subr.bf16.mxu0 %v12208_v54  ;;  %9143 = vmatprep.subr.bf16.mxu1 %v12211_v55  ;;  %v12299_v54 = vld [vmem:[%s13297_s7 + $0x15c0] ss:$16 sps:$4 sm:$0xff]   ;;  %v12302_v55 = vld [vmem:[%s13297_s7 + $0x15c8] ss:$16 sps:$4 sm:$0xff]  }
 0x2b6   : > { %8327 = vmatpush1.bf16.msra.mxu0 %v12206_v56  ;;  %9144 = vmatpush1.bf16.msra.mxu1 %v12209_v57  ;;  %v12307_v56 = vld [vmem:[%s13297_s7 + $0x15e4] ss:$16 sps:$4 sm:$0xff]   ;;  %v12310_v57 = vld [vmem:[%s13297_s7 + $0x15ec] ss:$16 sps:$4 sm:$0xff]  }
 0x2b7   : > { %8339 = vmatprep.subr.bf16.mxu0 %v12217_v59  ;;  %9156 = vmatprep.subr.bf16.mxu1 %v12220_v60  ;;  %v12308_v59 = vld [vmem:[%s13297_s7 + $0x15e8] ss:$16 sps:$4 sm:$0xff]   ;;  %v12316_v60 = vld [vmem:[%s13297_s7 + $0x1604] ss:$16 sps:$4 sm:$0xff]  }
 0x2b9   : > { %8329 = vmatmul.mubr.bf16.vlgmr.msra.gmra.mrb[0].mxu0 %v12212_v58  ;;  %9146 = vmatmul.mubr.bf16.vlgmr.msra.gmra.mrb[0].mxu1 %v12212_v58  ;;  %v12305_v58 = vld [vmem:[%s13297_s7 + $0x15e0] ss:$16 sps:$4 sm:$0xff]  }
 0x2ba   : > { %8340 = vmatpush1.bf16.msra.mxu0 %v12215_v61  ;;  %9157 = vmatpush1.bf16.msra.mxu1 %v12218_v62  ;;  %v12319_v61 = vld [vmem:[%s13297_s7 + $0x160c] ss:$16 sps:$4 sm:$0xff]   ;;  %v12311_v62 = vld [vmem:[%s13299_s8 + $0x50] ss:$152 sps:$4 sm:$0xff]  }
 0x2bb   : > { %8341 = vmatprep.subr.bf16.mxu0 %v12223_v63  ;;  %9158 = vmatprep.subr.bf16.mxu1 %v12226_v0  ;;  %v12314_v63 = vld [vmem:[%s13297_s7 + $0x1600] ss:$16 sps:$4 sm:$0xff]   ;;  %v12317_v0 = vld [vmem:[%s13297_s7 + $0x1608] ss:$16 sps:$4 sm:$0xff]  }
 0x2bc   : > { %8371 = vmatprep.mubr.bf16.mxu0 %v12313_v1  ;;  %9188 = vmatprep.mubr.bf16.mxu1 %v12313_v1  ;;  %v12322_v1 = vld [vmem:[%s13297_s7 + $0x1624] ss:$16 sps:$4 sm:$0xff]  }
 0x2be   : > { %8342 = vmatpush1.bf16.msra.mxu0 %v12221_v2  ;;  %9159 = vmatpush1.bf16.msra.mxu1 %v12224_v3  ;;  %v12325_v2 = vld [vmem:[%s13297_s7 + $0x162c] ss:$16 sps:$4 sm:$0xff]  }
 0x2bf   : > { %8343 = vmatprep.subr.bf16.mxu0 %v12229_v4  ;;  %9160 = vmatprep.subr.bf16.mxu1 %v12232_v5  ;;  %v12412_v3 = vld [vmem:[%s13299_s8 + $0x5c] ss:$152 sps:$4 sm:$0xff]   ;;  %v12320_v4 = vld [vmem:[%s13297_s7 + $0x1620] ss:$16 sps:$4 sm:$0xff]   ;;  %v12323_v5 = vld [vmem:[%s13297_s7 + $0x1628] ss:$16 sps:$4 sm:$0xff]  }
 0x2c2   : > { %8344 = vmatpush1.bf16.msra.mxu0 %v12227_v6  ;;  %9161 = vmatpush1.bf16.msra.mxu1 %v12230_v7  ;;  %v12328_v6 = vld [vmem:[%s13297_s7 + $0x1644] ss:$16 sps:$4 sm:$0xff]   ;;  %v12331_v7 = vld [vmem:[%s13297_s7 + $0x164c] ss:$16 sps:$4 sm:$0xff]  }
 0x2c3   : > { %8345 = vmatprep.subr.bf16.mxu0 %v12235_v8  ;;  %9162 = vmatprep.subr.bf16.mxu1 %v12238_v9  ;;  %v12326_v8 = vld [vmem:[%s13297_s7 + $0x1640] ss:$16 sps:$4 sm:$0xff]   ;;  %v12329_v9 = vld [vmem:[%s13297_s7 + $0x1648] ss:$16 sps:$4 sm:$0xff]  }
 0x2c6   : > { %8346 = vmatpush1.bf16.msra.mxu0 %v12233_v10  ;;  %9163 = vmatpush1.bf16.msra.mxu1 %v12236_v11  ;;  %v12334_v10 = vld [vmem:[%s13297_s7 + $0x1664] ss:$16 sps:$4 sm:$0xff]   ;;  %v12337_v11 = vld [vmem:[%s13297_s7 + $0x166c] ss:$16 sps:$4 sm:$0xff]  }
 0x2c7   : > { %8347 = vmatprep.subr.bf16.mxu0 %v12241_v12  ;;  %9164 = vmatprep.subr.bf16.mxu1 %v12244_v13  ;;  %v12332_v12 = vld [vmem:[%s13297_s7 + $0x1660] ss:$16 sps:$4 sm:$0xff]   ;;  %v12335_v13 = vld [vmem:[%s13297_s7 + $0x1668] ss:$16 sps:$4 sm:$0xff]  }
 0x2ca   : > { %8348 = vmatpush1.bf16.msra.mxu0 %v12239_v14  ;;  %9165 = vmatpush1.bf16.msra.mxu1 %v12242_v15  ;;  %v12340_v14 = vld [vmem:[%s13297_s7 + $0x1684] ss:$16 sps:$4 sm:$0xff]   ;;  %v12343_v15 = vld [vmem:[%s13297_s7 + $0x168c] ss:$16 sps:$4 sm:$0xff]  }
 0x2cb   : > { %8349 = vmatprep.subr.bf16.mxu0 %v12247_v16  ;;  %9166 = vmatprep.subr.bf16.mxu1 %v12250_v17  ;;  %v12338_v16 = vld [vmem:[%s13297_s7 + $0x1680] ss:$16 sps:$4 sm:$0xff]   ;;  %v12341_v17 = vld [vmem:[%s13297_s7 + $0x1688] ss:$16 sps:$4 sm:$0xff]  }
 0x2ce   : > { %8350 = vmatpush1.bf16.msra.mxu0 %v12245_v18  ;;  %9167 = vmatpush1.bf16.msra.mxu1 %v12248_v19  ;;  %v12346_v18 = vld [vmem:[%s13297_s7 + $0x16a4] ss:$16 sps:$4 sm:$0xff]   ;;  %v12349_v19 = vld [vmem:[%s13297_s7 + $0x16ac] ss:$16 sps:$4 sm:$0xff]  }
 0x2cf   : > { %8351 = vmatprep.subr.bf16.mxu0 %v12253_v20  ;;  %9168 = vmatprep.subr.bf16.mxu1 %v12256_v21  ;;  %v12344_v20 = vld [vmem:[%s13297_s7 + $0x16a0] ss:$16 sps:$4 sm:$0xff]   ;;  %v12347_v21 = vld [vmem:[%s13297_s7 + $0x16a8] ss:$16 sps:$4 sm:$0xff]  }
 0x2d2   : > { %8352 = vmatpush1.bf16.msra.mxu0 %v12251_v22  ;;  %9169 = vmatpush1.bf16.msra.mxu1 %v12254_v23  ;;  %v12352_v22 = vld [vmem:[%s13297_s7 + $0x16c4] ss:$16 sps:$4 sm:$0xff]   ;;  %v12355_v23 = vld [vmem:[%s13297_s7 + $0x16cc] ss:$16 sps:$4 sm:$0xff]  }
 0x2d3   : > { %8353 = vmatprep.subr.bf16.mxu0 %v12259_v24  ;;  %9170 = vmatprep.subr.bf16.mxu1 %v12262_v25  ;;  %v12350_v24 = vld [vmem:[%s13297_s7 + $0x16c0] ss:$16 sps:$4 sm:$0xff]   ;;  %v12353_v25 = vld [vmem:[%s13297_s7 + $0x16c8] ss:$16 sps:$4 sm:$0xff]  }
 0x2d6   : > { %8354 = vmatpush1.bf16.msra.mxu0 %v12257_v26  ;;  %9171 = vmatpush1.bf16.msra.mxu1 %v12260_v27  ;;  %v12358_v26 = vld [vmem:[%s13297_s7 + $0x16e4] ss:$16 sps:$4 sm:$0xff]   ;;  %v12361_v27 = vld [vmem:[%s13297_s7 + $0x16ec] ss:$16 sps:$4 sm:$0xff]  }
 0x2d7   : > { %8355 = vmatprep.subr.bf16.mxu0 %v12265_v28  ;;  %9172 = vmatprep.subr.bf16.mxu1 %v12268_v29  ;;  %v12356_v28 = vld [vmem:[%s13297_s7 + $0x16e0] ss:$16 sps:$4 sm:$0xff]   ;;  %v12359_v29 = vld [vmem:[%s13297_s7 + $0x16e8] ss:$16 sps:$4 sm:$0xff]  }
 0x2da   : > { %8356 = vmatpush1.bf16.msra.mxu0 %v12263_v30  ;;  %9173 = vmatpush1.bf16.msra.mxu1 %v12266_v31  ;;  %v12364_v30 = vld [vmem:[%s13297_s7 + $0x1704] ss:$16 sps:$4 sm:$0xff]   ;;  %v12367_v31 = vld [vmem:[%s13297_s7 + $0x170c] ss:$16 sps:$4 sm:$0xff]  }
 0x2db   : > { %8357 = vmatprep.subr.bf16.mxu0 %v12271_v32  ;;  %9174 = vmatprep.subr.bf16.mxu1 %v12274_v33  ;;  %v12362_v32 = vld [vmem:[%s13297_s7 + $0x1700] ss:$16 sps:$4 sm:$0xff]   ;;  %v12365_v33 = vld [vmem:[%s13297_s7 + $0x1708] ss:$16 sps:$4 sm:$0xff]  }
 0x2de   : > { %8358 = vmatpush1.bf16.msra.mxu0 %v12269_v34  ;;  %9175 = vmatpush1.bf16.msra.mxu1 %v12272_v35  ;;  %v12370_v34 = vld [vmem:[%s13297_s7 + $0x1724] ss:$16 sps:$4 sm:$0xff]   ;;  %v12373_v35 = vld [vmem:[%s13297_s7 + $0x172c] ss:$16 sps:$4 sm:$0xff]  }
 0x2df   : > { %8359 = vmatprep.subr.bf16.mxu0 %v12277_v36  ;;  %9176 = vmatprep.subr.bf16.mxu1 %v12280_v37  ;;  %v12368_v36 = vld [vmem:[%s13297_s7 + $0x1720] ss:$16 sps:$4 sm:$0xff]   ;;  %v12371_v37 = vld [vmem:[%s13297_s7 + $0x1728] ss:$16 sps:$4 sm:$0xff]  }
 0x2e2   : > { %8360 = vmatpush1.bf16.msra.mxu0 %v12275_v38  ;;  %9177 = vmatpush1.bf16.msra.mxu1 %v12278_v39  ;;  %v12376_v38 = vld [vmem:[%s13297_s7 + $0x1744] ss:$16 sps:$4 sm:$0xff]   ;;  %v12379_v39 = vld [vmem:[%s13297_s7 + $0x174c] ss:$16 sps:$4 sm:$0xff]  }
 0x2e3   : > { %8361 = vmatprep.subr.bf16.mxu0 %v12283_v40  ;;  %9178 = vmatprep.subr.bf16.mxu1 %v12286_v41  ;;  %v12374_v40 = vld [vmem:[%s13297_s7 + $0x1740] ss:$16 sps:$4 sm:$0xff]   ;;  %v12377_v41 = vld [vmem:[%s13297_s7 + $0x1748] ss:$16 sps:$4 sm:$0xff]  }
 0x2e6   : > { %8362 = vmatpush1.bf16.msra.mxu0 %v12281_v42  ;;  %9179 = vmatpush1.bf16.msra.mxu1 %v12284_v43  ;;  %v12382_v42 = vld [vmem:[%s13297_s7 + $0x1764] ss:$16 sps:$4 sm:$0xff]   ;;  %v12385_v43 = vld [vmem:[%s13297_s7 + $0x176c] ss:$16 sps:$4 sm:$0xff]  }
 0x2e7   : > { %8363 = vmatprep.subr.bf16.mxu0 %v12289_v44  ;;  %9180 = vmatprep.subr.bf16.mxu1 %v12292_v45  ;;  %v12380_v44 = vld [vmem:[%s13297_s7 + $0x1760] ss:$16 sps:$4 sm:$0xff]   ;;  %v12383_v45 = vld [vmem:[%s13297_s7 + $0x1768] ss:$16 sps:$4 sm:$0xff]  }
 0x2ea   : > { %8364 = vmatpush1.bf16.msra.mxu0 %v12287_v46  ;;  %9181 = vmatpush1.bf16.msra.mxu1 %v12290_v47  ;;  %v12388_v46 = vld [vmem:[%s13297_s7 + $0x1784] ss:$16 sps:$4 sm:$0xff]   ;;  %v12391_v47 = vld [vmem:[%s13297_s7 + $0x178c] ss:$16 sps:$4 sm:$0xff]  }
 0x2eb   : > { %8365 = vmatprep.subr.bf16.mxu0 %v12295_v48  ;;  %9182 = vmatprep.subr.bf16.mxu1 %v12298_v49  ;;  %v12386_v48 = vld [vmem:[%s13297_s7 + $0x1780] ss:$16 sps:$4 sm:$0xff]   ;;  %v12389_v49 = vld [vmem:[%s13297_s7 + $0x1788] ss:$16 sps:$4 sm:$0xff]  }
 0x2ee   : > { %8366 = vmatpush1.bf16.msra.mxu0 %v12293_v50  ;;  %9183 = vmatpush1.bf16.msra.mxu1 %v12296_v51  ;;  %v12394_v50 = vld [vmem:[%s13297_s7 + $0x17a4] ss:$16 sps:$4 sm:$0xff]   ;;  %v12397_v51 = vld [vmem:[%s13297_s7 + $0x17ac] ss:$16 sps:$4 sm:$0xff]  }
 0x2ef   : > { %8367 = vmatprep.subr.bf16.mxu0 %v12301_v52  ;;  %9184 = vmatprep.subr.bf16.mxu1 %v12304_v53  ;;  %v12392_v52 = vld [vmem:[%s13297_s7 + $0x17a0] ss:$16 sps:$4 sm:$0xff]   ;;  %v12395_v53 = vld [vmem:[%s13297_s7 + $0x17a8] ss:$16 sps:$4 sm:$0xff]  }
 0x2f2   : > { %8368 = vmatpush1.bf16.msra.mxu0 %v12299_v54  ;;  %9185 = vmatpush1.bf16.msra.mxu1 %v12302_v55  ;;  %v12400_v54 = vld [vmem:[%s13297_s7 + $0x17c4] ss:$16 sps:$4 sm:$0xff]   ;;  %v12403_v55 = vld [vmem:[%s13297_s7 + $0x17cc] ss:$16 sps:$4 sm:$0xff]  }
 0x2f3   : > { %8369 = vmatprep.subr.bf16.mxu0 %v12307_v56  ;;  %9186 = vmatprep.subr.bf16.mxu1 %v12310_v57  ;;  %v12398_v56 = vld [vmem:[%s13297_s7 + $0x17c0] ss:$16 sps:$4 sm:$0xff]   ;;  %v12401_v57 = vld [vmem:[%s13297_s7 + $0x17c8] ss:$16 sps:$4 sm:$0xff]  }
 0x2f6   : > { %8370 = vmatpush1.bf16.msra.mxu0 %v12305_v58  ;;  %9187 = vmatpush1.bf16.msra.mxu1 %v12308_v59  ;;  %v12406_v58 = vld [vmem:[%s13297_s7 + $0x17e4] ss:$16 sps:$4 sm:$0xff]   ;;  %v12409_v59 = vld [vmem:[%s13297_s7 + $0x17ec] ss:$16 sps:$4 sm:$0xff]  }
 0x2f7   : > { %8382 = vmatprep.subr.bf16.mxu0 %v12316_v60  ;;  %9199 = vmatprep.subr.bf16.mxu1 %v12319_v61  ;;  %v12404_v60 = vld [vmem:[%s13297_s7 + $0x17e0] ss:$16 sps:$4 sm:$0xff]   ;;  %v12407_v61 = vld [vmem:[%s13297_s7 + $0x17e8] ss:$16 sps:$4 sm:$0xff]  }
 0x2f9   : > { %8372 = vmatmul.mubr.bf16.vlgmr.msra.gmra.mrb[0].mxu0 %v12311_v62  ;;  %9189 = vmatmul.mubr.bf16.vlgmr.msra.gmra.mrb[0].mxu1 %v12311_v62  ;;  %v12415_v62 = vld [vmem:[%s13297_s7 + $0x1804] ss:$16 sps:$4 sm:$0xff]  }
 0x2fa   : > { %8383 = vmatpush1.bf16.msra.mxu0 %v12314_v63  ;;  %9200 = vmatpush1.bf16.msra.mxu1 %v12317_v0  ;;  %v12418_v63 = vld [vmem:[%s13297_s7 + $0x180c] ss:$16 sps:$4 sm:$0xff]   ;;  %v12410_v0 = vld [vmem:[%s13299_s8 + $0x58] ss:$152 sps:$4 sm:$0xff]  }
 0x2fb   : > { %8384 = vmatprep.subr.bf16.mxu0 %v12322_v1  ;;  %9201 = vmatprep.subr.bf16.mxu1 %v12325_v2  ;;  %v12413_v1 = vld [vmem:[%s13297_s7 + $0x1800] ss:$16 sps:$4 sm:$0xff]   ;;  %v12416_v2 = vld [vmem:[%s13297_s7 + $0x1808] ss:$16 sps:$4 sm:$0xff]  }
 0x2fc   : > { %8414 = vmatprep.mubr.bf16.mxu0 %v12412_v3  ;;  %9231 = vmatprep.mubr.bf16.mxu1 %v12412_v3  ;;  %v12421_v3 = vld [vmem:[%s13297_s7 + $0x1824] ss:$16 sps:$4 sm:$0xff]  }
 0x2fe   : > { %8385 = vmatpush1.bf16.msra.mxu0 %v12320_v4  ;;  %9202 = vmatpush1.bf16.msra.mxu1 %v12323_v5  ;;  %v12424_v4 = vld [vmem:[%s13297_s7 + $0x182c] ss:$16 sps:$4 sm:$0xff]  }
 0x2ff   : > { %8386 = vmatprep.subr.bf16.mxu0 %v12328_v6  ;;  %9203 = vmatprep.subr.bf16.mxu1 %v12331_v7  ;;  %v12511_v5 = vld [vmem:[%s13299_s8 + $0x64] ss:$152 sps:$4 sm:$0xff]   ;;  %v12419_v6 = vld [vmem:[%s13297_s7 + $0x1820] ss:$16 sps:$4 sm:$0xff]   ;;  %v12422_v7 = vld [vmem:[%s13297_s7 + $0x1828] ss:$16 sps:$4 sm:$0xff]  }
 0x302   : > { %8387 = vmatpush1.bf16.msra.mxu0 %v12326_v8  ;;  %9204 = vmatpush1.bf16.msra.mxu1 %v12329_v9  ;;  %v12427_v8 = vld [vmem:[%s13297_s7 + $0x1844] ss:$16 sps:$4 sm:$0xff]   ;;  %v12430_v9 = vld [vmem:[%s13297_s7 + $0x184c] ss:$16 sps:$4 sm:$0xff]  }
 0x303   : > { %8388 = vmatprep.subr.bf16.mxu0 %v12334_v10  ;;  %9205 = vmatprep.subr.bf16.mxu1 %v12337_v11  ;;  %v12425_v10 = vld [vmem:[%s13297_s7 + $0x1840] ss:$16 sps:$4 sm:$0xff]   ;;  %v12428_v11 = vld [vmem:[%s13297_s7 + $0x1848] ss:$16 sps:$4 sm:$0xff]  }
 0x306   : > { %8389 = vmatpush1.bf16.msra.mxu0 %v12332_v12  ;;  %9206 = vmatpush1.bf16.msra.mxu1 %v12335_v13  ;;  %v12433_v12 = vld [vmem:[%s13297_s7 + $0x1864] ss:$16 sps:$4 sm:$0xff]   ;;  %v12436_v13 = vld [vmem:[%s13297_s7 + $0x186c] ss:$16 sps:$4 sm:$0xff]  }
 0x307   : > { %8390 = vmatprep.subr.bf16.mxu0 %v12340_v14  ;;  %9207 = vmatprep.subr.bf16.mxu1 %v12343_v15  ;;  %v12431_v14 = vld [vmem:[%s13297_s7 + $0x1860] ss:$16 sps:$4 sm:$0xff]   ;;  %v12434_v15 = vld [vmem:[%s13297_s7 + $0x1868] ss:$16 sps:$4 sm:$0xff]  }
 0x30a   : > { %8391 = vmatpush1.bf16.msra.mxu0 %v12338_v16  ;;  %9208 = vmatpush1.bf16.msra.mxu1 %v12341_v17  ;;  %v12439_v16 = vld [vmem:[%s13297_s7 + $0x1884] ss:$16 sps:$4 sm:$0xff]   ;;  %v12442_v17 = vld [vmem:[%s13297_s7 + $0x188c] ss:$16 sps:$4 sm:$0xff]  }
 0x30b   : > { %8392 = vmatprep.subr.bf16.mxu0 %v12346_v18  ;;  %9209 = vmatprep.subr.bf16.mxu1 %v12349_v19  ;;  %v12437_v18 = vld [vmem:[%s13297_s7 + $0x1880] ss:$16 sps:$4 sm:$0xff]   ;;  %v12440_v19 = vld [vmem:[%s13297_s7 + $0x1888] ss:$16 sps:$4 sm:$0xff]  }
 0x30e   : > { %8393 = vmatpush1.bf16.msra.mxu0 %v12344_v20  ;;  %9210 = vmatpush1.bf16.msra.mxu1 %v12347_v21  ;;  %v12445_v20 = vld [vmem:[%s13297_s7 + $0x18a4] ss:$16 sps:$4 sm:$0xff]   ;;  %v12448_v21 = vld [vmem:[%s13297_s7 + $0x18ac] ss:$16 sps:$4 sm:$0xff]  }
 0x30f   : > { %8394 = vmatprep.subr.bf16.mxu0 %v12352_v22  ;;  %9211 = vmatprep.subr.bf16.mxu1 %v12355_v23  ;;  %v12443_v22 = vld [vmem:[%s13297_s7 + $0x18a0] ss:$16 sps:$4 sm:$0xff]   ;;  %v12446_v23 = vld [vmem:[%s13297_s7 + $0x18a8] ss:$16 sps:$4 sm:$0xff]  }
 0x312   : > { %8395 = vmatpush1.bf16.msra.mxu0 %v12350_v24  ;;  %9212 = vmatpush1.bf16.msra.mxu1 %v12353_v25  ;;  %v12451_v24 = vld [vmem:[%s13297_s7 + $0x18c4] ss:$16 sps:$4 sm:$0xff]   ;;  %v12454_v25 = vld [vmem:[%s13297_s7 + $0x18cc] ss:$16 sps:$4 sm:$0xff]  }
 0x313   : > { %8396 = vmatprep.subr.bf16.mxu0 %v12358_v26  ;;  %9213 = vmatprep.subr.bf16.mxu1 %v12361_v27  ;;  %v12449_v26 = vld [vmem:[%s13297_s7 + $0x18c0] ss:$16 sps:$4 sm:$0xff]   ;;  %v12452_v27 = vld [vmem:[%s13297_s7 + $0x18c8] ss:$16 sps:$4 sm:$0xff]  }
 0x316   : > { %8397 = vmatpush1.bf16.msra.mxu0 %v12356_v28  ;;  %9214 = vmatpush1.bf16.msra.mxu1 %v12359_v29  ;;  %v12457_v28 = vld [vmem:[%s13297_s7 + $0x18e4] ss:$16 sps:$4 sm:$0xff]   ;;  %v12460_v29 = vld [vmem:[%s13297_s7 + $0x18ec] ss:$16 sps:$4 sm:$0xff]  }
 0x317   : > { %8398 = vmatprep.subr.bf16.mxu0 %v12364_v30  ;;  %9215 = vmatprep.subr.bf16.mxu1 %v12367_v31  ;;  %v12455_v30 = vld [vmem:[%s13297_s7 + $0x18e0] ss:$16 sps:$4 sm:$0xff]   ;;  %v12458_v31 = vld [vmem:[%s13297_s7 + $0x18e8] ss:$16 sps:$4 sm:$0xff]  }
 0x31a   : > { %8399 = vmatpush1.bf16.msra.mxu0 %v12362_v32  ;;  %9216 = vmatpush1.bf16.msra.mxu1 %v12365_v33  ;;  %v12463_v32 = vld [vmem:[%s13297_s7 + $0x1904] ss:$16 sps:$4 sm:$0xff]   ;;  %v12466_v33 = vld [vmem:[%s13297_s7 + $0x190c] ss:$16 sps:$4 sm:$0xff]  }
 0x31b   : > { %8400 = vmatprep.subr.bf16.mxu0 %v12370_v34  ;;  %9217 = vmatprep.subr.bf16.mxu1 %v12373_v35  ;;  %v12461_v34 = vld [vmem:[%s13297_s7 + $0x1900] ss:$16 sps:$4 sm:$0xff]   ;;  %v12464_v35 = vld [vmem:[%s13297_s7 + $0x1908] ss:$16 sps:$4 sm:$0xff]  }
 0x31e   : > { %8401 = vmatpush1.bf16.msra.mxu0 %v12368_v36  ;;  %9218 = vmatpush1.bf16.msra.mxu1 %v12371_v37  ;;  %v12469_v36 = vld [vmem:[%s13297_s7 + $0x1924] ss:$16 sps:$4 sm:$0xff]   ;;  %v12472_v37 = vld [vmem:[%s13297_s7 + $0x192c] ss:$16 sps:$4 sm:$0xff]  }
 0x31f   : > { %8402 = vmatprep.subr.bf16.mxu0 %v12376_v38  ;;  %9219 = vmatprep.subr.bf16.mxu1 %v12379_v39  ;;  %v12467_v38 = vld [vmem:[%s13297_s7 + $0x1920] ss:$16 sps:$4 sm:$0xff]   ;;  %v12470_v39 = vld [vmem:[%s13297_s7 + $0x1928] ss:$16 sps:$4 sm:$0xff]  }
 0x322   : > { %8403 = vmatpush1.bf16.msra.mxu0 %v12374_v40  ;;  %9220 = vmatpush1.bf16.msra.mxu1 %v12377_v41  ;;  %v12475_v40 = vld [vmem:[%s13297_s7 + $0x1944] ss:$16 sps:$4 sm:$0xff]   ;;  %v12478_v41 = vld [vmem:[%s13297_s7 + $0x194c] ss:$16 sps:$4 sm:$0xff]  }
 0x323   : > { %8404 = vmatprep.subr.bf16.mxu0 %v12382_v42  ;;  %9221 = vmatprep.subr.bf16.mxu1 %v12385_v43  ;;  %v12473_v42 = vld [vmem:[%s13297_s7 + $0x1940] ss:$16 sps:$4 sm:$0xff]   ;;  %v12476_v43 = vld [vmem:[%s13297_s7 + $0x1948] ss:$16 sps:$4 sm:$0xff]  }
 0x326   : > { %8405 = vmatpush1.bf16.msra.mxu0 %v12380_v44  ;;  %9222 = vmatpush1.bf16.msra.mxu1 %v12383_v45  ;;  %v12481_v44 = vld [vmem:[%s13297_s7 + $0x1964] ss:$16 sps:$4 sm:$0xff]   ;;  %v12484_v45 = vld [vmem:[%s13297_s7 + $0x196c] ss:$16 sps:$4 sm:$0xff]  }
 0x327   : > { %8406 = vmatprep.subr.bf16.mxu0 %v12388_v46  ;;  %9223 = vmatprep.subr.bf16.mxu1 %v12391_v47  ;;  %v12479_v46 = vld [vmem:[%s13297_s7 + $0x1960] ss:$16 sps:$4 sm:$0xff]   ;;  %v12482_v47 = vld [vmem:[%s13297_s7 + $0x1968] ss:$16 sps:$4 sm:$0xff]  }
 0x32a   : > { %8407 = vmatpush1.bf16.msra.mxu0 %v12386_v48  ;;  %9224 = vmatpush1.bf16.msra.mxu1 %v12389_v49  ;;  %v12487_v48 = vld [vmem:[%s13297_s7 + $0x1984] ss:$16 sps:$4 sm:$0xff]   ;;  %v12490_v49 = vld [vmem:[%s13297_s7 + $0x198c] ss:$16 sps:$4 sm:$0xff]  }
 0x32b   : > { %8408 = vmatprep.subr.bf16.mxu0 %v12394_v50  ;;  %9225 = vmatprep.subr.bf16.mxu1 %v12397_v51  ;;  %v12485_v50 = vld [vmem:[%s13297_s7 + $0x1980] ss:$16 sps:$4 sm:$0xff]   ;;  %v12488_v51 = vld [vmem:[%s13297_s7 + $0x1988] ss:$16 sps:$4 sm:$0xff]  }
 0x32e   : > { %8409 = vmatpush1.bf16.msra.mxu0 %v12392_v52  ;;  %9226 = vmatpush1.bf16.msra.mxu1 %v12395_v53  ;;  %v12493_v52 = vld [vmem:[%s13297_s7 + $0x19a4] ss:$16 sps:$4 sm:$0xff]   ;;  %v12496_v53 = vld [vmem:[%s13297_s7 + $0x19ac] ss:$16 sps:$4 sm:$0xff]  }
 0x32f   : > { %8410 = vmatprep.subr.bf16.mxu0 %v12400_v54  ;;  %9227 = vmatprep.subr.bf16.mxu1 %v12403_v55  ;;  %v12491_v54 = vld [vmem:[%s13297_s7 + $0x19a0] ss:$16 sps:$4 sm:$0xff]   ;;  %v12494_v55 = vld [vmem:[%s13297_s7 + $0x19a8] ss:$16 sps:$4 sm:$0xff]  }
 0x332   : > { %8411 = vmatpush1.bf16.msra.mxu0 %v12398_v56  ;;  %9228 = vmatpush1.bf16.msra.mxu1 %v12401_v57  ;;  %v12499_v56 = vld [vmem:[%s13297_s7 + $0x19c4] ss:$16 sps:$4 sm:$0xff]   ;;  %v12502_v57 = vld [vmem:[%s13297_s7 + $0x19cc] ss:$16 sps:$4 sm:$0xff]  }
 0x333   : > { %8412 = vmatprep.subr.bf16.mxu0 %v12406_v58  ;;  %9229 = vmatprep.subr.bf16.mxu1 %v12409_v59  ;;  %v12497_v58 = vld [vmem:[%s13297_s7 + $0x19c0] ss:$16 sps:$4 sm:$0xff]   ;;  %v12500_v59 = vld [vmem:[%s13297_s7 + $0x19c8] ss:$16 sps:$4 sm:$0xff]  }
 0x336   : > { %8413 = vmatpush1.bf16.msra.mxu0 %v12404_v60  ;;  %9230 = vmatpush1.bf16.msra.mxu1 %v12407_v61  ;;  %v12505_v60 = vld [vmem:[%s13297_s7 + $0x19e4] ss:$16 sps:$4 sm:$0xff]   ;;  %v12508_v61 = vld [vmem:[%s13297_s7 + $0x19ec] ss:$16 sps:$4 sm:$0xff]  }
 0x337   : > { %8425 = vmatprep.subr.bf16.mxu0 %v12415_v62  ;;  %9242 = vmatprep.subr.bf16.mxu1 %v12418_v63  ;;  %v12503_v62 = vld [vmem:[%s13297_s7 + $0x19e0] ss:$16 sps:$4 sm:$0xff]   ;;  %v12506_v63 = vld [vmem:[%s13297_s7 + $0x19e8] ss:$16 sps:$4 sm:$0xff]  }
 0x339   : > { %8415 = vmatmul.mubr.bf16.vlgmr.msra.gmra.mrb[0].mxu0 %v12410_v0  ;;  %9232 = vmatmul.mubr.bf16.vlgmr.msra.gmra.mrb[0].mxu1 %v12410_v0  ;;  %v12514_v0 = vld [vmem:[%s13297_s7 + $0x1a04] ss:$16 sps:$4 sm:$0xff]  }
 0x33a   : > { %8426 = vmatpush1.bf16.msra.mxu0 %v12413_v1  ;;  %9243 = vmatpush1.bf16.msra.mxu1 %v12416_v2  ;;  %v12517_v1 = vld [vmem:[%s13297_s7 + $0x1a0c] ss:$16 sps:$4 sm:$0xff]   ;;  %v12509_v2 = vld [vmem:[%s13299_s8 + $0x60] ss:$152 sps:$4 sm:$0xff]  }
 0x33b   : > { %8427 = vmatprep.subr.bf16.mxu0 %v12421_v3  ;;  %9244 = vmatprep.subr.bf16.mxu1 %v12424_v4  ;;  %v12512_v3 = vld [vmem:[%s13297_s7 + $0x1a00] ss:$16 sps:$4 sm:$0xff]   ;;  %v12515_v4 = vld [vmem:[%s13297_s7 + $0x1a08] ss:$16 sps:$4 sm:$0xff]  }
 0x33c   : > { %8457 = vmatprep.mubr.bf16.mxu0 %v12511_v5  ;;  %9274 = vmatprep.mubr.bf16.mxu1 %v12511_v5  ;;  %v12520_v5 = vld [vmem:[%s13297_s7 + $0x1a24] ss:$16 sps:$4 sm:$0xff]  }
 0x33e   : > { %8428 = vmatpush1.bf16.msra.mxu0 %v12419_v6  ;;  %9245 = vmatpush1.bf16.msra.mxu1 %v12422_v7  ;;  %v12523_v6 = vld [vmem:[%s13297_s7 + $0x1a2c] ss:$16 sps:$4 sm:$0xff]  }
 0x33f   : > { %8429 = vmatprep.subr.bf16.mxu0 %v12427_v8  ;;  %9246 = vmatprep.subr.bf16.mxu1 %v12430_v9  ;;  %v12610_v7 = vld [vmem:[%s13299_s8 + $0x6c] ss:$152 sps:$4 sm:$0xff]   ;;  %v12518_v8 = vld [vmem:[%s13297_s7 + $0x1a20] ss:$16 sps:$4 sm:$0xff]   ;;  %v12521_v9 = vld [vmem:[%s13297_s7 + $0x1a28] ss:$16 sps:$4 sm:$0xff]  }
 0x342   : > { %8430 = vmatpush1.bf16.msra.mxu0 %v12425_v10  ;;  %9247 = vmatpush1.bf16.msra.mxu1 %v12428_v11  ;;  %v12526_v10 = vld [vmem:[%s13297_s7 + $0x1a44] ss:$16 sps:$4 sm:$0xff]   ;;  %v12529_v11 = vld [vmem:[%s13297_s7 + $0x1a4c] ss:$16 sps:$4 sm:$0xff]  }
 0x343   : > { %8431 = vmatprep.subr.bf16.mxu0 %v12433_v12  ;;  %9248 = vmatprep.subr.bf16.mxu1 %v12436_v13  ;;  %v12524_v12 = vld [vmem:[%s13297_s7 + $0x1a40] ss:$16 sps:$4 sm:$0xff]   ;;  %v12527_v13 = vld [vmem:[%s13297_s7 + $0x1a48] ss:$16 sps:$4 sm:$0xff]  }
 0x346   : > { %8432 = vmatpush1.bf16.msra.mxu0 %v12431_v14  ;;  %9249 = vmatpush1.bf16.msra.mxu1 %v12434_v15  ;;  %v12532_v14 = vld [vmem:[%s13297_s7 + $0x1a64] ss:$16 sps:$4 sm:$0xff]   ;;  %v12535_v15 = vld [vmem:[%s13297_s7 + $0x1a6c] ss:$16 sps:$4 sm:$0xff]  }
 0x347   : > { %8433 = vmatprep.subr.bf16.mxu0 %v12439_v16  ;;  %9250 = vmatprep.subr.bf16.mxu1 %v12442_v17  ;;  %v12530_v16 = vld [vmem:[%s13297_s7 + $0x1a60] ss:$16 sps:$4 sm:$0xff]   ;;  %v12533_v17 = vld [vmem:[%s13297_s7 + $0x1a68] ss:$16 sps:$4 sm:$0xff]  }
 0x34a   : > { %8434 = vmatpush1.bf16.msra.mxu0 %v12437_v18  ;;  %9251 = vmatpush1.bf16.msra.mxu1 %v12440_v19  ;;  %v12538_v18 = vld [vmem:[%s13297_s7 + $0x1a84] ss:$16 sps:$4 sm:$0xff]   ;;  %v12541_v19 = vld [vmem:[%s13297_s7 + $0x1a8c] ss:$16 sps:$4 sm:$0xff]  }
 0x34b   : > { %8435 = vmatprep.subr.bf16.mxu0 %v12445_v20  ;;  %9252 = vmatprep.subr.bf16.mxu1 %v12448_v21  ;;  %v12536_v20 = vld [vmem:[%s13297_s7 + $0x1a80] ss:$16 sps:$4 sm:$0xff]   ;;  %v12539_v21 = vld [vmem:[%s13297_s7 + $0x1a88] ss:$16 sps:$4 sm:$0xff]  }
 0x34e   : > { %8436 = vmatpush1.bf16.msra.mxu0 %v12443_v22  ;;  %9253 = vmatpush1.bf16.msra.mxu1 %v12446_v23  ;;  %v12544_v22 = vld [vmem:[%s13297_s7 + $0x1aa4] ss:$16 sps:$4 sm:$0xff]   ;;  %v12547_v23 = vld [vmem:[%s13297_s7 + $0x1aac] ss:$16 sps:$4 sm:$0xff]  }
 0x34f   : > { %8437 = vmatprep.subr.bf16.mxu0 %v12451_v24  ;;  %9254 = vmatprep.subr.bf16.mxu1 %v12454_v25  ;;  %v12542_v24 = vld [vmem:[%s13297_s7 + $0x1aa0] ss:$16 sps:$4 sm:$0xff]   ;;  %v12545_v25 = vld [vmem:[%s13297_s7 + $0x1aa8] ss:$16 sps:$4 sm:$0xff]  }
 0x352   : > { %8438 = vmatpush1.bf16.msra.mxu0 %v12449_v26  ;;  %9255 = vmatpush1.bf16.msra.mxu1 %v12452_v27  ;;  %v12550_v26 = vld [vmem:[%s13297_s7 + $0x1ac4] ss:$16 sps:$4 sm:$0xff]   ;;  %v12553_v27 = vld [vmem:[%s13297_s7 + $0x1acc] ss:$16 sps:$4 sm:$0xff]  }
 0x353   : > { %8439 = vmatprep.subr.bf16.mxu0 %v12457_v28  ;;  %9256 = vmatprep.subr.bf16.mxu1 %v12460_v29  ;;  %v12548_v28 = vld [vmem:[%s13297_s7 + $0x1ac0] ss:$16 sps:$4 sm:$0xff]   ;;  %v12551_v29 = vld [vmem:[%s13297_s7 + $0x1ac8] ss:$16 sps:$4 sm:$0xff]  }
 0x356   : > { %8440 = vmatpush1.bf16.msra.mxu0 %v12455_v30  ;;  %9257 = vmatpush1.bf16.msra.mxu1 %v12458_v31  ;;  %v12556_v30 = vld [vmem:[%s13297_s7 + $0x1ae4] ss:$16 sps:$4 sm:$0xff]   ;;  %v12559_v31 = vld [vmem:[%s13297_s7 + $0x1aec] ss:$16 sps:$4 sm:$0xff]  }
 0x357   : > { %8441 = vmatprep.subr.bf16.mxu0 %v12463_v32  ;;  %9258 = vmatprep.subr.bf16.mxu1 %v12466_v33  ;;  %v12554_v32 = vld [vmem:[%s13297_s7 + $0x1ae0] ss:$16 sps:$4 sm:$0xff]   ;;  %v12557_v33 = vld [vmem:[%s13297_s7 + $0x1ae8] ss:$16 sps:$4 sm:$0xff]  }
 0x35a   : > { %8442 = vmatpush1.bf16.msra.mxu0 %v12461_v34  ;;  %9259 = vmatpush1.bf16.msra.mxu1 %v12464_v35  ;;  %v12562_v34 = vld [vmem:[%s13297_s7 + $0x1b04] ss:$16 sps:$4 sm:$0xff]   ;;  %v12565_v35 = vld [vmem:[%s13297_s7 + $0x1b0c] ss:$16 sps:$4 sm:$0xff]  }
 0x35b   : > { %8443 = vmatprep.subr.bf16.mxu0 %v12469_v36  ;;  %9260 = vmatprep.subr.bf16.mxu1 %v12472_v37  ;;  %v12560_v36 = vld [vmem:[%s13297_s7 + $0x1b00] ss:$16 sps:$4 sm:$0xff]   ;;  %v12563_v37 = vld [vmem:[%s13297_s7 + $0x1b08] ss:$16 sps:$4 sm:$0xff]  }
 0x35e   : > { %8444 = vmatpush1.bf16.msra.mxu0 %v12467_v38  ;;  %9261 = vmatpush1.bf16.msra.mxu1 %v12470_v39  ;;  %v12568_v38 = vld [vmem:[%s13297_s7 + $0x1b24] ss:$16 sps:$4 sm:$0xff]   ;;  %v12571_v39 = vld [vmem:[%s13297_s7 + $0x1b2c] ss:$16 sps:$4 sm:$0xff]  }
 0x35f   : > { %8445 = vmatprep.subr.bf16.mxu0 %v12475_v40  ;;  %9262 = vmatprep.subr.bf16.mxu1 %v12478_v41  ;;  %v12566_v40 = vld [vmem:[%s13297_s7 + $0x1b20] ss:$16 sps:$4 sm:$0xff]   ;;  %v12569_v41 = vld [vmem:[%s13297_s7 + $0x1b28] ss:$16 sps:$4 sm:$0xff]  }
 0x362   : > { %8446 = vmatpush1.bf16.msra.mxu0 %v12473_v42  ;;  %9263 = vmatpush1.bf16.msra.mxu1 %v12476_v43  ;;  %v12574_v42 = vld [vmem:[%s13297_s7 + $0x1b44] ss:$16 sps:$4 sm:$0xff]   ;;  %v12577_v43 = vld [vmem:[%s13297_s7 + $0x1b4c] ss:$16 sps:$4 sm:$0xff]  }
 0x363   : > { %8447 = vmatprep.subr.bf16.mxu0 %v12481_v44  ;;  %9264 = vmatprep.subr.bf16.mxu1 %v12484_v45  ;;  %v12572_v44 = vld [vmem:[%s13297_s7 + $0x1b40] ss:$16 sps:$4 sm:$0xff]   ;;  %v12575_v45 = vld [vmem:[%s13297_s7 + $0x1b48] ss:$16 sps:$4 sm:$0xff]  }
 0x366   : > { %8448 = vmatpush1.bf16.msra.mxu0 %v12479_v46  ;;  %9265 = vmatpush1.bf16.msra.mxu1 %v12482_v47  ;;  %v12580_v46 = vld [vmem:[%s13297_s7 + $0x1b64] ss:$16 sps:$4 sm:$0xff]   ;;  %v12583_v47 = vld [vmem:[%s13297_s7 + $0x1b6c] ss:$16 sps:$4 sm:$0xff]  }
 0x367   : > { %8449 = vmatprep.subr.bf16.mxu0 %v12487_v48  ;;  %9266 = vmatprep.subr.bf16.mxu1 %v12490_v49  ;;  %v12578_v48 = vld [vmem:[%s13297_s7 + $0x1b60] ss:$16 sps:$4 sm:$0xff]   ;;  %v12581_v49 = vld [vmem:[%s13297_s7 + $0x1b68] ss:$16 sps:$4 sm:$0xff]  }
 0x36a   : > { %8450 = vmatpush1.bf16.msra.mxu0 %v12485_v50  ;;  %9267 = vmatpush1.bf16.msra.mxu1 %v12488_v51  ;;  %v12586_v50 = vld [vmem:[%s13297_s7 + $0x1b84] ss:$16 sps:$4 sm:$0xff]   ;;  %v12589_v51 = vld [vmem:[%s13297_s7 + $0x1b8c] ss:$16 sps:$4 sm:$0xff]  }
 0x36b   : > { %8451 = vmatprep.subr.bf16.mxu0 %v12493_v52  ;;  %9268 = vmatprep.subr.bf16.mxu1 %v12496_v53  ;;  %v12584_v52 = vld [vmem:[%s13297_s7 + $0x1b80] ss:$16 sps:$4 sm:$0xff]   ;;  %v12587_v53 = vld [vmem:[%s13297_s7 + $0x1b88] ss:$16 sps:$4 sm:$0xff]  }
 0x36e   : > { %8452 = vmatpush1.bf16.msra.mxu0 %v12491_v54  ;;  %9269 = vmatpush1.bf16.msra.mxu1 %v12494_v55  ;;  %v12592_v54 = vld [vmem:[%s13297_s7 + $0x1ba4] ss:$16 sps:$4 sm:$0xff]   ;;  %v12595_v55 = vld [vmem:[%s13297_s7 + $0x1bac] ss:$16 sps:$4 sm:$0xff]  }
 0x36f   : > { %8453 = vmatprep.subr.bf16.mxu0 %v12499_v56  ;;  %9270 = vmatprep.subr.bf16.mxu1 %v12502_v57  ;;  %v12590_v56 = vld [vmem:[%s13297_s7 + $0x1ba0] ss:$16 sps:$4 sm:$0xff]   ;;  %v12593_v57 = vld [vmem:[%s13297_s7 + $0x1ba8] ss:$16 sps:$4 sm:$0xff]  }
 0x372   : > { %8454 = vmatpush1.bf16.msra.mxu0 %v12497_v58  ;;  %9271 = vmatpush1.bf16.msra.mxu1 %v12500_v59  ;;  %v12598_v58 = vld [vmem:[%s13297_s7 + $0x1bc4] ss:$16 sps:$4 sm:$0xff]   ;;  %v12601_v59 = vld [vmem:[%s13297_s7 + $0x1bcc] ss:$16 sps:$4 sm:$0xff]  }
 0x373   : > { %8455 = vmatprep.subr.bf16.mxu0 %v12505_v60  ;;  %9272 = vmatprep.subr.bf16.mxu1 %v12508_v61  ;;  %v12596_v60 = vld [vmem:[%s13297_s7 + $0x1bc0] ss:$16 sps:$4 sm:$0xff]   ;;  %v12599_v61 = vld [vmem:[%s13297_s7 + $0x1bc8] ss:$16 sps:$4 sm:$0xff]  }
 0x376   : > { %8456 = vmatpush1.bf16.msra.mxu0 %v12503_v62  ;;  %9273 = vmatpush1.bf16.msra.mxu1 %v12506_v63  ;;  %v12604_v62 = vld [vmem:[%s13297_s7 + $0x1be4] ss:$16 sps:$4 sm:$0xff]   ;;  %v12607_v63 = vld [vmem:[%s13297_s7 + $0x1bec] ss:$16 sps:$4 sm:$0xff]  }
 0x377   : > { %8468 = vmatprep.subr.bf16.mxu0 %v12514_v0  ;;  %9285 = vmatprep.subr.bf16.mxu1 %v12517_v1  ;;  %v12602_v0 = vld [vmem:[%s13297_s7 + $0x1be0] ss:$16 sps:$4 sm:$0xff]   ;;  %v12605_v1 = vld [vmem:[%s13297_s7 + $0x1be8] ss:$16 sps:$4 sm:$0xff]  }
 0x379   : > { %8458 = vmatmul.mubr.bf16.vlgmr.msra.gmra.mrb[0].mxu0 %v12509_v2  ;;  %9275 = vmatmul.mubr.bf16.vlgmr.msra.gmra.mrb[0].mxu1 %v12509_v2  ;;  %v12613_v2 = vld [vmem:[%s13297_s7 + $0x1c04] ss:$16 sps:$4 sm:$0xff]  }
 0x37a   : > { %8469 = vmatpush1.bf16.msra.mxu0 %v12512_v3  ;;  %9286 = vmatpush1.bf16.msra.mxu1 %v12515_v4  ;;  %v12616_v3 = vld [vmem:[%s13297_s7 + $0x1c0c] ss:$16 sps:$4 sm:$0xff]   ;;  %v12608_v4 = vld [vmem:[%s13299_s8 + $0x68] ss:$152 sps:$4 sm:$0xff]  }
 0x37b   : > { %8470 = vmatprep.subr.bf16.mxu0 %v12520_v5  ;;  %9287 = vmatprep.subr.bf16.mxu1 %v12523_v6  ;;  %v12611_v5 = vld [vmem:[%s13297_s7 + $0x1c00] ss:$16 sps:$4 sm:$0xff]   ;;  %v12614_v6 = vld [vmem:[%s13297_s7 + $0x1c08] ss:$16 sps:$4 sm:$0xff]  }
 0x37c   : > { %8500 = vmatprep.mubr.bf16.mxu0 %v12610_v7  ;;  %9317 = vmatprep.mubr.bf16.mxu1 %v12610_v7  ;;  %v12619_v7 = vld [vmem:[%s13297_s7 + $0x1c24] ss:$16 sps:$4 sm:$0xff]  }
 0x37e   : > { %8471 = vmatpush1.bf16.msra.mxu0 %v12518_v8  ;;  %9288 = vmatpush1.bf16.msra.mxu1 %v12521_v9  ;;  %v12622_v8 = vld [vmem:[%s13297_s7 + $0x1c2c] ss:$16 sps:$4 sm:$0xff]  }
 0x37f   : > { %8472 = vmatprep.subr.bf16.mxu0 %v12526_v10  ;;  %9289 = vmatprep.subr.bf16.mxu1 %v12529_v11  ;;  %v12709_v9 = vld [vmem:[%s13299_s8 + $0x74] ss:$152 sps:$4 sm:$0xff]   ;;  %v12617_v10 = vld [vmem:[%s13297_s7 + $0x1c20] ss:$16 sps:$4 sm:$0xff]   ;;  %v12620_v11 = vld [vmem:[%s13297_s7 + $0x1c28] ss:$16 sps:$4 sm:$0xff]  }
 0x382   : > { %8473 = vmatpush1.bf16.msra.mxu0 %v12524_v12  ;;  %9290 = vmatpush1.bf16.msra.mxu1 %v12527_v13  ;;  %v12625_v12 = vld [vmem:[%s13297_s7 + $0x1c44] ss:$16 sps:$4 sm:$0xff]   ;;  %v12628_v13 = vld [vmem:[%s13297_s7 + $0x1c4c] ss:$16 sps:$4 sm:$0xff]  }
 0x383   : > { %8474 = vmatprep.subr.bf16.mxu0 %v12532_v14  ;;  %9291 = vmatprep.subr.bf16.mxu1 %v12535_v15  ;;  %v12623_v14 = vld [vmem:[%s13297_s7 + $0x1c40] ss:$16 sps:$4 sm:$0xff]   ;;  %v12626_v15 = vld [vmem:[%s13297_s7 + $0x1c48] ss:$16 sps:$4 sm:$0xff]  }
 0x386   : > { %8475 = vmatpush1.bf16.msra.mxu0 %v12530_v16  ;;  %9292 = vmatpush1.bf16.msra.mxu1 %v12533_v17  ;;  %v12631_v16 = vld [vmem:[%s13297_s7 + $0x1c64] ss:$16 sps:$4 sm:$0xff]   ;;  %v12634_v17 = vld [vmem:[%s13297_s7 + $0x1c6c] ss:$16 sps:$4 sm:$0xff]  }
 0x387   : > { %8476 = vmatprep.subr.bf16.mxu0 %v12538_v18  ;;  %9293 = vmatprep.subr.bf16.mxu1 %v12541_v19  ;;  %v12629_v18 = vld [vmem:[%s13297_s7 + $0x1c60] ss:$16 sps:$4 sm:$0xff]   ;;  %v12632_v19 = vld [vmem:[%s13297_s7 + $0x1c68] ss:$16 sps:$4 sm:$0xff]  }
 0x38a   : > { %8477 = vmatpush1.bf16.msra.mxu0 %v12536_v20  ;;  %9294 = vmatpush1.bf16.msra.mxu1 %v12539_v21  ;;  %v12637_v20 = vld [vmem:[%s13297_s7 + $0x1c84] ss:$16 sps:$4 sm:$0xff]   ;;  %v12640_v21 = vld [vmem:[%s13297_s7 + $0x1c8c] ss:$16 sps:$4 sm:$0xff]  }
 0x38b   : > { %8478 = vmatprep.subr.bf16.mxu0 %v12544_v22  ;;  %9295 = vmatprep.subr.bf16.mxu1 %v12547_v23  ;;  %v12635_v22 = vld [vmem:[%s13297_s7 + $0x1c80] ss:$16 sps:$4 sm:$0xff]   ;;  %v12638_v23 = vld [vmem:[%s13297_s7 + $0x1c88] ss:$16 sps:$4 sm:$0xff]  }
 0x38e   : > { %8479 = vmatpush1.bf16.msra.mxu0 %v12542_v24  ;;  %9296 = vmatpush1.bf16.msra.mxu1 %v12545_v25  ;;  %v12643_v24 = vld [vmem:[%s13297_s7 + $0x1ca4] ss:$16 sps:$4 sm:$0xff]   ;;  %v12646_v25 = vld [vmem:[%s13297_s7 + $0x1cac] ss:$16 sps:$4 sm:$0xff]  }
 0x38f   : > { %8480 = vmatprep.subr.bf16.mxu0 %v12550_v26  ;;  %9297 = vmatprep.subr.bf16.mxu1 %v12553_v27  ;;  %v12641_v26 = vld [vmem:[%s13297_s7 + $0x1ca0] ss:$16 sps:$4 sm:$0xff]   ;;  %v12644_v27 = vld [vmem:[%s13297_s7 + $0x1ca8] ss:$16 sps:$4 sm:$0xff]  }
 0x392   : > { %8481 = vmatpush1.bf16.msra.mxu0 %v12548_v28  ;;  %9298 = vmatpush1.bf16.msra.mxu1 %v12551_v29  ;;  %v12649_v28 = vld [vmem:[%s13297_s7 + $0x1cc4] ss:$16 sps:$4 sm:$0xff]   ;;  %v12652_v29 = vld [vmem:[%s13297_s7 + $0x1ccc] ss:$16 sps:$4 sm:$0xff]  }
 0x393   : > { %8482 = vmatprep.subr.bf16.mxu0 %v12556_v30  ;;  %9299 = vmatprep.subr.bf16.mxu1 %v12559_v31  ;;  %v12647_v30 = vld [vmem:[%s13297_s7 + $0x1cc0] ss:$16 sps:$4 sm:$0xff]   ;;  %v12650_v31 = vld [vmem:[%s13297_s7 + $0x1cc8] ss:$16 sps:$4 sm:$0xff]  }
 0x396   : > { %8483 = vmatpush1.bf16.msra.mxu0 %v12554_v32  ;;  %9300 = vmatpush1.bf16.msra.mxu1 %v12557_v33  ;;  %v12655_v32 = vld [vmem:[%s13297_s7 + $0x1ce4] ss:$16 sps:$4 sm:$0xff]   ;;  %v12658_v33 = vld [vmem:[%s13297_s7 + $0x1cec] ss:$16 sps:$4 sm:$0xff]  }
 0x397   : > { %8484 = vmatprep.subr.bf16.mxu0 %v12562_v34  ;;  %9301 = vmatprep.subr.bf16.mxu1 %v12565_v35  ;;  %v12653_v34 = vld [vmem:[%s13297_s7 + $0x1ce0] ss:$16 sps:$4 sm:$0xff]   ;;  %v12656_v35 = vld [vmem:[%s13297_s7 + $0x1ce8] ss:$16 sps:$4 sm:$0xff]  }
 0x39a   : > { %8485 = vmatpush1.bf16.msra.mxu0 %v12560_v36  ;;  %9302 = vmatpush1.bf16.msra.mxu1 %v12563_v37  ;;  %v12661_v36 = vld [vmem:[%s13297_s7 + $0x1d04] ss:$16 sps:$4 sm:$0xff]   ;;  %v12664_v37 = vld [vmem:[%s13297_s7 + $0x1d0c] ss:$16 sps:$4 sm:$0xff]  }
 0x39b   : > { %8486 = vmatprep.subr.bf16.mxu0 %v12568_v38  ;;  %9303 = vmatprep.subr.bf16.mxu1 %v12571_v39  ;;  %v12659_v38 = vld [vmem:[%s13297_s7 + $0x1d00] ss:$16 sps:$4 sm:$0xff]   ;;  %v12662_v39 = vld [vmem:[%s13297_s7 + $0x1d08] ss:$16 sps:$4 sm:$0xff]  }
 0x39e   : > { %8487 = vmatpush1.bf16.msra.mxu0 %v12566_v40  ;;  %9304 = vmatpush1.bf16.msra.mxu1 %v12569_v41  ;;  %v12667_v40 = vld [vmem:[%s13297_s7 + $0x1d24] ss:$16 sps:$4 sm:$0xff]   ;;  %v12670_v41 = vld [vmem:[%s13297_s7 + $0x1d2c] ss:$16 sps:$4 sm:$0xff]  }
 0x39f   : > { %8488 = vmatprep.subr.bf16.mxu0 %v12574_v42  ;;  %9305 = vmatprep.subr.bf16.mxu1 %v12577_v43  ;;  %v12665_v42 = vld [vmem:[%s13297_s7 + $0x1d20] ss:$16 sps:$4 sm:$0xff]   ;;  %v12668_v43 = vld [vmem:[%s13297_s7 + $0x1d28] ss:$16 sps:$4 sm:$0xff]  }
 0x3a2   : > { %8489 = vmatpush1.bf16.msra.mxu0 %v12572_v44  ;;  %9306 = vmatpush1.bf16.msra.mxu1 %v12575_v45  ;;  %v12673_v44 = vld [vmem:[%s13297_s7 + $0x1d44] ss:$16 sps:$4 sm:$0xff]   ;;  %v12676_v45 = vld [vmem:[%s13297_s7 + $0x1d4c] ss:$16 sps:$4 sm:$0xff]  }
 0x3a3   : > { %8490 = vmatprep.subr.bf16.mxu0 %v12580_v46  ;;  %9307 = vmatprep.subr.bf16.mxu1 %v12583_v47  ;;  %v12671_v46 = vld [vmem:[%s13297_s7 + $0x1d40] ss:$16 sps:$4 sm:$0xff]   ;;  %v12674_v47 = vld [vmem:[%s13297_s7 + $0x1d48] ss:$16 sps:$4 sm:$0xff]  }
 0x3a6   : > { %8491 = vmatpush1.bf16.msra.mxu0 %v12578_v48  ;;  %9308 = vmatpush1.bf16.msra.mxu1 %v12581_v49  ;;  %v12679_v48 = vld [vmem:[%s13297_s7 + $0x1d64] ss:$16 sps:$4 sm:$0xff]   ;;  %v12682_v49 = vld [vmem:[%s13297_s7 + $0x1d6c] ss:$16 sps:$4 sm:$0xff]  }
 0x3a7   : > { %8492 = vmatprep.subr.bf16.mxu0 %v12586_v50  ;;  %9309 = vmatprep.subr.bf16.mxu1 %v12589_v51  ;;  %v12677_v50 = vld [vmem:[%s13297_s7 + $0x1d60] ss:$16 sps:$4 sm:$0xff]   ;;  %v12680_v51 = vld [vmem:[%s13297_s7 + $0x1d68] ss:$16 sps:$4 sm:$0xff]  }
 0x3aa   : > { %8493 = vmatpush1.bf16.msra.mxu0 %v12584_v52  ;;  %9310 = vmatpush1.bf16.msra.mxu1 %v12587_v53  ;;  %v12685_v52 = vld [vmem:[%s13297_s7 + $0x1d84] ss:$16 sps:$4 sm:$0xff]   ;;  %v12688_v53 = vld [vmem:[%s13297_s7 + $0x1d8c] ss:$16 sps:$4 sm:$0xff]  }
 0x3ab   : > { %8494 = vmatprep.subr.bf16.mxu0 %v12592_v54  ;;  %9311 = vmatprep.subr.bf16.mxu1 %v12595_v55  ;;  %v12683_v54 = vld [vmem:[%s13297_s7 + $0x1d80] ss:$16 sps:$4 sm:$0xff]   ;;  %v12686_v55 = vld [vmem:[%s13297_s7 + $0x1d88] ss:$16 sps:$4 sm:$0xff]  }
 0x3ae   : > { %8495 = vmatpush1.bf16.msra.mxu0 %v12590_v56  ;;  %9312 = vmatpush1.bf16.msra.mxu1 %v12593_v57  ;;  %v12691_v56 = vld [vmem:[%s13297_s7 + $0x1da4] ss:$16 sps:$4 sm:$0xff]   ;;  %v12694_v57 = vld [vmem:[%s13297_s7 + $0x1dac] ss:$16 sps:$4 sm:$0xff]  }
 0x3af   : > { %8496 = vmatprep.subr.bf16.mxu0 %v12598_v58  ;;  %9313 = vmatprep.subr.bf16.mxu1 %v12601_v59  ;;  %v12689_v58 = vld [vmem:[%s13297_s7 + $0x1da0] ss:$16 sps:$4 sm:$0xff]   ;;  %v12692_v59 = vld [vmem:[%s13297_s7 + $0x1da8] ss:$16 sps:$4 sm:$0xff]  }
 0x3b2   : > { %8497 = vmatpush1.bf16.msra.mxu0 %v12596_v60  ;;  %9314 = vmatpush1.bf16.msra.mxu1 %v12599_v61  ;;  %v12697_v60 = vld [vmem:[%s13297_s7 + $0x1dc4] ss:$16 sps:$4 sm:$0xff]   ;;  %v12700_v61 = vld [vmem:[%s13297_s7 + $0x1dcc] ss:$16 sps:$4 sm:$0xff]  }
 0x3b3   : > { %8498 = vmatprep.subr.bf16.mxu0 %v12604_v62  ;;  %9315 = vmatprep.subr.bf16.mxu1 %v12607_v63  ;;  %v12695_v62 = vld [vmem:[%s13297_s7 + $0x1dc0] ss:$16 sps:$4 sm:$0xff]   ;;  %v12698_v63 = vld [vmem:[%s13297_s7 + $0x1dc8] ss:$16 sps:$4 sm:$0xff]  }
 0x3b6   : > { %8499 = vmatpush1.bf16.msra.mxu0 %v12602_v0  ;;  %9316 = vmatpush1.bf16.msra.mxu1 %v12605_v1  ;;  %v12703_v0 = vld [vmem:[%s13297_s7 + $0x1de4] ss:$16 sps:$4 sm:$0xff]   ;;  %v12706_v1 = vld [vmem:[%s13297_s7 + $0x1dec] ss:$16 sps:$4 sm:$0xff]  }
 0x3b7   : > { %8511 = vmatprep.subr.bf16.mxu0 %v12613_v2  ;;  %9328 = vmatprep.subr.bf16.mxu1 %v12616_v3  ;;  %v12701_v2 = vld [vmem:[%s13297_s7 + $0x1de0] ss:$16 sps:$4 sm:$0xff]   ;;  %v12704_v3 = vld [vmem:[%s13297_s7 + $0x1de8] ss:$16 sps:$4 sm:$0xff]  }
 0x3b9   : > { %8501 = vmatmul.mubr.bf16.vlgmr.msra.gmra.mrb[0].mxu0 %v12608_v4  ;;  %9318 = vmatmul.mubr.bf16.vlgmr.msra.gmra.mrb[0].mxu1 %v12608_v4  ;;  %v12712_v4 = vld [vmem:[%s13297_s7 + $0x1e04] ss:$16 sps:$4 sm:$0xff]  }
 0x3ba   : > { %8512 = vmatpush1.bf16.msra.mxu0 %v12611_v5  ;;  %9329 = vmatpush1.bf16.msra.mxu1 %v12614_v6  ;;  %v12715_v5 = vld [vmem:[%s13297_s7 + $0x1e0c] ss:$16 sps:$4 sm:$0xff]   ;;  %v12707_v6 = vld [vmem:[%s13299_s8 + $0x70] ss:$152 sps:$4 sm:$0xff]  }
 0x3bb   : > { %8513 = vmatprep.subr.bf16.mxu0 %v12619_v7  ;;  %9330 = vmatprep.subr.bf16.mxu1 %v12622_v8  ;;  %v12710_v7 = vld [vmem:[%s13297_s7 + $0x1e00] ss:$16 sps:$4 sm:$0xff]   ;;  %v12713_v8 = vld [vmem:[%s13297_s7 + $0x1e08] ss:$16 sps:$4 sm:$0xff]  }
 0x3bc   : > { %8543 = vmatprep.mubr.bf16.mxu0 %v12709_v9  ;;  %9360 = vmatprep.mubr.bf16.mxu1 %v12709_v9  ;;  %v12718_v9 = vld [vmem:[%s13297_s7 + $0x1e24] ss:$16 sps:$4 sm:$0xff]  }
 0x3be   : > { %8514 = vmatpush1.bf16.msra.mxu0 %v12617_v10  ;;  %9331 = vmatpush1.bf16.msra.mxu1 %v12620_v11  ;;  %v12721_v10 = vld [vmem:[%s13297_s7 + $0x1e2c] ss:$16 sps:$4 sm:$0xff]  }
 0x3bf   : > { %8515 = vmatprep.subr.bf16.mxu0 %v12625_v12  ;;  %9332 = vmatprep.subr.bf16.mxu1 %v12628_v13  ;;  %v12808_v11 = vld [vmem:[%s13299_s8 + $0x7c] ss:$152 sps:$4 sm:$0xff]   ;;  %v12716_v12 = vld [vmem:[%s13297_s7 + $0x1e20] ss:$16 sps:$4 sm:$0xff]   ;;  %v12719_v13 = vld [vmem:[%s13297_s7 + $0x1e28] ss:$16 sps:$4 sm:$0xff]  }
 0x3c2   : > { %8516 = vmatpush1.bf16.msra.mxu0 %v12623_v14  ;;  %9333 = vmatpush1.bf16.msra.mxu1 %v12626_v15  ;;  %v12724_v14 = vld [vmem:[%s13297_s7 + $0x1e44] ss:$16 sps:$4 sm:$0xff]   ;;  %v12727_v15 = vld [vmem:[%s13297_s7 + $0x1e4c] ss:$16 sps:$4 sm:$0xff]  }
 0x3c3   : > { %8517 = vmatprep.subr.bf16.mxu0 %v12631_v16  ;;  %9334 = vmatprep.subr.bf16.mxu1 %v12634_v17  ;;  %v12722_v16 = vld [vmem:[%s13297_s7 + $0x1e40] ss:$16 sps:$4 sm:$0xff]   ;;  %v12725_v17 = vld [vmem:[%s13297_s7 + $0x1e48] ss:$16 sps:$4 sm:$0xff]  }
 0x3c6   : > { %8518 = vmatpush1.bf16.msra.mxu0 %v12629_v18  ;;  %9335 = vmatpush1.bf16.msra.mxu1 %v12632_v19  ;;  %v12730_v18 = vld [vmem:[%s13297_s7 + $0x1e64] ss:$16 sps:$4 sm:$0xff]   ;;  %v12733_v19 = vld [vmem:[%s13297_s7 + $0x1e6c] ss:$16 sps:$4 sm:$0xff]  }
 0x3c7   : > { %8519 = vmatprep.subr.bf16.mxu0 %v12637_v20  ;;  %9336 = vmatprep.subr.bf16.mxu1 %v12640_v21  ;;  %v12728_v20 = vld [vmem:[%s13297_s7 + $0x1e60] ss:$16 sps:$4 sm:$0xff]   ;;  %v12731_v21 = vld [vmem:[%s13297_s7 + $0x1e68] ss:$16 sps:$4 sm:$0xff]  }
 0x3ca   : > { %8520 = vmatpush1.bf16.msra.mxu0 %v12635_v22  ;;  %9337 = vmatpush1.bf16.msra.mxu1 %v12638_v23  ;;  %v12736_v22 = vld [vmem:[%s13297_s7 + $0x1e84] ss:$16 sps:$4 sm:$0xff]   ;;  %v12739_v23 = vld [vmem:[%s13297_s7 + $0x1e8c] ss:$16 sps:$4 sm:$0xff]  }
 0x3cb   : > { %8521 = vmatprep.subr.bf16.mxu0 %v12643_v24  ;;  %9338 = vmatprep.subr.bf16.mxu1 %v12646_v25  ;;  %v12734_v24 = vld [vmem:[%s13297_s7 + $0x1e80] ss:$16 sps:$4 sm:$0xff]   ;;  %v12737_v25 = vld [vmem:[%s13297_s7 + $0x1e88] ss:$16 sps:$4 sm:$0xff]  }
 0x3ce   : > { %8522 = vmatpush1.bf16.msra.mxu0 %v12641_v26  ;;  %9339 = vmatpush1.bf16.msra.mxu1 %v12644_v27  ;;  %v12742_v26 = vld [vmem:[%s13297_s7 + $0x1ea4] ss:$16 sps:$4 sm:$0xff]   ;;  %v12745_v27 = vld [vmem:[%s13297_s7 + $0x1eac] ss:$16 sps:$4 sm:$0xff]  }
 0x3cf   : > { %8523 = vmatprep.subr.bf16.mxu0 %v12649_v28  ;;  %9340 = vmatprep.subr.bf16.mxu1 %v12652_v29  ;;  %v12740_v28 = vld [vmem:[%s13297_s7 + $0x1ea0] ss:$16 sps:$4 sm:$0xff]   ;;  %v12743_v29 = vld [vmem:[%s13297_s7 + $0x1ea8] ss:$16 sps:$4 sm:$0xff]  }
 0x3d2   : > { %8524 = vmatpush1.bf16.msra.mxu0 %v12647_v30  ;;  %9341 = vmatpush1.bf16.msra.mxu1 %v12650_v31  ;;  %v12748_v30 = vld [vmem:[%s13297_s7 + $0x1ec4] ss:$16 sps:$4 sm:$0xff]   ;;  %v12751_v31 = vld [vmem:[%s13297_s7 + $0x1ecc] ss:$16 sps:$4 sm:$0xff]  }
 0x3d3   : > { %8525 = vmatprep.subr.bf16.mxu0 %v12655_v32  ;;  %9342 = vmatprep.subr.bf16.mxu1 %v12658_v33  ;;  %v12746_v32 = vld [vmem:[%s13297_s7 + $0x1ec0] ss:$16 sps:$4 sm:$0xff]   ;;  %v12749_v33 = vld [vmem:[%s13297_s7 + $0x1ec8] ss:$16 sps:$4 sm:$0xff]  }
 0x3d6   : > { %8526 = vmatpush1.bf16.msra.mxu0 %v12653_v34  ;;  %9343 = vmatpush1.bf16.msra.mxu1 %v12656_v35  ;;  %v12754_v34 = vld [vmem:[%s13297_s7 + $0x1ee4] ss:$16 sps:$4 sm:$0xff]   ;;  %v12757_v35 = vld [vmem:[%s13297_s7 + $0x1eec] ss:$16 sps:$4 sm:$0xff]  }
 0x3d7   : > { %8527 = vmatprep.subr.bf16.mxu0 %v12661_v36  ;;  %9344 = vmatprep.subr.bf16.mxu1 %v12664_v37  ;;  %v12752_v36 = vld [vmem:[%s13297_s7 + $0x1ee0] ss:$16 sps:$4 sm:$0xff]   ;;  %v12755_v37 = vld [vmem:[%s13297_s7 + $0x1ee8] ss:$16 sps:$4 sm:$0xff]  }
 0x3da   : > { %8528 = vmatpush1.bf16.msra.mxu0 %v12659_v38  ;;  %9345 = vmatpush1.bf16.msra.mxu1 %v12662_v39  ;;  %v12760_v38 = vld [vmem:[%s13297_s7 + $0x1f04] ss:$16 sps:$4 sm:$0xff]   ;;  %v12763_v39 = vld [vmem:[%s13297_s7 + $0x1f0c] ss:$16 sps:$4 sm:$0xff]  }
 0x3db   : > { %8529 = vmatprep.subr.bf16.mxu0 %v12667_v40  ;;  %9346 = vmatprep.subr.bf16.mxu1 %v12670_v41  ;;  %v12758_v40 = vld [vmem:[%s13297_s7 + $0x1f00] ss:$16 sps:$4 sm:$0xff]   ;;  %v12761_v41 = vld [vmem:[%s13297_s7 + $0x1f08] ss:$16 sps:$4 sm:$0xff]  }
 0x3de   : > { %8530 = vmatpush1.bf16.msra.mxu0 %v12665_v42  ;;  %9347 = vmatpush1.bf16.msra.mxu1 %v12668_v43  ;;  %v12766_v42 = vld [vmem:[%s13297_s7 + $0x1f24] ss:$16 sps:$4 sm:$0xff]   ;;  %v12769_v43 = vld [vmem:[%s13297_s7 + $0x1f2c] ss:$16 sps:$4 sm:$0xff]  }
 0x3df   : > { %8531 = vmatprep.subr.bf16.mxu0 %v12673_v44  ;;  %9348 = vmatprep.subr.bf16.mxu1 %v12676_v45  ;;  %v12764_v44 = vld [vmem:[%s13297_s7 + $0x1f20] ss:$16 sps:$4 sm:$0xff]   ;;  %v12767_v45 = vld [vmem:[%s13297_s7 + $0x1f28] ss:$16 sps:$4 sm:$0xff]  }
 0x3e2   : > { %8532 = vmatpush1.bf16.msra.mxu0 %v12671_v46  ;;  %9349 = vmatpush1.bf16.msra.mxu1 %v12674_v47  ;;  %v12772_v46 = vld [vmem:[%s13297_s7 + $0x1f44] ss:$16 sps:$4 sm:$0xff]   ;;  %v12775_v47 = vld [vmem:[%s13297_s7 + $0x1f4c] ss:$16 sps:$4 sm:$0xff]  }
 0x3e3   : > { %8533 = vmatprep.subr.bf16.mxu0 %v12679_v48  ;;  %9350 = vmatprep.subr.bf16.mxu1 %v12682_v49  ;;  %v12770_v48 = vld [vmem:[%s13297_s7 + $0x1f40] ss:$16 sps:$4 sm:$0xff]   ;;  %v12773_v49 = vld [vmem:[%s13297_s7 + $0x1f48] ss:$16 sps:$4 sm:$0xff]  }
 0x3e6   : > { %8534 = vmatpush1.bf16.msra.mxu0 %v12677_v50  ;;  %9351 = vmatpush1.bf16.msra.mxu1 %v12680_v51  ;;  %v12778_v50 = vld [vmem:[%s13297_s7 + $0x1f64] ss:$16 sps:$4 sm:$0xff]   ;;  %v12781_v51 = vld [vmem:[%s13297_s7 + $0x1f6c] ss:$16 sps:$4 sm:$0xff]  }
 0x3e7   : > { %8535 = vmatprep.subr.bf16.mxu0 %v12685_v52  ;;  %9352 = vmatprep.subr.bf16.mxu1 %v12688_v53  ;;  %v12776_v52 = vld [vmem:[%s13297_s7 + $0x1f60] ss:$16 sps:$4 sm:$0xff]   ;;  %v12779_v53 = vld [vmem:[%s13297_s7 + $0x1f68] ss:$16 sps:$4 sm:$0xff]  }
 0x3ea   : > { %8536 = vmatpush1.bf16.msra.mxu0 %v12683_v54  ;;  %9353 = vmatpush1.bf16.msra.mxu1 %v12686_v55  ;;  %v12784_v54 = vld [vmem:[%s13297_s7 + $0x1f84] ss:$16 sps:$4 sm:$0xff]   ;;  %v12787_v55 = vld [vmem:[%s13297_s7 + $0x1f8c] ss:$16 sps:$4 sm:$0xff]  }
 0x3eb   : > { %8537 = vmatprep.subr.bf16.mxu0 %v12691_v56  ;;  %9354 = vmatprep.subr.bf16.mxu1 %v12694_v57  ;;  %v12782_v56 = vld [vmem:[%s13297_s7 + $0x1f80] ss:$16 sps:$4 sm:$0xff]   ;;  %v12785_v57 = vld [vmem:[%s13297_s7 + $0x1f88] ss:$16 sps:$4 sm:$0xff]  }
 0x3ee   : > { %8538 = vmatpush1.bf16.msra.mxu0 %v12689_v58  ;;  %9355 = vmatpush1.bf16.msra.mxu1 %v12692_v59  ;;  %v12790_v58 = vld [vmem:[%s13297_s7 + $0x1fa4] ss:$16 sps:$4 sm:$0xff]   ;;  %v12793_v59 = vld [vmem:[%s13297_s7 + $0x1fac] ss:$16 sps:$4 sm:$0xff]  }
 0x3ef   : > { %8539 = vmatprep.subr.bf16.mxu0 %v12697_v60  ;;  %9356 = vmatprep.subr.bf16.mxu1 %v12700_v61  ;;  %v12788_v60 = vld [vmem:[%s13297_s7 + $0x1fa0] ss:$16 sps:$4 sm:$0xff]   ;;  %v12791_v61 = vld [vmem:[%s13297_s7 + $0x1fa8] ss:$16 sps:$4 sm:$0xff]  }
 0x3f2   : > { %8540 = vmatpush1.bf16.msra.mxu0 %v12695_v62  ;;  %9357 = vmatpush1.bf16.msra.mxu1 %v12698_v63  ;;  %v12796_v62 = vld [vmem:[%s13297_s7 + $0x1fc4] ss:$16 sps:$4 sm:$0xff]   ;;  %v12799_v63 = vld [vmem:[%s13297_s7 + $0x1fcc] ss:$16 sps:$4 sm:$0xff]  }
 0x3f3   : > { %8541 = vmatprep.subr.bf16.mxu0 %v12703_v0  ;;  %9358 = vmatprep.subr.bf16.mxu1 %v12706_v1  ;;  %v12794_v0 = vld [vmem:[%s13297_s7 + $0x1fc0] ss:$16 sps:$4 sm:$0xff]   ;;  %v12797_v1 = vld [vmem:[%s13297_s7 + $0x1fc8] ss:$16 sps:$4 sm:$0xff]  }
 0x3f6   : > { %8542 = vmatpush1.bf16.msra.mxu0 %v12701_v2  ;;  %9359 = vmatpush1.bf16.msra.mxu1 %v12704_v3  ;;  %v12802_v2 = vld [vmem:[%s13297_s7 + $0x1fe4] ss:$16 sps:$4 sm:$0xff]   ;;  %v12805_v3 = vld [vmem:[%s13297_s7 + $0x1fec] ss:$16 sps:$4 sm:$0xff]  }
 0x3f7   : > { %8554 = vmatprep.subr.bf16.mxu0 %v12712_v4  ;;  %9371 = vmatprep.subr.bf16.mxu1 %v12715_v5  ;;  %v12800_v4 = vld [vmem:[%s13297_s7 + $0x1fe0] ss:$16 sps:$4 sm:$0xff]   ;;  %v12803_v5 = vld [vmem:[%s13297_s7 + $0x1fe8] ss:$16 sps:$4 sm:$0xff]  }
 0x3f9   : > { %8544 = vmatmul.mubr.bf16.vlgmr.msra.gmra.mrb[0].mxu0 %v12707_v6  ;;  %9361 = vmatmul.mubr.bf16.vlgmr.msra.gmra.mrb[0].mxu1 %v12707_v6  ;;  %v12811_v6 = vld [vmem:[%s13297_s7 + $0x2004] ss:$16 sps:$4 sm:$0xff]  }
 0x3fa   : > { %8555 = vmatpush1.bf16.msra.mxu0 %v12710_v7  ;;  %9372 = vmatpush1.bf16.msra.mxu1 %v12713_v8  ;;  %v12814_v7 = vld [vmem:[%s13297_s7 + $0x200c] ss:$16 sps:$4 sm:$0xff]   ;;  %v12806_v8 = vld [vmem:[%s13299_s8 + $0x78] ss:$152 sps:$4 sm:$0xff]  }
 0x3fb   : > { %8556 = vmatprep.subr.bf16.mxu0 %v12718_v9  ;;  %9373 = vmatprep.subr.bf16.mxu1 %v12721_v10  ;;  %v12809_v9 = vld [vmem:[%s13297_s7 + $0x2000] ss:$16 sps:$4 sm:$0xff]   ;;  %v12812_v10 = vld [vmem:[%s13297_s7 + $0x2008] ss:$16 sps:$4 sm:$0xff]  }
 0x3fc   : > { %8586 = vmatprep.mubr.bf16.mxu0 %v12808_v11  ;;  %9403 = vmatprep.mubr.bf16.mxu1 %v12808_v11  ;;  %v12817_v11 = vld [vmem:[%s13297_s7 + $0x2024] ss:$16 sps:$4 sm:$0xff]  }
 0x3fe   : > { %8557 = vmatpush1.bf16.msra.mxu0 %v12716_v12  ;;  %9374 = vmatpush1.bf16.msra.mxu1 %v12719_v13  ;;  %v12820_v12 = vld [vmem:[%s13297_s7 + $0x202c] ss:$16 sps:$4 sm:$0xff]  }
 0x3ff   : > { %8558 = vmatprep.subr.bf16.mxu0 %v12724_v14  ;;  %9375 = vmatprep.subr.bf16.mxu1 %v12727_v15  ;;  %v12907_v13 = vld [vmem:[%s13299_s8 + $0x84] ss:$152 sps:$4 sm:$0xff]   ;;  %v12815_v14 = vld [vmem:[%s13297_s7 + $0x2020] ss:$16 sps:$4 sm:$0xff]   ;;  %v12818_v15 = vld [vmem:[%s13297_s7 + $0x2028] ss:$16 sps:$4 sm:$0xff]  }
 0x402   : > { %8559 = vmatpush1.bf16.msra.mxu0 %v12722_v16  ;;  %9376 = vmatpush1.bf16.msra.mxu1 %v12725_v17  ;;  %v12823_v16 = vld [vmem:[%s13297_s7 + $0x2044] ss:$16 sps:$4 sm:$0xff]   ;;  %v12826_v17 = vld [vmem:[%s13297_s7 + $0x204c] ss:$16 sps:$4 sm:$0xff]  }
 0x403   : > { %8560 = vmatprep.subr.bf16.mxu0 %v12730_v18  ;;  %9377 = vmatprep.subr.bf16.mxu1 %v12733_v19  ;;  %v12821_v18 = vld [vmem:[%s13297_s7 + $0x2040] ss:$16 sps:$4 sm:$0xff]   ;;  %v12824_v19 = vld [vmem:[%s13297_s7 + $0x2048] ss:$16 sps:$4 sm:$0xff]  }
 0x406   : > { %8561 = vmatpush1.bf16.msra.mxu0 %v12728_v20  ;;  %9378 = vmatpush1.bf16.msra.mxu1 %v12731_v21  ;;  %v12829_v20 = vld [vmem:[%s13297_s7 + $0x2064] ss:$16 sps:$4 sm:$0xff]   ;;  %v12832_v21 = vld [vmem:[%s13297_s7 + $0x206c] ss:$16 sps:$4 sm:$0xff]  }
 0x407   : > { %8562 = vmatprep.subr.bf16.mxu0 %v12736_v22  ;;  %9379 = vmatprep.subr.bf16.mxu1 %v12739_v23  ;;  %v12827_v22 = vld [vmem:[%s13297_s7 + $0x2060] ss:$16 sps:$4 sm:$0xff]   ;;  %v12830_v23 = vld [vmem:[%s13297_s7 + $0x2068] ss:$16 sps:$4 sm:$0xff]  }
 0x40a   : > { %8563 = vmatpush1.bf16.msra.mxu0 %v12734_v24  ;;  %9380 = vmatpush1.bf16.msra.mxu1 %v12737_v25  ;;  %v12835_v24 = vld [vmem:[%s13297_s7 + $0x2084] ss:$16 sps:$4 sm:$0xff]   ;;  %v12838_v25 = vld [vmem:[%s13297_s7 + $0x208c] ss:$16 sps:$4 sm:$0xff]  }
 0x40b   : > { %8564 = vmatprep.subr.bf16.mxu0 %v12742_v26  ;;  %9381 = vmatprep.subr.bf16.mxu1 %v12745_v27  ;;  %v12833_v26 = vld [vmem:[%s13297_s7 + $0x2080] ss:$16 sps:$4 sm:$0xff]   ;;  %v12836_v27 = vld [vmem:[%s13297_s7 + $0x2088] ss:$16 sps:$4 sm:$0xff]  }
 0x40e   : > { %8565 = vmatpush1.bf16.msra.mxu0 %v12740_v28  ;;  %9382 = vmatpush1.bf16.msra.mxu1 %v12743_v29  ;;  %v12841_v28 = vld [vmem:[%s13297_s7 + $0x20a4] ss:$16 sps:$4 sm:$0xff]   ;;  %v12844_v29 = vld [vmem:[%s13297_s7 + $0x20ac] ss:$16 sps:$4 sm:$0xff]  }
 0x40f   : > { %8566 = vmatprep.subr.bf16.mxu0 %v12748_v30  ;;  %9383 = vmatprep.subr.bf16.mxu1 %v12751_v31  ;;  %v12839_v30 = vld [vmem:[%s13297_s7 + $0x20a0] ss:$16 sps:$4 sm:$0xff]   ;;  %v12842_v31 = vld [vmem:[%s13297_s7 + $0x20a8] ss:$16 sps:$4 sm:$0xff]  }
 0x412   : > { %8567 = vmatpush1.bf16.msra.mxu0 %v12746_v32  ;;  %9384 = vmatpush1.bf16.msra.mxu1 %v12749_v33  ;;  %v12847_v32 = vld [vmem:[%s13297_s7 + $0x20c4] ss:$16 sps:$4 sm:$0xff]   ;;  %v12850_v33 = vld [vmem:[%s13297_s7 + $0x20cc] ss:$16 sps:$4 sm:$0xff]  }
 0x413   : > { %8568 = vmatprep.subr.bf16.mxu0 %v12754_v34  ;;  %9385 = vmatprep.subr.bf16.mxu1 %v12757_v35  ;;  %v12845_v34 = vld [vmem:[%s13297_s7 + $0x20c0] ss:$16 sps:$4 sm:$0xff]   ;;  %v12848_v35 = vld [vmem:[%s13297_s7 + $0x20c8] ss:$16 sps:$4 sm:$0xff]  }
 0x416   : > { %8569 = vmatpush1.bf16.msra.mxu0 %v12752_v36  ;;  %9386 = vmatpush1.bf16.msra.mxu1 %v12755_v37  ;;  %v12853_v36 = vld [vmem:[%s13297_s7 + $0x20e4] ss:$16 sps:$4 sm:$0xff]   ;;  %v12856_v37 = vld [vmem:[%s13297_s7 + $0x20ec] ss:$16 sps:$4 sm:$0xff]  }
 0x417   : > { %8570 = vmatprep.subr.bf16.mxu0 %v12760_v38  ;;  %9387 = vmatprep.subr.bf16.mxu1 %v12763_v39  ;;  %v12851_v38 = vld [vmem:[%s13297_s7 + $0x20e0] ss:$16 sps:$4 sm:$0xff]   ;;  %v12854_v39 = vld [vmem:[%s13297_s7 + $0x20e8] ss:$16 sps:$4 sm:$0xff]  }
 0x41a   : > { %8571 = vmatpush1.bf16.msra.mxu0 %v12758_v40  ;;  %9388 = vmatpush1.bf16.msra.mxu1 %v12761_v41  ;;  %v12859_v40 = vld [vmem:[%s13297_s7 + $0x2104] ss:$16 sps:$4 sm:$0xff]   ;;  %v12862_v41 = vld [vmem:[%s13297_s7 + $0x210c] ss:$16 sps:$4 sm:$0xff]  }
 0x41b   : > { %8572 = vmatprep.subr.bf16.mxu0 %v12766_v42  ;;  %9389 = vmatprep.subr.bf16.mxu1 %v12769_v43  ;;  %v12857_v42 = vld [vmem:[%s13297_s7 + $0x2100] ss:$16 sps:$4 sm:$0xff]   ;;  %v12860_v43 = vld [vmem:[%s13297_s7 + $0x2108] ss:$16 sps:$4 sm:$0xff]  }
 0x41e   : > { %8573 = vmatpush1.bf16.msra.mxu0 %v12764_v44  ;;  %9390 = vmatpush1.bf16.msra.mxu1 %v12767_v45  ;;  %v12865_v44 = vld [vmem:[%s13297_s7 + $0x2124] ss:$16 sps:$4 sm:$0xff]   ;;  %v12868_v45 = vld [vmem:[%s13297_s7 + $0x212c] ss:$16 sps:$4 sm:$0xff]  }
 0x41f   : > { %8574 = vmatprep.subr.bf16.mxu0 %v12772_v46  ;;  %9391 = vmatprep.subr.bf16.mxu1 %v12775_v47  ;;  %v12863_v46 = vld [vmem:[%s13297_s7 + $0x2120] ss:$16 sps:$4 sm:$0xff]   ;;  %v12866_v47 = vld [vmem:[%s13297_s7 + $0x2128] ss:$16 sps:$4 sm:$0xff]  }
 0x422   : > { %8575 = vmatpush1.bf16.msra.mxu0 %v12770_v48  ;;  %9392 = vmatpush1.bf16.msra.mxu1 %v12773_v49  ;;  %v12871_v48 = vld [vmem:[%s13297_s7 + $0x2144] ss:$16 sps:$4 sm:$0xff]   ;;  %v12874_v49 = vld [vmem:[%s13297_s7 + $0x214c] ss:$16 sps:$4 sm:$0xff]  }
 0x423   : > { %8576 = vmatprep.subr.bf16.mxu0 %v12778_v50  ;;  %9393 = vmatprep.subr.bf16.mxu1 %v12781_v51  ;;  %v12869_v50 = vld [vmem:[%s13297_s7 + $0x2140] ss:$16 sps:$4 sm:$0xff]   ;;  %v12872_v51 = vld [vmem:[%s13297_s7 + $0x2148] ss:$16 sps:$4 sm:$0xff]  }
 0x426   : > { %8577 = vmatpush1.bf16.msra.mxu0 %v12776_v52  ;;  %9394 = vmatpush1.bf16.msra.mxu1 %v12779_v53  ;;  %v12877_v52 = vld [vmem:[%s13297_s7 + $0x2164] ss:$16 sps:$4 sm:$0xff]   ;;  %v12880_v53 = vld [vmem:[%s13297_s7 + $0x216c] ss:$16 sps:$4 sm:$0xff]  }
 0x427   : > { %8578 = vmatprep.subr.bf16.mxu0 %v12784_v54  ;;  %9395 = vmatprep.subr.bf16.mxu1 %v12787_v55  ;;  %v12875_v54 = vld [vmem:[%s13297_s7 + $0x2160] ss:$16 sps:$4 sm:$0xff]   ;;  %v12878_v55 = vld [vmem:[%s13297_s7 + $0x2168] ss:$16 sps:$4 sm:$0xff]  }
 0x42a   : > { %8579 = vmatpush1.bf16.msra.mxu0 %v12782_v56  ;;  %9396 = vmatpush1.bf16.msra.mxu1 %v12785_v57  ;;  %v12883_v56 = vld [vmem:[%s13297_s7 + $0x2184] ss:$16 sps:$4 sm:$0xff]   ;;  %v12886_v57 = vld [vmem:[%s13297_s7 + $0x218c] ss:$16 sps:$4 sm:$0xff]  }
 0x42b   : > { %8580 = vmatprep.subr.bf16.mxu0 %v12790_v58  ;;  %9397 = vmatprep.subr.bf16.mxu1 %v12793_v59  ;;  %v12881_v58 = vld [vmem:[%s13297_s7 + $0x2180] ss:$16 sps:$4 sm:$0xff]   ;;  %v12884_v59 = vld [vmem:[%s13297_s7 + $0x2188] ss:$16 sps:$4 sm:$0xff]  }
 0x42e   : > { %8581 = vmatpush1.bf16.msra.mxu0 %v12788_v60  ;;  %9398 = vmatpush1.bf16.msra.mxu1 %v12791_v61  ;;  %v12889_v60 = vld [vmem:[%s13297_s7 + $0x21a4] ss:$16 sps:$4 sm:$0xff]   ;;  %v12892_v61 = vld [vmem:[%s13297_s7 + $0x21ac] ss:$16 sps:$4 sm:$0xff]  }
 0x42f   : > { %8582 = vmatprep.subr.bf16.mxu0 %v12796_v62  ;;  %9399 = vmatprep.subr.bf16.mxu1 %v12799_v63  ;;  %v12887_v62 = vld [vmem:[%s13297_s7 + $0x21a0] ss:$16 sps:$4 sm:$0xff]   ;;  %v12890_v63 = vld [vmem:[%s13297_s7 + $0x21a8] ss:$16 sps:$4 sm:$0xff]  }
 0x432   : > { %8583 = vmatpush1.bf16.msra.mxu0 %v12794_v0  ;;  %9400 = vmatpush1.bf16.msra.mxu1 %v12797_v1  ;;  %v12895_v0 = vld [vmem:[%s13297_s7 + $0x21c4] ss:$16 sps:$4 sm:$0xff]   ;;  %v12898_v1 = vld [vmem:[%s13297_s7 + $0x21cc] ss:$16 sps:$4 sm:$0xff]  }
 0x433   : > { %8584 = vmatprep.subr.bf16.mxu0 %v12802_v2  ;;  %9401 = vmatprep.subr.bf16.mxu1 %v12805_v3  ;;  %v12893_v2 = vld [vmem:[%s13297_s7 + $0x21c0] ss:$16 sps:$4 sm:$0xff]   ;;  %v12896_v3 = vld [vmem:[%s13297_s7 + $0x21c8] ss:$16 sps:$4 sm:$0xff]  }
 0x436   : > { %8585 = vmatpush1.bf16.msra.mxu0 %v12800_v4  ;;  %9402 = vmatpush1.bf16.msra.mxu1 %v12803_v5  ;;  %v12901_v4 = vld [vmem:[%s13297_s7 + $0x21e4] ss:$16 sps:$4 sm:$0xff]   ;;  %v12904_v5 = vld [vmem:[%s13297_s7 + $0x21ec] ss:$16 sps:$4 sm:$0xff]  }
 0x437   : > { %8597 = vmatprep.subr.bf16.mxu0 %v12811_v6  ;;  %9414 = vmatprep.subr.bf16.mxu1 %v12814_v7  ;;  %v12899_v6 = vld [vmem:[%s13297_s7 + $0x21e0] ss:$16 sps:$4 sm:$0xff]   ;;  %v12902_v7 = vld [vmem:[%s13297_s7 + $0x21e8] ss:$16 sps:$4 sm:$0xff]  }
 0x439   : > { %8587 = vmatmul.mubr.bf16.vlgmr.msra.gmra.mrb[0].mxu0 %v12806_v8  ;;  %9404 = vmatmul.mubr.bf16.vlgmr.msra.gmra.mrb[0].mxu1 %v12806_v8  ;;  %v12910_v8 = vld [vmem:[%s13297_s7 + $0x2204] ss:$16 sps:$4 sm:$0xff]  }
 0x43a   : > { %8598 = vmatpush1.bf16.msra.mxu0 %v12809_v9  ;;  %9415 = vmatpush1.bf16.msra.mxu1 %v12812_v10  ;;  %v12913_v9 = vld [vmem:[%s13297_s7 + $0x220c] ss:$16 sps:$4 sm:$0xff]   ;;  %v12905_v10 = vld [vmem:[%s13299_s8 + $0x80] ss:$152 sps:$4 sm:$0xff]  }
 0x43b   : > { %8599 = vmatprep.subr.bf16.mxu0 %v12817_v11  ;;  %9416 = vmatprep.subr.bf16.mxu1 %v12820_v12  ;;  %v12908_v11 = vld [vmem:[%s13297_s7 + $0x2200] ss:$16 sps:$4 sm:$0xff]   ;;  %v12911_v12 = vld [vmem:[%s13297_s7 + $0x2208] ss:$16 sps:$4 sm:$0xff]  }
 0x43c   : > { %8629 = vmatprep.mubr.bf16.mxu0 %v12907_v13  ;;  %9446 = vmatprep.mubr.bf16.mxu1 %v12907_v13  ;;  %v12916_v13 = vld [vmem:[%s13297_s7 + $0x2224] ss:$16 sps:$4 sm:$0xff]  }
 0x43e   : > { %8600 = vmatpush1.bf16.msra.mxu0 %v12815_v14  ;;  %9417 = vmatpush1.bf16.msra.mxu1 %v12818_v15  ;;  %v12919_v14 = vld [vmem:[%s13297_s7 + $0x222c] ss:$16 sps:$4 sm:$0xff]  }
 0x43f   : > { %8601 = vmatprep.subr.bf16.mxu0 %v12823_v16  ;;  %9418 = vmatprep.subr.bf16.mxu1 %v12826_v17  ;;  %v13006_v15 = vld [vmem:[%s13299_s8 + $0x8c] ss:$152 sps:$4 sm:$0xff]   ;;  %v12914_v16 = vld [vmem:[%s13297_s7 + $0x2220] ss:$16 sps:$4 sm:$0xff]   ;;  %v12917_v17 = vld [vmem:[%s13297_s7 + $0x2228] ss:$16 sps:$4 sm:$0xff]  }
 0x442   : > { %8602 = vmatpush1.bf16.msra.mxu0 %v12821_v18  ;;  %9419 = vmatpush1.bf16.msra.mxu1 %v12824_v19  ;;  %v12922_v18 = vld [vmem:[%s13297_s7 + $0x2244] ss:$16 sps:$4 sm:$0xff]   ;;  %v12925_v19 = vld [vmem:[%s13297_s7 + $0x224c] ss:$16 sps:$4 sm:$0xff]  }
 0x443   : > { %8603 = vmatprep.subr.bf16.mxu0 %v12829_v20  ;;  %9420 = vmatprep.subr.bf16.mxu1 %v12832_v21  ;;  %v12920_v20 = vld [vmem:[%s13297_s7 + $0x2240] ss:$16 sps:$4 sm:$0xff]   ;;  %v12923_v21 = vld [vmem:[%s13297_s7 + $0x2248] ss:$16 sps:$4 sm:$0xff]  }
 0x446   : > { %8604 = vmatpush1.bf16.msra.mxu0 %v12827_v22  ;;  %9421 = vmatpush1.bf16.msra.mxu1 %v12830_v23  ;;  %v12928_v22 = vld [vmem:[%s13297_s7 + $0x2264] ss:$16 sps:$4 sm:$0xff]   ;;  %v12931_v23 = vld [vmem:[%s13297_s7 + $0x226c] ss:$16 sps:$4 sm:$0xff]  }
 0x447   : > { %8605 = vmatprep.subr.bf16.mxu0 %v12835_v24  ;;  %9422 = vmatprep.subr.bf16.mxu1 %v12838_v25  ;;  %v12926_v24 = vld [vmem:[%s13297_s7 + $0x2260] ss:$16 sps:$4 sm:$0xff]   ;;  %v12929_v25 = vld [vmem:[%s13297_s7 + $0x2268] ss:$16 sps:$4 sm:$0xff]  }
 0x44a   : > { %8606 = vmatpush1.bf16.msra.mxu0 %v12833_v26  ;;  %9423 = vmatpush1.bf16.msra.mxu1 %v12836_v27  ;;  %v12934_v26 = vld [vmem:[%s13297_s7 + $0x2284] ss:$16 sps:$4 sm:$0xff]   ;;  %v12937_v27 = vld [vmem:[%s13297_s7 + $0x228c] ss:$16 sps:$4 sm:$0xff]  }
 0x44b   : > { %8607 = vmatprep.subr.bf16.mxu0 %v12841_v28  ;;  %9424 = vmatprep.subr.bf16.mxu1 %v12844_v29  ;;  %v12932_v28 = vld [vmem:[%s13297_s7 + $0x2280] ss:$16 sps:$4 sm:$0xff]   ;;  %v12935_v29 = vld [vmem:[%s13297_s7 + $0x2288] ss:$16 sps:$4 sm:$0xff]  }
 0x44e   : > { %8608 = vmatpush1.bf16.msra.mxu0 %v12839_v30  ;;  %9425 = vmatpush1.bf16.msra.mxu1 %v12842_v31  ;;  %v12940_v30 = vld [vmem:[%s13297_s7 + $0x22a4] ss:$16 sps:$4 sm:$0xff]   ;;  %v12943_v31 = vld [vmem:[%s13297_s7 + $0x22ac] ss:$16 sps:$4 sm:$0xff]  }
 0x44f   : > { %8609 = vmatprep.subr.bf16.mxu0 %v12847_v32  ;;  %9426 = vmatprep.subr.bf16.mxu1 %v12850_v33  ;;  %v12938_v32 = vld [vmem:[%s13297_s7 + $0x22a0] ss:$16 sps:$4 sm:$0xff]   ;;  %v12941_v33 = vld [vmem:[%s13297_s7 + $0x22a8] ss:$16 sps:$4 sm:$0xff]  }
 0x452   : > { %8610 = vmatpush1.bf16.msra.mxu0 %v12845_v34  ;;  %9427 = vmatpush1.bf16.msra.mxu1 %v12848_v35  ;;  %v12946_v34 = vld [vmem:[%s13297_s7 + $0x22c4] ss:$16 sps:$4 sm:$0xff]   ;;  %v12949_v35 = vld [vmem:[%s13297_s7 + $0x22cc] ss:$16 sps:$4 sm:$0xff]  }
 0x453   : > { %8611 = vmatprep.subr.bf16.mxu0 %v12853_v36  ;;  %9428 = vmatprep.subr.bf16.mxu1 %v12856_v37  ;;  %v12944_v36 = vld [vmem:[%s13297_s7 + $0x22c0] ss:$16 sps:$4 sm:$0xff]   ;;  %v12947_v37 = vld [vmem:[%s13297_s7 + $0x22c8] ss:$16 sps:$4 sm:$0xff]  }
 0x456   : > { %8612 = vmatpush1.bf16.msra.mxu0 %v12851_v38  ;;  %9429 = vmatpush1.bf16.msra.mxu1 %v12854_v39  ;;  %v12952_v38 = vld [vmem:[%s13297_s7 + $0x22e4] ss:$16 sps:$4 sm:$0xff]   ;;  %v12955_v39 = vld [vmem:[%s13297_s7 + $0x22ec] ss:$16 sps:$4 sm:$0xff]  }
 0x457   : > { %8613 = vmatprep.subr.bf16.mxu0 %v12859_v40  ;;  %9430 = vmatprep.subr.bf16.mxu1 %v12862_v41  ;;  %v12950_v40 = vld [vmem:[%s13297_s7 + $0x22e0] ss:$16 sps:$4 sm:$0xff]   ;;  %v12953_v41 = vld [vmem:[%s13297_s7 + $0x22e8] ss:$16 sps:$4 sm:$0xff]  }
 0x45a   : > { %8614 = vmatpush1.bf16.msra.mxu0 %v12857_v42  ;;  %9431 = vmatpush1.bf16.msra.mxu1 %v12860_v43  ;;  %v12958_v42 = vld [vmem:[%s13297_s7 + $0x2304] ss:$16 sps:$4 sm:$0xff]   ;;  %v12961_v43 = vld [vmem:[%s13297_s7 + $0x230c] ss:$16 sps:$4 sm:$0xff]  }
 0x45b   : > { %8615 = vmatprep.subr.bf16.mxu0 %v12865_v44  ;;  %9432 = vmatprep.subr.bf16.mxu1 %v12868_v45  ;;  %v12956_v44 = vld [vmem:[%s13297_s7 + $0x2300] ss:$16 sps:$4 sm:$0xff]   ;;  %v12959_v45 = vld [vmem:[%s13297_s7 + $0x2308] ss:$16 sps:$4 sm:$0xff]  }
 0x45e   : > { %8616 = vmatpush1.bf16.msra.mxu0 %v12863_v46  ;;  %9433 = vmatpush1.bf16.msra.mxu1 %v12866_v47  ;;  %v12964_v46 = vld [vmem:[%s13297_s7 + $0x2324] ss:$16 sps:$4 sm:$0xff]   ;;  %v12967_v47 = vld [vmem:[%s13297_s7 + $0x232c] ss:$16 sps:$4 sm:$0xff]  }
 0x45f   : > { %8617 = vmatprep.subr.bf16.mxu0 %v12871_v48  ;;  %9434 = vmatprep.subr.bf16.mxu1 %v12874_v49  ;;  %v12962_v48 = vld [vmem:[%s13297_s7 + $0x2320] ss:$16 sps:$4 sm:$0xff]   ;;  %v12965_v49 = vld [vmem:[%s13297_s7 + $0x2328] ss:$16 sps:$4 sm:$0xff]  }
 0x462   : > { %8618 = vmatpush1.bf16.msra.mxu0 %v12869_v50  ;;  %9435 = vmatpush1.bf16.msra.mxu1 %v12872_v51  ;;  %v12970_v50 = vld [vmem:[%s13297_s7 + $0x2344] ss:$16 sps:$4 sm:$0xff]   ;;  %v12973_v51 = vld [vmem:[%s13297_s7 + $0x234c] ss:$16 sps:$4 sm:$0xff]  }
 0x463   : > { %8619 = vmatprep.subr.bf16.mxu0 %v12877_v52  ;;  %9436 = vmatprep.subr.bf16.mxu1 %v12880_v53  ;;  %v12968_v52 = vld [vmem:[%s13297_s7 + $0x2340] ss:$16 sps:$4 sm:$0xff]   ;;  %v12971_v53 = vld [vmem:[%s13297_s7 + $0x2348] ss:$16 sps:$4 sm:$0xff]  }
 0x466   : > { %8620 = vmatpush1.bf16.msra.mxu0 %v12875_v54  ;;  %9437 = vmatpush1.bf16.msra.mxu1 %v12878_v55  ;;  %v12976_v54 = vld [vmem:[%s13297_s7 + $0x2364] ss:$16 sps:$4 sm:$0xff]   ;;  %v12979_v55 = vld [vmem:[%s13297_s7 + $0x236c] ss:$16 sps:$4 sm:$0xff]  }
 0x467   : > { %8621 = vmatprep.subr.bf16.mxu0 %v12883_v56  ;;  %9438 = vmatprep.subr.bf16.mxu1 %v12886_v57  ;;  %v12974_v56 = vld [vmem:[%s13297_s7 + $0x2360] ss:$16 sps:$4 sm:$0xff]   ;;  %v12977_v57 = vld [vmem:[%s13297_s7 + $0x2368] ss:$16 sps:$4 sm:$0xff]  }
 0x46a   : > { %8622 = vmatpush1.bf16.msra.mxu0 %v12881_v58  ;;  %9439 = vmatpush1.bf16.msra.mxu1 %v12884_v59  ;;  %v12982_v58 = vld [vmem:[%s13297_s7 + $0x2384] ss:$16 sps:$4 sm:$0xff]   ;;  %v12985_v59 = vld [vmem:[%s13297_s7 + $0x238c] ss:$16 sps:$4 sm:$0xff]  }
 0x46b   : > { %8623 = vmatprep.subr.bf16.mxu0 %v12889_v60  ;;  %9440 = vmatprep.subr.bf16.mxu1 %v12892_v61  ;;  %v12980_v60 = vld [vmem:[%s13297_s7 + $0x2380] ss:$16 sps:$4 sm:$0xff]   ;;  %v12983_v61 = vld [vmem:[%s13297_s7 + $0x2388] ss:$16 sps:$4 sm:$0xff]  }
 0x46e   : > { %8624 = vmatpush1.bf16.msra.mxu0 %v12887_v62  ;;  %9441 = vmatpush1.bf16.msra.mxu1 %v12890_v63  ;;  %v12988_v62 = vld [vmem:[%s13297_s7 + $0x23a4] ss:$16 sps:$4 sm:$0xff]   ;;  %v12991_v63 = vld [vmem:[%s13297_s7 + $0x23ac] ss:$16 sps:$4 sm:$0xff]  }
 0x46f   : > { %8625 = vmatprep.subr.bf16.mxu0 %v12895_v0  ;;  %9442 = vmatprep.subr.bf16.mxu1 %v12898_v1  ;;  %v12986_v0 = vld [vmem:[%s13297_s7 + $0x23a0] ss:$16 sps:$4 sm:$0xff]   ;;  %v12989_v1 = vld [vmem:[%s13297_s7 + $0x23a8] ss:$16 sps:$4 sm:$0xff]  }
 0x472   : > { %8626 = vmatpush1.bf16.msra.mxu0 %v12893_v2  ;;  %9443 = vmatpush1.bf16.msra.mxu1 %v12896_v3  ;;  %v12994_v2 = vld [vmem:[%s13297_s7 + $0x23c4] ss:$16 sps:$4 sm:$0xff]   ;;  %v12997_v3 = vld [vmem:[%s13297_s7 + $0x23cc] ss:$16 sps:$4 sm:$0xff]  }
 0x473   : > { %8627 = vmatprep.subr.bf16.mxu0 %v12901_v4  ;;  %9444 = vmatprep.subr.bf16.mxu1 %v12904_v5  ;;  %v12992_v4 = vld [vmem:[%s13297_s7 + $0x23c0] ss:$16 sps:$4 sm:$0xff]   ;;  %v12995_v5 = vld [vmem:[%s13297_s7 + $0x23c8] ss:$16 sps:$4 sm:$0xff]  }
 0x476   : > { %8628 = vmatpush1.bf16.msra.mxu0 %v12899_v6  ;;  %9445 = vmatpush1.bf16.msra.mxu1 %v12902_v7  ;;  %v13000_v6 = vld [vmem:[%s13297_s7 + $0x23e4] ss:$16 sps:$4 sm:$0xff]   ;;  %v13003_v7 = vld [vmem:[%s13297_s7 + $0x23ec] ss:$16 sps:$4 sm:$0xff]  }
 0x477   : > { %8640 = vmatprep.subr.bf16.mxu0 %v12910_v8  ;;  %9457 = vmatprep.subr.bf16.mxu1 %v12913_v9  ;;  %v12998_v8 = vld [vmem:[%s13297_s7 + $0x23e0] ss:$16 sps:$4 sm:$0xff]   ;;  %v13001_v9 = vld [vmem:[%s13297_s7 + $0x23e8] ss:$16 sps:$4 sm:$0xff]  }
 0x479   : > { %8630 = vmatmul.mubr.bf16.vlgmr.msra.gmra.mrb[0].mxu0 %v12905_v10  ;;  %9447 = vmatmul.mubr.bf16.vlgmr.msra.gmra.mrb[0].mxu1 %v12905_v10  ;;  %v13009_v10 = vld [vmem:[%s13297_s7 + $0x2404] ss:$16 sps:$4 sm:$0xff]  }
 0x47a   : > { %8641 = vmatpush1.bf16.msra.mxu0 %v12908_v11  ;;  %9458 = vmatpush1.bf16.msra.mxu1 %v12911_v12  ;;  %v13012_v11 = vld [vmem:[%s13297_s7 + $0x240c] ss:$16 sps:$4 sm:$0xff]   ;;  %v13004_v12 = vld [vmem:[%s13299_s8 + $0x88] ss:$152 sps:$4 sm:$0xff]  }
 0x47b   : > { %8642 = vmatprep.subr.bf16.mxu0 %v12916_v13  ;;  %9459 = vmatprep.subr.bf16.mxu1 %v12919_v14  ;;  %v13007_v13 = vld [vmem:[%s13297_s7 + $0x2400] ss:$16 sps:$4 sm:$0xff]   ;;  %v13010_v14 = vld [vmem:[%s13297_s7 + $0x2408] ss:$16 sps:$4 sm:$0xff]  }
 0x47c   : > { %8672 = vmatprep.mubr.bf16.mxu0 %v13006_v15  ;;  %9489 = vmatprep.mubr.bf16.mxu1 %v13006_v15  ;;  %v13015_v15 = vld [vmem:[%s13297_s7 + $0x2424] ss:$16 sps:$4 sm:$0xff]  }
 0x47e   : > { %8643 = vmatpush1.bf16.msra.mxu0 %v12914_v16  ;;  %9460 = vmatpush1.bf16.msra.mxu1 %v12917_v17  ;;  %v13018_v16 = vld [vmem:[%s13297_s7 + $0x242c] ss:$16 sps:$4 sm:$0xff]  }
 0x47f   : > { %8644 = vmatprep.subr.bf16.mxu0 %v12922_v18  ;;  %9461 = vmatprep.subr.bf16.mxu1 %v12925_v19  ;;  %v13105_v17 = vld [vmem:[%s13299_s8 + $0x94] ss:$152 sps:$4 sm:$0xff]   ;;  %v13013_v18 = vld [vmem:[%s13297_s7 + $0x2420] ss:$16 sps:$4 sm:$0xff]   ;;  %v13016_v19 = vld [vmem:[%s13297_s7 + $0x2428] ss:$16 sps:$4 sm:$0xff]  }
 0x482   : > { %8645 = vmatpush1.bf16.msra.mxu0 %v12920_v20  ;;  %9462 = vmatpush1.bf16.msra.mxu1 %v12923_v21  ;;  %v13021_v20 = vld [vmem:[%s13297_s7 + $0x2444] ss:$16 sps:$4 sm:$0xff]   ;;  %v13024_v21 = vld [vmem:[%s13297_s7 + $0x244c] ss:$16 sps:$4 sm:$0xff]  }
 0x483   : > { %8646 = vmatprep.subr.bf16.mxu0 %v12928_v22  ;;  %9463 = vmatprep.subr.bf16.mxu1 %v12931_v23  ;;  %v13019_v22 = vld [vmem:[%s13297_s7 + $0x2440] ss:$16 sps:$4 sm:$0xff]   ;;  %v13022_v23 = vld [vmem:[%s13297_s7 + $0x2448] ss:$16 sps:$4 sm:$0xff]  }
 0x486   : > { %8647 = vmatpush1.bf16.msra.mxu0 %v12926_v24  ;;  %9464 = vmatpush1.bf16.msra.mxu1 %v12929_v25  ;;  %v13027_v24 = vld [vmem:[%s13297_s7 + $0x2464] ss:$16 sps:$4 sm:$0xff]   ;;  %v13030_v25 = vld [vmem:[%s13297_s7 + $0x246c] ss:$16 sps:$4 sm:$0xff]  }
 0x487   : > { %8648 = vmatprep.subr.bf16.mxu0 %v12934_v26  ;;  %9465 = vmatprep.subr.bf16.mxu1 %v12937_v27  ;;  %v13025_v26 = vld [vmem:[%s13297_s7 + $0x2460] ss:$16 sps:$4 sm:$0xff]   ;;  %v13028_v27 = vld [vmem:[%s13297_s7 + $0x2468] ss:$16 sps:$4 sm:$0xff]  }
 0x48a   : > { %8649 = vmatpush1.bf16.msra.mxu0 %v12932_v28  ;;  %9466 = vmatpush1.bf16.msra.mxu1 %v12935_v29  ;;  %v13033_v28 = vld [vmem:[%s13297_s7 + $0x2484] ss:$16 sps:$4 sm:$0xff]   ;;  %v13036_v29 = vld [vmem:[%s13297_s7 + $0x248c] ss:$16 sps:$4 sm:$0xff]  }
 0x48b   : > { %8650 = vmatprep.subr.bf16.mxu0 %v12940_v30  ;;  %9467 = vmatprep.subr.bf16.mxu1 %v12943_v31  ;;  %v13031_v30 = vld [vmem:[%s13297_s7 + $0x2480] ss:$16 sps:$4 sm:$0xff]   ;;  %v13034_v31 = vld [vmem:[%s13297_s7 + $0x2488] ss:$16 sps:$4 sm:$0xff]  }
 0x48e   : > { %8651 = vmatpush1.bf16.msra.mxu0 %v12938_v32  ;;  %9468 = vmatpush1.bf16.msra.mxu1 %v12941_v33  ;;  %v13039_v32 = vld [vmem:[%s13297_s7 + $0x24a4] ss:$16 sps:$4 sm:$0xff]   ;;  %v13042_v33 = vld [vmem:[%s13297_s7 + $0x24ac] ss:$16 sps:$4 sm:$0xff]  }
 0x48f   : > { %8652 = vmatprep.subr.bf16.mxu0 %v12946_v34  ;;  %9469 = vmatprep.subr.bf16.mxu1 %v12949_v35  ;;  %v13037_v34 = vld [vmem:[%s13297_s7 + $0x24a0] ss:$16 sps:$4 sm:$0xff]   ;;  %v13040_v35 = vld [vmem:[%s13297_s7 + $0x24a8] ss:$16 sps:$4 sm:$0xff]  }
 0x492   : > { %8653 = vmatpush1.bf16.msra.mxu0 %v12944_v36  ;;  %9470 = vmatpush1.bf16.msra.mxu1 %v12947_v37  ;;  %v13045_v36 = vld [vmem:[%s13297_s7 + $0x24c4] ss:$16 sps:$4 sm:$0xff]   ;;  %v13048_v37 = vld [vmem:[%s13297_s7 + $0x24cc] ss:$16 sps:$4 sm:$0xff]  }
 0x493   : > { %8654 = vmatprep.subr.bf16.mxu0 %v12952_v38  ;;  %9471 = vmatprep.subr.bf16.mxu1 %v12955_v39  ;;  %v13043_v38 = vld [vmem:[%s13297_s7 + $0x24c0] ss:$16 sps:$4 sm:$0xff]   ;;  %v13046_v39 = vld [vmem:[%s13297_s7 + $0x24c8] ss:$16 sps:$4 sm:$0xff]  }
 0x496   : > { %8655 = vmatpush1.bf16.msra.mxu0 %v12950_v40  ;;  %9472 = vmatpush1.bf16.msra.mxu1 %v12953_v41  ;;  %v13051_v40 = vld [vmem:[%s13297_s7 + $0x24e4] ss:$16 sps:$4 sm:$0xff]   ;;  %v13054_v41 = vld [vmem:[%s13297_s7 + $0x24ec] ss:$16 sps:$4 sm:$0xff]  }
 0x497   : > { %8656 = vmatprep.subr.bf16.mxu0 %v12958_v42  ;;  %9473 = vmatprep.subr.bf16.mxu1 %v12961_v43  ;;  %v13049_v42 = vld [vmem:[%s13297_s7 + $0x24e0] ss:$16 sps:$4 sm:$0xff]   ;;  %v13052_v43 = vld [vmem:[%s13297_s7 + $0x24e8] ss:$16 sps:$4 sm:$0xff]  }
 0x49a   : > { %8657 = vmatpush1.bf16.msra.mxu0 %v12956_v44  ;;  %9474 = vmatpush1.bf16.msra.mxu1 %v12959_v45  ;;  %v13057_v44 = vld [vmem:[%s13297_s7 + $0x2504] ss:$16 sps:$4 sm:$0xff]   ;;  %v13060_v45 = vld [vmem:[%s13297_s7 + $0x250c] ss:$16 sps:$4 sm:$0xff]  }
 0x49b   : > { %8658 = vmatprep.subr.bf16.mxu0 %v12964_v46  ;;  %9475 = vmatprep.subr.bf16.mxu1 %v12967_v47  ;;  %v13055_v46 = vld [vmem:[%s13297_s7 + $0x2500] ss:$16 sps:$4 sm:$0xff]   ;;  %v13058_v47 = vld [vmem:[%s13297_s7 + $0x2508] ss:$16 sps:$4 sm:$0xff]  }
 0x49e   : > { %8659 = vmatpush1.bf16.msra.mxu0 %v12962_v48  ;;  %9476 = vmatpush1.bf16.msra.mxu1 %v12965_v49  ;;  %v13063_v48 = vld [vmem:[%s13297_s7 + $0x2524] ss:$16 sps:$4 sm:$0xff]   ;;  %v13066_v49 = vld [vmem:[%s13297_s7 + $0x252c] ss:$16 sps:$4 sm:$0xff]  }
 0x49f   : > { %8660 = vmatprep.subr.bf16.mxu0 %v12970_v50  ;;  %9477 = vmatprep.subr.bf16.mxu1 %v12973_v51  ;;  %v13061_v50 = vld [vmem:[%s13297_s7 + $0x2520] ss:$16 sps:$4 sm:$0xff]   ;;  %v13064_v51 = vld [vmem:[%s13297_s7 + $0x2528] ss:$16 sps:$4 sm:$0xff]  }
 0x4a2   : > { %8661 = vmatpush1.bf16.msra.mxu0 %v12968_v52  ;;  %9478 = vmatpush1.bf16.msra.mxu1 %v12971_v53  ;;  %v13069_v52 = vld [vmem:[%s13297_s7 + $0x2544] ss:$16 sps:$4 sm:$0xff]   ;;  %v13072_v53 = vld [vmem:[%s13297_s7 + $0x254c] ss:$16 sps:$4 sm:$0xff]  }
 0x4a3   : > { %8662 = vmatprep.subr.bf16.mxu0 %v12976_v54  ;;  %9479 = vmatprep.subr.bf16.mxu1 %v12979_v55  ;;  %v13067_v54 = vld [vmem:[%s13297_s7 + $0x2540] ss:$16 sps:$4 sm:$0xff]   ;;  %v13070_v55 = vld [vmem:[%s13297_s7 + $0x2548] ss:$16 sps:$4 sm:$0xff]  }
 0x4a6   : > { %8663 = vmatpush1.bf16.msra.mxu0 %v12974_v56  ;;  %9480 = vmatpush1.bf16.msra.mxu1 %v12977_v57  ;;  %v13075_v56 = vld [vmem:[%s13297_s7 + $0x2564] ss:$16 sps:$4 sm:$0xff]   ;;  %v13078_v57 = vld [vmem:[%s13297_s7 + $0x256c] ss:$16 sps:$4 sm:$0xff]  }
 0x4a7   : > { %8664 = vmatprep.subr.bf16.mxu0 %v12982_v58  ;;  %9481 = vmatprep.subr.bf16.mxu1 %v12985_v59  ;;  %v13073_v58 = vld [vmem:[%s13297_s7 + $0x2560] ss:$16 sps:$4 sm:$0xff]   ;;  %v13076_v59 = vld [vmem:[%s13297_s7 + $0x2568] ss:$16 sps:$4 sm:$0xff]  }
 0x4aa   : > { %8665 = vmatpush1.bf16.msra.mxu0 %v12980_v60  ;;  %9482 = vmatpush1.bf16.msra.mxu1 %v12983_v61  ;;  %v13081_v60 = vld [vmem:[%s13297_s7 + $0x2584] ss:$16 sps:$4 sm:$0xff]   ;;  %v13084_v61 = vld [vmem:[%s13297_s7 + $0x258c] ss:$16 sps:$4 sm:$0xff]  }
 0x4ab   : > { %8666 = vmatprep.subr.bf16.mxu0 %v12988_v62  ;;  %9483 = vmatprep.subr.bf16.mxu1 %v12991_v63  ;;  %v13079_v62 = vld [vmem:[%s13297_s7 + $0x2580] ss:$16 sps:$4 sm:$0xff]   ;;  %v13082_v63 = vld [vmem:[%s13297_s7 + $0x2588] ss:$16 sps:$4 sm:$0xff]  }
 0x4ae   : > { %8667 = vmatpush1.bf16.msra.mxu0 %v12986_v0  ;;  %9484 = vmatpush1.bf16.msra.mxu1 %v12989_v1  ;;  %v13087_v0 = vld [vmem:[%s13297_s7 + $0x25a4] ss:$16 sps:$4 sm:$0xff]   ;;  %v13090_v1 = vld [vmem:[%s13297_s7 + $0x25ac] ss:$16 sps:$4 sm:$0xff]  }
 0x4af   : > { %8668 = vmatprep.subr.bf16.mxu0 %v12994_v2  ;;  %9485 = vmatprep.subr.bf16.mxu1 %v12997_v3  ;;  %v13085_v2 = vld [vmem:[%s13297_s7 + $0x25a0] ss:$16 sps:$4 sm:$0xff]   ;;  %v13088_v3 = vld [vmem:[%s13297_s7 + $0x25a8] ss:$16 sps:$4 sm:$0xff]  }
 0x4b2   : > { %8669 = vmatpush1.bf16.msra.mxu0 %v12992_v4  ;;  %9486 = vmatpush1.bf16.msra.mxu1 %v12995_v5  ;;  %v13093_v4 = vld [vmem:[%s13297_s7 + $0x25c4] ss:$16 sps:$4 sm:$0xff]   ;;  %v13096_v5 = vld [vmem:[%s13297_s7 + $0x25cc] ss:$16 sps:$4 sm:$0xff]  }
 0x4b3   : > { %8670 = vmatprep.subr.bf16.mxu0 %v13000_v6  ;;  %9487 = vmatprep.subr.bf16.mxu1 %v13003_v7  ;;  %v13091_v6 = vld [vmem:[%s13297_s7 + $0x25c0] ss:$16 sps:$4 sm:$0xff]   ;;  %v13094_v7 = vld [vmem:[%s13297_s7 + $0x25c8] ss:$16 sps:$4 sm:$0xff]  }
 0x4b6   : > { %8671 = vmatpush1.bf16.msra.mxu0 %v12998_v8  ;;  %9488 = vmatpush1.bf16.msra.mxu1 %v13001_v9  ;;  %v13099_v8 = vld [vmem:[%s13297_s7 + $0x25e4] ss:$16 sps:$4 sm:$0xff]   ;;  %v13102_v9 = vld [vmem:[%s13297_s7 + $0x25ec] ss:$16 sps:$4 sm:$0xff]  }
 0x4b7   : > { %8683 = vmatprep.subr.bf16.mxu0 %v13009_v10  ;;  %9500 = vmatprep.subr.bf16.mxu1 %v13012_v11  ;;  %v13097_v10 = vld [vmem:[%s13297_s7 + $0x25e0] ss:$16 sps:$4 sm:$0xff]   ;;  %v13100_v11 = vld [vmem:[%s13297_s7 + $0x25e8] ss:$16 sps:$4 sm:$0xff]  }
 0x4b9   : > { %8673 = vmatmul.mubr.bf16.vlgmr.msra.gmra.mrb[0].mxu0 %v13004_v12  ;;  %9490 = vmatmul.mubr.bf16.vlgmr.msra.gmra.mrb[0].mxu1 %v13004_v12  ;;  %v13103_v12 = vld [vmem:[%s13299_s8 + $0x90] ss:$152 sps:$4 sm:$0xff]  }
 0x4ba   : > { %8684 = vmatpush1.bf16.msra.mxu0 %v13007_v13  ;;  %9501 = vmatpush1.bf16.msra.mxu1 %v13010_v14  ;;  %v377_v13 = vld [vmem:[#allocation2] sm:$0xff]  ;;  %v379_v14 = vld [vmem:[#allocation2 + $0x10] sm:$0xff] }
 0x4bb   : > { %8685 = vmatprep.subr.bf16.mxu0 %v13015_v15  ;;  %9502 = vmatprep.subr.bf16.mxu1 %v13018_v16  ;;  %v378_v15 = vld [vmem:[#allocation2 + $0x8] sm:$0xff]  ;;  %v380_v16 = vld [vmem:[#allocation2 + $0x18] sm:$0xff] }
 0x4bc   : > { %8715 = vmatprep.mubr.bf16.mxu0 %v13105_v17  ;;  %9532 = vmatprep.mubr.bf16.mxu1 %v13105_v17 }
 0x4be   : > { %8686 = vmatpush1.bf16.msra.mxu0 %v13013_v18  ;;  %9503 = vmatpush1.bf16.msra.mxu1 %v13016_v19  ;;  %v381_v19 = vld [vmem:[#allocation2 + $0x20] sm:$0xff] }
 0x4bf   : > { %8687 = vmatprep.subr.bf16.mxu0 %v13021_v20  ;;  %9504 = vmatprep.subr.bf16.mxu1 %v13024_v21  ;;  %v383_v20 = vld [vmem:[#allocation2 + $0x30] sm:$0xff] }
 0x4c2   : > { %8688 = vmatpush1.bf16.msra.mxu0 %v13019_v22  ;;  %9505 = vmatpush1.bf16.msra.mxu1 %v13022_v23 }
 0x4c3   : > { %8689 = vmatprep.subr.bf16.mxu0 %v13027_v24  ;;  %9506 = vmatprep.subr.bf16.mxu1 %v13030_v25  ;;  %v382_v25 = vld [vmem:[#allocation2 + $0x28] sm:$0xff] }
 0x4c6   : > { %8690 = vmatpush1.bf16.msra.mxu0 %v13025_v26  ;;  %9507 = vmatpush1.bf16.msra.mxu1 %v13028_v27  ;;  %v384_v26 = vld [vmem:[#allocation2 + $0x38] sm:$0xff] }
 0x4c7   : > { %8691 = vmatprep.subr.bf16.mxu0 %v13033_v28  ;;  %9508 = vmatprep.subr.bf16.mxu1 %v13036_v29 }
 0x4ca   : > { %8692 = vmatpush1.bf16.msra.mxu0 %v13031_v30  ;;  %9509 = vmatpush1.bf16.msra.mxu1 %v13034_v31 }
 0x4cb   : > { %8693 = vmatprep.subr.bf16.mxu0 %v13039_v32  ;;  %9510 = vmatprep.subr.bf16.mxu1 %v13042_v33 }
 0x4ce   : > { %8694 = vmatpush1.bf16.msra.mxu0 %v13037_v34  ;;  %9511 = vmatpush1.bf16.msra.mxu1 %v13040_v35 }
 0x4cf   : > { %8695 = vmatprep.subr.bf16.mxu0 %v13045_v36  ;;  %9512 = vmatprep.subr.bf16.mxu1 %v13048_v37  ;;  %v9573_v37 = vlaneseq (!%p11023_p11) }
 0x4d2   : > { %8696 = vmatpush1.bf16.msra.mxu0 %v13043_v38  ;;  %9513 = vmatpush1.bf16.msra.mxu1 %v13046_v39  ;;  %v9574_v38 = vshrl.u32 (!%p11023_p11), %v9573_v37, 7  ;;  %v9571_v39 = vld [vmem:[%s14589_s2] sm:$0xf] (!%p11023_p11) }
 0x4d3   : > { %8697 = vmatprep.subr.bf16.mxu0 %v13051_v40  ;;  %9514 = vmatprep.subr.bf16.mxu1 %v13054_v41 }
 0x4d6   : > { %8698 = vmatpush1.bf16.msra.mxu0 %v13049_v42  ;;  %9515 = vmatpush1.bf16.msra.mxu1 %v13052_v43  ;;  %v9575_v42 = vsub.s32 (!%p11023_p11), 0, %v9574_v38  ;;  %v9579_v43 = vsub.s32 (!%p11023_p11), 1, %v9574_v38 }
 0x4d7   : > { %8699 = vmatprep.subr.bf16.mxu0 %v13057_v44  ;;  %9516 = vmatprep.subr.bf16.mxu1 %v13060_v45  ;;  %v9583_v44 = vsub.s32 (!%p11023_p11), 2, %v9574_v38  ;;  %v9587_v45 = vsub.s32 (!%p11023_p11), 3, %v9574_v38 }
 0x4da   : > { %8700 = vmatpush1.bf16.msra.mxu0 %v13055_v46  ;;  %9517 = vmatpush1.bf16.msra.mxu1 %v13058_v47 }
 0x4db   : > { %8701 = vmatprep.subr.bf16.mxu0 %v13063_v48  ;;  %9518 = vmatprep.subr.bf16.mxu1 %v13066_v49  ;;  %v9576_v49 = vrot.slane (!%p11023_p11), %v9571_v39, %v9575_v42 }
 0x4de   : > { %8702 = vmatpush1.bf16.msra.mxu0 %v13061_v50  ;;  %9519 = vmatpush1.bf16.msra.mxu1 %v13064_v51  ;;  %v9580_v50 = vrot.slane (!%p11023_p11), %v9571_v39, %v9579_v43  ;;  %v9584_v51 = vrot.slane (!%p11023_p11), %v9571_v39, %v9583_v44 }
 0x4df   : > { %8703 = vmatprep.subr.bf16.mxu0 %v13069_v52  ;;  %9520 = vmatprep.subr.bf16.mxu1 %v13072_v53  ;;  %v9588_v52 = vrot.slane (!%p11023_p11), %v9571_v39, %v9587_v45 }
 0x4e2   : > { %8704 = vmatpush1.bf16.msra.mxu0 %v13067_v54  ;;  %9521 = vmatpush1.bf16.msra.mxu1 %v13070_v55 }
 0x4e3   : > { %8705 = vmatprep.subr.bf16.mxu0 %v13075_v56  ;;  %9522 = vmatprep.subr.bf16.mxu1 %v13078_v57 }
 0x4e6   : > { %8706 = vmatpush1.bf16.msra.mxu0 %v13073_v58  ;;  %9523 = vmatpush1.bf16.msra.mxu1 %v13076_v59 }
 0x4e7   : > { %8707 = vmatprep.subr.bf16.mxu0 %v13081_v60  ;;  %9524 = vmatprep.subr.bf16.mxu1 %v13084_v61 }
 0x4ea   : > { %8708 = vmatpush1.bf16.msra.mxu0 %v13079_v62  ;;  %9525 = vmatpush1.bf16.msra.mxu1 %v13082_v63 }
 0x4eb   : > { %8709 = vmatprep.subr.bf16.mxu0 %v13087_v0  ;;  %9526 = vmatprep.subr.bf16.mxu1 %v13090_v1 }
 0x4ee   : > { %8710 = vmatpush1.bf16.msra.mxu0 %v13085_v2  ;;  %9527 = vmatpush1.bf16.msra.mxu1 %v13088_v3 }
 0x4ef   : > { %8711 = vmatprep.subr.bf16.mxu0 %v13093_v4  ;;  %9528 = vmatprep.subr.bf16.mxu1 %v13096_v5 }
 0x4f2   : > { %8712 = vmatpush1.bf16.msra.mxu0 %v13091_v6  ;;  %9529 = vmatpush1.bf16.msra.mxu1 %v13094_v7 }
 0x4f3   : > { %8713 = vmatprep.subr.bf16.mxu0 %v13099_v8  ;;  %9530 = vmatprep.subr.bf16.mxu1 %v13102_v9 }
 0x4f6   : > { %8714 = vmatpush1.bf16.msra.mxu0 %v13097_v10  ;;  %9531 = vmatpush1.bf16.msra.mxu1 %v13100_v11 }
 0x4f9   : > { %8716 = vmatmul.mubr.bf16.vlgmr.msra.gmra.mrb[0].mxu0 %v13103_v12  ;;  %9533 = vmatmul.mubr.bf16.vlgmr.msra.gmra.mrb[0].mxu1 %v13103_v12 }
 0x5cc   : > { %v8717_v17 = vpop.f32.mrb[0].mxu0  ;;  %v9534_v18 = vpop.f32.mrb[0].mxu1  ;;  %9562 = sbr.rel (%p11023_p11) target bundleno = 1505 (0x5e1), region = 63 }
 0x5cd   : > { %v9543_v21 = vadd.f32 %v8717_v17, %v377_v13  ;;  %v9545_v22 = vadd.f32 %v9534_v18, %v379_v14  ;;  %v8719_v23 = vpop.f32.mrb[1].mxu0  ;;  %v9536_v24 = vpop.f32.mrb[1].mxu1 }
 0x5ce   : > { %v9544_v27 = vadd.f32 %v8719_v23, %v378_v15  ;;  %v9546_v28 = vadd.f32 %v9536_v24, %v380_v16  ;;  %v8721_v29 = vpop.f32.mrb[2].mxu0  ;;  %v9538_v30 = vpop.f32.mrb[2].mxu1 }
 0x5cf   : > { %9551 = vst [vmem:[#allocation2] sm:$0xff] %v9543_v21  ;;  %9553 = vst [vmem:[#allocation2 + $0x10] sm:$0xff] %v9545_v22  ;;  %v9547_v31 = vadd.f32 %v8721_v29, %v381_v19  ;;  %v9549_v32 = vadd.f32 %v9538_v30, %v383_v20  ;;  %v8723_v33 = vpop.f32.mrb[3].mxu0  ;;  %v9540_v34 = vpop.f32.mrb[3].mxu1 }
 0x5d0   : > { %9552 = vst [vmem:[#allocation2 + $0x8] sm:$0xff] %v9544_v27  ;;  %9554 = vst [vmem:[#allocation2 + $0x18] sm:$0xff] %v9546_v28  ;;  %v9548_v35 = vadd.f32 %v8723_v33, %v382_v25  ;;  %v9550_v36 = vadd.f32 %v9540_v34, %v384_v26 }
 0x5d1   : > { %9555 = vst [vmem:[#allocation2 + $0x20] sm:$0xff] %v9547_v31  ;;  %9557 = vst [vmem:[#allocation2 + $0x30] sm:$0xff] %v9549_v32 }
 0x5d2   : > { %9556 = vst [vmem:[#allocation2 + $0x28] sm:$0xff] %v9548_v35  ;;  %9558 = vst [vmem:[#allocation2 + $0x38] sm:$0xff] %v9550_v36 }
 0x5d6   : > { %v9563_v40 = vld [vmem:[#allocation2] sm:$0xff]  ;;  %v9565_v46 = vld [vmem:[#allocation2 + $0x10] sm:$0xff] }
 0x5d7   : > { %v9564_v41 = vld [vmem:[#allocation2 + $0x8] sm:$0xff]  ;;  %v9566_v47 = vld [vmem:[#allocation2 + $0x18] sm:$0xff]  ;;  %v9593_v56 = vadd.f32 %v9576_v49, %v9563_v40  ;;  %v9595_v58 = vadd.f32 %v9584_v51, %v9565_v46 }
 0x5d8   : > { %v9567_v48 = vld [vmem:[#allocation2 + $0x20] sm:$0xff]  ;;  %v9569_v54 = vld [vmem:[#allocation2 + $0x30] sm:$0xff]  ;;  %v9594_v57 = vadd.f32 %v9580_v50, %v9564_v41  ;;  %v9596_v59 = vadd.f32 %v9588_v52, %v9566_v47 }
 0x5d9   : > { %v9568_v53 = vld [vmem:[#allocation2 + $0x28] sm:$0xff]  ;;  %v9570_v55 = vld [vmem:[#allocation2 + $0x38] sm:$0xff]  ;;  %v9597_v60 = vadd.f32 %v9576_v49, %v9567_v48  ;;  %v9599_v62 = vadd.f32 %v9584_v51, %v9569_v54  ;;  %v9601_v0 = vmax.f32 %v9593_v56, 0.0  ;;  %v9603_v2 = vmax.f32 %v9595_v58, 0.0 }
 0x5da   : > { %v9598_v61 = vadd.f32 %v9580_v50, %v9568_v53  ;;  %v9600_v63 = vadd.f32 %v9588_v52, %v9570_v55  ;;  %v9602_v1 = vmax.f32 %v9594_v57, 0.0  ;;  %v9604_v3 = vmax.f32 %v9596_v59, 0.0 }
 0x5db   : > { %v9605_v4 = vmax.f32 %v9597_v60, 0.0  ;;  %v9607_v6 = vmax.f32 %v9599_v62, 0.0 }
 0x5dc   : > { %v9606_v5 = vmax.f32 %v9598_v61, 0.0  ;;  %v9608_v7 = vmax.f32 %v9600_v63, 0.0  ;;  %v11034_v8 = vpack.c.bf16 %v9602_v1, %v9601_v0  ;;  %v11035_v9 = vpack.c.bf16 %v9604_v3, %v9603_v2 }
 0x5de   : > { %v11036_v10 = vpack.c.bf16 %v9606_v5, %v9605_v4  ;;  %v11037_v11 = vpack.c.bf16 %v9608_v7, %v9607_v6  ;;  %9633 = vst [vmem:[%s14590_s3] sm:$0xff] %v11034_v8  ;;  %9634 = vst [vmem:[%s14590_s3 + $0x8] sm:$0xff] %v11035_v9 }
 0x5e0   : > { %9635 = vst [vmem:[%s14590_s3 + $0x10] sm:$0xff] %v11036_v10  ;;  %9636 = vst [vmem:[%s14590_s3 + $0x18] sm:$0xff] %v11037_v11 }
 0x5e1 PF: > { %s13_s16 = sadd.s32 1, %s13144_s16   ;;  %s14591_s12 = smov %s13132_s13 }
 0x5e2   : > { %p10_p12 = scmp.ge.s32.totalorder %s13_s16, 6   ;;  %s14592_s13 = smov %s13202_s20 }
 0x5e3   : > { %s14593_s14 = smov %s13140_s15  ;;  %s14594_s15 = smov %s14596_s17 }
 0x5e4   :  { %12 = sbr.rel (!%p10_p12) target bundleno = 3 (0x3), region = 104 }

</bundles_post_ra>
